<compile_context>
chip_gen: v6e
topology: v6e:2x2x1
jax: 0.10.0
libtpu: 0.0.40
codegen_flags: <defaults>
</compile_context>

<pallas_src>
import functools

import jax
import jax.numpy as jnp
from jax.experimental import pallas as pl
from jax.experimental.pallas import tpu as pltpu


# -----------------------------------------------------------------------------
# In-kernel helpers (traced Python; T is static and small => fully unrolled)
# -----------------------------------------------------------------------------
def _in_proj(x2, wih, b):
    """Input->gates projection (hoisted out of the recurrence).

    x2: (N, I); wih: (I, 4H); b: (1, 4H)  ->  (N, 4H).
    I == 1 is an outer product: keep it off the MXU (broadcast multiply).
    """
    if x2.shape[-1] == 1:
        return x2 * wih + b
    return jnp.dot(x2, wih, preferred_element_type=jnp.float32) + b


def _rec_proj(h, whh):
    """Hidden->gates projection. H == 1 -> VPU broadcast multiply, else MXU."""
    if h.shape[-1] == 1:
        return h * whh
    return jnp.dot(h, whh, preferred_element_type=jnp.float32)


def _lstm_cell(gates, c, H):
    """PyTorch gate order: i, f, g, o."""
    i_g = jax.nn.sigmoid(gates[:, 0 * H:1 * H])
    f_g = jax.nn.sigmoid(gates[:, 1 * H:2 * H])
    g_g = jnp.tanh(gates[:, 2 * H:3 * H])
    o_g = jax.nn.sigmoid(gates[:, 3 * H:4 * H])
    c_new = f_g * c + i_g * g_g
    h_new = o_g * jnp.tanh(c_new)
    return h_new, c_new


def _bilstm(gx_f, gx_b, whh_f, whh_b, *, H, T, B, return_seq, time_invariant):
    """Fused forward+backward LSTM recurrence, fully unrolled over T.

    gx_f / gx_b: precomputed input projections (+ bias).
        time_invariant=False: (T, B, 4H);  True: (B, 4H) reused every step.
    Returns (seq_or_None, h_last_fwd, h_last_bwd); seq is (T, B, 2H) with the
    backward half already aligned to original time indices (PyTorch layout).
    """
    h_f = jnp.zeros((B, H), jnp.float32)
    c_f = jnp.zeros((B, H), jnp.float32)
    h_b = jnp.zeros((B, H), jnp.float32)
    c_b = jnp.zeros((B, H), jnp.float32)
    outs_f = [None] * T
    outs_b = [None] * T
    for t in range(T):
        tb = T - 1 - t
        gxf_t = gx_f if time_invariant else gx_f[t]
        gxb_t = gx_b if time_invariant else gx_b[tb]
        h_f, c_f = _lstm_cell(gxf_t + _rec_proj(h_f, whh_f), c_f, H)
        h_b, c_b = _lstm_cell(gxb_t + _rec_proj(h_b, whh_b), c_b, H)
        if return_seq:
            outs_f[t] = h_f
            outs_b[tb] = h_b
    if return_seq:
        seq = jnp.concatenate(
            [jnp.stack(outs_f, axis=0), jnp.stack(outs_b, axis=0)], axis=-1)
        return seq, h_f, h_b
    return None, h_f, h_b


# -----------------------------------------------------------------------------
# Single fused kernel: encoder -> latent -> decoder
# -----------------------------------------------------------------------------
def _vae_kernel(x_ref, eps_ref,
                e1_wih_ref, e1_whh_ref, e1_b_ref,
                e2_wih_ref, e2_whh_ref, e2_b_ref,
                lat_w_ref, lat_b_ref,
                d1_wih_ref, d1_whh_ref, d1_b_ref,
                d2_wih_ref, d2_whh_ref, d2_b_ref,
                dec_ref, zm_ref, zv_ref,
                *, T_enc, T_dec, B, emb):
    H_e1, H_e2, H_d1, H_d2 = 50, emb // 2, 50, 1

    # ---------------- Encoder layer 1: input size 1, H=50 ----------------
    x_tb = x_ref[...]                       # (T_enc, B), time-major
    x_col = x_tb[:, :, None]                # (T_enc, B, 1)
    e1_wih = e1_wih_ref[...]                # (2, 1, 4*H_e1)
    e1_whh = e1_whh_ref[...]                # (2, H_e1, 4*H_e1)
    e1_b = e1_b_ref[...]                    # (2, 1, 4*H_e1)
    gx1_f = x_col * e1_wih[0] + e1_b[0]     # (T_enc, B, 4*H_e1) — VPU outer product
    gx1_b = x_col * e1_wih[1] + e1_b[1]
    out1, _, _ = _bilstm(gx1_f, gx1_b, e1_whh[0], e1_whh[1],
                         H=H_e1, T=T_enc, B=B, return_seq=True,
                         time_invariant=False)            # (T_enc, B, 100)

    # ---------------- Encoder layer 2: hN only ----------------------------
    e2_wih = e2_wih_ref[...]                # (2, 100, 4*H_e2)
    e2_whh = e2_whh_ref[...]
    e2_b = e2_b_ref[...]
    o1_2d = out1.reshape(T_enc * B, 2 * H_e1)
    gx2_f = _in_proj(o1_2d, e2_wih[0], e2_b[0]).reshape(T_enc, B, 4 * H_e2)
    gx2_b = _in_proj(o1_2d, e2_wih[1], e2_b[1]).reshape(T_enc, B, 4 * H_e2)
    _, h2_f, h2_b = _bilstm(gx2_f, gx2_b, e2_whh[0], e2_whh[1],
                            H=H_e2, T=T_enc, B=B, return_seq=False,
                            time_invariant=False)
    l = jnp.concatenate([h2_f, h2_b], axis=-1)            # (B, emb)

    # ---------------- Latent: fused [z_mean | z_log_var] + reparam --------
    zmv = (jnp.dot(l, lat_w_ref[...], preferred_element_type=jnp.float32)
           + lat_b_ref[...])                               # (B, 2*emb)
    zm = zmv[:, :emb]
    zv = zmv[:, emb:]
    z = zm + eps_ref[...] * jnp.exp(zv * 0.5)
    zm_ref[...] = zm
    zv_ref[...] = zv

    # ---------------- Decoder layer 1: input constant over time -----------
    d1_wih = d1_wih_ref[...]                # (2, emb, 4*H_d1)
    d1_whh = d1_whh_ref[...]
    d1_b = d1_b_ref[...]
    gx3_f = _in_proj(z, d1_wih[0], d1_b[0])                # (B, 200), reused each step
    gx3_b = _in_proj(z, d1_wih[1], d1_b[1])
    d1, _, _ = _bilstm(gx3_f, gx3_b, d1_whh[0], d1_whh[1],
                       H=H_d1, T=T_dec, B=B, return_seq=True,
                       time_invariant=True)                # (T_dec, B, 100)

    # ---------------- Decoder layer 2: H=1 (VPU recurrence) ---------------
    d2_wih = d2_wih_ref[...]                # (2, 100, 4)
    d2_whh = d2_whh_ref[...]                # (2, 1, 4)
    d2_b = d2_b_ref[...]                    # (2, 1, 4)
    d1_2d = d1.reshape(T_dec * B, 2 * H_d1)
    gx4_f = _in_proj(d1_2d, d2_wih[0], d2_b[0]).reshape(T_dec, B, 4 * H_d2)
    gx4_b = _in_proj(d1_2d, d2_wih[1], d2_b[1]).reshape(T_dec, B, 4 * H_d2)
    d2, _, _ = _bilstm(gx4_f, gx4_b, d2_whh[0], d2_whh[1],
                       H=H_d2, T=T_dec, B=B, return_seq=True,
                       time_invariant=False)               # (T_dec, B, 2)

    decoded = jnp.sum(d2, axis=-1)                         # (T_dec, B)
    dec_ref[...] = decoded.T                               # (B, T_dec)


# -----------------------------------------------------------------------------
# Wrapper
# -----------------------------------------------------------------------------
_VMEM = pl.BlockSpec(memory_space=pltpu.MemorySpace.VMEM)


def bilstm_vae_forward(x, params, eps, *, seq_len):
    """x: (B, 1, T) float32; eps: (B, emb).  Returns (decoded, z_mean, z_log_var)."""
    B, _, T = x.shape
    emb = params["lat_w"].shape[0]          # static (shape of a param array)

    x_tb = jnp.transpose(x[:, 0, :], (1, 0))   # (T, B), time-major (tiny glue op)

    kernel = functools.partial(_vae_kernel, T_enc=T, T_dec=seq_len, B=B, emb=emb)
    dec, zm, zv = pl.pallas_call(
        kernel,
        out_shape=(
            jax.ShapeDtypeStruct((B, seq_len), jnp.float32),
            jax.ShapeDtypeStruct((B, emb), jnp.float32),
            jax.ShapeDtypeStruct((B, emb), jnp.float32),
        ),
        in_specs=[_VMEM] * 16,
        out_specs=(_VMEM, _VMEM, _VMEM),
    )(x_tb, eps,
      params["e1_wih"], params["e1_whh"], params["e1_b"],
      params["e2_wih"], params["e2_whh"], params["e2_b"],
      params["lat_w"], params["lat_b"],
      params["d1_wih"], params["d1_whh"], params["d1_b"],
      params["d2_wih"], params["d2_whh"], params["d2_b"])

    return dec[:, None, :], zm[:, None, :], zv[:, None, :]


# -----------------------------------------------------------------------------
# Parameter init (PyTorch-style uniform(-1/sqrt(H), 1/sqrt(H)))
# Weights pre-transposed to (I, 4H)/(H, 4H); both directions stacked on axis 0.
# -----------------------------------------------------------------------------
def _init_bilstm(key, input_size, hidden):
    k = float(1.0 / (hidden ** 0.5))
    keys = jax.random.split(key, 8)

    def u(kk, shape):
        return jax.random.uniform(kk, shape, jnp.float32, -k, k)

    wih = jnp.stack([u(keys[0], (4 * hidden, input_size)).T,
                     u(keys[4], (4 * hidden, input_size)).T])        # (2, I, 4H)
    whh = jnp.stack([u(keys[1], (4 * hidden, hidden)).T,
                     u(keys[5], (4 * hidden, hidden)).T])            # (2, H, 4H)
    b = jnp.stack([
        (u(keys[2], (4 * hidden,)) + u(keys[3], (4 * hidden,))).reshape(1, 4 * hidden),
        (u(keys[6], (4 * hidden,)) + u(keys[7], (4 * hidden,))).reshape(1, 4 * hidden),
    ])                                                               # (2, 1, 4H)
    return wih, whh, b


def _init_linear(key, dim):
    k = float(1.0 / (dim ** 0.5))
    k1, k2 = jax.random.split(key)
    w = jax.random.uniform(k1, (dim, dim), jnp.float32, -k, k)
    b = jax.random.uniform(k2, (dim,), jnp.float32, -k, k)
    return w.T, b


def init_model_params(key, embedding_dim):
    assert embedding_dim % 2 == 0, "'embedding_dim' must be even."
    ks = jax.random.split(key, 6)
    p = {}
    p["e1_wih"], p["e1_whh"], p["e1_b"] = _init_bilstm(ks[0], 1, 50)
    p["e2_wih"], p["e2_whh"], p["e2_b"] = _init_bilstm(ks[1], 100, embedding_dim // 2)
    p["d1_wih"], p["d1_whh"], p["d1_b"] = _init_bilstm(ks[2], embedding_dim, 50)
    p["d2_wih"], p["d2_whh"], p["d2_b"] = _init_bilstm(ks[3], 100, 1)
    wm, bm = _init_linear(ks[4], embedding_dim)
    wv, bv = _init_linear(ks[5], embedding_dim)
    p["lat_w"] = jnp.concatenate([wm, wv], axis=1)                   # (emb, 2*emb)
    p["lat_b"] = jnp.concatenate([bm, bv]).reshape(1, 2 * embedding_dim)
    return p


# -----------------------------------------------------------------------------
if __name__ == "__main__":
    seq_len = 8
    embedding_dim = 16
    batch = 2

    key = jax.random.PRNGKey(0)
    k_x, k_p, k_eps = jax.random.split(key, 3)

    x = jax.random.normal(k_x, (batch, 1, seq_len), jnp.float32)     # (B, C=1, T)
    params = init_model_params(k_p, embedding_dim)
    eps = jax.random.normal(k_eps, (batch, embedding_dim), jnp.float32)

    fwd = jax.jit(functools.partial(bilstm_vae_forward, seq_len=seq_len))
    decoded, z_mean, z_log_var = fwd(x, params, eps)
    jax.block_until_ready((decoded, z_mean, z_log_var))

    assert decoded.shape == (batch, 1, seq_len)
    assert z_mean.shape == (batch, 1, embedding_dim)
    assert z_log_var.shape == (batch, 1, embedding_dim)
    assert bool(jnp.all(jnp.isfinite(decoded)))
    assert bool(jnp.all(jnp.isfinite(z_mean)))
    assert bool(jnp.all(jnp.isfinite(z_log_var)))
    print("KERNEL_OK")
</pallas_src>

<mosaic_0001>
module attributes {stable_mosaic.version = 11 : i64} {
  func.func @_vae_kernel(%arg0: memref<8x2xf32, #tpu.memory_space<vmem>>, %arg1: memref<2x16xf32, #tpu.memory_space<vmem>>, %arg2: memref<2x1x200xf32, #tpu.memory_space<vmem>>, %arg3: memref<2x50x200xf32, #tpu.memory_space<vmem>>, %arg4: memref<2x1x200xf32, #tpu.memory_space<vmem>>, %arg5: memref<2x100x32xf32, #tpu.memory_space<vmem>>, %arg6: memref<2x8x32xf32, #tpu.memory_space<vmem>>, %arg7: memref<2x1x32xf32, #tpu.memory_space<vmem>>, %arg8: memref<16x32xf32, #tpu.memory_space<vmem>>, %arg9: memref<1x32xf32, #tpu.memory_space<vmem>>, %arg10: memref<2x16x200xf32, #tpu.memory_space<vmem>>, %arg11: memref<2x50x200xf32, #tpu.memory_space<vmem>>, %arg12: memref<2x1x200xf32, #tpu.memory_space<vmem>>, %arg13: memref<2x100x4xf32, #tpu.memory_space<vmem>>, %arg14: memref<2x1x4xf32, #tpu.memory_space<vmem>>, %arg15: memref<2x1x4xf32, #tpu.memory_space<vmem>>, %arg16: memref<2x8xf32, #tpu.memory_space<vmem>>, %arg17: memref<2x16xf32, #tpu.memory_space<vmem>>, %arg18: memref<2x16xf32, #tpu.memory_space<vmem>>) attributes {dimension_semantics = [], scalar_prefetch = 0 : i64, scratch_operands = 0 : i64, tpu.core_type = #tpu.core_type<tc>} {
    %c0 = arith.constant 0 : index
    %c0_0 = arith.constant 0 : index
    %0 = vector.load %arg0[%c0, %c0_0] : memref<8x2xf32, #tpu.memory_space<vmem>>, vector<8x2xf32>
    %1 = vector.shape_cast %0 : vector<8x2xf32> to vector<8x2x1xf32>
    %c0_1 = arith.constant 0 : index
    %c0_2 = arith.constant 0 : index
    %c0_3 = arith.constant 0 : index
    %2 = vector.load %arg2[%c0_1, %c0_2, %c0_3] : memref<2x1x200xf32, #tpu.memory_space<vmem>>, vector<2x1x200xf32>
    %c0_4 = arith.constant 0 : index
    %c0_5 = arith.constant 0 : index
    %c0_6 = arith.constant 0 : index
    %3 = vector.load %arg3[%c0_4, %c0_5, %c0_6] : memref<2x50x200xf32, #tpu.memory_space<vmem>>, vector<2x50x200xf32>
    %c0_7 = arith.constant 0 : index
    %c0_8 = arith.constant 0 : index
    %c0_9 = arith.constant 0 : index
    %4 = vector.load %arg4[%c0_7, %c0_8, %c0_9] : memref<2x1x200xf32, #tpu.memory_space<vmem>>, vector<2x1x200xf32>
    %5 = vector.extract_strided_slice %2 {offsets = [0, 0, 0], sizes = [1, 1, 200], strides = [1, 1, 1]} : vector<2x1x200xf32> to vector<1x1x200xf32>
    %6 = vector.shape_cast %5 : vector<1x1x200xf32> to vector<1x200xf32>
    %7 = vector.shape_cast %6 : vector<1x200xf32> to vector<1x1x200xf32>
    %8 = vector.broadcast %1 : vector<8x2x1xf32> to vector<8x2x200xf32>
    %9 = vector.broadcast %7 : vector<1x1x200xf32> to vector<8x2x200xf32>
    %10 = arith.mulf %8, %9 : vector<8x2x200xf32>
    %11 = vector.extract_strided_slice %4 {offsets = [0, 0, 0], sizes = [1, 1, 200], strides = [1, 1, 1]} : vector<2x1x200xf32> to vector<1x1x200xf32>
    %12 = vector.shape_cast %11 : vector<1x1x200xf32> to vector<1x200xf32>
    %13 = vector.shape_cast %12 : vector<1x200xf32> to vector<1x1x200xf32>
    %14 = vector.broadcast %13 : vector<1x1x200xf32> to vector<8x2x200xf32>
    %15 = arith.addf %10, %14 : vector<8x2x200xf32>
    %16 = vector.extract_strided_slice %2 {offsets = [1, 0, 0], sizes = [1, 1, 200], strides = [1, 1, 1]} : vector<2x1x200xf32> to vector<1x1x200xf32>
    %17 = vector.shape_cast %16 : vector<1x1x200xf32> to vector<1x200xf32>
    %18 = vector.shape_cast %17 : vector<1x200xf32> to vector<1x1x200xf32>
    %19 = vector.broadcast %1 : vector<8x2x1xf32> to vector<8x2x200xf32>
    %20 = vector.broadcast %18 : vector<1x1x200xf32> to vector<8x2x200xf32>
    %21 = arith.mulf %19, %20 : vector<8x2x200xf32>
    %22 = vector.extract_strided_slice %4 {offsets = [1, 0, 0], sizes = [1, 1, 200], strides = [1, 1, 1]} : vector<2x1x200xf32> to vector<1x1x200xf32>
    %23 = vector.shape_cast %22 : vector<1x1x200xf32> to vector<1x200xf32>
    %24 = vector.shape_cast %23 : vector<1x200xf32> to vector<1x1x200xf32>
    %25 = vector.broadcast %24 : vector<1x1x200xf32> to vector<8x2x200xf32>
    %26 = arith.addf %21, %25 : vector<8x2x200xf32>
    %27 = vector.extract_strided_slice %3 {offsets = [0, 0, 0], sizes = [1, 50, 200], strides = [1, 1, 1]} : vector<2x50x200xf32> to vector<1x50x200xf32>
    %28 = vector.shape_cast %27 : vector<1x50x200xf32> to vector<50x200xf32>
    %29 = vector.extract_strided_slice %3 {offsets = [1, 0, 0], sizes = [1, 50, 200], strides = [1, 1, 1]} : vector<2x50x200xf32> to vector<1x50x200xf32>
    %30 = vector.shape_cast %29 : vector<1x50x200xf32> to vector<50x200xf32>
    %cst = arith.constant 0.000000e+00 : f32
    %31 = vector.broadcast %cst : f32 to vector<2x50xf32>
    %cst_10 = arith.constant 0.000000e+00 : f32
    %32 = vector.broadcast %cst_10 : f32 to vector<2x50xf32>
    %cst_11 = arith.constant 0.000000e+00 : f32
    %33 = vector.broadcast %cst_11 : f32 to vector<2x50xf32>
    %cst_12 = arith.constant 0.000000e+00 : f32
    %34 = vector.broadcast %cst_12 : f32 to vector<2x50xf32>
    %35 = vector.extract_strided_slice %15 {offsets = [0, 0, 0], sizes = [1, 2, 200], strides = [1, 1, 1]} : vector<8x2x200xf32> to vector<1x2x200xf32>
    %36 = vector.shape_cast %35 : vector<1x2x200xf32> to vector<2x200xf32>
    %37 = vector.extract_strided_slice %26 {offsets = [7, 0, 0], sizes = [1, 2, 200], strides = [1, 1, 1]} : vector<8x2x200xf32> to vector<1x2x200xf32>
    %38 = vector.shape_cast %37 : vector<1x2x200xf32> to vector<2x200xf32>
    %cst_13 = arith.constant dense<0.000000e+00> : vector<2x200xf32>
    %39 = tpu.matmul %31, %28, %cst_13 {dimension_numbers = #tpu.dot_dimension_numbers<[1], [0], [0], [1], [0, 0, 1, 1], [], []>} : vector<2x50xf32>, vector<50x200xf32>, vector<2x200xf32> -> vector<2x200xf32>
    %40 = arith.addf %36, %39 : vector<2x200xf32>
    %41 = vector.extract_strided_slice %40 {offsets = [0, 0], sizes = [2, 50], strides = [1, 1]} : vector<2x200xf32> to vector<2x50xf32>
    %42 = arith.negf %41 : vector<2x50xf32>
    %43 = math.exp %42 : vector<2x50xf32>
    %cst_14 = arith.constant 1.000000e+00 : f32
    %44 = vector.broadcast %cst_14 : f32 to vector<2x50xf32>
    %45 = arith.addf %44, %43 : vector<2x50xf32>
    %46 = arith.divf %44, %45 : vector<2x50xf32>
    %47 = vector.extract_strided_slice %40 {offsets = [0, 50], sizes = [2, 50], strides = [1, 1]} : vector<2x200xf32> to vector<2x50xf32>
    %48 = arith.negf %47 : vector<2x50xf32>
    %49 = math.exp %48 : vector<2x50xf32>
    %cst_15 = arith.constant 1.000000e+00 : f32
    %50 = vector.broadcast %cst_15 : f32 to vector<2x50xf32>
    %51 = arith.addf %50, %49 : vector<2x50xf32>
    %52 = arith.divf %50, %51 : vector<2x50xf32>
    %53 = vector.extract_strided_slice %40 {offsets = [0, 100], sizes = [2, 50], strides = [1, 1]} : vector<2x200xf32> to vector<2x50xf32>
    %54 = math.tanh %53 : vector<2x50xf32>
    %55 = vector.extract_strided_slice %40 {offsets = [0, 150], sizes = [2, 50], strides = [1, 1]} : vector<2x200xf32> to vector<2x50xf32>
    %56 = arith.negf %55 : vector<2x50xf32>
    %57 = math.exp %56 : vector<2x50xf32>
    %cst_16 = arith.constant 1.000000e+00 : f32
    %58 = vector.broadcast %cst_16 : f32 to vector<2x50xf32>
    %59 = arith.addf %58, %57 : vector<2x50xf32>
    %60 = arith.divf %58, %59 : vector<2x50xf32>
    %61 = arith.mulf %52, %32 : vector<2x50xf32>
    %62 = arith.mulf %46, %54 : vector<2x50xf32>
    %63 = arith.addf %61, %62 : vector<2x50xf32>
    %64 = math.tanh %63 : vector<2x50xf32>
    %65 = arith.mulf %60, %64 : vector<2x50xf32>
    %cst_17 = arith.constant dense<0.000000e+00> : vector<2x200xf32>
    %66 = tpu.matmul %33, %30, %cst_17 {dimension_numbers = #tpu.dot_dimension_numbers<[1], [0], [0], [1], [0, 0, 1, 1], [], []>} : vector<2x50xf32>, vector<50x200xf32>, vector<2x200xf32> -> vector<2x200xf32>
    %67 = arith.addf %38, %66 : vector<2x200xf32>
    %68 = vector.extract_strided_slice %67 {offsets = [0, 0], sizes = [2, 50], strides = [1, 1]} : vector<2x200xf32> to vector<2x50xf32>
    %69 = arith.negf %68 : vector<2x50xf32>
    %70 = math.exp %69 : vector<2x50xf32>
    %cst_18 = arith.constant 1.000000e+00 : f32
    %71 = vector.broadcast %cst_18 : f32 to vector<2x50xf32>
    %72 = arith.addf %71, %70 : vector<2x50xf32>
    %73 = arith.divf %71, %72 : vector<2x50xf32>
    %74 = vector.extract_strided_slice %67 {offsets = [0, 50], sizes = [2, 50], strides = [1, 1]} : vector<2x200xf32> to vector<2x50xf32>
    %75 = arith.negf %74 : vector<2x50xf32>
    %76 = math.exp %75 : vector<2x50xf32>
    %cst_19 = arith.constant 1.000000e+00 : f32
    %77 = vector.broadcast %cst_19 : f32 to vector<2x50xf32>
    %78 = arith.addf %77, %76 : vector<2x50xf32>
    %79 = arith.divf %77, %78 : vector<2x50xf32>
    %80 = vector.extract_strided_slice %67 {offsets = [0, 100], sizes = [2, 50], strides = [1, 1]} : vector<2x200xf32> to vector<2x50xf32>
    %81 = math.tanh %80 : vector<2x50xf32>
    %82 = vector.extract_strided_slice %67 {offsets = [0, 150], sizes = [2, 50], strides = [1, 1]} : vector<2x200xf32> to vector<2x50xf32>
    %83 = arith.negf %82 : vector<2x50xf32>
    %84 = math.exp %83 : vector<2x50xf32>
    %cst_20 = arith.constant 1.000000e+00 : f32
    %85 = vector.broadcast %cst_20 : f32 to vector<2x50xf32>
    %86 = arith.addf %85, %84 : vector<2x50xf32>
    %87 = arith.divf %85, %86 : vector<2x50xf32>
    %88 = arith.mulf %79, %34 : vector<2x50xf32>
    %89 = arith.mulf %73, %81 : vector<2x50xf32>
    %90 = arith.addf %88, %89 : vector<2x50xf32>
    %91 = math.tanh %90 : vector<2x50xf32>
    %92 = arith.mulf %87, %91 : vector<2x50xf32>
    %93 = vector.extract_strided_slice %15 {offsets = [1, 0, 0], sizes = [1, 2, 200], strides = [1, 1, 1]} : vector<8x2x200xf32> to vector<1x2x200xf32>
    %94 = vector.shape_cast %93 : vector<1x2x200xf32> to vector<2x200xf32>
    %95 = vector.extract_strided_slice %26 {offsets = [6, 0, 0], sizes = [1, 2, 200], strides = [1, 1, 1]} : vector<8x2x200xf32> to vector<1x2x200xf32>
    %96 = vector.shape_cast %95 : vector<1x2x200xf32> to vector<2x200xf32>
    %cst_21 = arith.constant dense<0.000000e+00> : vector<2x200xf32>
    %97 = tpu.matmul %65, %28, %cst_21 {dimension_numbers = #tpu.dot_dimension_numbers<[1], [0], [0], [1], [0, 0, 1, 1], [], []>} : vector<2x50xf32>, vector<50x200xf32>, vector<2x200xf32> -> vector<2x200xf32>
    %98 = arith.addf %94, %97 : vector<2x200xf32>
    %99 = vector.extract_strided_slice %98 {offsets = [0, 0], sizes = [2, 50], strides = [1, 1]} : vector<2x200xf32> to vector<2x50xf32>
    %100 = arith.negf %99 : vector<2x50xf32>
    %101 = math.exp %100 : vector<2x50xf32>
    %cst_22 = arith.constant 1.000000e+00 : f32
    %102 = vector.broadcast %cst_22 : f32 to vector<2x50xf32>
    %103 = arith.addf %102, %101 : vector<2x50xf32>
    %104 = arith.divf %102, %103 : vector<2x50xf32>
    %105 = vector.extract_strided_slice %98 {offsets = [0, 50], sizes = [2, 50], strides = [1, 1]} : vector<2x200xf32> to vector<2x50xf32>
    %106 = arith.negf %105 : vector<2x50xf32>
    %107 = math.exp %106 : vector<2x50xf32>
    %cst_23 = arith.constant 1.000000e+00 : f32
    %108 = vector.broadcast %cst_23 : f32 to vector<2x50xf32>
    %109 = arith.addf %108, %107 : vector<2x50xf32>
    %110 = arith.divf %108, %109 : vector<2x50xf32>
    %111 = vector.extract_strided_slice %98 {offsets = [0, 100], sizes = [2, 50], strides = [1, 1]} : vector<2x200xf32> to vector<2x50xf32>
    %112 = math.tanh %111 : vector<2x50xf32>
    %113 = vector.extract_strided_slice %98 {offsets = [0, 150], sizes = [2, 50], strides = [1, 1]} : vector<2x200xf32> to vector<2x50xf32>
    %114 = arith.negf %113 : vector<2x50xf32>
    %115 = math.exp %114 : vector<2x50xf32>
    %cst_24 = arith.constant 1.000000e+00 : f32
    %116 = vector.broadcast %cst_24 : f32 to vector<2x50xf32>
    %117 = arith.addf %116, %115 : vector<2x50xf32>
    %118 = arith.divf %116, %117 : vector<2x50xf32>
    %119 = arith.mulf %110, %63 : vector<2x50xf32>
    %120 = arith.mulf %104, %112 : vector<2x50xf32>
    %121 = arith.addf %119, %120 : vector<2x50xf32>
    %122 = math.tanh %121 : vector<2x50xf32>
    %123 = arith.mulf %118, %122 : vector<2x50xf32>
    %cst_25 = arith.constant dense<0.000000e+00> : vector<2x200xf32>
    %124 = tpu.matmul %92, %30, %cst_25 {dimension_numbers = #tpu.dot_dimension_numbers<[1], [0], [0], [1], [0, 0, 1, 1], [], []>} : vector<2x50xf32>, vector<50x200xf32>, vector<2x200xf32> -> vector<2x200xf32>
    %125 = arith.addf %96, %124 : vector<2x200xf32>
    %126 = vector.extract_strided_slice %125 {offsets = [0, 0], sizes = [2, 50], strides = [1, 1]} : vector<2x200xf32> to vector<2x50xf32>
    %127 = arith.negf %126 : vector<2x50xf32>
    %128 = math.exp %127 : vector<2x50xf32>
    %cst_26 = arith.constant 1.000000e+00 : f32
    %129 = vector.broadcast %cst_26 : f32 to vector<2x50xf32>
    %130 = arith.addf %129, %128 : vector<2x50xf32>
    %131 = arith.divf %129, %130 : vector<2x50xf32>
    %132 = vector.extract_strided_slice %125 {offsets = [0, 50], sizes = [2, 50], strides = [1, 1]} : vector<2x200xf32> to vector<2x50xf32>
    %133 = arith.negf %132 : vector<2x50xf32>
    %134 = math.exp %133 : vector<2x50xf32>
    %cst_27 = arith.constant 1.000000e+00 : f32
    %135 = vector.broadcast %cst_27 : f32 to vector<2x50xf32>
    %136 = arith.addf %135, %134 : vector<2x50xf32>
    %137 = arith.divf %135, %136 : vector<2x50xf32>
    %138 = vector.extract_strided_slice %125 {offsets = [0, 100], sizes = [2, 50], strides = [1, 1]} : vector<2x200xf32> to vector<2x50xf32>
    %139 = math.tanh %138 : vector<2x50xf32>
    %140 = vector.extract_strided_slice %125 {offsets = [0, 150], sizes = [2, 50], strides = [1, 1]} : vector<2x200xf32> to vector<2x50xf32>
    %141 = arith.negf %140 : vector<2x50xf32>
    %142 = math.exp %141 : vector<2x50xf32>
    %cst_28 = arith.constant 1.000000e+00 : f32
    %143 = vector.broadcast %cst_28 : f32 to vector<2x50xf32>
    %144 = arith.addf %143, %142 : vector<2x50xf32>
    %145 = arith.divf %143, %144 : vector<2x50xf32>
    %146 = arith.mulf %137, %90 : vector<2x50xf32>
    %147 = arith.mulf %131, %139 : vector<2x50xf32>
    %148 = arith.addf %146, %147 : vector<2x50xf32>
    %149 = math.tanh %148 : vector<2x50xf32>
    %150 = arith.mulf %145, %149 : vector<2x50xf32>
    %151 = vector.extract_strided_slice %15 {offsets = [2, 0, 0], sizes = [1, 2, 200], strides = [1, 1, 1]} : vector<8x2x200xf32> to vector<1x2x200xf32>
    %152 = vector.shape_cast %151 : vector<1x2x200xf32> to vector<2x200xf32>
    %153 = vector.extract_strided_slice %26 {offsets = [5, 0, 0], sizes = [1, 2, 200], strides = [1, 1, 1]} : vector<8x2x200xf32> to vector<1x2x200xf32>
    %154 = vector.shape_cast %153 : vector<1x2x200xf32> to vector<2x200xf32>
    %cst_29 = arith.constant dense<0.000000e+00> : vector<2x200xf32>
    %155 = tpu.matmul %123, %28, %cst_29 {dimension_numbers = #tpu.dot_dimension_numbers<[1], [0], [0], [1], [0, 0, 1, 1], [], []>} : vector<2x50xf32>, vector<50x200xf32>, vector<2x200xf32> -> vector<2x200xf32>
    %156 = arith.addf %152, %155 : vector<2x200xf32>
    %157 = vector.extract_strided_slice %156 {offsets = [0, 0], sizes = [2, 50], strides = [1, 1]} : vector<2x200xf32> to vector<2x50xf32>
    %158 = arith.negf %157 : vector<2x50xf32>
    %159 = math.exp %158 : vector<2x50xf32>
    %cst_30 = arith.constant 1.000000e+00 : f32
    %160 = vector.broadcast %cst_30 : f32 to vector<2x50xf32>
    %161 = arith.addf %160, %159 : vector<2x50xf32>
    %162 = arith.divf %160, %161 : vector<2x50xf32>
    %163 = vector.extract_strided_slice %156 {offsets = [0, 50], sizes = [2, 50], strides = [1, 1]} : vector<2x200xf32> to vector<2x50xf32>
    %164 = arith.negf %163 : vector<2x50xf32>
    %165 = math.exp %164 : vector<2x50xf32>
    %cst_31 = arith.constant 1.000000e+00 : f32
    %166 = vector.broadcast %cst_31 : f32 to vector<2x50xf32>
    %167 = arith.addf %166, %165 : vector<2x50xf32>
    %168 = arith.divf %166, %167 : vector<2x50xf32>
    %169 = vector.extract_strided_slice %156 {offsets = [0, 100], sizes = [2, 50], strides = [1, 1]} : vector<2x200xf32> to vector<2x50xf32>
    %170 = math.tanh %169 : vector<2x50xf32>
    %171 = vector.extract_strided_slice %156 {offsets = [0, 150], sizes = [2, 50], strides = [1, 1]} : vector<2x200xf32> to vector<2x50xf32>
    %172 = arith.negf %171 : vector<2x50xf32>
    %173 = math.exp %172 : vector<2x50xf32>
    %cst_32 = arith.constant 1.000000e+00 : f32
    %174 = vector.broadcast %cst_32 : f32 to vector<2x50xf32>
    %175 = arith.addf %174, %173 : vector<2x50xf32>
    %176 = arith.divf %174, %175 : vector<2x50xf32>
    %177 = arith.mulf %168, %121 : vector<2x50xf32>
    %178 = arith.mulf %162, %170 : vector<2x50xf32>
    %179 = arith.addf %177, %178 : vector<2x50xf32>
    %180 = math.tanh %179 : vector<2x50xf32>
    %181 = arith.mulf %176, %180 : vector<2x50xf32>
    %cst_33 = arith.constant dense<0.000000e+00> : vector<2x200xf32>
    %182 = tpu.matmul %150, %30, %cst_33 {dimension_numbers = #tpu.dot_dimension_numbers<[1], [0], [0], [1], [0, 0, 1, 1], [], []>} : vector<2x50xf32>, vector<50x200xf32>, vector<2x200xf32> -> vector<2x200xf32>
    %183 = arith.addf %154, %182 : vector<2x200xf32>
    %184 = vector.extract_strided_slice %183 {offsets = [0, 0], sizes = [2, 50], strides = [1, 1]} : vector<2x200xf32> to vector<2x50xf32>
    %185 = arith.negf %184 : vector<2x50xf32>
    %186 = math.exp %185 : vector<2x50xf32>
    %cst_34 = arith.constant 1.000000e+00 : f32
    %187 = vector.broadcast %cst_34 : f32 to vector<2x50xf32>
    %188 = arith.addf %187, %186 : vector<2x50xf32>
    %189 = arith.divf %187, %188 : vector<2x50xf32>
    %190 = vector.extract_strided_slice %183 {offsets = [0, 50], sizes = [2, 50], strides = [1, 1]} : vector<2x200xf32> to vector<2x50xf32>
    %191 = arith.negf %190 : vector<2x50xf32>
    %192 = math.exp %191 : vector<2x50xf32>
    %cst_35 = arith.constant 1.000000e+00 : f32
    %193 = vector.broadcast %cst_35 : f32 to vector<2x50xf32>
    %194 = arith.addf %193, %192 : vector<2x50xf32>
    %195 = arith.divf %193, %194 : vector<2x50xf32>
    %196 = vector.extract_strided_slice %183 {offsets = [0, 100], sizes = [2, 50], strides = [1, 1]} : vector<2x200xf32> to vector<2x50xf32>
    %197 = math.tanh %196 : vector<2x50xf32>
    %198 = vector.extract_strided_slice %183 {offsets = [0, 150], sizes = [2, 50], strides = [1, 1]} : vector<2x200xf32> to vector<2x50xf32>
    %199 = arith.negf %198 : vector<2x50xf32>
    %200 = math.exp %199 : vector<2x50xf32>
    %cst_36 = arith.constant 1.000000e+00 : f32
    %201 = vector.broadcast %cst_36 : f32 to vector<2x50xf32>
    %202 = arith.addf %201, %200 : vector<2x50xf32>
    %203 = arith.divf %201, %202 : vector<2x50xf32>
    %204 = arith.mulf %195, %148 : vector<2x50xf32>
    %205 = arith.mulf %189, %197 : vector<2x50xf32>
    %206 = arith.addf %204, %205 : vector<2x50xf32>
    %207 = math.tanh %206 : vector<2x50xf32>
    %208 = arith.mulf %203, %207 : vector<2x50xf32>
    %209 = vector.extract_strided_slice %15 {offsets = [3, 0, 0], sizes = [1, 2, 200], strides = [1, 1, 1]} : vector<8x2x200xf32> to vector<1x2x200xf32>
    %210 = vector.shape_cast %209 : vector<1x2x200xf32> to vector<2x200xf32>
    %211 = vector.extract_strided_slice %26 {offsets = [4, 0, 0], sizes = [1, 2, 200], strides = [1, 1, 1]} : vector<8x2x200xf32> to vector<1x2x200xf32>
    %212 = vector.shape_cast %211 : vector<1x2x200xf32> to vector<2x200xf32>
    %cst_37 = arith.constant dense<0.000000e+00> : vector<2x200xf32>
    %213 = tpu.matmul %181, %28, %cst_37 {dimension_numbers = #tpu.dot_dimension_numbers<[1], [0], [0], [1], [0, 0, 1, 1], [], []>} : vector<2x50xf32>, vector<50x200xf32>, vector<2x200xf32> -> vector<2x200xf32>
    %214 = arith.addf %210, %213 : vector<2x200xf32>
    %215 = vector.extract_strided_slice %214 {offsets = [0, 0], sizes = [2, 50], strides = [1, 1]} : vector<2x200xf32> to vector<2x50xf32>
    %216 = arith.negf %215 : vector<2x50xf32>
    %217 = math.exp %216 : vector<2x50xf32>
    %cst_38 = arith.constant 1.000000e+00 : f32
    %218 = vector.broadcast %cst_38 : f32 to vector<2x50xf32>
    %219 = arith.addf %218, %217 : vector<2x50xf32>
    %220 = arith.divf %218, %219 : vector<2x50xf32>
    %221 = vector.extract_strided_slice %214 {offsets = [0, 50], sizes = [2, 50], strides = [1, 1]} : vector<2x200xf32> to vector<2x50xf32>
    %222 = arith.negf %221 : vector<2x50xf32>
    %223 = math.exp %222 : vector<2x50xf32>
    %cst_39 = arith.constant 1.000000e+00 : f32
    %224 = vector.broadcast %cst_39 : f32 to vector<2x50xf32>
    %225 = arith.addf %224, %223 : vector<2x50xf32>
    %226 = arith.divf %224, %225 : vector<2x50xf32>
    %227 = vector.extract_strided_slice %214 {offsets = [0, 100], sizes = [2, 50], strides = [1, 1]} : vector<2x200xf32> to vector<2x50xf32>
    %228 = math.tanh %227 : vector<2x50xf32>
    %229 = vector.extract_strided_slice %214 {offsets = [0, 150], sizes = [2, 50], strides = [1, 1]} : vector<2x200xf32> to vector<2x50xf32>
    %230 = arith.negf %229 : vector<2x50xf32>
    %231 = math.exp %230 : vector<2x50xf32>
    %cst_40 = arith.constant 1.000000e+00 : f32
    %232 = vector.broadcast %cst_40 : f32 to vector<2x50xf32>
    %233 = arith.addf %232, %231 : vector<2x50xf32>
    %234 = arith.divf %232, %233 : vector<2x50xf32>
    %235 = arith.mulf %226, %179 : vector<2x50xf32>
    %236 = arith.mulf %220, %228 : vector<2x50xf32>
    %237 = arith.addf %235, %236 : vector<2x50xf32>
    %238 = math.tanh %237 : vector<2x50xf32>
    %239 = arith.mulf %234, %238 : vector<2x50xf32>
    %cst_41 = arith.constant dense<0.000000e+00> : vector<2x200xf32>
    %240 = tpu.matmul %208, %30, %cst_41 {dimension_numbers = #tpu.dot_dimension_numbers<[1], [0], [0], [1], [0, 0, 1, 1], [], []>} : vector<2x50xf32>, vector<50x200xf32>, vector<2x200xf32> -> vector<2x200xf32>
    %241 = arith.addf %212, %240 : vector<2x200xf32>
    %242 = vector.extract_strided_slice %241 {offsets = [0, 0], sizes = [2, 50], strides = [1, 1]} : vector<2x200xf32> to vector<2x50xf32>
    %243 = arith.negf %242 : vector<2x50xf32>
    %244 = math.exp %243 : vector<2x50xf32>
    %cst_42 = arith.constant 1.000000e+00 : f32
    %245 = vector.broadcast %cst_42 : f32 to vector<2x50xf32>
    %246 = arith.addf %245, %244 : vector<2x50xf32>
    %247 = arith.divf %245, %246 : vector<2x50xf32>
    %248 = vector.extract_strided_slice %241 {offsets = [0, 50], sizes = [2, 50], strides = [1, 1]} : vector<2x200xf32> to vector<2x50xf32>
    %249 = arith.negf %248 : vector<2x50xf32>
    %250 = math.exp %249 : vector<2x50xf32>
    %cst_43 = arith.constant 1.000000e+00 : f32
    %251 = vector.broadcast %cst_43 : f32 to vector<2x50xf32>
    %252 = arith.addf %251, %250 : vector<2x50xf32>
    %253 = arith.divf %251, %252 : vector<2x50xf32>
    %254 = vector.extract_strided_slice %241 {offsets = [0, 100], sizes = [2, 50], strides = [1, 1]} : vector<2x200xf32> to vector<2x50xf32>
    %255 = math.tanh %254 : vector<2x50xf32>
    %256 = vector.extract_strided_slice %241 {offsets = [0, 150], sizes = [2, 50], strides = [1, 1]} : vector<2x200xf32> to vector<2x50xf32>
    %257 = arith.negf %256 : vector<2x50xf32>
    %258 = math.exp %257 : vector<2x50xf32>
    %cst_44 = arith.constant 1.000000e+00 : f32
    %259 = vector.broadcast %cst_44 : f32 to vector<2x50xf32>
    %260 = arith.addf %259, %258 : vector<2x50xf32>
    %261 = arith.divf %259, %260 : vector<2x50xf32>
    %262 = arith.mulf %253, %206 : vector<2x50xf32>
    %263 = arith.mulf %247, %255 : vector<2x50xf32>
    %264 = arith.addf %262, %263 : vector<2x50xf32>
    %265 = math.tanh %264 : vector<2x50xf32>
    %266 = arith.mulf %261, %265 : vector<2x50xf32>
    %267 = vector.extract_strided_slice %15 {offsets = [4, 0, 0], sizes = [1, 2, 200], strides = [1, 1, 1]} : vector<8x2x200xf32> to vector<1x2x200xf32>
    %268 = vector.shape_cast %267 : vector<1x2x200xf32> to vector<2x200xf32>
    %269 = vector.extract_strided_slice %26 {offsets = [3, 0, 0], sizes = [1, 2, 200], strides = [1, 1, 1]} : vector<8x2x200xf32> to vector<1x2x200xf32>
    %270 = vector.shape_cast %269 : vector<1x2x200xf32> to vector<2x200xf32>
    %cst_45 = arith.constant dense<0.000000e+00> : vector<2x200xf32>
    %271 = tpu.matmul %239, %28, %cst_45 {dimension_numbers = #tpu.dot_dimension_numbers<[1], [0], [0], [1], [0, 0, 1, 1], [], []>} : vector<2x50xf32>, vector<50x200xf32>, vector<2x200xf32> -> vector<2x200xf32>
    %272 = arith.addf %268, %271 : vector<2x200xf32>
    %273 = vector.extract_strided_slice %272 {offsets = [0, 0], sizes = [2, 50], strides = [1, 1]} : vector<2x200xf32> to vector<2x50xf32>
    %274 = arith.negf %273 : vector<2x50xf32>
    %275 = math.exp %274 : vector<2x50xf32>
    %cst_46 = arith.constant 1.000000e+00 : f32
    %276 = vector.broadcast %cst_46 : f32 to vector<2x50xf32>
    %277 = arith.addf %276, %275 : vector<2x50xf32>
    %278 = arith.divf %276, %277 : vector<2x50xf32>
    %279 = vector.extract_strided_slice %272 {offsets = [0, 50], sizes = [2, 50], strides = [1, 1]} : vector<2x200xf32> to vector<2x50xf32>
    %280 = arith.negf %279 : vector<2x50xf32>
    %281 = math.exp %280 : vector<2x50xf32>
    %cst_47 = arith.constant 1.000000e+00 : f32
    %282 = vector.broadcast %cst_47 : f32 to vector<2x50xf32>
    %283 = arith.addf %282, %281 : vector<2x50xf32>
    %284 = arith.divf %282, %283 : vector<2x50xf32>
    %285 = vector.extract_strided_slice %272 {offsets = [0, 100], sizes = [2, 50], strides = [1, 1]} : vector<2x200xf32> to vector<2x50xf32>
    %286 = math.tanh %285 : vector<2x50xf32>
    %287 = vector.extract_strided_slice %272 {offsets = [0, 150], sizes = [2, 50], strides = [1, 1]} : vector<2x200xf32> to vector<2x50xf32>
    %288 = arith.negf %287 : vector<2x50xf32>
    %289 = math.exp %288 : vector<2x50xf32>
    %cst_48 = arith.constant 1.000000e+00 : f32
    %290 = vector.broadcast %cst_48 : f32 to vector<2x50xf32>
    %291 = arith.addf %290, %289 : vector<2x50xf32>
    %292 = arith.divf %290, %291 : vector<2x50xf32>
    %293 = arith.mulf %284, %237 : vector<2x50xf32>
    %294 = arith.mulf %278, %286 : vector<2x50xf32>
    %295 = arith.addf %293, %294 : vector<2x50xf32>
    %296 = math.tanh %295 : vector<2x50xf32>
    %297 = arith.mulf %292, %296 : vector<2x50xf32>
    %cst_49 = arith.constant dense<0.000000e+00> : vector<2x200xf32>
    %298 = tpu.matmul %266, %30, %cst_49 {dimension_numbers = #tpu.dot_dimension_numbers<[1], [0], [0], [1], [0, 0, 1, 1], [], []>} : vector<2x50xf32>, vector<50x200xf32>, vector<2x200xf32> -> vector<2x200xf32>
    %299 = arith.addf %270, %298 : vector<2x200xf32>
    %300 = vector.extract_strided_slice %299 {offsets = [0, 0], sizes = [2, 50], strides = [1, 1]} : vector<2x200xf32> to vector<2x50xf32>
    %301 = arith.negf %300 : vector<2x50xf32>
    %302 = math.exp %301 : vector<2x50xf32>
    %cst_50 = arith.constant 1.000000e+00 : f32
    %303 = vector.broadcast %cst_50 : f32 to vector<2x50xf32>
    %304 = arith.addf %303, %302 : vector<2x50xf32>
    %305 = arith.divf %303, %304 : vector<2x50xf32>
    %306 = vector.extract_strided_slice %299 {offsets = [0, 50], sizes = [2, 50], strides = [1, 1]} : vector<2x200xf32> to vector<2x50xf32>
    %307 = arith.negf %306 : vector<2x50xf32>
    %308 = math.exp %307 : vector<2x50xf32>
    %cst_51 = arith.constant 1.000000e+00 : f32
    %309 = vector.broadcast %cst_51 : f32 to vector<2x50xf32>
    %310 = arith.addf %309, %308 : vector<2x50xf32>
    %311 = arith.divf %309, %310 : vector<2x50xf32>
    %312 = vector.extract_strided_slice %299 {offsets = [0, 100], sizes = [2, 50], strides = [1, 1]} : vector<2x200xf32> to vector<2x50xf32>
    %313 = math.tanh %312 : vector<2x50xf32>
    %314 = vector.extract_strided_slice %299 {offsets = [0, 150], sizes = [2, 50], strides = [1, 1]} : vector<2x200xf32> to vector<2x50xf32>
    %315 = arith.negf %314 : vector<2x50xf32>
    %316 = math.exp %315 : vector<2x50xf32>
    %cst_52 = arith.constant 1.000000e+00 : f32
    %317 = vector.broadcast %cst_52 : f32 to vector<2x50xf32>
    %318 = arith.addf %317, %316 : vector<2x50xf32>
    %319 = arith.divf %317, %318 : vector<2x50xf32>
    %320 = arith.mulf %311, %264 : vector<2x50xf32>
    %321 = arith.mulf %305, %313 : vector<2x50xf32>
    %322 = arith.addf %320, %321 : vector<2x50xf32>
    %323 = math.tanh %322 : vector<2x50xf32>
    %324 = arith.mulf %319, %323 : vector<2x50xf32>
    %325 = vector.extract_strided_slice %15 {offsets = [5, 0, 0], sizes = [1, 2, 200], strides = [1, 1, 1]} : vector<8x2x200xf32> to vector<1x2x200xf32>
    %326 = vector.shape_cast %325 : vector<1x2x200xf32> to vector<2x200xf32>
    %327 = vector.extract_strided_slice %26 {offsets = [2, 0, 0], sizes = [1, 2, 200], strides = [1, 1, 1]} : vector<8x2x200xf32> to vector<1x2x200xf32>
    %328 = vector.shape_cast %327 : vector<1x2x200xf32> to vector<2x200xf32>
    %cst_53 = arith.constant dense<0.000000e+00> : vector<2x200xf32>
    %329 = tpu.matmul %297, %28, %cst_53 {dimension_numbers = #tpu.dot_dimension_numbers<[1], [0], [0], [1], [0, 0, 1, 1], [], []>} : vector<2x50xf32>, vector<50x200xf32>, vector<2x200xf32> -> vector<2x200xf32>
    %330 = arith.addf %326, %329 : vector<2x200xf32>
    %331 = vector.extract_strided_slice %330 {offsets = [0, 0], sizes = [2, 50], strides = [1, 1]} : vector<2x200xf32> to vector<2x50xf32>
    %332 = arith.negf %331 : vector<2x50xf32>
    %333 = math.exp %332 : vector<2x50xf32>
    %cst_54 = arith.constant 1.000000e+00 : f32
    %334 = vector.broadcast %cst_54 : f32 to vector<2x50xf32>
    %335 = arith.addf %334, %333 : vector<2x50xf32>
    %336 = arith.divf %334, %335 : vector<2x50xf32>
    %337 = vector.extract_strided_slice %330 {offsets = [0, 50], sizes = [2, 50], strides = [1, 1]} : vector<2x200xf32> to vector<2x50xf32>
    %338 = arith.negf %337 : vector<2x50xf32>
    %339 = math.exp %338 : vector<2x50xf32>
    %cst_55 = arith.constant 1.000000e+00 : f32
    %340 = vector.broadcast %cst_55 : f32 to vector<2x50xf32>
    %341 = arith.addf %340, %339 : vector<2x50xf32>
    %342 = arith.divf %340, %341 : vector<2x50xf32>
    %343 = vector.extract_strided_slice %330 {offsets = [0, 100], sizes = [2, 50], strides = [1, 1]} : vector<2x200xf32> to vector<2x50xf32>
    %344 = math.tanh %343 : vector<2x50xf32>
    %345 = vector.extract_strided_slice %330 {offsets = [0, 150], sizes = [2, 50], strides = [1, 1]} : vector<2x200xf32> to vector<2x50xf32>
    %346 = arith.negf %345 : vector<2x50xf32>
    %347 = math.exp %346 : vector<2x50xf32>
    %cst_56 = arith.constant 1.000000e+00 : f32
    %348 = vector.broadcast %cst_56 : f32 to vector<2x50xf32>
    %349 = arith.addf %348, %347 : vector<2x50xf32>
    %350 = arith.divf %348, %349 : vector<2x50xf32>
    %351 = arith.mulf %342, %295 : vector<2x50xf32>
    %352 = arith.mulf %336, %344 : vector<2x50xf32>
    %353 = arith.addf %351, %352 : vector<2x50xf32>
    %354 = math.tanh %353 : vector<2x50xf32>
    %355 = arith.mulf %350, %354 : vector<2x50xf32>
    %cst_57 = arith.constant dense<0.000000e+00> : vector<2x200xf32>
    %356 = tpu.matmul %324, %30, %cst_57 {dimension_numbers = #tpu.dot_dimension_numbers<[1], [0], [0], [1], [0, 0, 1, 1], [], []>} : vector<2x50xf32>, vector<50x200xf32>, vector<2x200xf32> -> vector<2x200xf32>
    %357 = arith.addf %328, %356 : vector<2x200xf32>
    %358 = vector.extract_strided_slice %357 {offsets = [0, 0], sizes = [2, 50], strides = [1, 1]} : vector<2x200xf32> to vector<2x50xf32>
    %359 = arith.negf %358 : vector<2x50xf32>
    %360 = math.exp %359 : vector<2x50xf32>
    %cst_58 = arith.constant 1.000000e+00 : f32
    %361 = vector.broadcast %cst_58 : f32 to vector<2x50xf32>
    %362 = arith.addf %361, %360 : vector<2x50xf32>
    %363 = arith.divf %361, %362 : vector<2x50xf32>
    %364 = vector.extract_strided_slice %357 {offsets = [0, 50], sizes = [2, 50], strides = [1, 1]} : vector<2x200xf32> to vector<2x50xf32>
    %365 = arith.negf %364 : vector<2x50xf32>
    %366 = math.exp %365 : vector<2x50xf32>
    %cst_59 = arith.constant 1.000000e+00 : f32
    %367 = vector.broadcast %cst_59 : f32 to vector<2x50xf32>
    %368 = arith.addf %367, %366 : vector<2x50xf32>
    %369 = arith.divf %367, %368 : vector<2x50xf32>
    %370 = vector.extract_strided_slice %357 {offsets = [0, 100], sizes = [2, 50], strides = [1, 1]} : vector<2x200xf32> to vector<2x50xf32>
    %371 = math.tanh %370 : vector<2x50xf32>
    %372 = vector.extract_strided_slice %357 {offsets = [0, 150], sizes = [2, 50], strides = [1, 1]} : vector<2x200xf32> to vector<2x50xf32>
    %373 = arith.negf %372 : vector<2x50xf32>
    %374 = math.exp %373 : vector<2x50xf32>
    %cst_60 = arith.constant 1.000000e+00 : f32
    %375 = vector.broadcast %cst_60 : f32 to vector<2x50xf32>
    %376 = arith.addf %375, %374 : vector<2x50xf32>
    %377 = arith.divf %375, %376 : vector<2x50xf32>
    %378 = arith.mulf %369, %322 : vector<2x50xf32>
    %379 = arith.mulf %363, %371 : vector<2x50xf32>
    %380 = arith.addf %378, %379 : vector<2x50xf32>
    %381 = math.tanh %380 : vector<2x50xf32>
    %382 = arith.mulf %377, %381 : vector<2x50xf32>
    %383 = vector.extract_strided_slice %15 {offsets = [6, 0, 0], sizes = [1, 2, 200], strides = [1, 1, 1]} : vector<8x2x200xf32> to vector<1x2x200xf32>
    %384 = vector.shape_cast %383 : vector<1x2x200xf32> to vector<2x200xf32>
    %385 = vector.extract_strided_slice %26 {offsets = [1, 0, 0], sizes = [1, 2, 200], strides = [1, 1, 1]} : vector<8x2x200xf32> to vector<1x2x200xf32>
    %386 = vector.shape_cast %385 : vector<1x2x200xf32> to vector<2x200xf32>
    %cst_61 = arith.constant dense<0.000000e+00> : vector<2x200xf32>
    %387 = tpu.matmul %355, %28, %cst_61 {dimension_numbers = #tpu.dot_dimension_numbers<[1], [0], [0], [1], [0, 0, 1, 1], [], []>} : vector<2x50xf32>, vector<50x200xf32>, vector<2x200xf32> -> vector<2x200xf32>
    %388 = arith.addf %384, %387 : vector<2x200xf32>
    %389 = vector.extract_strided_slice %388 {offsets = [0, 0], sizes = [2, 50], strides = [1, 1]} : vector<2x200xf32> to vector<2x50xf32>
    %390 = arith.negf %389 : vector<2x50xf32>
    %391 = math.exp %390 : vector<2x50xf32>
    %cst_62 = arith.constant 1.000000e+00 : f32
    %392 = vector.broadcast %cst_62 : f32 to vector<2x50xf32>
    %393 = arith.addf %392, %391 : vector<2x50xf32>
    %394 = arith.divf %392, %393 : vector<2x50xf32>
    %395 = vector.extract_strided_slice %388 {offsets = [0, 50], sizes = [2, 50], strides = [1, 1]} : vector<2x200xf32> to vector<2x50xf32>
    %396 = arith.negf %395 : vector<2x50xf32>
    %397 = math.exp %396 : vector<2x50xf32>
    %cst_63 = arith.constant 1.000000e+00 : f32
    %398 = vector.broadcast %cst_63 : f32 to vector<2x50xf32>
    %399 = arith.addf %398, %397 : vector<2x50xf32>
    %400 = arith.divf %398, %399 : vector<2x50xf32>
    %401 = vector.extract_strided_slice %388 {offsets = [0, 100], sizes = [2, 50], strides = [1, 1]} : vector<2x200xf32> to vector<2x50xf32>
    %402 = math.tanh %401 : vector<2x50xf32>
    %403 = vector.extract_strided_slice %388 {offsets = [0, 150], sizes = [2, 50], strides = [1, 1]} : vector<2x200xf32> to vector<2x50xf32>
    %404 = arith.negf %403 : vector<2x50xf32>
    %405 = math.exp %404 : vector<2x50xf32>
    %cst_64 = arith.constant 1.000000e+00 : f32
    %406 = vector.broadcast %cst_64 : f32 to vector<2x50xf32>
    %407 = arith.addf %406, %405 : vector<2x50xf32>
    %408 = arith.divf %406, %407 : vector<2x50xf32>
    %409 = arith.mulf %400, %353 : vector<2x50xf32>
    %410 = arith.mulf %394, %402 : vector<2x50xf32>
    %411 = arith.addf %409, %410 : vector<2x50xf32>
    %412 = math.tanh %411 : vector<2x50xf32>
    %413 = arith.mulf %408, %412 : vector<2x50xf32>
    %cst_65 = arith.constant dense<0.000000e+00> : vector<2x200xf32>
    %414 = tpu.matmul %382, %30, %cst_65 {dimension_numbers = #tpu.dot_dimension_numbers<[1], [0], [0], [1], [0, 0, 1, 1], [], []>} : vector<2x50xf32>, vector<50x200xf32>, vector<2x200xf32> -> vector<2x200xf32>
    %415 = arith.addf %386, %414 : vector<2x200xf32>
    %416 = vector.extract_strided_slice %415 {offsets = [0, 0], sizes = [2, 50], strides = [1, 1]} : vector<2x200xf32> to vector<2x50xf32>
    %417 = arith.negf %416 : vector<2x50xf32>
    %418 = math.exp %417 : vector<2x50xf32>
    %cst_66 = arith.constant 1.000000e+00 : f32
    %419 = vector.broadcast %cst_66 : f32 to vector<2x50xf32>
    %420 = arith.addf %419, %418 : vector<2x50xf32>
    %421 = arith.divf %419, %420 : vector<2x50xf32>
    %422 = vector.extract_strided_slice %415 {offsets = [0, 50], sizes = [2, 50], strides = [1, 1]} : vector<2x200xf32> to vector<2x50xf32>
    %423 = arith.negf %422 : vector<2x50xf32>
    %424 = math.exp %423 : vector<2x50xf32>
    %cst_67 = arith.constant 1.000000e+00 : f32
    %425 = vector.broadcast %cst_67 : f32 to vector<2x50xf32>
    %426 = arith.addf %425, %424 : vector<2x50xf32>
    %427 = arith.divf %425, %426 : vector<2x50xf32>
    %428 = vector.extract_strided_slice %415 {offsets = [0, 100], sizes = [2, 50], strides = [1, 1]} : vector<2x200xf32> to vector<2x50xf32>
    %429 = math.tanh %428 : vector<2x50xf32>
    %430 = vector.extract_strided_slice %415 {offsets = [0, 150], sizes = [2, 50], strides = [1, 1]} : vector<2x200xf32> to vector<2x50xf32>
    %431 = arith.negf %430 : vector<2x50xf32>
    %432 = math.exp %431 : vector<2x50xf32>
    %cst_68 = arith.constant 1.000000e+00 : f32
    %433 = vector.broadcast %cst_68 : f32 to vector<2x50xf32>
    %434 = arith.addf %433, %432 : vector<2x50xf32>
    %435 = arith.divf %433, %434 : vector<2x50xf32>
    %436 = arith.mulf %427, %380 : vector<2x50xf32>
    %437 = arith.mulf %421, %429 : vector<2x50xf32>
    %438 = arith.addf %436, %437 : vector<2x50xf32>
    %439 = math.tanh %438 : vector<2x50xf32>
    %440 = arith.mulf %435, %439 : vector<2x50xf32>
    %441 = vector.extract_strided_slice %15 {offsets = [7, 0, 0], sizes = [1, 2, 200], strides = [1, 1, 1]} : vector<8x2x200xf32> to vector<1x2x200xf32>
    %442 = vector.shape_cast %441 : vector<1x2x200xf32> to vector<2x200xf32>
    %443 = vector.extract_strided_slice %26 {offsets = [0, 0, 0], sizes = [1, 2, 200], strides = [1, 1, 1]} : vector<8x2x200xf32> to vector<1x2x200xf32>
    %444 = vector.shape_cast %443 : vector<1x2x200xf32> to vector<2x200xf32>
    %cst_69 = arith.constant dense<0.000000e+00> : vector<2x200xf32>
    %445 = tpu.matmul %413, %28, %cst_69 {dimension_numbers = #tpu.dot_dimension_numbers<[1], [0], [0], [1], [0, 0, 1, 1], [], []>} : vector<2x50xf32>, vector<50x200xf32>, vector<2x200xf32> -> vector<2x200xf32>
    %446 = arith.addf %442, %445 : vector<2x200xf32>
    %447 = vector.extract_strided_slice %446 {offsets = [0, 0], sizes = [2, 50], strides = [1, 1]} : vector<2x200xf32> to vector<2x50xf32>
    %448 = arith.negf %447 : vector<2x50xf32>
    %449 = math.exp %448 : vector<2x50xf32>
    %cst_70 = arith.constant 1.000000e+00 : f32
    %450 = vector.broadcast %cst_70 : f32 to vector<2x50xf32>
    %451 = arith.addf %450, %449 : vector<2x50xf32>
    %452 = arith.divf %450, %451 : vector<2x50xf32>
    %453 = vector.extract_strided_slice %446 {offsets = [0, 50], sizes = [2, 50], strides = [1, 1]} : vector<2x200xf32> to vector<2x50xf32>
    %454 = arith.negf %453 : vector<2x50xf32>
    %455 = math.exp %454 : vector<2x50xf32>
    %cst_71 = arith.constant 1.000000e+00 : f32
    %456 = vector.broadcast %cst_71 : f32 to vector<2x50xf32>
    %457 = arith.addf %456, %455 : vector<2x50xf32>
    %458 = arith.divf %456, %457 : vector<2x50xf32>
    %459 = vector.extract_strided_slice %446 {offsets = [0, 100], sizes = [2, 50], strides = [1, 1]} : vector<2x200xf32> to vector<2x50xf32>
    %460 = math.tanh %459 : vector<2x50xf32>
    %461 = vector.extract_strided_slice %446 {offsets = [0, 150], sizes = [2, 50], strides = [1, 1]} : vector<2x200xf32> to vector<2x50xf32>
    %462 = arith.negf %461 : vector<2x50xf32>
    %463 = math.exp %462 : vector<2x50xf32>
    %cst_72 = arith.constant 1.000000e+00 : f32
    %464 = vector.broadcast %cst_72 : f32 to vector<2x50xf32>
    %465 = arith.addf %464, %463 : vector<2x50xf32>
    %466 = arith.divf %464, %465 : vector<2x50xf32>
    %467 = arith.mulf %458, %411 : vector<2x50xf32>
    %468 = arith.mulf %452, %460 : vector<2x50xf32>
    %469 = arith.addf %467, %468 : vector<2x50xf32>
    %470 = math.tanh %469 : vector<2x50xf32>
    %471 = arith.mulf %466, %470 : vector<2x50xf32>
    %cst_73 = arith.constant dense<0.000000e+00> : vector<2x200xf32>
    %472 = tpu.matmul %440, %30, %cst_73 {dimension_numbers = #tpu.dot_dimension_numbers<[1], [0], [0], [1], [0, 0, 1, 1], [], []>} : vector<2x50xf32>, vector<50x200xf32>, vector<2x200xf32> -> vector<2x200xf32>
    %473 = arith.addf %444, %472 : vector<2x200xf32>
    %474 = vector.extract_strided_slice %473 {offsets = [0, 0], sizes = [2, 50], strides = [1, 1]} : vector<2x200xf32> to vector<2x50xf32>
    %475 = arith.negf %474 : vector<2x50xf32>
    %476 = math.exp %475 : vector<2x50xf32>
    %cst_74 = arith.constant 1.000000e+00 : f32
    %477 = vector.broadcast %cst_74 : f32 to vector<2x50xf32>
    %478 = arith.addf %477, %476 : vector<2x50xf32>
    %479 = arith.divf %477, %478 : vector<2x50xf32>
    %480 = vector.extract_strided_slice %473 {offsets = [0, 50], sizes = [2, 50], strides = [1, 1]} : vector<2x200xf32> to vector<2x50xf32>
    %481 = arith.negf %480 : vector<2x50xf32>
    %482 = math.exp %481 : vector<2x50xf32>
    %cst_75 = arith.constant 1.000000e+00 : f32
    %483 = vector.broadcast %cst_75 : f32 to vector<2x50xf32>
    %484 = arith.addf %483, %482 : vector<2x50xf32>
    %485 = arith.divf %483, %484 : vector<2x50xf32>
    %486 = vector.extract_strided_slice %473 {offsets = [0, 100], sizes = [2, 50], strides = [1, 1]} : vector<2x200xf32> to vector<2x50xf32>
    %487 = math.tanh %486 : vector<2x50xf32>
    %488 = vector.extract_strided_slice %473 {offsets = [0, 150], sizes = [2, 50], strides = [1, 1]} : vector<2x200xf32> to vector<2x50xf32>
    %489 = arith.negf %488 : vector<2x50xf32>
    %490 = math.exp %489 : vector<2x50xf32>
    %cst_76 = arith.constant 1.000000e+00 : f32
    %491 = vector.broadcast %cst_76 : f32 to vector<2x50xf32>
    %492 = arith.addf %491, %490 : vector<2x50xf32>
    %493 = arith.divf %491, %492 : vector<2x50xf32>
    %494 = arith.mulf %485, %438 : vector<2x50xf32>
    %495 = arith.mulf %479, %487 : vector<2x50xf32>
    %496 = arith.addf %494, %495 : vector<2x50xf32>
    %497 = math.tanh %496 : vector<2x50xf32>
    %498 = arith.mulf %493, %497 : vector<2x50xf32>
    %499 = vector.shape_cast %65 : vector<2x50xf32> to vector<1x2x50xf32>
    %500 = vector.shape_cast %123 : vector<2x50xf32> to vector<1x2x50xf32>
    %501 = vector.shape_cast %181 : vector<2x50xf32> to vector<1x2x50xf32>
    %502 = vector.shape_cast %239 : vector<2x50xf32> to vector<1x2x50xf32>
    %503 = vector.shape_cast %297 : vector<2x50xf32> to vector<1x2x50xf32>
    %504 = vector.shape_cast %355 : vector<2x50xf32> to vector<1x2x50xf32>
    %505 = vector.shape_cast %413 : vector<2x50xf32> to vector<1x2x50xf32>
    %506 = vector.shape_cast %471 : vector<2x50xf32> to vector<1x2x50xf32>
    %507 = tpu.concatenate %499, %500, %501, %502, %503, %504, %505, %506 in 0 : vector<1x2x50xf32>, vector<1x2x50xf32>, vector<1x2x50xf32>, vector<1x2x50xf32>, vector<1x2x50xf32>, vector<1x2x50xf32>, vector<1x2x50xf32>, vector<1x2x50xf32> -> vector<8x2x50xf32>
    %508 = vector.shape_cast %498 : vector<2x50xf32> to vector<1x2x50xf32>
    %509 = vector.shape_cast %440 : vector<2x50xf32> to vector<1x2x50xf32>
    %510 = vector.shape_cast %382 : vector<2x50xf32> to vector<1x2x50xf32>
    %511 = vector.shape_cast %324 : vector<2x50xf32> to vector<1x2x50xf32>
    %512 = vector.shape_cast %266 : vector<2x50xf32> to vector<1x2x50xf32>
    %513 = vector.shape_cast %208 : vector<2x50xf32> to vector<1x2x50xf32>
    %514 = vector.shape_cast %150 : vector<2x50xf32> to vector<1x2x50xf32>
    %515 = vector.shape_cast %92 : vector<2x50xf32> to vector<1x2x50xf32>
    %516 = tpu.concatenate %508, %509, %510, %511, %512, %513, %514, %515 in 0 : vector<1x2x50xf32>, vector<1x2x50xf32>, vector<1x2x50xf32>, vector<1x2x50xf32>, vector<1x2x50xf32>, vector<1x2x50xf32>, vector<1x2x50xf32>, vector<1x2x50xf32> -> vector<8x2x50xf32>
    %517 = tpu.concatenate %507, %516 in 2 : vector<8x2x50xf32>, vector<8x2x50xf32> -> vector<8x2x100xf32>
    %c0_77 = arith.constant 0 : index
    %c0_78 = arith.constant 0 : index
    %c0_79 = arith.constant 0 : index
    %518 = vector.load %arg5[%c0_77, %c0_78, %c0_79] : memref<2x100x32xf32, #tpu.memory_space<vmem>>, vector<2x100x32xf32>
    %c0_80 = arith.constant 0 : index
    %c0_81 = arith.constant 0 : index
    %c0_82 = arith.constant 0 : index
    %519 = vector.load %arg6[%c0_80, %c0_81, %c0_82] : memref<2x8x32xf32, #tpu.memory_space<vmem>>, vector<2x8x32xf32>
    %c0_83 = arith.constant 0 : index
    %c0_84 = arith.constant 0 : index
    %c0_85 = arith.constant 0 : index
    %520 = vector.load %arg7[%c0_83, %c0_84, %c0_85] : memref<2x1x32xf32, #tpu.memory_space<vmem>>, vector<2x1x32xf32>
    %521 = vector.shape_cast %517 : vector<8x2x100xf32> to vector<16x100xf32>
    %522 = vector.extract_strided_slice %518 {offsets = [0, 0, 0], sizes = [1, 100, 32], strides = [1, 1, 1]} : vector<2x100x32xf32> to vector<1x100x32xf32>
    %523 = vector.shape_cast %522 : vector<1x100x32xf32> to vector<100x32xf32>
    %524 = vector.extract_strided_slice %520 {offsets = [0, 0, 0], sizes = [1, 1, 32], strides = [1, 1, 1]} : vector<2x1x32xf32> to vector<1x1x32xf32>
    %525 = vector.shape_cast %524 : vector<1x1x32xf32> to vector<1x32xf32>
    %cst_86 = arith.constant dense<0.000000e+00> : vector<16x32xf32>
    %526 = tpu.matmul %521, %523, %cst_86 {dimension_numbers = #tpu.dot_dimension_numbers<[1], [0], [0], [1], [0, 0, 1, 1], [], []>} : vector<16x100xf32>, vector<100x32xf32>, vector<16x32xf32> -> vector<16x32xf32>
    %527 = vector.broadcast %525 : vector<1x32xf32> to vector<16x32xf32>
    %528 = arith.addf %526, %527 : vector<16x32xf32>
    %529 = vector.shape_cast %528 : vector<16x32xf32> to vector<8x2x32xf32>
    %530 = vector.extract_strided_slice %518 {offsets = [1, 0, 0], sizes = [1, 100, 32], strides = [1, 1, 1]} : vector<2x100x32xf32> to vector<1x100x32xf32>
    %531 = vector.shape_cast %530 : vector<1x100x32xf32> to vector<100x32xf32>
    %532 = vector.extract_strided_slice %520 {offsets = [1, 0, 0], sizes = [1, 1, 32], strides = [1, 1, 1]} : vector<2x1x32xf32> to vector<1x1x32xf32>
    %533 = vector.shape_cast %532 : vector<1x1x32xf32> to vector<1x32xf32>
    %cst_87 = arith.constant dense<0.000000e+00> : vector<16x32xf32>
    %534 = tpu.matmul %521, %531, %cst_87 {dimension_numbers = #tpu.dot_dimension_numbers<[1], [0], [0], [1], [0, 0, 1, 1], [], []>} : vector<16x100xf32>, vector<100x32xf32>, vector<16x32xf32> -> vector<16x32xf32>
    %535 = vector.broadcast %533 : vector<1x32xf32> to vector<16x32xf32>
    %536 = arith.addf %534, %535 : vector<16x32xf32>
    %537 = vector.shape_cast %536 : vector<16x32xf32> to vector<8x2x32xf32>
    %538 = vector.extract_strided_slice %519 {offsets = [0, 0, 0], sizes = [1, 8, 32], strides = [1, 1, 1]} : vector<2x8x32xf32> to vector<1x8x32xf32>
    %539 = vector.shape_cast %538 : vector<1x8x32xf32> to vector<8x32xf32>
    %540 = vector.extract_strided_slice %519 {offsets = [1, 0, 0], sizes = [1, 8, 32], strides = [1, 1, 1]} : vector<2x8x32xf32> to vector<1x8x32xf32>
    %541 = vector.shape_cast %540 : vector<1x8x32xf32> to vector<8x32xf32>
    %cst_88 = arith.constant 0.000000e+00 : f32
    %542 = vector.broadcast %cst_88 : f32 to vector<2x8xf32>
    %cst_89 = arith.constant 0.000000e+00 : f32
    %543 = vector.broadcast %cst_89 : f32 to vector<2x8xf32>
    %cst_90 = arith.constant 0.000000e+00 : f32
    %544 = vector.broadcast %cst_90 : f32 to vector<2x8xf32>
    %cst_91 = arith.constant 0.000000e+00 : f32
    %545 = vector.broadcast %cst_91 : f32 to vector<2x8xf32>
    %546 = vector.extract_strided_slice %529 {offsets = [0, 0, 0], sizes = [1, 2, 32], strides = [1, 1, 1]} : vector<8x2x32xf32> to vector<1x2x32xf32>
    %547 = vector.shape_cast %546 : vector<1x2x32xf32> to vector<2x32xf32>
    %548 = vector.extract_strided_slice %537 {offsets = [7, 0, 0], sizes = [1, 2, 32], strides = [1, 1, 1]} : vector<8x2x32xf32> to vector<1x2x32xf32>
    %549 = vector.shape_cast %548 : vector<1x2x32xf32> to vector<2x32xf32>
    %cst_92 = arith.constant dense<0.000000e+00> : vector<2x32xf32>
    %550 = tpu.matmul %542, %539, %cst_92 {dimension_numbers = #tpu.dot_dimension_numbers<[1], [0], [0], [1], [0, 0, 1, 1], [], []>} : vector<2x8xf32>, vector<8x32xf32>, vector<2x32xf32> -> vector<2x32xf32>
    %551 = arith.addf %547, %550 : vector<2x32xf32>
    %552 = vector.extract_strided_slice %551 {offsets = [0, 0], sizes = [2, 8], strides = [1, 1]} : vector<2x32xf32> to vector<2x8xf32>
    %553 = arith.negf %552 : vector<2x8xf32>
    %554 = math.exp %553 : vector<2x8xf32>
    %cst_93 = arith.constant 1.000000e+00 : f32
    %555 = vector.broadcast %cst_93 : f32 to vector<2x8xf32>
    %556 = arith.addf %555, %554 : vector<2x8xf32>
    %557 = arith.divf %555, %556 : vector<2x8xf32>
    %558 = vector.extract_strided_slice %551 {offsets = [0, 8], sizes = [2, 8], strides = [1, 1]} : vector<2x32xf32> to vector<2x8xf32>
    %559 = arith.negf %558 : vector<2x8xf32>
    %560 = math.exp %559 : vector<2x8xf32>
    %cst_94 = arith.constant 1.000000e+00 : f32
    %561 = vector.broadcast %cst_94 : f32 to vector<2x8xf32>
    %562 = arith.addf %561, %560 : vector<2x8xf32>
    %563 = arith.divf %561, %562 : vector<2x8xf32>
    %564 = vector.extract_strided_slice %551 {offsets = [0, 16], sizes = [2, 8], strides = [1, 1]} : vector<2x32xf32> to vector<2x8xf32>
    %565 = math.tanh %564 : vector<2x8xf32>
    %566 = vector.extract_strided_slice %551 {offsets = [0, 24], sizes = [2, 8], strides = [1, 1]} : vector<2x32xf32> to vector<2x8xf32>
    %567 = arith.negf %566 : vector<2x8xf32>
    %568 = math.exp %567 : vector<2x8xf32>
    %cst_95 = arith.constant 1.000000e+00 : f32
    %569 = vector.broadcast %cst_95 : f32 to vector<2x8xf32>
    %570 = arith.addf %569, %568 : vector<2x8xf32>
    %571 = arith.divf %569, %570 : vector<2x8xf32>
    %572 = arith.mulf %563, %543 : vector<2x8xf32>
    %573 = arith.mulf %557, %565 : vector<2x8xf32>
    %574 = arith.addf %572, %573 : vector<2x8xf32>
    %575 = math.tanh %574 : vector<2x8xf32>
    %576 = arith.mulf %571, %575 : vector<2x8xf32>
    %cst_96 = arith.constant dense<0.000000e+00> : vector<2x32xf32>
    %577 = tpu.matmul %544, %541, %cst_96 {dimension_numbers = #tpu.dot_dimension_numbers<[1], [0], [0], [1], [0, 0, 1, 1], [], []>} : vector<2x8xf32>, vector<8x32xf32>, vector<2x32xf32> -> vector<2x32xf32>
    %578 = arith.addf %549, %577 : vector<2x32xf32>
    %579 = vector.extract_strided_slice %578 {offsets = [0, 0], sizes = [2, 8], strides = [1, 1]} : vector<2x32xf32> to vector<2x8xf32>
    %580 = arith.negf %579 : vector<2x8xf32>
    %581 = math.exp %580 : vector<2x8xf32>
    %cst_97 = arith.constant 1.000000e+00 : f32
    %582 = vector.broadcast %cst_97 : f32 to vector<2x8xf32>
    %583 = arith.addf %582, %581 : vector<2x8xf32>
    %584 = arith.divf %582, %583 : vector<2x8xf32>
    %585 = vector.extract_strided_slice %578 {offsets = [0, 8], sizes = [2, 8], strides = [1, 1]} : vector<2x32xf32> to vector<2x8xf32>
    %586 = arith.negf %585 : vector<2x8xf32>
    %587 = math.exp %586 : vector<2x8xf32>
    %cst_98 = arith.constant 1.000000e+00 : f32
    %588 = vector.broadcast %cst_98 : f32 to vector<2x8xf32>
    %589 = arith.addf %588, %587 : vector<2x8xf32>
    %590 = arith.divf %588, %589 : vector<2x8xf32>
    %591 = vector.extract_strided_slice %578 {offsets = [0, 16], sizes = [2, 8], strides = [1, 1]} : vector<2x32xf32> to vector<2x8xf32>
    %592 = math.tanh %591 : vector<2x8xf32>
    %593 = vector.extract_strided_slice %578 {offsets = [0, 24], sizes = [2, 8], strides = [1, 1]} : vector<2x32xf32> to vector<2x8xf32>
    %594 = arith.negf %593 : vector<2x8xf32>
    %595 = math.exp %594 : vector<2x8xf32>
    %cst_99 = arith.constant 1.000000e+00 : f32
    %596 = vector.broadcast %cst_99 : f32 to vector<2x8xf32>
    %597 = arith.addf %596, %595 : vector<2x8xf32>
    %598 = arith.divf %596, %597 : vector<2x8xf32>
    %599 = arith.mulf %590, %545 : vector<2x8xf32>
    %600 = arith.mulf %584, %592 : vector<2x8xf32>
    %601 = arith.addf %599, %600 : vector<2x8xf32>
    %602 = math.tanh %601 : vector<2x8xf32>
    %603 = arith.mulf %598, %602 : vector<2x8xf32>
    %604 = vector.extract_strided_slice %529 {offsets = [1, 0, 0], sizes = [1, 2, 32], strides = [1, 1, 1]} : vector<8x2x32xf32> to vector<1x2x32xf32>
    %605 = vector.shape_cast %604 : vector<1x2x32xf32> to vector<2x32xf32>
    %606 = vector.extract_strided_slice %537 {offsets = [6, 0, 0], sizes = [1, 2, 32], strides = [1, 1, 1]} : vector<8x2x32xf32> to vector<1x2x32xf32>
    %607 = vector.shape_cast %606 : vector<1x2x32xf32> to vector<2x32xf32>
    %cst_100 = arith.constant dense<0.000000e+00> : vector<2x32xf32>
    %608 = tpu.matmul %576, %539, %cst_100 {dimension_numbers = #tpu.dot_dimension_numbers<[1], [0], [0], [1], [0, 0, 1, 1], [], []>} : vector<2x8xf32>, vector<8x32xf32>, vector<2x32xf32> -> vector<2x32xf32>
    %609 = arith.addf %605, %608 : vector<2x32xf32>
    %610 = vector.extract_strided_slice %609 {offsets = [0, 0], sizes = [2, 8], strides = [1, 1]} : vector<2x32xf32> to vector<2x8xf32>
    %611 = arith.negf %610 : vector<2x8xf32>
    %612 = math.exp %611 : vector<2x8xf32>
    %cst_101 = arith.constant 1.000000e+00 : f32
    %613 = vector.broadcast %cst_101 : f32 to vector<2x8xf32>
    %614 = arith.addf %613, %612 : vector<2x8xf32>
    %615 = arith.divf %613, %614 : vector<2x8xf32>
    %616 = vector.extract_strided_slice %609 {offsets = [0, 8], sizes = [2, 8], strides = [1, 1]} : vector<2x32xf32> to vector<2x8xf32>
    %617 = arith.negf %616 : vector<2x8xf32>
    %618 = math.exp %617 : vector<2x8xf32>
    %cst_102 = arith.constant 1.000000e+00 : f32
    %619 = vector.broadcast %cst_102 : f32 to vector<2x8xf32>
    %620 = arith.addf %619, %618 : vector<2x8xf32>
    %621 = arith.divf %619, %620 : vector<2x8xf32>
    %622 = vector.extract_strided_slice %609 {offsets = [0, 16], sizes = [2, 8], strides = [1, 1]} : vector<2x32xf32> to vector<2x8xf32>
    %623 = math.tanh %622 : vector<2x8xf32>
    %624 = vector.extract_strided_slice %609 {offsets = [0, 24], sizes = [2, 8], strides = [1, 1]} : vector<2x32xf32> to vector<2x8xf32>
    %625 = arith.negf %624 : vector<2x8xf32>
    %626 = math.exp %625 : vector<2x8xf32>
    %cst_103 = arith.constant 1.000000e+00 : f32
    %627 = vector.broadcast %cst_103 : f32 to vector<2x8xf32>
    %628 = arith.addf %627, %626 : vector<2x8xf32>
    %629 = arith.divf %627, %628 : vector<2x8xf32>
    %630 = arith.mulf %621, %574 : vector<2x8xf32>
    %631 = arith.mulf %615, %623 : vector<2x8xf32>
    %632 = arith.addf %630, %631 : vector<2x8xf32>
    %633 = math.tanh %632 : vector<2x8xf32>
    %634 = arith.mulf %629, %633 : vector<2x8xf32>
    %cst_104 = arith.constant dense<0.000000e+00> : vector<2x32xf32>
    %635 = tpu.matmul %603, %541, %cst_104 {dimension_numbers = #tpu.dot_dimension_numbers<[1], [0], [0], [1], [0, 0, 1, 1], [], []>} : vector<2x8xf32>, vector<8x32xf32>, vector<2x32xf32> -> vector<2x32xf32>
    %636 = arith.addf %607, %635 : vector<2x32xf32>
    %637 = vector.extract_strided_slice %636 {offsets = [0, 0], sizes = [2, 8], strides = [1, 1]} : vector<2x32xf32> to vector<2x8xf32>
    %638 = arith.negf %637 : vector<2x8xf32>
    %639 = math.exp %638 : vector<2x8xf32>
    %cst_105 = arith.constant 1.000000e+00 : f32
    %640 = vector.broadcast %cst_105 : f32 to vector<2x8xf32>
    %641 = arith.addf %640, %639 : vector<2x8xf32>
    %642 = arith.divf %640, %641 : vector<2x8xf32>
    %643 = vector.extract_strided_slice %636 {offsets = [0, 8], sizes = [2, 8], strides = [1, 1]} : vector<2x32xf32> to vector<2x8xf32>
    %644 = arith.negf %643 : vector<2x8xf32>
    %645 = math.exp %644 : vector<2x8xf32>
    %cst_106 = arith.constant 1.000000e+00 : f32
    %646 = vector.broadcast %cst_106 : f32 to vector<2x8xf32>
    %647 = arith.addf %646, %645 : vector<2x8xf32>
    %648 = arith.divf %646, %647 : vector<2x8xf32>
    %649 = vector.extract_strided_slice %636 {offsets = [0, 16], sizes = [2, 8], strides = [1, 1]} : vector<2x32xf32> to vector<2x8xf32>
    %650 = math.tanh %649 : vector<2x8xf32>
    %651 = vector.extract_strided_slice %636 {offsets = [0, 24], sizes = [2, 8], strides = [1, 1]} : vector<2x32xf32> to vector<2x8xf32>
    %652 = arith.negf %651 : vector<2x8xf32>
    %653 = math.exp %652 : vector<2x8xf32>
    %cst_107 = arith.constant 1.000000e+00 : f32
    %654 = vector.broadcast %cst_107 : f32 to vector<2x8xf32>
    %655 = arith.addf %654, %653 : vector<2x8xf32>
    %656 = arith.divf %654, %655 : vector<2x8xf32>
    %657 = arith.mulf %648, %601 : vector<2x8xf32>
    %658 = arith.mulf %642, %650 : vector<2x8xf32>
    %659 = arith.addf %657, %658 : vector<2x8xf32>
    %660 = math.tanh %659 : vector<2x8xf32>
    %661 = arith.mulf %656, %660 : vector<2x8xf32>
    %662 = vector.extract_strided_slice %529 {offsets = [2, 0, 0], sizes = [1, 2, 32], strides = [1, 1, 1]} : vector<8x2x32xf32> to vector<1x2x32xf32>
    %663 = vector.shape_cast %662 : vector<1x2x32xf32> to vector<2x32xf32>
    %664 = vector.extract_strided_slice %537 {offsets = [5, 0, 0], sizes = [1, 2, 32], strides = [1, 1, 1]} : vector<8x2x32xf32> to vector<1x2x32xf32>
    %665 = vector.shape_cast %664 : vector<1x2x32xf32> to vector<2x32xf32>
    %cst_108 = arith.constant dense<0.000000e+00> : vector<2x32xf32>
    %666 = tpu.matmul %634, %539, %cst_108 {dimension_numbers = #tpu.dot_dimension_numbers<[1], [0], [0], [1], [0, 0, 1, 1], [], []>} : vector<2x8xf32>, vector<8x32xf32>, vector<2x32xf32> -> vector<2x32xf32>
    %667 = arith.addf %663, %666 : vector<2x32xf32>
    %668 = vector.extract_strided_slice %667 {offsets = [0, 0], sizes = [2, 8], strides = [1, 1]} : vector<2x32xf32> to vector<2x8xf32>
    %669 = arith.negf %668 : vector<2x8xf32>
    %670 = math.exp %669 : vector<2x8xf32>
    %cst_109 = arith.constant 1.000000e+00 : f32
    %671 = vector.broadcast %cst_109 : f32 to vector<2x8xf32>
    %672 = arith.addf %671, %670 : vector<2x8xf32>
    %673 = arith.divf %671, %672 : vector<2x8xf32>
    %674 = vector.extract_strided_slice %667 {offsets = [0, 8], sizes = [2, 8], strides = [1, 1]} : vector<2x32xf32> to vector<2x8xf32>
    %675 = arith.negf %674 : vector<2x8xf32>
    %676 = math.exp %675 : vector<2x8xf32>
    %cst_110 = arith.constant 1.000000e+00 : f32
    %677 = vector.broadcast %cst_110 : f32 to vector<2x8xf32>
    %678 = arith.addf %677, %676 : vector<2x8xf32>
    %679 = arith.divf %677, %678 : vector<2x8xf32>
    %680 = vector.extract_strided_slice %667 {offsets = [0, 16], sizes = [2, 8], strides = [1, 1]} : vector<2x32xf32> to vector<2x8xf32>
    %681 = math.tanh %680 : vector<2x8xf32>
    %682 = vector.extract_strided_slice %667 {offsets = [0, 24], sizes = [2, 8], strides = [1, 1]} : vector<2x32xf32> to vector<2x8xf32>
    %683 = arith.negf %682 : vector<2x8xf32>
    %684 = math.exp %683 : vector<2x8xf32>
    %cst_111 = arith.constant 1.000000e+00 : f32
    %685 = vector.broadcast %cst_111 : f32 to vector<2x8xf32>
    %686 = arith.addf %685, %684 : vector<2x8xf32>
    %687 = arith.divf %685, %686 : vector<2x8xf32>
    %688 = arith.mulf %679, %632 : vector<2x8xf32>
    %689 = arith.mulf %673, %681 : vector<2x8xf32>
    %690 = arith.addf %688, %689 : vector<2x8xf32>
    %691 = math.tanh %690 : vector<2x8xf32>
    %692 = arith.mulf %687, %691 : vector<2x8xf32>
    %cst_112 = arith.constant dense<0.000000e+00> : vector<2x32xf32>
    %693 = tpu.matmul %661, %541, %cst_112 {dimension_numbers = #tpu.dot_dimension_numbers<[1], [0], [0], [1], [0, 0, 1, 1], [], []>} : vector<2x8xf32>, vector<8x32xf32>, vector<2x32xf32> -> vector<2x32xf32>
    %694 = arith.addf %665, %693 : vector<2x32xf32>
    %695 = vector.extract_strided_slice %694 {offsets = [0, 0], sizes = [2, 8], strides = [1, 1]} : vector<2x32xf32> to vector<2x8xf32>
    %696 = arith.negf %695 : vector<2x8xf32>
    %697 = math.exp %696 : vector<2x8xf32>
    %cst_113 = arith.constant 1.000000e+00 : f32
    %698 = vector.broadcast %cst_113 : f32 to vector<2x8xf32>
    %699 = arith.addf %698, %697 : vector<2x8xf32>
    %700 = arith.divf %698, %699 : vector<2x8xf32>
    %701 = vector.extract_strided_slice %694 {offsets = [0, 8], sizes = [2, 8], strides = [1, 1]} : vector<2x32xf32> to vector<2x8xf32>
    %702 = arith.negf %701 : vector<2x8xf32>
    %703 = math.exp %702 : vector<2x8xf32>
    %cst_114 = arith.constant 1.000000e+00 : f32
    %704 = vector.broadcast %cst_114 : f32 to vector<2x8xf32>
    %705 = arith.addf %704, %703 : vector<2x8xf32>
    %706 = arith.divf %704, %705 : vector<2x8xf32>
    %707 = vector.extract_strided_slice %694 {offsets = [0, 16], sizes = [2, 8], strides = [1, 1]} : vector<2x32xf32> to vector<2x8xf32>
    %708 = math.tanh %707 : vector<2x8xf32>
    %709 = vector.extract_strided_slice %694 {offsets = [0, 24], sizes = [2, 8], strides = [1, 1]} : vector<2x32xf32> to vector<2x8xf32>
    %710 = arith.negf %709 : vector<2x8xf32>
    %711 = math.exp %710 : vector<2x8xf32>
    %cst_115 = arith.constant 1.000000e+00 : f32
    %712 = vector.broadcast %cst_115 : f32 to vector<2x8xf32>
    %713 = arith.addf %712, %711 : vector<2x8xf32>
    %714 = arith.divf %712, %713 : vector<2x8xf32>
    %715 = arith.mulf %706, %659 : vector<2x8xf32>
    %716 = arith.mulf %700, %708 : vector<2x8xf32>
    %717 = arith.addf %715, %716 : vector<2x8xf32>
    %718 = math.tanh %717 : vector<2x8xf32>
    %719 = arith.mulf %714, %718 : vector<2x8xf32>
    %720 = vector.extract_strided_slice %529 {offsets = [3, 0, 0], sizes = [1, 2, 32], strides = [1, 1, 1]} : vector<8x2x32xf32> to vector<1x2x32xf32>
    %721 = vector.shape_cast %720 : vector<1x2x32xf32> to vector<2x32xf32>
    %722 = vector.extract_strided_slice %537 {offsets = [4, 0, 0], sizes = [1, 2, 32], strides = [1, 1, 1]} : vector<8x2x32xf32> to vector<1x2x32xf32>
    %723 = vector.shape_cast %722 : vector<1x2x32xf32> to vector<2x32xf32>
    %cst_116 = arith.constant dense<0.000000e+00> : vector<2x32xf32>
    %724 = tpu.matmul %692, %539, %cst_116 {dimension_numbers = #tpu.dot_dimension_numbers<[1], [0], [0], [1], [0, 0, 1, 1], [], []>} : vector<2x8xf32>, vector<8x32xf32>, vector<2x32xf32> -> vector<2x32xf32>
    %725 = arith.addf %721, %724 : vector<2x32xf32>
    %726 = vector.extract_strided_slice %725 {offsets = [0, 0], sizes = [2, 8], strides = [1, 1]} : vector<2x32xf32> to vector<2x8xf32>
    %727 = arith.negf %726 : vector<2x8xf32>
    %728 = math.exp %727 : vector<2x8xf32>
    %cst_117 = arith.constant 1.000000e+00 : f32
    %729 = vector.broadcast %cst_117 : f32 to vector<2x8xf32>
    %730 = arith.addf %729, %728 : vector<2x8xf32>
    %731 = arith.divf %729, %730 : vector<2x8xf32>
    %732 = vector.extract_strided_slice %725 {offsets = [0, 8], sizes = [2, 8], strides = [1, 1]} : vector<2x32xf32> to vector<2x8xf32>
    %733 = arith.negf %732 : vector<2x8xf32>
    %734 = math.exp %733 : vector<2x8xf32>
    %cst_118 = arith.constant 1.000000e+00 : f32
    %735 = vector.broadcast %cst_118 : f32 to vector<2x8xf32>
    %736 = arith.addf %735, %734 : vector<2x8xf32>
    %737 = arith.divf %735, %736 : vector<2x8xf32>
    %738 = vector.extract_strided_slice %725 {offsets = [0, 16], sizes = [2, 8], strides = [1, 1]} : vector<2x32xf32> to vector<2x8xf32>
    %739 = math.tanh %738 : vector<2x8xf32>
    %740 = vector.extract_strided_slice %725 {offsets = [0, 24], sizes = [2, 8], strides = [1, 1]} : vector<2x32xf32> to vector<2x8xf32>
    %741 = arith.negf %740 : vector<2x8xf32>
    %742 = math.exp %741 : vector<2x8xf32>
    %cst_119 = arith.constant 1.000000e+00 : f32
    %743 = vector.broadcast %cst_119 : f32 to vector<2x8xf32>
    %744 = arith.addf %743, %742 : vector<2x8xf32>
    %745 = arith.divf %743, %744 : vector<2x8xf32>
    %746 = arith.mulf %737, %690 : vector<2x8xf32>
    %747 = arith.mulf %731, %739 : vector<2x8xf32>
    %748 = arith.addf %746, %747 : vector<2x8xf32>
    %749 = math.tanh %748 : vector<2x8xf32>
    %750 = arith.mulf %745, %749 : vector<2x8xf32>
    %cst_120 = arith.constant dense<0.000000e+00> : vector<2x32xf32>
    %751 = tpu.matmul %719, %541, %cst_120 {dimension_numbers = #tpu.dot_dimension_numbers<[1], [0], [0], [1], [0, 0, 1, 1], [], []>} : vector<2x8xf32>, vector<8x32xf32>, vector<2x32xf32> -> vector<2x32xf32>
    %752 = arith.addf %723, %751 : vector<2x32xf32>
    %753 = vector.extract_strided_slice %752 {offsets = [0, 0], sizes = [2, 8], strides = [1, 1]} : vector<2x32xf32> to vector<2x8xf32>
    %754 = arith.negf %753 : vector<2x8xf32>
    %755 = math.exp %754 : vector<2x8xf32>
    %cst_121 = arith.constant 1.000000e+00 : f32
    %756 = vector.broadcast %cst_121 : f32 to vector<2x8xf32>
    %757 = arith.addf %756, %755 : vector<2x8xf32>
    %758 = arith.divf %756, %757 : vector<2x8xf32>
    %759 = vector.extract_strided_slice %752 {offsets = [0, 8], sizes = [2, 8], strides = [1, 1]} : vector<2x32xf32> to vector<2x8xf32>
    %760 = arith.negf %759 : vector<2x8xf32>
    %761 = math.exp %760 : vector<2x8xf32>
    %cst_122 = arith.constant 1.000000e+00 : f32
    %762 = vector.broadcast %cst_122 : f32 to vector<2x8xf32>
    %763 = arith.addf %762, %761 : vector<2x8xf32>
    %764 = arith.divf %762, %763 : vector<2x8xf32>
    %765 = vector.extract_strided_slice %752 {offsets = [0, 16], sizes = [2, 8], strides = [1, 1]} : vector<2x32xf32> to vector<2x8xf32>
    %766 = math.tanh %765 : vector<2x8xf32>
    %767 = vector.extract_strided_slice %752 {offsets = [0, 24], sizes = [2, 8], strides = [1, 1]} : vector<2x32xf32> to vector<2x8xf32>
    %768 = arith.negf %767 : vector<2x8xf32>
    %769 = math.exp %768 : vector<2x8xf32>
    %cst_123 = arith.constant 1.000000e+00 : f32
    %770 = vector.broadcast %cst_123 : f32 to vector<2x8xf32>
    %771 = arith.addf %770, %769 : vector<2x8xf32>
    %772 = arith.divf %770, %771 : vector<2x8xf32>
    %773 = arith.mulf %764, %717 : vector<2x8xf32>
    %774 = arith.mulf %758, %766 : vector<2x8xf32>
    %775 = arith.addf %773, %774 : vector<2x8xf32>
    %776 = math.tanh %775 : vector<2x8xf32>
    %777 = arith.mulf %772, %776 : vector<2x8xf32>
    %778 = vector.extract_strided_slice %529 {offsets = [4, 0, 0], sizes = [1, 2, 32], strides = [1, 1, 1]} : vector<8x2x32xf32> to vector<1x2x32xf32>
    %779 = vector.shape_cast %778 : vector<1x2x32xf32> to vector<2x32xf32>
    %780 = vector.extract_strided_slice %537 {offsets = [3, 0, 0], sizes = [1, 2, 32], strides = [1, 1, 1]} : vector<8x2x32xf32> to vector<1x2x32xf32>
    %781 = vector.shape_cast %780 : vector<1x2x32xf32> to vector<2x32xf32>
    %cst_124 = arith.constant dense<0.000000e+00> : vector<2x32xf32>
    %782 = tpu.matmul %750, %539, %cst_124 {dimension_numbers = #tpu.dot_dimension_numbers<[1], [0], [0], [1], [0, 0, 1, 1], [], []>} : vector<2x8xf32>, vector<8x32xf32>, vector<2x32xf32> -> vector<2x32xf32>
    %783 = arith.addf %779, %782 : vector<2x32xf32>
    %784 = vector.extract_strided_slice %783 {offsets = [0, 0], sizes = [2, 8], strides = [1, 1]} : vector<2x32xf32> to vector<2x8xf32>
    %785 = arith.negf %784 : vector<2x8xf32>
    %786 = math.exp %785 : vector<2x8xf32>
    %cst_125 = arith.constant 1.000000e+00 : f32
    %787 = vector.broadcast %cst_125 : f32 to vector<2x8xf32>
    %788 = arith.addf %787, %786 : vector<2x8xf32>
    %789 = arith.divf %787, %788 : vector<2x8xf32>
    %790 = vector.extract_strided_slice %783 {offsets = [0, 8], sizes = [2, 8], strides = [1, 1]} : vector<2x32xf32> to vector<2x8xf32>
    %791 = arith.negf %790 : vector<2x8xf32>
    %792 = math.exp %791 : vector<2x8xf32>
    %cst_126 = arith.constant 1.000000e+00 : f32
    %793 = vector.broadcast %cst_126 : f32 to vector<2x8xf32>
    %794 = arith.addf %793, %792 : vector<2x8xf32>
    %795 = arith.divf %793, %794 : vector<2x8xf32>
    %796 = vector.extract_strided_slice %783 {offsets = [0, 16], sizes = [2, 8], strides = [1, 1]} : vector<2x32xf32> to vector<2x8xf32>
    %797 = math.tanh %796 : vector<2x8xf32>
    %798 = vector.extract_strided_slice %783 {offsets = [0, 24], sizes = [2, 8], strides = [1, 1]} : vector<2x32xf32> to vector<2x8xf32>
    %799 = arith.negf %798 : vector<2x8xf32>
    %800 = math.exp %799 : vector<2x8xf32>
    %cst_127 = arith.constant 1.000000e+00 : f32
    %801 = vector.broadcast %cst_127 : f32 to vector<2x8xf32>
    %802 = arith.addf %801, %800 : vector<2x8xf32>
    %803 = arith.divf %801, %802 : vector<2x8xf32>
    %804 = arith.mulf %795, %748 : vector<2x8xf32>
    %805 = arith.mulf %789, %797 : vector<2x8xf32>
    %806 = arith.addf %804, %805 : vector<2x8xf32>
    %807 = math.tanh %806 : vector<2x8xf32>
    %808 = arith.mulf %803, %807 : vector<2x8xf32>
    %cst_128 = arith.constant dense<0.000000e+00> : vector<2x32xf32>
    %809 = tpu.matmul %777, %541, %cst_128 {dimension_numbers = #tpu.dot_dimension_numbers<[1], [0], [0], [1], [0, 0, 1, 1], [], []>} : vector<2x8xf32>, vector<8x32xf32>, vector<2x32xf32> -> vector<2x32xf32>
    %810 = arith.addf %781, %809 : vector<2x32xf32>
    %811 = vector.extract_strided_slice %810 {offsets = [0, 0], sizes = [2, 8], strides = [1, 1]} : vector<2x32xf32> to vector<2x8xf32>
    %812 = arith.negf %811 : vector<2x8xf32>
    %813 = math.exp %812 : vector<2x8xf32>
    %cst_129 = arith.constant 1.000000e+00 : f32
    %814 = vector.broadcast %cst_129 : f32 to vector<2x8xf32>
    %815 = arith.addf %814, %813 : vector<2x8xf32>
    %816 = arith.divf %814, %815 : vector<2x8xf32>
    %817 = vector.extract_strided_slice %810 {offsets = [0, 8], sizes = [2, 8], strides = [1, 1]} : vector<2x32xf32> to vector<2x8xf32>
    %818 = arith.negf %817 : vector<2x8xf32>
    %819 = math.exp %818 : vector<2x8xf32>
    %cst_130 = arith.constant 1.000000e+00 : f32
    %820 = vector.broadcast %cst_130 : f32 to vector<2x8xf32>
    %821 = arith.addf %820, %819 : vector<2x8xf32>
    %822 = arith.divf %820, %821 : vector<2x8xf32>
    %823 = vector.extract_strided_slice %810 {offsets = [0, 16], sizes = [2, 8], strides = [1, 1]} : vector<2x32xf32> to vector<2x8xf32>
    %824 = math.tanh %823 : vector<2x8xf32>
    %825 = vector.extract_strided_slice %810 {offsets = [0, 24], sizes = [2, 8], strides = [1, 1]} : vector<2x32xf32> to vector<2x8xf32>
    %826 = arith.negf %825 : vector<2x8xf32>
    %827 = math.exp %826 : vector<2x8xf32>
    %cst_131 = arith.constant 1.000000e+00 : f32
    %828 = vector.broadcast %cst_131 : f32 to vector<2x8xf32>
    %829 = arith.addf %828, %827 : vector<2x8xf32>
    %830 = arith.divf %828, %829 : vector<2x8xf32>
    %831 = arith.mulf %822, %775 : vector<2x8xf32>
    %832 = arith.mulf %816, %824 : vector<2x8xf32>
    %833 = arith.addf %831, %832 : vector<2x8xf32>
    %834 = math.tanh %833 : vector<2x8xf32>
    %835 = arith.mulf %830, %834 : vector<2x8xf32>
    %836 = vector.extract_strided_slice %529 {offsets = [5, 0, 0], sizes = [1, 2, 32], strides = [1, 1, 1]} : vector<8x2x32xf32> to vector<1x2x32xf32>
    %837 = vector.shape_cast %836 : vector<1x2x32xf32> to vector<2x32xf32>
    %838 = vector.extract_strided_slice %537 {offsets = [2, 0, 0], sizes = [1, 2, 32], strides = [1, 1, 1]} : vector<8x2x32xf32> to vector<1x2x32xf32>
    %839 = vector.shape_cast %838 : vector<1x2x32xf32> to vector<2x32xf32>
    %cst_132 = arith.constant dense<0.000000e+00> : vector<2x32xf32>
    %840 = tpu.matmul %808, %539, %cst_132 {dimension_numbers = #tpu.dot_dimension_numbers<[1], [0], [0], [1], [0, 0, 1, 1], [], []>} : vector<2x8xf32>, vector<8x32xf32>, vector<2x32xf32> -> vector<2x32xf32>
    %841 = arith.addf %837, %840 : vector<2x32xf32>
    %842 = vector.extract_strided_slice %841 {offsets = [0, 0], sizes = [2, 8], strides = [1, 1]} : vector<2x32xf32> to vector<2x8xf32>
    %843 = arith.negf %842 : vector<2x8xf32>
    %844 = math.exp %843 : vector<2x8xf32>
    %cst_133 = arith.constant 1.000000e+00 : f32
    %845 = vector.broadcast %cst_133 : f32 to vector<2x8xf32>
    %846 = arith.addf %845, %844 : vector<2x8xf32>
    %847 = arith.divf %845, %846 : vector<2x8xf32>
    %848 = vector.extract_strided_slice %841 {offsets = [0, 8], sizes = [2, 8], strides = [1, 1]} : vector<2x32xf32> to vector<2x8xf32>
    %849 = arith.negf %848 : vector<2x8xf32>
    %850 = math.exp %849 : vector<2x8xf32>
    %cst_134 = arith.constant 1.000000e+00 : f32
    %851 = vector.broadcast %cst_134 : f32 to vector<2x8xf32>
    %852 = arith.addf %851, %850 : vector<2x8xf32>
    %853 = arith.divf %851, %852 : vector<2x8xf32>
    %854 = vector.extract_strided_slice %841 {offsets = [0, 16], sizes = [2, 8], strides = [1, 1]} : vector<2x32xf32> to vector<2x8xf32>
    %855 = math.tanh %854 : vector<2x8xf32>
    %856 = vector.extract_strided_slice %841 {offsets = [0, 24], sizes = [2, 8], strides = [1, 1]} : vector<2x32xf32> to vector<2x8xf32>
    %857 = arith.negf %856 : vector<2x8xf32>
    %858 = math.exp %857 : vector<2x8xf32>
    %cst_135 = arith.constant 1.000000e+00 : f32
    %859 = vector.broadcast %cst_135 : f32 to vector<2x8xf32>
    %860 = arith.addf %859, %858 : vector<2x8xf32>
    %861 = arith.divf %859, %860 : vector<2x8xf32>
    %862 = arith.mulf %853, %806 : vector<2x8xf32>
    %863 = arith.mulf %847, %855 : vector<2x8xf32>
    %864 = arith.addf %862, %863 : vector<2x8xf32>
    %865 = math.tanh %864 : vector<2x8xf32>
    %866 = arith.mulf %861, %865 : vector<2x8xf32>
    %cst_136 = arith.constant dense<0.000000e+00> : vector<2x32xf32>
    %867 = tpu.matmul %835, %541, %cst_136 {dimension_numbers = #tpu.dot_dimension_numbers<[1], [0], [0], [1], [0, 0, 1, 1], [], []>} : vector<2x8xf32>, vector<8x32xf32>, vector<2x32xf32> -> vector<2x32xf32>
    %868 = arith.addf %839, %867 : vector<2x32xf32>
    %869 = vector.extract_strided_slice %868 {offsets = [0, 0], sizes = [2, 8], strides = [1, 1]} : vector<2x32xf32> to vector<2x8xf32>
    %870 = arith.negf %869 : vector<2x8xf32>
    %871 = math.exp %870 : vector<2x8xf32>
    %cst_137 = arith.constant 1.000000e+00 : f32
    %872 = vector.broadcast %cst_137 : f32 to vector<2x8xf32>
    %873 = arith.addf %872, %871 : vector<2x8xf32>
    %874 = arith.divf %872, %873 : vector<2x8xf32>
    %875 = vector.extract_strided_slice %868 {offsets = [0, 8], sizes = [2, 8], strides = [1, 1]} : vector<2x32xf32> to vector<2x8xf32>
    %876 = arith.negf %875 : vector<2x8xf32>
    %877 = math.exp %876 : vector<2x8xf32>
    %cst_138 = arith.constant 1.000000e+00 : f32
    %878 = vector.broadcast %cst_138 : f32 to vector<2x8xf32>
    %879 = arith.addf %878, %877 : vector<2x8xf32>
    %880 = arith.divf %878, %879 : vector<2x8xf32>
    %881 = vector.extract_strided_slice %868 {offsets = [0, 16], sizes = [2, 8], strides = [1, 1]} : vector<2x32xf32> to vector<2x8xf32>
    %882 = math.tanh %881 : vector<2x8xf32>
    %883 = vector.extract_strided_slice %868 {offsets = [0, 24], sizes = [2, 8], strides = [1, 1]} : vector<2x32xf32> to vector<2x8xf32>
    %884 = arith.negf %883 : vector<2x8xf32>
    %885 = math.exp %884 : vector<2x8xf32>
    %cst_139 = arith.constant 1.000000e+00 : f32
    %886 = vector.broadcast %cst_139 : f32 to vector<2x8xf32>
    %887 = arith.addf %886, %885 : vector<2x8xf32>
    %888 = arith.divf %886, %887 : vector<2x8xf32>
    %889 = arith.mulf %880, %833 : vector<2x8xf32>
    %890 = arith.mulf %874, %882 : vector<2x8xf32>
    %891 = arith.addf %889, %890 : vector<2x8xf32>
    %892 = math.tanh %891 : vector<2x8xf32>
    %893 = arith.mulf %888, %892 : vector<2x8xf32>
    %894 = vector.extract_strided_slice %529 {offsets = [6, 0, 0], sizes = [1, 2, 32], strides = [1, 1, 1]} : vector<8x2x32xf32> to vector<1x2x32xf32>
    %895 = vector.shape_cast %894 : vector<1x2x32xf32> to vector<2x32xf32>
    %896 = vector.extract_strided_slice %537 {offsets = [1, 0, 0], sizes = [1, 2, 32], strides = [1, 1, 1]} : vector<8x2x32xf32> to vector<1x2x32xf32>
    %897 = vector.shape_cast %896 : vector<1x2x32xf32> to vector<2x32xf32>
    %cst_140 = arith.constant dense<0.000000e+00> : vector<2x32xf32>
    %898 = tpu.matmul %866, %539, %cst_140 {dimension_numbers = #tpu.dot_dimension_numbers<[1], [0], [0], [1], [0, 0, 1, 1], [], []>} : vector<2x8xf32>, vector<8x32xf32>, vector<2x32xf32> -> vector<2x32xf32>
    %899 = arith.addf %895, %898 : vector<2x32xf32>
    %900 = vector.extract_strided_slice %899 {offsets = [0, 0], sizes = [2, 8], strides = [1, 1]} : vector<2x32xf32> to vector<2x8xf32>
    %901 = arith.negf %900 : vector<2x8xf32>
    %902 = math.exp %901 : vector<2x8xf32>
    %cst_141 = arith.constant 1.000000e+00 : f32
    %903 = vector.broadcast %cst_141 : f32 to vector<2x8xf32>
    %904 = arith.addf %903, %902 : vector<2x8xf32>
    %905 = arith.divf %903, %904 : vector<2x8xf32>
    %906 = vector.extract_strided_slice %899 {offsets = [0, 8], sizes = [2, 8], strides = [1, 1]} : vector<2x32xf32> to vector<2x8xf32>
    %907 = arith.negf %906 : vector<2x8xf32>
    %908 = math.exp %907 : vector<2x8xf32>
    %cst_142 = arith.constant 1.000000e+00 : f32
    %909 = vector.broadcast %cst_142 : f32 to vector<2x8xf32>
    %910 = arith.addf %909, %908 : vector<2x8xf32>
    %911 = arith.divf %909, %910 : vector<2x8xf32>
    %912 = vector.extract_strided_slice %899 {offsets = [0, 16], sizes = [2, 8], strides = [1, 1]} : vector<2x32xf32> to vector<2x8xf32>
    %913 = math.tanh %912 : vector<2x8xf32>
    %914 = vector.extract_strided_slice %899 {offsets = [0, 24], sizes = [2, 8], strides = [1, 1]} : vector<2x32xf32> to vector<2x8xf32>
    %915 = arith.negf %914 : vector<2x8xf32>
    %916 = math.exp %915 : vector<2x8xf32>
    %cst_143 = arith.constant 1.000000e+00 : f32
    %917 = vector.broadcast %cst_143 : f32 to vector<2x8xf32>
    %918 = arith.addf %917, %916 : vector<2x8xf32>
    %919 = arith.divf %917, %918 : vector<2x8xf32>
    %920 = arith.mulf %911, %864 : vector<2x8xf32>
    %921 = arith.mulf %905, %913 : vector<2x8xf32>
    %922 = arith.addf %920, %921 : vector<2x8xf32>
    %923 = math.tanh %922 : vector<2x8xf32>
    %924 = arith.mulf %919, %923 : vector<2x8xf32>
    %cst_144 = arith.constant dense<0.000000e+00> : vector<2x32xf32>
    %925 = tpu.matmul %893, %541, %cst_144 {dimension_numbers = #tpu.dot_dimension_numbers<[1], [0], [0], [1], [0, 0, 1, 1], [], []>} : vector<2x8xf32>, vector<8x32xf32>, vector<2x32xf32> -> vector<2x32xf32>
    %926 = arith.addf %897, %925 : vector<2x32xf32>
    %927 = vector.extract_strided_slice %926 {offsets = [0, 0], sizes = [2, 8], strides = [1, 1]} : vector<2x32xf32> to vector<2x8xf32>
    %928 = arith.negf %927 : vector<2x8xf32>
    %929 = math.exp %928 : vector<2x8xf32>
    %cst_145 = arith.constant 1.000000e+00 : f32
    %930 = vector.broadcast %cst_145 : f32 to vector<2x8xf32>
    %931 = arith.addf %930, %929 : vector<2x8xf32>
    %932 = arith.divf %930, %931 : vector<2x8xf32>
    %933 = vector.extract_strided_slice %926 {offsets = [0, 8], sizes = [2, 8], strides = [1, 1]} : vector<2x32xf32> to vector<2x8xf32>
    %934 = arith.negf %933 : vector<2x8xf32>
    %935 = math.exp %934 : vector<2x8xf32>
    %cst_146 = arith.constant 1.000000e+00 : f32
    %936 = vector.broadcast %cst_146 : f32 to vector<2x8xf32>
    %937 = arith.addf %936, %935 : vector<2x8xf32>
    %938 = arith.divf %936, %937 : vector<2x8xf32>
    %939 = vector.extract_strided_slice %926 {offsets = [0, 16], sizes = [2, 8], strides = [1, 1]} : vector<2x32xf32> to vector<2x8xf32>
    %940 = math.tanh %939 : vector<2x8xf32>
    %941 = vector.extract_strided_slice %926 {offsets = [0, 24], sizes = [2, 8], strides = [1, 1]} : vector<2x32xf32> to vector<2x8xf32>
    %942 = arith.negf %941 : vector<2x8xf32>
    %943 = math.exp %942 : vector<2x8xf32>
    %cst_147 = arith.constant 1.000000e+00 : f32
    %944 = vector.broadcast %cst_147 : f32 to vector<2x8xf32>
    %945 = arith.addf %944, %943 : vector<2x8xf32>
    %946 = arith.divf %944, %945 : vector<2x8xf32>
    %947 = arith.mulf %938, %891 : vector<2x8xf32>
    %948 = arith.mulf %932, %940 : vector<2x8xf32>
    %949 = arith.addf %947, %948 : vector<2x8xf32>
    %950 = math.tanh %949 : vector<2x8xf32>
    %951 = arith.mulf %946, %950 : vector<2x8xf32>
    %952 = vector.extract_strided_slice %529 {offsets = [7, 0, 0], sizes = [1, 2, 32], strides = [1, 1, 1]} : vector<8x2x32xf32> to vector<1x2x32xf32>
    %953 = vector.shape_cast %952 : vector<1x2x32xf32> to vector<2x32xf32>
    %954 = vector.extract_strided_slice %537 {offsets = [0, 0, 0], sizes = [1, 2, 32], strides = [1, 1, 1]} : vector<8x2x32xf32> to vector<1x2x32xf32>
    %955 = vector.shape_cast %954 : vector<1x2x32xf32> to vector<2x32xf32>
    %cst_148 = arith.constant dense<0.000000e+00> : vector<2x32xf32>
    %956 = tpu.matmul %924, %539, %cst_148 {dimension_numbers = #tpu.dot_dimension_numbers<[1], [0], [0], [1], [0, 0, 1, 1], [], []>} : vector<2x8xf32>, vector<8x32xf32>, vector<2x32xf32> -> vector<2x32xf32>
    %957 = arith.addf %953, %956 : vector<2x32xf32>
    %958 = vector.extract_strided_slice %957 {offsets = [0, 0], sizes = [2, 8], strides = [1, 1]} : vector<2x32xf32> to vector<2x8xf32>
    %959 = arith.negf %958 : vector<2x8xf32>
    %960 = math.exp %959 : vector<2x8xf32>
    %cst_149 = arith.constant 1.000000e+00 : f32
    %961 = vector.broadcast %cst_149 : f32 to vector<2x8xf32>
    %962 = arith.addf %961, %960 : vector<2x8xf32>
    %963 = arith.divf %961, %962 : vector<2x8xf32>
    %964 = vector.extract_strided_slice %957 {offsets = [0, 8], sizes = [2, 8], strides = [1, 1]} : vector<2x32xf32> to vector<2x8xf32>
    %965 = arith.negf %964 : vector<2x8xf32>
    %966 = math.exp %965 : vector<2x8xf32>
    %cst_150 = arith.constant 1.000000e+00 : f32
    %967 = vector.broadcast %cst_150 : f32 to vector<2x8xf32>
    %968 = arith.addf %967, %966 : vector<2x8xf32>
    %969 = arith.divf %967, %968 : vector<2x8xf32>
    %970 = vector.extract_strided_slice %957 {offsets = [0, 16], sizes = [2, 8], strides = [1, 1]} : vector<2x32xf32> to vector<2x8xf32>
    %971 = math.tanh %970 : vector<2x8xf32>
    %972 = vector.extract_strided_slice %957 {offsets = [0, 24], sizes = [2, 8], strides = [1, 1]} : vector<2x32xf32> to vector<2x8xf32>
    %973 = arith.negf %972 : vector<2x8xf32>
    %974 = math.exp %973 : vector<2x8xf32>
    %cst_151 = arith.constant 1.000000e+00 : f32
    %975 = vector.broadcast %cst_151 : f32 to vector<2x8xf32>
    %976 = arith.addf %975, %974 : vector<2x8xf32>
    %977 = arith.divf %975, %976 : vector<2x8xf32>
    %978 = arith.mulf %969, %922 : vector<2x8xf32>
    %979 = arith.mulf %963, %971 : vector<2x8xf32>
    %980 = arith.addf %978, %979 : vector<2x8xf32>
    %981 = math.tanh %980 : vector<2x8xf32>
    %982 = arith.mulf %977, %981 : vector<2x8xf32>
    %cst_152 = arith.constant dense<0.000000e+00> : vector<2x32xf32>
    %983 = tpu.matmul %951, %541, %cst_152 {dimension_numbers = #tpu.dot_dimension_numbers<[1], [0], [0], [1], [0, 0, 1, 1], [], []>} : vector<2x8xf32>, vector<8x32xf32>, vector<2x32xf32> -> vector<2x32xf32>
    %984 = arith.addf %955, %983 : vector<2x32xf32>
    %985 = vector.extract_strided_slice %984 {offsets = [0, 0], sizes = [2, 8], strides = [1, 1]} : vector<2x32xf32> to vector<2x8xf32>
    %986 = arith.negf %985 : vector<2x8xf32>
    %987 = math.exp %986 : vector<2x8xf32>
    %cst_153 = arith.constant 1.000000e+00 : f32
    %988 = vector.broadcast %cst_153 : f32 to vector<2x8xf32>
    %989 = arith.addf %988, %987 : vector<2x8xf32>
    %990 = arith.divf %988, %989 : vector<2x8xf32>
    %991 = vector.extract_strided_slice %984 {offsets = [0, 8], sizes = [2, 8], strides = [1, 1]} : vector<2x32xf32> to vector<2x8xf32>
    %992 = arith.negf %991 : vector<2x8xf32>
    %993 = math.exp %992 : vector<2x8xf32>
    %cst_154 = arith.constant 1.000000e+00 : f32
    %994 = vector.broadcast %cst_154 : f32 to vector<2x8xf32>
    %995 = arith.addf %994, %993 : vector<2x8xf32>
    %996 = arith.divf %994, %995 : vector<2x8xf32>
    %997 = vector.extract_strided_slice %984 {offsets = [0, 16], sizes = [2, 8], strides = [1, 1]} : vector<2x32xf32> to vector<2x8xf32>
    %998 = math.tanh %997 : vector<2x8xf32>
    %999 = vector.extract_strided_slice %984 {offsets = [0, 24], sizes = [2, 8], strides = [1, 1]} : vector<2x32xf32> to vector<2x8xf32>
    %1000 = arith.negf %999 : vector<2x8xf32>
    %1001 = math.exp %1000 : vector<2x8xf32>
    %cst_155 = arith.constant 1.000000e+00 : f32
    %1002 = vector.broadcast %cst_155 : f32 to vector<2x8xf32>
    %1003 = arith.addf %1002, %1001 : vector<2x8xf32>
    %1004 = arith.divf %1002, %1003 : vector<2x8xf32>
    %1005 = arith.mulf %996, %949 : vector<2x8xf32>
    %1006 = arith.mulf %990, %998 : vector<2x8xf32>
    %1007 = arith.addf %1005, %1006 : vector<2x8xf32>
    %1008 = math.tanh %1007 : vector<2x8xf32>
    %1009 = arith.mulf %1004, %1008 : vector<2x8xf32>
    %1010 = tpu.concatenate %982, %1009 in 1 : vector<2x8xf32>, vector<2x8xf32> -> vector<2x16xf32>
    %c0_156 = arith.constant 0 : index
    %c0_157 = arith.constant 0 : index
    %1011 = vector.load %arg8[%c0_156, %c0_157] : memref<16x32xf32, #tpu.memory_space<vmem>>, vector<16x32xf32>
    %cst_158 = arith.constant dense<0.000000e+00> : vector<2x32xf32>
    %1012 = tpu.matmul %1010, %1011, %cst_158 {dimension_numbers = #tpu.dot_dimension_numbers<[1], [0], [0], [1], [0, 0, 1, 1], [], []>} : vector<2x16xf32>, vector<16x32xf32>, vector<2x32xf32> -> vector<2x32xf32>
    %c0_159 = arith.constant 0 : index
    %c0_160 = arith.constant 0 : index
    %1013 = vector.load %arg9[%c0_159, %c0_160] : memref<1x32xf32, #tpu.memory_space<vmem>>, vector<1x32xf32>
    %1014 = vector.broadcast %1013 : vector<1x32xf32> to vector<2x32xf32>
    %1015 = arith.addf %1012, %1014 : vector<2x32xf32>
    %1016 = vector.extract_strided_slice %1015 {offsets = [0, 0], sizes = [2, 16], strides = [1, 1]} : vector<2x32xf32> to vector<2x16xf32>
    %1017 = vector.extract_strided_slice %1015 {offsets = [0, 16], sizes = [2, 16], strides = [1, 1]} : vector<2x32xf32> to vector<2x16xf32>
    %c0_161 = arith.constant 0 : index
    %c0_162 = arith.constant 0 : index
    %1018 = vector.load %arg1[%c0_161, %c0_162] : memref<2x16xf32, #tpu.memory_space<vmem>>, vector<2x16xf32>
    %cst_163 = arith.constant 5.000000e-01 : f32
    %1019 = vector.broadcast %cst_163 : f32 to vector<2x16xf32>
    %1020 = arith.mulf %1017, %1019 : vector<2x16xf32>
    %1021 = math.exp %1020 : vector<2x16xf32>
    %1022 = arith.mulf %1018, %1021 : vector<2x16xf32>
    %1023 = arith.addf %1016, %1022 : vector<2x16xf32>
    %c0_164 = arith.constant 0 : index
    %c0_165 = arith.constant 0 : index
    %1024 = vector.load %arg17[%c0_164, %c0_165] : memref<2x16xf32, #tpu.memory_space<vmem>>, vector<2x16xf32>
    tpu.vector_store %arg17[%c0_164, %c0_165], %1016 {strides = array<i32>} : memref<2x16xf32, #tpu.memory_space<vmem>>, vector<2x16xf32>,
    %c0_166 = arith.constant 0 : index
    %c0_167 = arith.constant 0 : index
    %1025 = vector.load %arg18[%c0_166, %c0_167] : memref<2x16xf32, #tpu.memory_space<vmem>>, vector<2x16xf32>
    tpu.vector_store %arg18[%c0_166, %c0_167], %1017 {strides = array<i32>} : memref<2x16xf32, #tpu.memory_space<vmem>>, vector<2x16xf32>,
    %c0_168 = arith.constant 0 : index
    %c0_169 = arith.constant 0 : index
    %c0_170 = arith.constant 0 : index
    %1026 = vector.load %arg10[%c0_168, %c0_169, %c0_170] : memref<2x16x200xf32, #tpu.memory_space<vmem>>, vector<2x16x200xf32>
    %c0_171 = arith.constant 0 : index
    %c0_172 = arith.constant 0 : index
    %c0_173 = arith.constant 0 : index
    %1027 = vector.load %arg11[%c0_171, %c0_172, %c0_173] : memref<2x50x200xf32, #tpu.memory_space<vmem>>, vector<2x50x200xf32>
    %c0_174 = arith.constant 0 : index
    %c0_175 = arith.constant 0 : index
    %c0_176 = arith.constant 0 : index
    %1028 = vector.load %arg12[%c0_174, %c0_175, %c0_176] : memref<2x1x200xf32, #tpu.memory_space<vmem>>, vector<2x1x200xf32>
    %1029 = vector.extract_strided_slice %1026 {offsets = [0, 0, 0], sizes = [1, 16, 200], strides = [1, 1, 1]} : vector<2x16x200xf32> to vector<1x16x200xf32>
    %1030 = vector.shape_cast %1029 : vector<1x16x200xf32> to vector<16x200xf32>
    %1031 = vector.extract_strided_slice %1028 {offsets = [0, 0, 0], sizes = [1, 1, 200], strides = [1, 1, 1]} : vector<2x1x200xf32> to vector<1x1x200xf32>
    %1032 = vector.shape_cast %1031 : vector<1x1x200xf32> to vector<1x200xf32>
    %cst_177 = arith.constant dense<0.000000e+00> : vector<2x200xf32>
    %1033 = tpu.matmul %1023, %1030, %cst_177 {dimension_numbers = #tpu.dot_dimension_numbers<[1], [0], [0], [1], [0, 0, 1, 1], [], []>} : vector<2x16xf32>, vector<16x200xf32>, vector<2x200xf32> -> vector<2x200xf32>
    %1034 = vector.broadcast %1032 : vector<1x200xf32> to vector<2x200xf32>
    %1035 = arith.addf %1033, %1034 : vector<2x200xf32>
    %1036 = vector.extract_strided_slice %1026 {offsets = [1, 0, 0], sizes = [1, 16, 200], strides = [1, 1, 1]} : vector<2x16x200xf32> to vector<1x16x200xf32>
    %1037 = vector.shape_cast %1036 : vector<1x16x200xf32> to vector<16x200xf32>
    %1038 = vector.extract_strided_slice %1028 {offsets = [1, 0, 0], sizes = [1, 1, 200], strides = [1, 1, 1]} : vector<2x1x200xf32> to vector<1x1x200xf32>
    %1039 = vector.shape_cast %1038 : vector<1x1x200xf32> to vector<1x200xf32>
    %cst_178 = arith.constant dense<0.000000e+00> : vector<2x200xf32>
    %1040 = tpu.matmul %1023, %1037, %cst_178 {dimension_numbers = #tpu.dot_dimension_numbers<[1], [0], [0], [1], [0, 0, 1, 1], [], []>} : vector<2x16xf32>, vector<16x200xf32>, vector<2x200xf32> -> vector<2x200xf32>
    %1041 = vector.broadcast %1039 : vector<1x200xf32> to vector<2x200xf32>
    %1042 = arith.addf %1040, %1041 : vector<2x200xf32>
    %1043 = vector.extract_strided_slice %1027 {offsets = [0, 0, 0], sizes = [1, 50, 200], strides = [1, 1, 1]} : vector<2x50x200xf32> to vector<1x50x200xf32>
    %1044 = vector.shape_cast %1043 : vector<1x50x200xf32> to vector<50x200xf32>
    %1045 = vector.extract_strided_slice %1027 {offsets = [1, 0, 0], sizes = [1, 50, 200], strides = [1, 1, 1]} : vector<2x50x200xf32> to vector<1x50x200xf32>
    %1046 = vector.shape_cast %1045 : vector<1x50x200xf32> to vector<50x200xf32>
    %cst_179 = arith.constant 0.000000e+00 : f32
    %1047 = vector.broadcast %cst_179 : f32 to vector<2x50xf32>
    %cst_180 = arith.constant 0.000000e+00 : f32
    %1048 = vector.broadcast %cst_180 : f32 to vector<2x50xf32>
    %cst_181 = arith.constant 0.000000e+00 : f32
    %1049 = vector.broadcast %cst_181 : f32 to vector<2x50xf32>
    %cst_182 = arith.constant 0.000000e+00 : f32
    %1050 = vector.broadcast %cst_182 : f32 to vector<2x50xf32>
    %cst_183 = arith.constant dense<0.000000e+00> : vector<2x200xf32>
    %1051 = tpu.matmul %1047, %1044, %cst_183 {dimension_numbers = #tpu.dot_dimension_numbers<[1], [0], [0], [1], [0, 0, 1, 1], [], []>} : vector<2x50xf32>, vector<50x200xf32>, vector<2x200xf32> -> vector<2x200xf32>
    %1052 = arith.addf %1035, %1051 : vector<2x200xf32>
    %1053 = vector.extract_strided_slice %1052 {offsets = [0, 0], sizes = [2, 50], strides = [1, 1]} : vector<2x200xf32> to vector<2x50xf32>
    %1054 = arith.negf %1053 : vector<2x50xf32>
    %1055 = math.exp %1054 : vector<2x50xf32>
    %cst_184 = arith.constant 1.000000e+00 : f32
    %1056 = vector.broadcast %cst_184 : f32 to vector<2x50xf32>
    %1057 = arith.addf %1056, %1055 : vector<2x50xf32>
    %1058 = arith.divf %1056, %1057 : vector<2x50xf32>
    %1059 = vector.extract_strided_slice %1052 {offsets = [0, 50], sizes = [2, 50], strides = [1, 1]} : vector<2x200xf32> to vector<2x50xf32>
    %1060 = arith.negf %1059 : vector<2x50xf32>
    %1061 = math.exp %1060 : vector<2x50xf32>
    %cst_185 = arith.constant 1.000000e+00 : f32
    %1062 = vector.broadcast %cst_185 : f32 to vector<2x50xf32>
    %1063 = arith.addf %1062, %1061 : vector<2x50xf32>
    %1064 = arith.divf %1062, %1063 : vector<2x50xf32>
    %1065 = vector.extract_strided_slice %1052 {offsets = [0, 100], sizes = [2, 50], strides = [1, 1]} : vector<2x200xf32> to vector<2x50xf32>
    %1066 = math.tanh %1065 : vector<2x50xf32>
    %1067 = vector.extract_strided_slice %1052 {offsets = [0, 150], sizes = [2, 50], strides = [1, 1]} : vector<2x200xf32> to vector<2x50xf32>
    %1068 = arith.negf %1067 : vector<2x50xf32>
    %1069 = math.exp %1068 : vector<2x50xf32>
    %cst_186 = arith.constant 1.000000e+00 : f32
    %1070 = vector.broadcast %cst_186 : f32 to vector<2x50xf32>
    %1071 = arith.addf %1070, %1069 : vector<2x50xf32>
    %1072 = arith.divf %1070, %1071 : vector<2x50xf32>
    %1073 = arith.mulf %1064, %1048 : vector<2x50xf32>
    %1074 = arith.mulf %1058, %1066 : vector<2x50xf32>
    %1075 = arith.addf %1073, %1074 : vector<2x50xf32>
    %1076 = math.tanh %1075 : vector<2x50xf32>
    %1077 = arith.mulf %1072, %1076 : vector<2x50xf32>
    %cst_187 = arith.constant dense<0.000000e+00> : vector<2x200xf32>
    %1078 = tpu.matmul %1049, %1046, %cst_187 {dimension_numbers = #tpu.dot_dimension_numbers<[1], [0], [0], [1], [0, 0, 1, 1], [], []>} : vector<2x50xf32>, vector<50x200xf32>, vector<2x200xf32> -> vector<2x200xf32>
    %1079 = arith.addf %1042, %1078 : vector<2x200xf32>
    %1080 = vector.extract_strided_slice %1079 {offsets = [0, 0], sizes = [2, 50], strides = [1, 1]} : vector<2x200xf32> to vector<2x50xf32>
    %1081 = arith.negf %1080 : vector<2x50xf32>
    %1082 = math.exp %1081 : vector<2x50xf32>
    %cst_188 = arith.constant 1.000000e+00 : f32
    %1083 = vector.broadcast %cst_188 : f32 to vector<2x50xf32>
    %1084 = arith.addf %1083, %1082 : vector<2x50xf32>
    %1085 = arith.divf %1083, %1084 : vector<2x50xf32>
    %1086 = vector.extract_strided_slice %1079 {offsets = [0, 50], sizes = [2, 50], strides = [1, 1]} : vector<2x200xf32> to vector<2x50xf32>
    %1087 = arith.negf %1086 : vector<2x50xf32>
    %1088 = math.exp %1087 : vector<2x50xf32>
    %cst_189 = arith.constant 1.000000e+00 : f32
    %1089 = vector.broadcast %cst_189 : f32 to vector<2x50xf32>
    %1090 = arith.addf %1089, %1088 : vector<2x50xf32>
    %1091 = arith.divf %1089, %1090 : vector<2x50xf32>
    %1092 = vector.extract_strided_slice %1079 {offsets = [0, 100], sizes = [2, 50], strides = [1, 1]} : vector<2x200xf32> to vector<2x50xf32>
    %1093 = math.tanh %1092 : vector<2x50xf32>
    %1094 = vector.extract_strided_slice %1079 {offsets = [0, 150], sizes = [2, 50], strides = [1, 1]} : vector<2x200xf32> to vector<2x50xf32>
    %1095 = arith.negf %1094 : vector<2x50xf32>
    %1096 = math.exp %1095 : vector<2x50xf32>
    %cst_190 = arith.constant 1.000000e+00 : f32
    %1097 = vector.broadcast %cst_190 : f32 to vector<2x50xf32>
    %1098 = arith.addf %1097, %1096 : vector<2x50xf32>
    %1099 = arith.divf %1097, %1098 : vector<2x50xf32>
    %1100 = arith.mulf %1091, %1050 : vector<2x50xf32>
    %1101 = arith.mulf %1085, %1093 : vector<2x50xf32>
    %1102 = arith.addf %1100, %1101 : vector<2x50xf32>
    %1103 = math.tanh %1102 : vector<2x50xf32>
    %1104 = arith.mulf %1099, %1103 : vector<2x50xf32>
    %cst_191 = arith.constant dense<0.000000e+00> : vector<2x200xf32>
    %1105 = tpu.matmul %1077, %1044, %cst_191 {dimension_numbers = #tpu.dot_dimension_numbers<[1], [0], [0], [1], [0, 0, 1, 1], [], []>} : vector<2x50xf32>, vector<50x200xf32>, vector<2x200xf32> -> vector<2x200xf32>
    %1106 = arith.addf %1035, %1105 : vector<2x200xf32>
    %1107 = vector.extract_strided_slice %1106 {offsets = [0, 0], sizes = [2, 50], strides = [1, 1]} : vector<2x200xf32> to vector<2x50xf32>
    %1108 = arith.negf %1107 : vector<2x50xf32>
    %1109 = math.exp %1108 : vector<2x50xf32>
    %cst_192 = arith.constant 1.000000e+00 : f32
    %1110 = vector.broadcast %cst_192 : f32 to vector<2x50xf32>
    %1111 = arith.addf %1110, %1109 : vector<2x50xf32>
    %1112 = arith.divf %1110, %1111 : vector<2x50xf32>
    %1113 = vector.extract_strided_slice %1106 {offsets = [0, 50], sizes = [2, 50], strides = [1, 1]} : vector<2x200xf32> to vector<2x50xf32>
    %1114 = arith.negf %1113 : vector<2x50xf32>
    %1115 = math.exp %1114 : vector<2x50xf32>
    %cst_193 = arith.constant 1.000000e+00 : f32
    %1116 = vector.broadcast %cst_193 : f32 to vector<2x50xf32>
    %1117 = arith.addf %1116, %1115 : vector<2x50xf32>
    %1118 = arith.divf %1116, %1117 : vector<2x50xf32>
    %1119 = vector.extract_strided_slice %1106 {offsets = [0, 100], sizes = [2, 50], strides = [1, 1]} : vector<2x200xf32> to vector<2x50xf32>
    %1120 = math.tanh %1119 : vector<2x50xf32>
    %1121 = vector.extract_strided_slice %1106 {offsets = [0, 150], sizes = [2, 50], strides = [1, 1]} : vector<2x200xf32> to vector<2x50xf32>
    %1122 = arith.negf %1121 : vector<2x50xf32>
    %1123 = math.exp %1122 : vector<2x50xf32>
    %cst_194 = arith.constant 1.000000e+00 : f32
    %1124 = vector.broadcast %cst_194 : f32 to vector<2x50xf32>
    %1125 = arith.addf %1124, %1123 : vector<2x50xf32>
    %1126 = arith.divf %1124, %1125 : vector<2x50xf32>
    %1127 = arith.mulf %1118, %1075 : vector<2x50xf32>
    %1128 = arith.mulf %1112, %1120 : vector<2x50xf32>
    %1129 = arith.addf %1127, %1128 : vector<2x50xf32>
    %1130 = math.tanh %1129 : vector<2x50xf32>
    %1131 = arith.mulf %1126, %1130 : vector<2x50xf32>
    %cst_195 = arith.constant dense<0.000000e+00> : vector<2x200xf32>
    %1132 = tpu.matmul %1104, %1046, %cst_195 {dimension_numbers = #tpu.dot_dimension_numbers<[1], [0], [0], [1], [0, 0, 1, 1], [], []>} : vector<2x50xf32>, vector<50x200xf32>, vector<2x200xf32> -> vector<2x200xf32>
    %1133 = arith.addf %1042, %1132 : vector<2x200xf32>
    %1134 = vector.extract_strided_slice %1133 {offsets = [0, 0], sizes = [2, 50], strides = [1, 1]} : vector<2x200xf32> to vector<2x50xf32>
    %1135 = arith.negf %1134 : vector<2x50xf32>
    %1136 = math.exp %1135 : vector<2x50xf32>
    %cst_196 = arith.constant 1.000000e+00 : f32
    %1137 = vector.broadcast %cst_196 : f32 to vector<2x50xf32>
    %1138 = arith.addf %1137, %1136 : vector<2x50xf32>
    %1139 = arith.divf %1137, %1138 : vector<2x50xf32>
    %1140 = vector.extract_strided_slice %1133 {offsets = [0, 50], sizes = [2, 50], strides = [1, 1]} : vector<2x200xf32> to vector<2x50xf32>
    %1141 = arith.negf %1140 : vector<2x50xf32>
    %1142 = math.exp %1141 : vector<2x50xf32>
    %cst_197 = arith.constant 1.000000e+00 : f32
    %1143 = vector.broadcast %cst_197 : f32 to vector<2x50xf32>
    %1144 = arith.addf %1143, %1142 : vector<2x50xf32>
    %1145 = arith.divf %1143, %1144 : vector<2x50xf32>
    %1146 = vector.extract_strided_slice %1133 {offsets = [0, 100], sizes = [2, 50], strides = [1, 1]} : vector<2x200xf32> to vector<2x50xf32>
    %1147 = math.tanh %1146 : vector<2x50xf32>
    %1148 = vector.extract_strided_slice %1133 {offsets = [0, 150], sizes = [2, 50], strides = [1, 1]} : vector<2x200xf32> to vector<2x50xf32>
    %1149 = arith.negf %1148 : vector<2x50xf32>
    %1150 = math.exp %1149 : vector<2x50xf32>
    %cst_198 = arith.constant 1.000000e+00 : f32
    %1151 = vector.broadcast %cst_198 : f32 to vector<2x50xf32>
    %1152 = arith.addf %1151, %1150 : vector<2x50xf32>
    %1153 = arith.divf %1151, %1152 : vector<2x50xf32>
    %1154 = arith.mulf %1145, %1102 : vector<2x50xf32>
    %1155 = arith.mulf %1139, %1147 : vector<2x50xf32>
    %1156 = arith.addf %1154, %1155 : vector<2x50xf32>
    %1157 = math.tanh %1156 : vector<2x50xf32>
    %1158 = arith.mulf %1153, %1157 : vector<2x50xf32>
    %cst_199 = arith.constant dense<0.000000e+00> : vector<2x200xf32>
    %1159 = tpu.matmul %1131, %1044, %cst_199 {dimension_numbers = #tpu.dot_dimension_numbers<[1], [0], [0], [1], [0, 0, 1, 1], [], []>} : vector<2x50xf32>, vector<50x200xf32>, vector<2x200xf32> -> vector<2x200xf32>
    %1160 = arith.addf %1035, %1159 : vector<2x200xf32>
    %1161 = vector.extract_strided_slice %1160 {offsets = [0, 0], sizes = [2, 50], strides = [1, 1]} : vector<2x200xf32> to vector<2x50xf32>
    %1162 = arith.negf %1161 : vector<2x50xf32>
    %1163 = math.exp %1162 : vector<2x50xf32>
    %cst_200 = arith.constant 1.000000e+00 : f32
    %1164 = vector.broadcast %cst_200 : f32 to vector<2x50xf32>
    %1165 = arith.addf %1164, %1163 : vector<2x50xf32>
    %1166 = arith.divf %1164, %1165 : vector<2x50xf32>
    %1167 = vector.extract_strided_slice %1160 {offsets = [0, 50], sizes = [2, 50], strides = [1, 1]} : vector<2x200xf32> to vector<2x50xf32>
    %1168 = arith.negf %1167 : vector<2x50xf32>
    %1169 = math.exp %1168 : vector<2x50xf32>
    %cst_201 = arith.constant 1.000000e+00 : f32
    %1170 = vector.broadcast %cst_201 : f32 to vector<2x50xf32>
    %1171 = arith.addf %1170, %1169 : vector<2x50xf32>
    %1172 = arith.divf %1170, %1171 : vector<2x50xf32>
    %1173 = vector.extract_strided_slice %1160 {offsets = [0, 100], sizes = [2, 50], strides = [1, 1]} : vector<2x200xf32> to vector<2x50xf32>
    %1174 = math.tanh %1173 : vector<2x50xf32>
    %1175 = vector.extract_strided_slice %1160 {offsets = [0, 150], sizes = [2, 50], strides = [1, 1]} : vector<2x200xf32> to vector<2x50xf32>
    %1176 = arith.negf %1175 : vector<2x50xf32>
    %1177 = math.exp %1176 : vector<2x50xf32>
    %cst_202 = arith.constant 1.000000e+00 : f32
    %1178 = vector.broadcast %cst_202 : f32 to vector<2x50xf32>
    %1179 = arith.addf %1178, %1177 : vector<2x50xf32>
    %1180 = arith.divf %1178, %1179 : vector<2x50xf32>
    %1181 = arith.mulf %1172, %1129 : vector<2x50xf32>
    %1182 = arith.mulf %1166, %1174 : vector<2x50xf32>
    %1183 = arith.addf %1181, %1182 : vector<2x50xf32>
    %1184 = math.tanh %1183 : vector<2x50xf32>
    %1185 = arith.mulf %1180, %1184 : vector<2x50xf32>
    %cst_203 = arith.constant dense<0.000000e+00> : vector<2x200xf32>
    %1186 = tpu.matmul %1158, %1046, %cst_203 {dimension_numbers = #tpu.dot_dimension_numbers<[1], [0], [0], [1], [0, 0, 1, 1], [], []>} : vector<2x50xf32>, vector<50x200xf32>, vector<2x200xf32> -> vector<2x200xf32>
    %1187 = arith.addf %1042, %1186 : vector<2x200xf32>
    %1188 = vector.extract_strided_slice %1187 {offsets = [0, 0], sizes = [2, 50], strides = [1, 1]} : vector<2x200xf32> to vector<2x50xf32>
    %1189 = arith.negf %1188 : vector<2x50xf32>
    %1190 = math.exp %1189 : vector<2x50xf32>
    %cst_204 = arith.constant 1.000000e+00 : f32
    %1191 = vector.broadcast %cst_204 : f32 to vector<2x50xf32>
    %1192 = arith.addf %1191, %1190 : vector<2x50xf32>
    %1193 = arith.divf %1191, %1192 : vector<2x50xf32>
    %1194 = vector.extract_strided_slice %1187 {offsets = [0, 50], sizes = [2, 50], strides = [1, 1]} : vector<2x200xf32> to vector<2x50xf32>
    %1195 = arith.negf %1194 : vector<2x50xf32>
    %1196 = math.exp %1195 : vector<2x50xf32>
    %cst_205 = arith.constant 1.000000e+00 : f32
    %1197 = vector.broadcast %cst_205 : f32 to vector<2x50xf32>
    %1198 = arith.addf %1197, %1196 : vector<2x50xf32>
    %1199 = arith.divf %1197, %1198 : vector<2x50xf32>
    %1200 = vector.extract_strided_slice %1187 {offsets = [0, 100], sizes = [2, 50], strides = [1, 1]} : vector<2x200xf32> to vector<2x50xf32>
    %1201 = math.tanh %1200 : vector<2x50xf32>
    %1202 = vector.extract_strided_slice %1187 {offsets = [0, 150], sizes = [2, 50], strides = [1, 1]} : vector<2x200xf32> to vector<2x50xf32>
    %1203 = arith.negf %1202 : vector<2x50xf32>
    %1204 = math.exp %1203 : vector<2x50xf32>
    %cst_206 = arith.constant 1.000000e+00 : f32
    %1205 = vector.broadcast %cst_206 : f32 to vector<2x50xf32>
    %1206 = arith.addf %1205, %1204 : vector<2x50xf32>
    %1207 = arith.divf %1205, %1206 : vector<2x50xf32>
    %1208 = arith.mulf %1199, %1156 : vector<2x50xf32>
    %1209 = arith.mulf %1193, %1201 : vector<2x50xf32>
    %1210 = arith.addf %1208, %1209 : vector<2x50xf32>
    %1211 = math.tanh %1210 : vector<2x50xf32>
    %1212 = arith.mulf %1207, %1211 : vector<2x50xf32>
    %cst_207 = arith.constant dense<0.000000e+00> : vector<2x200xf32>
    %1213 = tpu.matmul %1185, %1044, %cst_207 {dimension_numbers = #tpu.dot_dimension_numbers<[1], [0], [0], [1], [0, 0, 1, 1], [], []>} : vector<2x50xf32>, vector<50x200xf32>, vector<2x200xf32> -> vector<2x200xf32>
    %1214 = arith.addf %1035, %1213 : vector<2x200xf32>
    %1215 = vector.extract_strided_slice %1214 {offsets = [0, 0], sizes = [2, 50], strides = [1, 1]} : vector<2x200xf32> to vector<2x50xf32>
    %1216 = arith.negf %1215 : vector<2x50xf32>
    %1217 = math.exp %1216 : vector<2x50xf32>
    %cst_208 = arith.constant 1.000000e+00 : f32
    %1218 = vector.broadcast %cst_208 : f32 to vector<2x50xf32>
    %1219 = arith.addf %1218, %1217 : vector<2x50xf32>
    %1220 = arith.divf %1218, %1219 : vector<2x50xf32>
    %1221 = vector.extract_strided_slice %1214 {offsets = [0, 50], sizes = [2, 50], strides = [1, 1]} : vector<2x200xf32> to vector<2x50xf32>
    %1222 = arith.negf %1221 : vector<2x50xf32>
    %1223 = math.exp %1222 : vector<2x50xf32>
    %cst_209 = arith.constant 1.000000e+00 : f32
    %1224 = vector.broadcast %cst_209 : f32 to vector<2x50xf32>
    %1225 = arith.addf %1224, %1223 : vector<2x50xf32>
    %1226 = arith.divf %1224, %1225 : vector<2x50xf32>
    %1227 = vector.extract_strided_slice %1214 {offsets = [0, 100], sizes = [2, 50], strides = [1, 1]} : vector<2x200xf32> to vector<2x50xf32>
    %1228 = math.tanh %1227 : vector<2x50xf32>
    %1229 = vector.extract_strided_slice %1214 {offsets = [0, 150], sizes = [2, 50], strides = [1, 1]} : vector<2x200xf32> to vector<2x50xf32>
    %1230 = arith.negf %1229 : vector<2x50xf32>
    %1231 = math.exp %1230 : vector<2x50xf32>
    %cst_210 = arith.constant 1.000000e+00 : f32
    %1232 = vector.broadcast %cst_210 : f32 to vector<2x50xf32>
    %1233 = arith.addf %1232, %1231 : vector<2x50xf32>
    %1234 = arith.divf %1232, %1233 : vector<2x50xf32>
    %1235 = arith.mulf %1226, %1183 : vector<2x50xf32>
    %1236 = arith.mulf %1220, %1228 : vector<2x50xf32>
    %1237 = arith.addf %1235, %1236 : vector<2x50xf32>
    %1238 = math.tanh %1237 : vector<2x50xf32>
    %1239 = arith.mulf %1234, %1238 : vector<2x50xf32>
    %cst_211 = arith.constant dense<0.000000e+00> : vector<2x200xf32>
    %1240 = tpu.matmul %1212, %1046, %cst_211 {dimension_numbers = #tpu.dot_dimension_numbers<[1], [0], [0], [1], [0, 0, 1, 1], [], []>} : vector<2x50xf32>, vector<50x200xf32>, vector<2x200xf32> -> vector<2x200xf32>
    %1241 = arith.addf %1042, %1240 : vector<2x200xf32>
    %1242 = vector.extract_strided_slice %1241 {offsets = [0, 0], sizes = [2, 50], strides = [1, 1]} : vector<2x200xf32> to vector<2x50xf32>
    %1243 = arith.negf %1242 : vector<2x50xf32>
    %1244 = math.exp %1243 : vector<2x50xf32>
    %cst_212 = arith.constant 1.000000e+00 : f32
    %1245 = vector.broadcast %cst_212 : f32 to vector<2x50xf32>
    %1246 = arith.addf %1245, %1244 : vector<2x50xf32>
    %1247 = arith.divf %1245, %1246 : vector<2x50xf32>
    %1248 = vector.extract_strided_slice %1241 {offsets = [0, 50], sizes = [2, 50], strides = [1, 1]} : vector<2x200xf32> to vector<2x50xf32>
    %1249 = arith.negf %1248 : vector<2x50xf32>
    %1250 = math.exp %1249 : vector<2x50xf32>
    %cst_213 = arith.constant 1.000000e+00 : f32
    %1251 = vector.broadcast %cst_213 : f32 to vector<2x50xf32>
    %1252 = arith.addf %1251, %1250 : vector<2x50xf32>
    %1253 = arith.divf %1251, %1252 : vector<2x50xf32>
    %1254 = vector.extract_strided_slice %1241 {offsets = [0, 100], sizes = [2, 50], strides = [1, 1]} : vector<2x200xf32> to vector<2x50xf32>
    %1255 = math.tanh %1254 : vector<2x50xf32>
    %1256 = vector.extract_strided_slice %1241 {offsets = [0, 150], sizes = [2, 50], strides = [1, 1]} : vector<2x200xf32> to vector<2x50xf32>
    %1257 = arith.negf %1256 : vector<2x50xf32>
    %1258 = math.exp %1257 : vector<2x50xf32>
    %cst_214 = arith.constant 1.000000e+00 : f32
    %1259 = vector.broadcast %cst_214 : f32 to vector<2x50xf32>
    %1260 = arith.addf %1259, %1258 : vector<2x50xf32>
    %1261 = arith.divf %1259, %1260 : vector<2x50xf32>
    %1262 = arith.mulf %1253, %1210 : vector<2x50xf32>
    %1263 = arith.mulf %1247, %1255 : vector<2x50xf32>
    %1264 = arith.addf %1262, %1263 : vector<2x50xf32>
    %1265 = math.tanh %1264 : vector<2x50xf32>
    %1266 = arith.mulf %1261, %1265 : vector<2x50xf32>
    %cst_215 = arith.constant dense<0.000000e+00> : vector<2x200xf32>
    %1267 = tpu.matmul %1239, %1044, %cst_215 {dimension_numbers = #tpu.dot_dimension_numbers<[1], [0], [0], [1], [0, 0, 1, 1], [], []>} : vector<2x50xf32>, vector<50x200xf32>, vector<2x200xf32> -> vector<2x200xf32>
    %1268 = arith.addf %1035, %1267 : vector<2x200xf32>
    %1269 = vector.extract_strided_slice %1268 {offsets = [0, 0], sizes = [2, 50], strides = [1, 1]} : vector<2x200xf32> to vector<2x50xf32>
    %1270 = arith.negf %1269 : vector<2x50xf32>
    %1271 = math.exp %1270 : vector<2x50xf32>
    %cst_216 = arith.constant 1.000000e+00 : f32
    %1272 = vector.broadcast %cst_216 : f32 to vector<2x50xf32>
    %1273 = arith.addf %1272, %1271 : vector<2x50xf32>
    %1274 = arith.divf %1272, %1273 : vector<2x50xf32>
    %1275 = vector.extract_strided_slice %1268 {offsets = [0, 50], sizes = [2, 50], strides = [1, 1]} : vector<2x200xf32> to vector<2x50xf32>
    %1276 = arith.negf %1275 : vector<2x50xf32>
    %1277 = math.exp %1276 : vector<2x50xf32>
    %cst_217 = arith.constant 1.000000e+00 : f32
    %1278 = vector.broadcast %cst_217 : f32 to vector<2x50xf32>
    %1279 = arith.addf %1278, %1277 : vector<2x50xf32>
    %1280 = arith.divf %1278, %1279 : vector<2x50xf32>
    %1281 = vector.extract_strided_slice %1268 {offsets = [0, 100], sizes = [2, 50], strides = [1, 1]} : vector<2x200xf32> to vector<2x50xf32>
    %1282 = math.tanh %1281 : vector<2x50xf32>
    %1283 = vector.extract_strided_slice %1268 {offsets = [0, 150], sizes = [2, 50], strides = [1, 1]} : vector<2x200xf32> to vector<2x50xf32>
    %1284 = arith.negf %1283 : vector<2x50xf32>
    %1285 = math.exp %1284 : vector<2x50xf32>
    %cst_218 = arith.constant 1.000000e+00 : f32
    %1286 = vector.broadcast %cst_218 : f32 to vector<2x50xf32>
    %1287 = arith.addf %1286, %1285 : vector<2x50xf32>
    %1288 = arith.divf %1286, %1287 : vector<2x50xf32>
    %1289 = arith.mulf %1280, %1237 : vector<2x50xf32>
    %1290 = arith.mulf %1274, %1282 : vector<2x50xf32>
    %1291 = arith.addf %1289, %1290 : vector<2x50xf32>
    %1292 = math.tanh %1291 : vector<2x50xf32>
    %1293 = arith.mulf %1288, %1292 : vector<2x50xf32>
    %cst_219 = arith.constant dense<0.000000e+00> : vector<2x200xf32>
    %1294 = tpu.matmul %1266, %1046, %cst_219 {dimension_numbers = #tpu.dot_dimension_numbers<[1], [0], [0], [1], [0, 0, 1, 1], [], []>} : vector<2x50xf32>, vector<50x200xf32>, vector<2x200xf32> -> vector<2x200xf32>
    %1295 = arith.addf %1042, %1294 : vector<2x200xf32>
    %1296 = vector.extract_strided_slice %1295 {offsets = [0, 0], sizes = [2, 50], strides = [1, 1]} : vector<2x200xf32> to vector<2x50xf32>
    %1297 = arith.negf %1296 : vector<2x50xf32>
    %1298 = math.exp %1297 : vector<2x50xf32>
    %cst_220 = arith.constant 1.000000e+00 : f32
    %1299 = vector.broadcast %cst_220 : f32 to vector<2x50xf32>
    %1300 = arith.addf %1299, %1298 : vector<2x50xf32>
    %1301 = arith.divf %1299, %1300 : vector<2x50xf32>
    %1302 = vector.extract_strided_slice %1295 {offsets = [0, 50], sizes = [2, 50], strides = [1, 1]} : vector<2x200xf32> to vector<2x50xf32>
    %1303 = arith.negf %1302 : vector<2x50xf32>
    %1304 = math.exp %1303 : vector<2x50xf32>
    %cst_221 = arith.constant 1.000000e+00 : f32
    %1305 = vector.broadcast %cst_221 : f32 to vector<2x50xf32>
    %1306 = arith.addf %1305, %1304 : vector<2x50xf32>
    %1307 = arith.divf %1305, %1306 : vector<2x50xf32>
    %1308 = vector.extract_strided_slice %1295 {offsets = [0, 100], sizes = [2, 50], strides = [1, 1]} : vector<2x200xf32> to vector<2x50xf32>
    %1309 = math.tanh %1308 : vector<2x50xf32>
    %1310 = vector.extract_strided_slice %1295 {offsets = [0, 150], sizes = [2, 50], strides = [1, 1]} : vector<2x200xf32> to vector<2x50xf32>
    %1311 = arith.negf %1310 : vector<2x50xf32>
    %1312 = math.exp %1311 : vector<2x50xf32>
    %cst_222 = arith.constant 1.000000e+00 : f32
    %1313 = vector.broadcast %cst_222 : f32 to vector<2x50xf32>
    %1314 = arith.addf %1313, %1312 : vector<2x50xf32>
    %1315 = arith.divf %1313, %1314 : vector<2x50xf32>
    %1316 = arith.mulf %1307, %1264 : vector<2x50xf32>
    %1317 = arith.mulf %1301, %1309 : vector<2x50xf32>
    %1318 = arith.addf %1316, %1317 : vector<2x50xf32>
    %1319 = math.tanh %1318 : vector<2x50xf32>
    %1320 = arith.mulf %1315, %1319 : vector<2x50xf32>
    %cst_223 = arith.constant dense<0.000000e+00> : vector<2x200xf32>
    %1321 = tpu.matmul %1293, %1044, %cst_223 {dimension_numbers = #tpu.dot_dimension_numbers<[1], [0], [0], [1], [0, 0, 1, 1], [], []>} : vector<2x50xf32>, vector<50x200xf32>, vector<2x200xf32> -> vector<2x200xf32>
    %1322 = arith.addf %1035, %1321 : vector<2x200xf32>
    %1323 = vector.extract_strided_slice %1322 {offsets = [0, 0], sizes = [2, 50], strides = [1, 1]} : vector<2x200xf32> to vector<2x50xf32>
    %1324 = arith.negf %1323 : vector<2x50xf32>
    %1325 = math.exp %1324 : vector<2x50xf32>
    %cst_224 = arith.constant 1.000000e+00 : f32
    %1326 = vector.broadcast %cst_224 : f32 to vector<2x50xf32>
    %1327 = arith.addf %1326, %1325 : vector<2x50xf32>
    %1328 = arith.divf %1326, %1327 : vector<2x50xf32>
    %1329 = vector.extract_strided_slice %1322 {offsets = [0, 50], sizes = [2, 50], strides = [1, 1]} : vector<2x200xf32> to vector<2x50xf32>
    %1330 = arith.negf %1329 : vector<2x50xf32>
    %1331 = math.exp %1330 : vector<2x50xf32>
    %cst_225 = arith.constant 1.000000e+00 : f32
    %1332 = vector.broadcast %cst_225 : f32 to vector<2x50xf32>
    %1333 = arith.addf %1332, %1331 : vector<2x50xf32>
    %1334 = arith.divf %1332, %1333 : vector<2x50xf32>
    %1335 = vector.extract_strided_slice %1322 {offsets = [0, 100], sizes = [2, 50], strides = [1, 1]} : vector<2x200xf32> to vector<2x50xf32>
    %1336 = math.tanh %1335 : vector<2x50xf32>
    %1337 = vector.extract_strided_slice %1322 {offsets = [0, 150], sizes = [2, 50], strides = [1, 1]} : vector<2x200xf32> to vector<2x50xf32>
    %1338 = arith.negf %1337 : vector<2x50xf32>
    %1339 = math.exp %1338 : vector<2x50xf32>
    %cst_226 = arith.constant 1.000000e+00 : f32
    %1340 = vector.broadcast %cst_226 : f32 to vector<2x50xf32>
    %1341 = arith.addf %1340, %1339 : vector<2x50xf32>
    %1342 = arith.divf %1340, %1341 : vector<2x50xf32>
    %1343 = arith.mulf %1334, %1291 : vector<2x50xf32>
    %1344 = arith.mulf %1328, %1336 : vector<2x50xf32>
    %1345 = arith.addf %1343, %1344 : vector<2x50xf32>
    %1346 = math.tanh %1345 : vector<2x50xf32>
    %1347 = arith.mulf %1342, %1346 : vector<2x50xf32>
    %cst_227 = arith.constant dense<0.000000e+00> : vector<2x200xf32>
    %1348 = tpu.matmul %1320, %1046, %cst_227 {dimension_numbers = #tpu.dot_dimension_numbers<[1], [0], [0], [1], [0, 0, 1, 1], [], []>} : vector<2x50xf32>, vector<50x200xf32>, vector<2x200xf32> -> vector<2x200xf32>
    %1349 = arith.addf %1042, %1348 : vector<2x200xf32>
    %1350 = vector.extract_strided_slice %1349 {offsets = [0, 0], sizes = [2, 50], strides = [1, 1]} : vector<2x200xf32> to vector<2x50xf32>
    %1351 = arith.negf %1350 : vector<2x50xf32>
    %1352 = math.exp %1351 : vector<2x50xf32>
    %cst_228 = arith.constant 1.000000e+00 : f32
    %1353 = vector.broadcast %cst_228 : f32 to vector<2x50xf32>
    %1354 = arith.addf %1353, %1352 : vector<2x50xf32>
    %1355 = arith.divf %1353, %1354 : vector<2x50xf32>
    %1356 = vector.extract_strided_slice %1349 {offsets = [0, 50], sizes = [2, 50], strides = [1, 1]} : vector<2x200xf32> to vector<2x50xf32>
    %1357 = arith.negf %1356 : vector<2x50xf32>
    %1358 = math.exp %1357 : vector<2x50xf32>
    %cst_229 = arith.constant 1.000000e+00 : f32
    %1359 = vector.broadcast %cst_229 : f32 to vector<2x50xf32>
    %1360 = arith.addf %1359, %1358 : vector<2x50xf32>
    %1361 = arith.divf %1359, %1360 : vector<2x50xf32>
    %1362 = vector.extract_strided_slice %1349 {offsets = [0, 100], sizes = [2, 50], strides = [1, 1]} : vector<2x200xf32> to vector<2x50xf32>
    %1363 = math.tanh %1362 : vector<2x50xf32>
    %1364 = vector.extract_strided_slice %1349 {offsets = [0, 150], sizes = [2, 50], strides = [1, 1]} : vector<2x200xf32> to vector<2x50xf32>
    %1365 = arith.negf %1364 : vector<2x50xf32>
    %1366 = math.exp %1365 : vector<2x50xf32>
    %cst_230 = arith.constant 1.000000e+00 : f32
    %1367 = vector.broadcast %cst_230 : f32 to vector<2x50xf32>
    %1368 = arith.addf %1367, %1366 : vector<2x50xf32>
    %1369 = arith.divf %1367, %1368 : vector<2x50xf32>
    %1370 = arith.mulf %1361, %1318 : vector<2x50xf32>
    %1371 = arith.mulf %1355, %1363 : vector<2x50xf32>
    %1372 = arith.addf %1370, %1371 : vector<2x50xf32>
    %1373 = math.tanh %1372 : vector<2x50xf32>
    %1374 = arith.mulf %1369, %1373 : vector<2x50xf32>
    %cst_231 = arith.constant dense<0.000000e+00> : vector<2x200xf32>
    %1375 = tpu.matmul %1347, %1044, %cst_231 {dimension_numbers = #tpu.dot_dimension_numbers<[1], [0], [0], [1], [0, 0, 1, 1], [], []>} : vector<2x50xf32>, vector<50x200xf32>, vector<2x200xf32> -> vector<2x200xf32>
    %1376 = arith.addf %1035, %1375 : vector<2x200xf32>
    %1377 = vector.extract_strided_slice %1376 {offsets = [0, 0], sizes = [2, 50], strides = [1, 1]} : vector<2x200xf32> to vector<2x50xf32>
    %1378 = arith.negf %1377 : vector<2x50xf32>
    %1379 = math.exp %1378 : vector<2x50xf32>
    %cst_232 = arith.constant 1.000000e+00 : f32
    %1380 = vector.broadcast %cst_232 : f32 to vector<2x50xf32>
    %1381 = arith.addf %1380, %1379 : vector<2x50xf32>
    %1382 = arith.divf %1380, %1381 : vector<2x50xf32>
    %1383 = vector.extract_strided_slice %1376 {offsets = [0, 50], sizes = [2, 50], strides = [1, 1]} : vector<2x200xf32> to vector<2x50xf32>
    %1384 = arith.negf %1383 : vector<2x50xf32>
    %1385 = math.exp %1384 : vector<2x50xf32>
    %cst_233 = arith.constant 1.000000e+00 : f32
    %1386 = vector.broadcast %cst_233 : f32 to vector<2x50xf32>
    %1387 = arith.addf %1386, %1385 : vector<2x50xf32>
    %1388 = arith.divf %1386, %1387 : vector<2x50xf32>
    %1389 = vector.extract_strided_slice %1376 {offsets = [0, 100], sizes = [2, 50], strides = [1, 1]} : vector<2x200xf32> to vector<2x50xf32>
    %1390 = math.tanh %1389 : vector<2x50xf32>
    %1391 = vector.extract_strided_slice %1376 {offsets = [0, 150], sizes = [2, 50], strides = [1, 1]} : vector<2x200xf32> to vector<2x50xf32>
    %1392 = arith.negf %1391 : vector<2x50xf32>
    %1393 = math.exp %1392 : vector<2x50xf32>
    %cst_234 = arith.constant 1.000000e+00 : f32
    %1394 = vector.broadcast %cst_234 : f32 to vector<2x50xf32>
    %1395 = arith.addf %1394, %1393 : vector<2x50xf32>
    %1396 = arith.divf %1394, %1395 : vector<2x50xf32>
    %1397 = arith.mulf %1388, %1345 : vector<2x50xf32>
    %1398 = arith.mulf %1382, %1390 : vector<2x50xf32>
    %1399 = arith.addf %1397, %1398 : vector<2x50xf32>
    %1400 = math.tanh %1399 : vector<2x50xf32>
    %1401 = arith.mulf %1396, %1400 : vector<2x50xf32>
    %cst_235 = arith.constant dense<0.000000e+00> : vector<2x200xf32>
    %1402 = tpu.matmul %1374, %1046, %cst_235 {dimension_numbers = #tpu.dot_dimension_numbers<[1], [0], [0], [1], [0, 0, 1, 1], [], []>} : vector<2x50xf32>, vector<50x200xf32>, vector<2x200xf32> -> vector<2x200xf32>
    %1403 = arith.addf %1042, %1402 : vector<2x200xf32>
    %1404 = vector.extract_strided_slice %1403 {offsets = [0, 0], sizes = [2, 50], strides = [1, 1]} : vector<2x200xf32> to vector<2x50xf32>
    %1405 = arith.negf %1404 : vector<2x50xf32>
    %1406 = math.exp %1405 : vector<2x50xf32>
    %cst_236 = arith.constant 1.000000e+00 : f32
    %1407 = vector.broadcast %cst_236 : f32 to vector<2x50xf32>
    %1408 = arith.addf %1407, %1406 : vector<2x50xf32>
    %1409 = arith.divf %1407, %1408 : vector<2x50xf32>
    %1410 = vector.extract_strided_slice %1403 {offsets = [0, 50], sizes = [2, 50], strides = [1, 1]} : vector<2x200xf32> to vector<2x50xf32>
    %1411 = arith.negf %1410 : vector<2x50xf32>
    %1412 = math.exp %1411 : vector<2x50xf32>
    %cst_237 = arith.constant 1.000000e+00 : f32
    %1413 = vector.broadcast %cst_237 : f32 to vector<2x50xf32>
    %1414 = arith.addf %1413, %1412 : vector<2x50xf32>
    %1415 = arith.divf %1413, %1414 : vector<2x50xf32>
    %1416 = vector.extract_strided_slice %1403 {offsets = [0, 100], sizes = [2, 50], strides = [1, 1]} : vector<2x200xf32> to vector<2x50xf32>
    %1417 = math.tanh %1416 : vector<2x50xf32>
    %1418 = vector.extract_strided_slice %1403 {offsets = [0, 150], sizes = [2, 50], strides = [1, 1]} : vector<2x200xf32> to vector<2x50xf32>
    %1419 = arith.negf %1418 : vector<2x50xf32>
    %1420 = math.exp %1419 : vector<2x50xf32>
    %cst_238 = arith.constant 1.000000e+00 : f32
    %1421 = vector.broadcast %cst_238 : f32 to vector<2x50xf32>
    %1422 = arith.addf %1421, %1420 : vector<2x50xf32>
    %1423 = arith.divf %1421, %1422 : vector<2x50xf32>
    %1424 = arith.mulf %1415, %1372 : vector<2x50xf32>
    %1425 = arith.mulf %1409, %1417 : vector<2x50xf32>
    %1426 = arith.addf %1424, %1425 : vector<2x50xf32>
    %1427 = math.tanh %1426 : vector<2x50xf32>
    %1428 = arith.mulf %1423, %1427 : vector<2x50xf32>
    %cst_239 = arith.constant dense<0.000000e+00> : vector<2x200xf32>
    %1429 = tpu.matmul %1401, %1044, %cst_239 {dimension_numbers = #tpu.dot_dimension_numbers<[1], [0], [0], [1], [0, 0, 1, 1], [], []>} : vector<2x50xf32>, vector<50x200xf32>, vector<2x200xf32> -> vector<2x200xf32>
    %1430 = arith.addf %1035, %1429 : vector<2x200xf32>
    %1431 = vector.extract_strided_slice %1430 {offsets = [0, 0], sizes = [2, 50], strides = [1, 1]} : vector<2x200xf32> to vector<2x50xf32>
    %1432 = arith.negf %1431 : vector<2x50xf32>
    %1433 = math.exp %1432 : vector<2x50xf32>
    %cst_240 = arith.constant 1.000000e+00 : f32
    %1434 = vector.broadcast %cst_240 : f32 to vector<2x50xf32>
    %1435 = arith.addf %1434, %1433 : vector<2x50xf32>
    %1436 = arith.divf %1434, %1435 : vector<2x50xf32>
    %1437 = vector.extract_strided_slice %1430 {offsets = [0, 50], sizes = [2, 50], strides = [1, 1]} : vector<2x200xf32> to vector<2x50xf32>
    %1438 = arith.negf %1437 : vector<2x50xf32>
    %1439 = math.exp %1438 : vector<2x50xf32>
    %cst_241 = arith.constant 1.000000e+00 : f32
    %1440 = vector.broadcast %cst_241 : f32 to vector<2x50xf32>
    %1441 = arith.addf %1440, %1439 : vector<2x50xf32>
    %1442 = arith.divf %1440, %1441 : vector<2x50xf32>
    %1443 = vector.extract_strided_slice %1430 {offsets = [0, 100], sizes = [2, 50], strides = [1, 1]} : vector<2x200xf32> to vector<2x50xf32>
    %1444 = math.tanh %1443 : vector<2x50xf32>
    %1445 = vector.extract_strided_slice %1430 {offsets = [0, 150], sizes = [2, 50], strides = [1, 1]} : vector<2x200xf32> to vector<2x50xf32>
    %1446 = arith.negf %1445 : vector<2x50xf32>
    %1447 = math.exp %1446 : vector<2x50xf32>
    %cst_242 = arith.constant 1.000000e+00 : f32
    %1448 = vector.broadcast %cst_242 : f32 to vector<2x50xf32>
    %1449 = arith.addf %1448, %1447 : vector<2x50xf32>
    %1450 = arith.divf %1448, %1449 : vector<2x50xf32>
    %1451 = arith.mulf %1442, %1399 : vector<2x50xf32>
    %1452 = arith.mulf %1436, %1444 : vector<2x50xf32>
    %1453 = arith.addf %1451, %1452 : vector<2x50xf32>
    %1454 = math.tanh %1453 : vector<2x50xf32>
    %1455 = arith.mulf %1450, %1454 : vector<2x50xf32>
    %cst_243 = arith.constant dense<0.000000e+00> : vector<2x200xf32>
    %1456 = tpu.matmul %1428, %1046, %cst_243 {dimension_numbers = #tpu.dot_dimension_numbers<[1], [0], [0], [1], [0, 0, 1, 1], [], []>} : vector<2x50xf32>, vector<50x200xf32>, vector<2x200xf32> -> vector<2x200xf32>
    %1457 = arith.addf %1042, %1456 : vector<2x200xf32>
    %1458 = vector.extract_strided_slice %1457 {offsets = [0, 0], sizes = [2, 50], strides = [1, 1]} : vector<2x200xf32> to vector<2x50xf32>
    %1459 = arith.negf %1458 : vector<2x50xf32>
    %1460 = math.exp %1459 : vector<2x50xf32>
    %cst_244 = arith.constant 1.000000e+00 : f32
    %1461 = vector.broadcast %cst_244 : f32 to vector<2x50xf32>
    %1462 = arith.addf %1461, %1460 : vector<2x50xf32>
    %1463 = arith.divf %1461, %1462 : vector<2x50xf32>
    %1464 = vector.extract_strided_slice %1457 {offsets = [0, 50], sizes = [2, 50], strides = [1, 1]} : vector<2x200xf32> to vector<2x50xf32>
    %1465 = arith.negf %1464 : vector<2x50xf32>
    %1466 = math.exp %1465 : vector<2x50xf32>
    %cst_245 = arith.constant 1.000000e+00 : f32
    %1467 = vector.broadcast %cst_245 : f32 to vector<2x50xf32>
    %1468 = arith.addf %1467, %1466 : vector<2x50xf32>
    %1469 = arith.divf %1467, %1468 : vector<2x50xf32>
    %1470 = vector.extract_strided_slice %1457 {offsets = [0, 100], sizes = [2, 50], strides = [1, 1]} : vector<2x200xf32> to vector<2x50xf32>
    %1471 = math.tanh %1470 : vector<2x50xf32>
    %1472 = vector.extract_strided_slice %1457 {offsets = [0, 150], sizes = [2, 50], strides = [1, 1]} : vector<2x200xf32> to vector<2x50xf32>
    %1473 = arith.negf %1472 : vector<2x50xf32>
    %1474 = math.exp %1473 : vector<2x50xf32>
    %cst_246 = arith.constant 1.000000e+00 : f32
    %1475 = vector.broadcast %cst_246 : f32 to vector<2x50xf32>
    %1476 = arith.addf %1475, %1474 : vector<2x50xf32>
    %1477 = arith.divf %1475, %1476 : vector<2x50xf32>
    %1478 = arith.mulf %1469, %1426 : vector<2x50xf32>
    %1479 = arith.mulf %1463, %1471 : vector<2x50xf32>
    %1480 = arith.addf %1478, %1479 : vector<2x50xf32>
    %1481 = math.tanh %1480 : vector<2x50xf32>
    %1482 = arith.mulf %1477, %1481 : vector<2x50xf32>
    %1483 = vector.shape_cast %1077 : vector<2x50xf32> to vector<1x2x50xf32>
    %1484 = vector.shape_cast %1131 : vector<2x50xf32> to vector<1x2x50xf32>
    %1485 = vector.shape_cast %1185 : vector<2x50xf32> to vector<1x2x50xf32>
    %1486 = vector.shape_cast %1239 : vector<2x50xf32> to vector<1x2x50xf32>
    %1487 = vector.shape_cast %1293 : vector<2x50xf32> to vector<1x2x50xf32>
    %1488 = vector.shape_cast %1347 : vector<2x50xf32> to vector<1x2x50xf32>
    %1489 = vector.shape_cast %1401 : vector<2x50xf32> to vector<1x2x50xf32>
    %1490 = vector.shape_cast %1455 : vector<2x50xf32> to vector<1x2x50xf32>
    %1491 = tpu.concatenate %1483, %1484, %1485, %1486, %1487, %1488, %1489, %1490 in 0 : vector<1x2x50xf32>, vector<1x2x50xf32>, vector<1x2x50xf32>, vector<1x2x50xf32>, vector<1x2x50xf32>, vector<1x2x50xf32>, vector<1x2x50xf32>, vector<1x2x50xf32> -> vector<8x2x50xf32>
    %1492 = vector.shape_cast %1482 : vector<2x50xf32> to vector<1x2x50xf32>
    %1493 = vector.shape_cast %1428 : vector<2x50xf32> to vector<1x2x50xf32>
    %1494 = vector.shape_cast %1374 : vector<2x50xf32> to vector<1x2x50xf32>
    %1495 = vector.shape_cast %1320 : vector<2x50xf32> to vector<1x2x50xf32>
    %1496 = vector.shape_cast %1266 : vector<2x50xf32> to vector<1x2x50xf32>
    %1497 = vector.shape_cast %1212 : vector<2x50xf32> to vector<1x2x50xf32>
    %1498 = vector.shape_cast %1158 : vector<2x50xf32> to vector<1x2x50xf32>
    %1499 = vector.shape_cast %1104 : vector<2x50xf32> to vector<1x2x50xf32>
    %1500 = tpu.concatenate %1492, %1493, %1494, %1495, %1496, %1497, %1498, %1499 in 0 : vector<1x2x50xf32>, vector<1x2x50xf32>, vector<1x2x50xf32>, vector<1x2x50xf32>, vector<1x2x50xf32>, vector<1x2x50xf32>, vector<1x2x50xf32>, vector<1x2x50xf32> -> vector<8x2x50xf32>
    %1501 = tpu.concatenate %1491, %1500 in 2 : vector<8x2x50xf32>, vector<8x2x50xf32> -> vector<8x2x100xf32>
    %c0_247 = arith.constant 0 : index
    %c0_248 = arith.constant 0 : index
    %c0_249 = arith.constant 0 : index
    %1502 = vector.load %arg13[%c0_247, %c0_248, %c0_249] : memref<2x100x4xf32, #tpu.memory_space<vmem>>, vector<2x100x4xf32>
    %c0_250 = arith.constant 0 : index
    %c0_251 = arith.constant 0 : index
    %c0_252 = arith.constant 0 : index
    %1503 = vector.load %arg14[%c0_250, %c0_251, %c0_252] : memref<2x1x4xf32, #tpu.memory_space<vmem>>, vector<2x1x4xf32>
    %c0_253 = arith.constant 0 : index
    %c0_254 = arith.constant 0 : index
    %c0_255 = arith.constant 0 : index
    %1504 = vector.load %arg15[%c0_253, %c0_254, %c0_255] : memref<2x1x4xf32, #tpu.memory_space<vmem>>, vector<2x1x4xf32>
    %1505 = vector.shape_cast %1501 : vector<8x2x100xf32> to vector<16x100xf32>
    %1506 = vector.extract_strided_slice %1502 {offsets = [0, 0, 0], sizes = [1, 100, 4], strides = [1, 1, 1]} : vector<2x100x4xf32> to vector<1x100x4xf32>
    %1507 = vector.shape_cast %1506 : vector<1x100x4xf32> to vector<100x4xf32>
    %1508 = vector.extract_strided_slice %1504 {offsets = [0, 0, 0], sizes = [1, 1, 4], strides = [1, 1, 1]} : vector<2x1x4xf32> to vector<1x1x4xf32>
    %1509 = vector.shape_cast %1508 : vector<1x1x4xf32> to vector<1x4xf32>
    %cst_256 = arith.constant dense<0.000000e+00> : vector<16x4xf32>
    %1510 = tpu.matmul %1505, %1507, %cst_256 {dimension_numbers = #tpu.dot_dimension_numbers<[1], [0], [0], [1], [0, 0, 1, 1], [], []>} : vector<16x100xf32>, vector<100x4xf32>, vector<16x4xf32> -> vector<16x4xf32>
    %1511 = vector.broadcast %1509 : vector<1x4xf32> to vector<16x4xf32>
    %1512 = arith.addf %1510, %1511 : vector<16x4xf32>
    %1513 = vector.shape_cast %1512 : vector<16x4xf32> to vector<8x2x4xf32>
    %1514 = vector.extract_strided_slice %1502 {offsets = [1, 0, 0], sizes = [1, 100, 4], strides = [1, 1, 1]} : vector<2x100x4xf32> to vector<1x100x4xf32>
    %1515 = vector.shape_cast %1514 : vector<1x100x4xf32> to vector<100x4xf32>
    %1516 = vector.extract_strided_slice %1504 {offsets = [1, 0, 0], sizes = [1, 1, 4], strides = [1, 1, 1]} : vector<2x1x4xf32> to vector<1x1x4xf32>
    %1517 = vector.shape_cast %1516 : vector<1x1x4xf32> to vector<1x4xf32>
    %cst_257 = arith.constant dense<0.000000e+00> : vector<16x4xf32>
    %1518 = tpu.matmul %1505, %1515, %cst_257 {dimension_numbers = #tpu.dot_dimension_numbers<[1], [0], [0], [1], [0, 0, 1, 1], [], []>} : vector<16x100xf32>, vector<100x4xf32>, vector<16x4xf32> -> vector<16x4xf32>
    %1519 = vector.broadcast %1517 : vector<1x4xf32> to vector<16x4xf32>
    %1520 = arith.addf %1518, %1519 : vector<16x4xf32>
    %1521 = vector.shape_cast %1520 : vector<16x4xf32> to vector<8x2x4xf32>
    %1522 = vector.extract_strided_slice %1503 {offsets = [0, 0, 0], sizes = [1, 1, 4], strides = [1, 1, 1]} : vector<2x1x4xf32> to vector<1x1x4xf32>
    %1523 = vector.shape_cast %1522 : vector<1x1x4xf32> to vector<1x4xf32>
    %1524 = vector.extract_strided_slice %1503 {offsets = [1, 0, 0], sizes = [1, 1, 4], strides = [1, 1, 1]} : vector<2x1x4xf32> to vector<1x1x4xf32>
    %1525 = vector.shape_cast %1524 : vector<1x1x4xf32> to vector<1x4xf32>
    %cst_258 = arith.constant 0.000000e+00 : f32
    %1526 = vector.broadcast %cst_258 : f32 to vector<2x1xf32>
    %cst_259 = arith.constant 0.000000e+00 : f32
    %1527 = vector.broadcast %cst_259 : f32 to vector<2x1xf32>
    %cst_260 = arith.constant 0.000000e+00 : f32
    %1528 = vector.broadcast %cst_260 : f32 to vector<2x1xf32>
    %cst_261 = arith.constant 0.000000e+00 : f32
    %1529 = vector.broadcast %cst_261 : f32 to vector<2x1xf32>
    %1530 = vector.extract_strided_slice %1513 {offsets = [0, 0, 0], sizes = [1, 2, 4], strides = [1, 1, 1]} : vector<8x2x4xf32> to vector<1x2x4xf32>
    %1531 = vector.shape_cast %1530 : vector<1x2x4xf32> to vector<2x4xf32>
    %1532 = vector.extract_strided_slice %1521 {offsets = [7, 0, 0], sizes = [1, 2, 4], strides = [1, 1, 1]} : vector<8x2x4xf32> to vector<1x2x4xf32>
    %1533 = vector.shape_cast %1532 : vector<1x2x4xf32> to vector<2x4xf32>
    %1534 = vector.broadcast %1526 : vector<2x1xf32> to vector<2x4xf32>
    %1535 = vector.broadcast %1523 : vector<1x4xf32> to vector<2x4xf32>
    %1536 = arith.mulf %1534, %1535 : vector<2x4xf32>
    %1537 = arith.addf %1531, %1536 : vector<2x4xf32>
    %1538 = vector.extract_strided_slice %1537 {offsets = [0, 0], sizes = [2, 1], strides = [1, 1]} : vector<2x4xf32> to vector<2x1xf32>
    %1539 = arith.negf %1538 : vector<2x1xf32>
    %1540 = math.exp %1539 : vector<2x1xf32>
    %cst_262 = arith.constant 1.000000e+00 : f32
    %1541 = vector.broadcast %cst_262 : f32 to vector<2x1xf32>
    %1542 = arith.addf %1541, %1540 : vector<2x1xf32>
    %1543 = arith.divf %1541, %1542 : vector<2x1xf32>
    %1544 = vector.extract_strided_slice %1537 {offsets = [0, 1], sizes = [2, 1], strides = [1, 1]} : vector<2x4xf32> to vector<2x1xf32>
    %1545 = arith.negf %1544 : vector<2x1xf32>
    %1546 = math.exp %1545 : vector<2x1xf32>
    %cst_263 = arith.constant 1.000000e+00 : f32
    %1547 = vector.broadcast %cst_263 : f32 to vector<2x1xf32>
    %1548 = arith.addf %1547, %1546 : vector<2x1xf32>
    %1549 = arith.divf %1547, %1548 : vector<2x1xf32>
    %1550 = vector.extract_strided_slice %1537 {offsets = [0, 2], sizes = [2, 1], strides = [1, 1]} : vector<2x4xf32> to vector<2x1xf32>
    %1551 = math.tanh %1550 : vector<2x1xf32>
    %1552 = vector.extract_strided_slice %1537 {offsets = [0, 3], sizes = [2, 1], strides = [1, 1]} : vector<2x4xf32> to vector<2x1xf32>
    %1553 = arith.negf %1552 : vector<2x1xf32>
    %1554 = math.exp %1553 : vector<2x1xf32>
    %cst_264 = arith.constant 1.000000e+00 : f32
    %1555 = vector.broadcast %cst_264 : f32 to vector<2x1xf32>
    %1556 = arith.addf %1555, %1554 : vector<2x1xf32>
    %1557 = arith.divf %1555, %1556 : vector<2x1xf32>
    %1558 = arith.mulf %1549, %1527 : vector<2x1xf32>
    %1559 = arith.mulf %1543, %1551 : vector<2x1xf32>
    %1560 = arith.addf %1558, %1559 : vector<2x1xf32>
    %1561 = math.tanh %1560 : vector<2x1xf32>
    %1562 = arith.mulf %1557, %1561 : vector<2x1xf32>
    %1563 = vector.broadcast %1528 : vector<2x1xf32> to vector<2x4xf32>
    %1564 = vector.broadcast %1525 : vector<1x4xf32> to vector<2x4xf32>
    %1565 = arith.mulf %1563, %1564 : vector<2x4xf32>
    %1566 = arith.addf %1533, %1565 : vector<2x4xf32>
    %1567 = vector.extract_strided_slice %1566 {offsets = [0, 0], sizes = [2, 1], strides = [1, 1]} : vector<2x4xf32> to vector<2x1xf32>
    %1568 = arith.negf %1567 : vector<2x1xf32>
    %1569 = math.exp %1568 : vector<2x1xf32>
    %cst_265 = arith.constant 1.000000e+00 : f32
    %1570 = vector.broadcast %cst_265 : f32 to vector<2x1xf32>
    %1571 = arith.addf %1570, %1569 : vector<2x1xf32>
    %1572 = arith.divf %1570, %1571 : vector<2x1xf32>
    %1573 = vector.extract_strided_slice %1566 {offsets = [0, 1], sizes = [2, 1], strides = [1, 1]} : vector<2x4xf32> to vector<2x1xf32>
    %1574 = arith.negf %1573 : vector<2x1xf32>
    %1575 = math.exp %1574 : vector<2x1xf32>
    %cst_266 = arith.constant 1.000000e+00 : f32
    %1576 = vector.broadcast %cst_266 : f32 to vector<2x1xf32>
    %1577 = arith.addf %1576, %1575 : vector<2x1xf32>
    %1578 = arith.divf %1576, %1577 : vector<2x1xf32>
    %1579 = vector.extract_strided_slice %1566 {offsets = [0, 2], sizes = [2, 1], strides = [1, 1]} : vector<2x4xf32> to vector<2x1xf32>
    %1580 = math.tanh %1579 : vector<2x1xf32>
    %1581 = vector.extract_strided_slice %1566 {offsets = [0, 3], sizes = [2, 1], strides = [1, 1]} : vector<2x4xf32> to vector<2x1xf32>
    %1582 = arith.negf %1581 : vector<2x1xf32>
    %1583 = math.exp %1582 : vector<2x1xf32>
    %cst_267 = arith.constant 1.000000e+00 : f32
    %1584 = vector.broadcast %cst_267 : f32 to vector<2x1xf32>
    %1585 = arith.addf %1584, %1583 : vector<2x1xf32>
    %1586 = arith.divf %1584, %1585 : vector<2x1xf32>
    %1587 = arith.mulf %1578, %1529 : vector<2x1xf32>
    %1588 = arith.mulf %1572, %1580 : vector<2x1xf32>
    %1589 = arith.addf %1587, %1588 : vector<2x1xf32>
    %1590 = math.tanh %1589 : vector<2x1xf32>
    %1591 = arith.mulf %1586, %1590 : vector<2x1xf32>
    %1592 = vector.extract_strided_slice %1513 {offsets = [1, 0, 0], sizes = [1, 2, 4], strides = [1, 1, 1]} : vector<8x2x4xf32> to vector<1x2x4xf32>
    %1593 = vector.shape_cast %1592 : vector<1x2x4xf32> to vector<2x4xf32>
    %1594 = vector.extract_strided_slice %1521 {offsets = [6, 0, 0], sizes = [1, 2, 4], strides = [1, 1, 1]} : vector<8x2x4xf32> to vector<1x2x4xf32>
    %1595 = vector.shape_cast %1594 : vector<1x2x4xf32> to vector<2x4xf32>
    %1596 = vector.broadcast %1562 : vector<2x1xf32> to vector<2x4xf32>
    %1597 = vector.broadcast %1523 : vector<1x4xf32> to vector<2x4xf32>
    %1598 = arith.mulf %1596, %1597 : vector<2x4xf32>
    %1599 = arith.addf %1593, %1598 : vector<2x4xf32>
    %1600 = vector.extract_strided_slice %1599 {offsets = [0, 0], sizes = [2, 1], strides = [1, 1]} : vector<2x4xf32> to vector<2x1xf32>
    %1601 = arith.negf %1600 : vector<2x1xf32>
    %1602 = math.exp %1601 : vector<2x1xf32>
    %cst_268 = arith.constant 1.000000e+00 : f32
    %1603 = vector.broadcast %cst_268 : f32 to vector<2x1xf32>
    %1604 = arith.addf %1603, %1602 : vector<2x1xf32>
    %1605 = arith.divf %1603, %1604 : vector<2x1xf32>
    %1606 = vector.extract_strided_slice %1599 {offsets = [0, 1], sizes = [2, 1], strides = [1, 1]} : vector<2x4xf32> to vector<2x1xf32>
    %1607 = arith.negf %1606 : vector<2x1xf32>
    %1608 = math.exp %1607 : vector<2x1xf32>
    %cst_269 = arith.constant 1.000000e+00 : f32
    %1609 = vector.broadcast %cst_269 : f32 to vector<2x1xf32>
    %1610 = arith.addf %1609, %1608 : vector<2x1xf32>
    %1611 = arith.divf %1609, %1610 : vector<2x1xf32>
    %1612 = vector.extract_strided_slice %1599 {offsets = [0, 2], sizes = [2, 1], strides = [1, 1]} : vector<2x4xf32> to vector<2x1xf32>
    %1613 = math.tanh %1612 : vector<2x1xf32>
    %1614 = vector.extract_strided_slice %1599 {offsets = [0, 3], sizes = [2, 1], strides = [1, 1]} : vector<2x4xf32> to vector<2x1xf32>
    %1615 = arith.negf %1614 : vector<2x1xf32>
    %1616 = math.exp %1615 : vector<2x1xf32>
    %cst_270 = arith.constant 1.000000e+00 : f32
    %1617 = vector.broadcast %cst_270 : f32 to vector<2x1xf32>
    %1618 = arith.addf %1617, %1616 : vector<2x1xf32>
    %1619 = arith.divf %1617, %1618 : vector<2x1xf32>
    %1620 = arith.mulf %1611, %1560 : vector<2x1xf32>
    %1621 = arith.mulf %1605, %1613 : vector<2x1xf32>
    %1622 = arith.addf %1620, %1621 : vector<2x1xf32>
    %1623 = math.tanh %1622 : vector<2x1xf32>
    %1624 = arith.mulf %1619, %1623 : vector<2x1xf32>
    %1625 = vector.broadcast %1591 : vector<2x1xf32> to vector<2x4xf32>
    %1626 = vector.broadcast %1525 : vector<1x4xf32> to vector<2x4xf32>
    %1627 = arith.mulf %1625, %1626 : vector<2x4xf32>
    %1628 = arith.addf %1595, %1627 : vector<2x4xf32>
    %1629 = vector.extract_strided_slice %1628 {offsets = [0, 0], sizes = [2, 1], strides = [1, 1]} : vector<2x4xf32> to vector<2x1xf32>
    %1630 = arith.negf %1629 : vector<2x1xf32>
    %1631 = math.exp %1630 : vector<2x1xf32>
    %cst_271 = arith.constant 1.000000e+00 : f32
    %1632 = vector.broadcast %cst_271 : f32 to vector<2x1xf32>
    %1633 = arith.addf %1632, %1631 : vector<2x1xf32>
    %1634 = arith.divf %1632, %1633 : vector<2x1xf32>
    %1635 = vector.extract_strided_slice %1628 {offsets = [0, 1], sizes = [2, 1], strides = [1, 1]} : vector<2x4xf32> to vector<2x1xf32>
    %1636 = arith.negf %1635 : vector<2x1xf32>
    %1637 = math.exp %1636 : vector<2x1xf32>
    %cst_272 = arith.constant 1.000000e+00 : f32
    %1638 = vector.broadcast %cst_272 : f32 to vector<2x1xf32>
    %1639 = arith.addf %1638, %1637 : vector<2x1xf32>
    %1640 = arith.divf %1638, %1639 : vector<2x1xf32>
    %1641 = vector.extract_strided_slice %1628 {offsets = [0, 2], sizes = [2, 1], strides = [1, 1]} : vector<2x4xf32> to vector<2x1xf32>
    %1642 = math.tanh %1641 : vector<2x1xf32>
    %1643 = vector.extract_strided_slice %1628 {offsets = [0, 3], sizes = [2, 1], strides = [1, 1]} : vector<2x4xf32> to vector<2x1xf32>
    %1644 = arith.negf %1643 : vector<2x1xf32>
    %1645 = math.exp %1644 : vector<2x1xf32>
    %cst_273 = arith.constant 1.000000e+00 : f32
    %1646 = vector.broadcast %cst_273 : f32 to vector<2x1xf32>
    %1647 = arith.addf %1646, %1645 : vector<2x1xf32>
    %1648 = arith.divf %1646, %1647 : vector<2x1xf32>
    %1649 = arith.mulf %1640, %1589 : vector<2x1xf32>
    %1650 = arith.mulf %1634, %1642 : vector<2x1xf32>
    %1651 = arith.addf %1649, %1650 : vector<2x1xf32>
    %1652 = math.tanh %1651 : vector<2x1xf32>
    %1653 = arith.mulf %1648, %1652 : vector<2x1xf32>
    %1654 = vector.extract_strided_slice %1513 {offsets = [2, 0, 0], sizes = [1, 2, 4], strides = [1, 1, 1]} : vector<8x2x4xf32> to vector<1x2x4xf32>
    %1655 = vector.shape_cast %1654 : vector<1x2x4xf32> to vector<2x4xf32>
    %1656 = vector.extract_strided_slice %1521 {offsets = [5, 0, 0], sizes = [1, 2, 4], strides = [1, 1, 1]} : vector<8x2x4xf32> to vector<1x2x4xf32>
    %1657 = vector.shape_cast %1656 : vector<1x2x4xf32> to vector<2x4xf32>
    %1658 = vector.broadcast %1624 : vector<2x1xf32> to vector<2x4xf32>
    %1659 = vector.broadcast %1523 : vector<1x4xf32> to vector<2x4xf32>
    %1660 = arith.mulf %1658, %1659 : vector<2x4xf32>
    %1661 = arith.addf %1655, %1660 : vector<2x4xf32>
    %1662 = vector.extract_strided_slice %1661 {offsets = [0, 0], sizes = [2, 1], strides = [1, 1]} : vector<2x4xf32> to vector<2x1xf32>
    %1663 = arith.negf %1662 : vector<2x1xf32>
    %1664 = math.exp %1663 : vector<2x1xf32>
    %cst_274 = arith.constant 1.000000e+00 : f32
    %1665 = vector.broadcast %cst_274 : f32 to vector<2x1xf32>
    %1666 = arith.addf %1665, %1664 : vector<2x1xf32>
    %1667 = arith.divf %1665, %1666 : vector<2x1xf32>
    %1668 = vector.extract_strided_slice %1661 {offsets = [0, 1], sizes = [2, 1], strides = [1, 1]} : vector<2x4xf32> to vector<2x1xf32>
    %1669 = arith.negf %1668 : vector<2x1xf32>
    %1670 = math.exp %1669 : vector<2x1xf32>
    %cst_275 = arith.constant 1.000000e+00 : f32
    %1671 = vector.broadcast %cst_275 : f32 to vector<2x1xf32>
    %1672 = arith.addf %1671, %1670 : vector<2x1xf32>
    %1673 = arith.divf %1671, %1672 : vector<2x1xf32>
    %1674 = vector.extract_strided_slice %1661 {offsets = [0, 2], sizes = [2, 1], strides = [1, 1]} : vector<2x4xf32> to vector<2x1xf32>
    %1675 = math.tanh %1674 : vector<2x1xf32>
    %1676 = vector.extract_strided_slice %1661 {offsets = [0, 3], sizes = [2, 1], strides = [1, 1]} : vector<2x4xf32> to vector<2x1xf32>
    %1677 = arith.negf %1676 : vector<2x1xf32>
    %1678 = math.exp %1677 : vector<2x1xf32>
    %cst_276 = arith.constant 1.000000e+00 : f32
    %1679 = vector.broadcast %cst_276 : f32 to vector<2x1xf32>
    %1680 = arith.addf %1679, %1678 : vector<2x1xf32>
    %1681 = arith.divf %1679, %1680 : vector<2x1xf32>
    %1682 = arith.mulf %1673, %1622 : vector<2x1xf32>
    %1683 = arith.mulf %1667, %1675 : vector<2x1xf32>
    %1684 = arith.addf %1682, %1683 : vector<2x1xf32>
    %1685 = math.tanh %1684 : vector<2x1xf32>
    %1686 = arith.mulf %1681, %1685 : vector<2x1xf32>
    %1687 = vector.broadcast %1653 : vector<2x1xf32> to vector<2x4xf32>
    %1688 = vector.broadcast %1525 : vector<1x4xf32> to vector<2x4xf32>
    %1689 = arith.mulf %1687, %1688 : vector<2x4xf32>
    %1690 = arith.addf %1657, %1689 : vector<2x4xf32>
    %1691 = vector.extract_strided_slice %1690 {offsets = [0, 0], sizes = [2, 1], strides = [1, 1]} : vector<2x4xf32> to vector<2x1xf32>
    %1692 = arith.negf %1691 : vector<2x1xf32>
    %1693 = math.exp %1692 : vector<2x1xf32>
    %cst_277 = arith.constant 1.000000e+00 : f32
    %1694 = vector.broadcast %cst_277 : f32 to vector<2x1xf32>
    %1695 = arith.addf %1694, %1693 : vector<2x1xf32>
    %1696 = arith.divf %1694, %1695 : vector<2x1xf32>
    %1697 = vector.extract_strided_slice %1690 {offsets = [0, 1], sizes = [2, 1], strides = [1, 1]} : vector<2x4xf32> to vector<2x1xf32>
    %1698 = arith.negf %1697 : vector<2x1xf32>
    %1699 = math.exp %1698 : vector<2x1xf32>
    %cst_278 = arith.constant 1.000000e+00 : f32
    %1700 = vector.broadcast %cst_278 : f32 to vector<2x1xf32>
    %1701 = arith.addf %1700, %1699 : vector<2x1xf32>
    %1702 = arith.divf %1700, %1701 : vector<2x1xf32>
    %1703 = vector.extract_strided_slice %1690 {offsets = [0, 2], sizes = [2, 1], strides = [1, 1]} : vector<2x4xf32> to vector<2x1xf32>
    %1704 = math.tanh %1703 : vector<2x1xf32>
    %1705 = vector.extract_strided_slice %1690 {offsets = [0, 3], sizes = [2, 1], strides = [1, 1]} : vector<2x4xf32> to vector<2x1xf32>
    %1706 = arith.negf %1705 : vector<2x1xf32>
    %1707 = math.exp %1706 : vector<2x1xf32>
    %cst_279 = arith.constant 1.000000e+00 : f32
    %1708 = vector.broadcast %cst_279 : f32 to vector<2x1xf32>
    %1709 = arith.addf %1708, %1707 : vector<2x1xf32>
    %1710 = arith.divf %1708, %1709 : vector<2x1xf32>
    %1711 = arith.mulf %1702, %1651 : vector<2x1xf32>
    %1712 = arith.mulf %1696, %1704 : vector<2x1xf32>
    %1713 = arith.addf %1711, %1712 : vector<2x1xf32>
    %1714 = math.tanh %1713 : vector<2x1xf32>
    %1715 = arith.mulf %1710, %1714 : vector<2x1xf32>
    %1716 = vector.extract_strided_slice %1513 {offsets = [3, 0, 0], sizes = [1, 2, 4], strides = [1, 1, 1]} : vector<8x2x4xf32> to vector<1x2x4xf32>
    %1717 = vector.shape_cast %1716 : vector<1x2x4xf32> to vector<2x4xf32>
    %1718 = vector.extract_strided_slice %1521 {offsets = [4, 0, 0], sizes = [1, 2, 4], strides = [1, 1, 1]} : vector<8x2x4xf32> to vector<1x2x4xf32>
    %1719 = vector.shape_cast %1718 : vector<1x2x4xf32> to vector<2x4xf32>
    %1720 = vector.broadcast %1686 : vector<2x1xf32> to vector<2x4xf32>
    %1721 = vector.broadcast %1523 : vector<1x4xf32> to vector<2x4xf32>
    %1722 = arith.mulf %1720, %1721 : vector<2x4xf32>
    %1723 = arith.addf %1717, %1722 : vector<2x4xf32>
    %1724 = vector.extract_strided_slice %1723 {offsets = [0, 0], sizes = [2, 1], strides = [1, 1]} : vector<2x4xf32> to vector<2x1xf32>
    %1725 = arith.negf %1724 : vector<2x1xf32>
    %1726 = math.exp %1725 : vector<2x1xf32>
    %cst_280 = arith.constant 1.000000e+00 : f32
    %1727 = vector.broadcast %cst_280 : f32 to vector<2x1xf32>
    %1728 = arith.addf %1727, %1726 : vector<2x1xf32>
    %1729 = arith.divf %1727, %1728 : vector<2x1xf32>
    %1730 = vector.extract_strided_slice %1723 {offsets = [0, 1], sizes = [2, 1], strides = [1, 1]} : vector<2x4xf32> to vector<2x1xf32>
    %1731 = arith.negf %1730 : vector<2x1xf32>
    %1732 = math.exp %1731 : vector<2x1xf32>
    %cst_281 = arith.constant 1.000000e+00 : f32
    %1733 = vector.broadcast %cst_281 : f32 to vector<2x1xf32>
    %1734 = arith.addf %1733, %1732 : vector<2x1xf32>
    %1735 = arith.divf %1733, %1734 : vector<2x1xf32>
    %1736 = vector.extract_strided_slice %1723 {offsets = [0, 2], sizes = [2, 1], strides = [1, 1]} : vector<2x4xf32> to vector<2x1xf32>
    %1737 = math.tanh %1736 : vector<2x1xf32>
    %1738 = vector.extract_strided_slice %1723 {offsets = [0, 3], sizes = [2, 1], strides = [1, 1]} : vector<2x4xf32> to vector<2x1xf32>
    %1739 = arith.negf %1738 : vector<2x1xf32>
    %1740 = math.exp %1739 : vector<2x1xf32>
    %cst_282 = arith.constant 1.000000e+00 : f32
    %1741 = vector.broadcast %cst_282 : f32 to vector<2x1xf32>
    %1742 = arith.addf %1741, %1740 : vector<2x1xf32>
    %1743 = arith.divf %1741, %1742 : vector<2x1xf32>
    %1744 = arith.mulf %1735, %1684 : vector<2x1xf32>
    %1745 = arith.mulf %1729, %1737 : vector<2x1xf32>
    %1746 = arith.addf %1744, %1745 : vector<2x1xf32>
    %1747 = math.tanh %1746 : vector<2x1xf32>
    %1748 = arith.mulf %1743, %1747 : vector<2x1xf32>
    %1749 = vector.broadcast %1715 : vector<2x1xf32> to vector<2x4xf32>
    %1750 = vector.broadcast %1525 : vector<1x4xf32> to vector<2x4xf32>
    %1751 = arith.mulf %1749, %1750 : vector<2x4xf32>
    %1752 = arith.addf %1719, %1751 : vector<2x4xf32>
    %1753 = vector.extract_strided_slice %1752 {offsets = [0, 0], sizes = [2, 1], strides = [1, 1]} : vector<2x4xf32> to vector<2x1xf32>
    %1754 = arith.negf %1753 : vector<2x1xf32>
    %1755 = math.exp %1754 : vector<2x1xf32>
    %cst_283 = arith.constant 1.000000e+00 : f32
    %1756 = vector.broadcast %cst_283 : f32 to vector<2x1xf32>
    %1757 = arith.addf %1756, %1755 : vector<2x1xf32>
    %1758 = arith.divf %1756, %1757 : vector<2x1xf32>
    %1759 = vector.extract_strided_slice %1752 {offsets = [0, 1], sizes = [2, 1], strides = [1, 1]} : vector<2x4xf32> to vector<2x1xf32>
    %1760 = arith.negf %1759 : vector<2x1xf32>
    %1761 = math.exp %1760 : vector<2x1xf32>
    %cst_284 = arith.constant 1.000000e+00 : f32
    %1762 = vector.broadcast %cst_284 : f32 to vector<2x1xf32>
    %1763 = arith.addf %1762, %1761 : vector<2x1xf32>
    %1764 = arith.divf %1762, %1763 : vector<2x1xf32>
    %1765 = vector.extract_strided_slice %1752 {offsets = [0, 2], sizes = [2, 1], strides = [1, 1]} : vector<2x4xf32> to vector<2x1xf32>
    %1766 = math.tanh %1765 : vector<2x1xf32>
    %1767 = vector.extract_strided_slice %1752 {offsets = [0, 3], sizes = [2, 1], strides = [1, 1]} : vector<2x4xf32> to vector<2x1xf32>
    %1768 = arith.negf %1767 : vector<2x1xf32>
    %1769 = math.exp %1768 : vector<2x1xf32>
    %cst_285 = arith.constant 1.000000e+00 : f32
    %1770 = vector.broadcast %cst_285 : f32 to vector<2x1xf32>
    %1771 = arith.addf %1770, %1769 : vector<2x1xf32>
    %1772 = arith.divf %1770, %1771 : vector<2x1xf32>
    %1773 = arith.mulf %1764, %1713 : vector<2x1xf32>
    %1774 = arith.mulf %1758, %1766 : vector<2x1xf32>
    %1775 = arith.addf %1773, %1774 : vector<2x1xf32>
    %1776 = math.tanh %1775 : vector<2x1xf32>
    %1777 = arith.mulf %1772, %1776 : vector<2x1xf32>
    %1778 = vector.extract_strided_slice %1513 {offsets = [4, 0, 0], sizes = [1, 2, 4], strides = [1, 1, 1]} : vector<8x2x4xf32> to vector<1x2x4xf32>
    %1779 = vector.shape_cast %1778 : vector<1x2x4xf32> to vector<2x4xf32>
    %1780 = vector.extract_strided_slice %1521 {offsets = [3, 0, 0], sizes = [1, 2, 4], strides = [1, 1, 1]} : vector<8x2x4xf32> to vector<1x2x4xf32>
    %1781 = vector.shape_cast %1780 : vector<1x2x4xf32> to vector<2x4xf32>
    %1782 = vector.broadcast %1748 : vector<2x1xf32> to vector<2x4xf32>
    %1783 = vector.broadcast %1523 : vector<1x4xf32> to vector<2x4xf32>
    %1784 = arith.mulf %1782, %1783 : vector<2x4xf32>
    %1785 = arith.addf %1779, %1784 : vector<2x4xf32>
    %1786 = vector.extract_strided_slice %1785 {offsets = [0, 0], sizes = [2, 1], strides = [1, 1]} : vector<2x4xf32> to vector<2x1xf32>
    %1787 = arith.negf %1786 : vector<2x1xf32>
    %1788 = math.exp %1787 : vector<2x1xf32>
    %cst_286 = arith.constant 1.000000e+00 : f32
    %1789 = vector.broadcast %cst_286 : f32 to vector<2x1xf32>
    %1790 = arith.addf %1789, %1788 : vector<2x1xf32>
    %1791 = arith.divf %1789, %1790 : vector<2x1xf32>
    %1792 = vector.extract_strided_slice %1785 {offsets = [0, 1], sizes = [2, 1], strides = [1, 1]} : vector<2x4xf32> to vector<2x1xf32>
    %1793 = arith.negf %1792 : vector<2x1xf32>
    %1794 = math.exp %1793 : vector<2x1xf32>
    %cst_287 = arith.constant 1.000000e+00 : f32
    %1795 = vector.broadcast %cst_287 : f32 to vector<2x1xf32>
    %1796 = arith.addf %1795, %1794 : vector<2x1xf32>
    %1797 = arith.divf %1795, %1796 : vector<2x1xf32>
    %1798 = vector.extract_strided_slice %1785 {offsets = [0, 2], sizes = [2, 1], strides = [1, 1]} : vector<2x4xf32> to vector<2x1xf32>
    %1799 = math.tanh %1798 : vector<2x1xf32>
    %1800 = vector.extract_strided_slice %1785 {offsets = [0, 3], sizes = [2, 1], strides = [1, 1]} : vector<2x4xf32> to vector<2x1xf32>
    %1801 = arith.negf %1800 : vector<2x1xf32>
    %1802 = math.exp %1801 : vector<2x1xf32>
    %cst_288 = arith.constant 1.000000e+00 : f32
    %1803 = vector.broadcast %cst_288 : f32 to vector<2x1xf32>
    %1804 = arith.addf %1803, %1802 : vector<2x1xf32>
    %1805 = arith.divf %1803, %1804 : vector<2x1xf32>
    %1806 = arith.mulf %1797, %1746 : vector<2x1xf32>
    %1807 = arith.mulf %1791, %1799 : vector<2x1xf32>
    %1808 = arith.addf %1806, %1807 : vector<2x1xf32>
    %1809 = math.tanh %1808 : vector<2x1xf32>
    %1810 = arith.mulf %1805, %1809 : vector<2x1xf32>
    %1811 = vector.broadcast %1777 : vector<2x1xf32> to vector<2x4xf32>
    %1812 = vector.broadcast %1525 : vector<1x4xf32> to vector<2x4xf32>
    %1813 = arith.mulf %1811, %1812 : vector<2x4xf32>
    %1814 = arith.addf %1781, %1813 : vector<2x4xf32>
    %1815 = vector.extract_strided_slice %1814 {offsets = [0, 0], sizes = [2, 1], strides = [1, 1]} : vector<2x4xf32> to vector<2x1xf32>
    %1816 = arith.negf %1815 : vector<2x1xf32>
    %1817 = math.exp %1816 : vector<2x1xf32>
    %cst_289 = arith.constant 1.000000e+00 : f32
    %1818 = vector.broadcast %cst_289 : f32 to vector<2x1xf32>
    %1819 = arith.addf %1818, %1817 : vector<2x1xf32>
    %1820 = arith.divf %1818, %1819 : vector<2x1xf32>
    %1821 = vector.extract_strided_slice %1814 {offsets = [0, 1], sizes = [2, 1], strides = [1, 1]} : vector<2x4xf32> to vector<2x1xf32>
    %1822 = arith.negf %1821 : vector<2x1xf32>
    %1823 = math.exp %1822 : vector<2x1xf32>
    %cst_290 = arith.constant 1.000000e+00 : f32
    %1824 = vector.broadcast %cst_290 : f32 to vector<2x1xf32>
    %1825 = arith.addf %1824, %1823 : vector<2x1xf32>
    %1826 = arith.divf %1824, %1825 : vector<2x1xf32>
    %1827 = vector.extract_strided_slice %1814 {offsets = [0, 2], sizes = [2, 1], strides = [1, 1]} : vector<2x4xf32> to vector<2x1xf32>
    %1828 = math.tanh %1827 : vector<2x1xf32>
    %1829 = vector.extract_strided_slice %1814 {offsets = [0, 3], sizes = [2, 1], strides = [1, 1]} : vector<2x4xf32> to vector<2x1xf32>
    %1830 = arith.negf %1829 : vector<2x1xf32>
    %1831 = math.exp %1830 : vector<2x1xf32>
    %cst_291 = arith.constant 1.000000e+00 : f32
    %1832 = vector.broadcast %cst_291 : f32 to vector<2x1xf32>
    %1833 = arith.addf %1832, %1831 : vector<2x1xf32>
    %1834 = arith.divf %1832, %1833 : vector<2x1xf32>
    %1835 = arith.mulf %1826, %1775 : vector<2x1xf32>
    %1836 = arith.mulf %1820, %1828 : vector<2x1xf32>
    %1837 = arith.addf %1835, %1836 : vector<2x1xf32>
    %1838 = math.tanh %1837 : vector<2x1xf32>
    %1839 = arith.mulf %1834, %1838 : vector<2x1xf32>
    %1840 = vector.extract_strided_slice %1513 {offsets = [5, 0, 0], sizes = [1, 2, 4], strides = [1, 1, 1]} : vector<8x2x4xf32> to vector<1x2x4xf32>
    %1841 = vector.shape_cast %1840 : vector<1x2x4xf32> to vector<2x4xf32>
    %1842 = vector.extract_strided_slice %1521 {offsets = [2, 0, 0], sizes = [1, 2, 4], strides = [1, 1, 1]} : vector<8x2x4xf32> to vector<1x2x4xf32>
    %1843 = vector.shape_cast %1842 : vector<1x2x4xf32> to vector<2x4xf32>
    %1844 = vector.broadcast %1810 : vector<2x1xf32> to vector<2x4xf32>
    %1845 = vector.broadcast %1523 : vector<1x4xf32> to vector<2x4xf32>
    %1846 = arith.mulf %1844, %1845 : vector<2x4xf32>
    %1847 = arith.addf %1841, %1846 : vector<2x4xf32>
    %1848 = vector.extract_strided_slice %1847 {offsets = [0, 0], sizes = [2, 1], strides = [1, 1]} : vector<2x4xf32> to vector<2x1xf32>
    %1849 = arith.negf %1848 : vector<2x1xf32>
    %1850 = math.exp %1849 : vector<2x1xf32>
    %cst_292 = arith.constant 1.000000e+00 : f32
    %1851 = vector.broadcast %cst_292 : f32 to vector<2x1xf32>
    %1852 = arith.addf %1851, %1850 : vector<2x1xf32>
    %1853 = arith.divf %1851, %1852 : vector<2x1xf32>
    %1854 = vector.extract_strided_slice %1847 {offsets = [0, 1], sizes = [2, 1], strides = [1, 1]} : vector<2x4xf32> to vector<2x1xf32>
    %1855 = arith.negf %1854 : vector<2x1xf32>
    %1856 = math.exp %1855 : vector<2x1xf32>
    %cst_293 = arith.constant 1.000000e+00 : f32
    %1857 = vector.broadcast %cst_293 : f32 to vector<2x1xf32>
    %1858 = arith.addf %1857, %1856 : vector<2x1xf32>
    %1859 = arith.divf %1857, %1858 : vector<2x1xf32>
    %1860 = vector.extract_strided_slice %1847 {offsets = [0, 2], sizes = [2, 1], strides = [1, 1]} : vector<2x4xf32> to vector<2x1xf32>
    %1861 = math.tanh %1860 : vector<2x1xf32>
    %1862 = vector.extract_strided_slice %1847 {offsets = [0, 3], sizes = [2, 1], strides = [1, 1]} : vector<2x4xf32> to vector<2x1xf32>
    %1863 = arith.negf %1862 : vector<2x1xf32>
    %1864 = math.exp %1863 : vector<2x1xf32>
    %cst_294 = arith.constant 1.000000e+00 : f32
    %1865 = vector.broadcast %cst_294 : f32 to vector<2x1xf32>
    %1866 = arith.addf %1865, %1864 : vector<2x1xf32>
    %1867 = arith.divf %1865, %1866 : vector<2x1xf32>
    %1868 = arith.mulf %1859, %1808 : vector<2x1xf32>
    %1869 = arith.mulf %1853, %1861 : vector<2x1xf32>
    %1870 = arith.addf %1868, %1869 : vector<2x1xf32>
    %1871 = math.tanh %1870 : vector<2x1xf32>
    %1872 = arith.mulf %1867, %1871 : vector<2x1xf32>
    %1873 = vector.broadcast %1839 : vector<2x1xf32> to vector<2x4xf32>
    %1874 = vector.broadcast %1525 : vector<1x4xf32> to vector<2x4xf32>
    %1875 = arith.mulf %1873, %1874 : vector<2x4xf32>
    %1876 = arith.addf %1843, %1875 : vector<2x4xf32>
    %1877 = vector.extract_strided_slice %1876 {offsets = [0, 0], sizes = [2, 1], strides = [1, 1]} : vector<2x4xf32> to vector<2x1xf32>
    %1878 = arith.negf %1877 : vector<2x1xf32>
    %1879 = math.exp %1878 : vector<2x1xf32>
    %cst_295 = arith.constant 1.000000e+00 : f32
    %1880 = vector.broadcast %cst_295 : f32 to vector<2x1xf32>
    %1881 = arith.addf %1880, %1879 : vector<2x1xf32>
    %1882 = arith.divf %1880, %1881 : vector<2x1xf32>
    %1883 = vector.extract_strided_slice %1876 {offsets = [0, 1], sizes = [2, 1], strides = [1, 1]} : vector<2x4xf32> to vector<2x1xf32>
    %1884 = arith.negf %1883 : vector<2x1xf32>
    %1885 = math.exp %1884 : vector<2x1xf32>
    %cst_296 = arith.constant 1.000000e+00 : f32
    %1886 = vector.broadcast %cst_296 : f32 to vector<2x1xf32>
    %1887 = arith.addf %1886, %1885 : vector<2x1xf32>
    %1888 = arith.divf %1886, %1887 : vector<2x1xf32>
    %1889 = vector.extract_strided_slice %1876 {offsets = [0, 2], sizes = [2, 1], strides = [1, 1]} : vector<2x4xf32> to vector<2x1xf32>
    %1890 = math.tanh %1889 : vector<2x1xf32>
    %1891 = vector.extract_strided_slice %1876 {offsets = [0, 3], sizes = [2, 1], strides = [1, 1]} : vector<2x4xf32> to vector<2x1xf32>
    %1892 = arith.negf %1891 : vector<2x1xf32>
    %1893 = math.exp %1892 : vector<2x1xf32>
    %cst_297 = arith.constant 1.000000e+00 : f32
    %1894 = vector.broadcast %cst_297 : f32 to vector<2x1xf32>
    %1895 = arith.addf %1894, %1893 : vector<2x1xf32>
    %1896 = arith.divf %1894, %1895 : vector<2x1xf32>
    %1897 = arith.mulf %1888, %1837 : vector<2x1xf32>
    %1898 = arith.mulf %1882, %1890 : vector<2x1xf32>
    %1899 = arith.addf %1897, %1898 : vector<2x1xf32>
    %1900 = math.tanh %1899 : vector<2x1xf32>
    %1901 = arith.mulf %1896, %1900 : vector<2x1xf32>
    %1902 = vector.extract_strided_slice %1513 {offsets = [6, 0, 0], sizes = [1, 2, 4], strides = [1, 1, 1]} : vector<8x2x4xf32> to vector<1x2x4xf32>
    %1903 = vector.shape_cast %1902 : vector<1x2x4xf32> to vector<2x4xf32>
    %1904 = vector.extract_strided_slice %1521 {offsets = [1, 0, 0], sizes = [1, 2, 4], strides = [1, 1, 1]} : vector<8x2x4xf32> to vector<1x2x4xf32>
    %1905 = vector.shape_cast %1904 : vector<1x2x4xf32> to vector<2x4xf32>
    %1906 = vector.broadcast %1872 : vector<2x1xf32> to vector<2x4xf32>
    %1907 = vector.broadcast %1523 : vector<1x4xf32> to vector<2x4xf32>
    %1908 = arith.mulf %1906, %1907 : vector<2x4xf32>
    %1909 = arith.addf %1903, %1908 : vector<2x4xf32>
    %1910 = vector.extract_strided_slice %1909 {offsets = [0, 0], sizes = [2, 1], strides = [1, 1]} : vector<2x4xf32> to vector<2x1xf32>
    %1911 = arith.negf %1910 : vector<2x1xf32>
    %1912 = math.exp %1911 : vector<2x1xf32>
    %cst_298 = arith.constant 1.000000e+00 : f32
    %1913 = vector.broadcast %cst_298 : f32 to vector<2x1xf32>
    %1914 = arith.addf %1913, %1912 : vector<2x1xf32>
    %1915 = arith.divf %1913, %1914 : vector<2x1xf32>
    %1916 = vector.extract_strided_slice %1909 {offsets = [0, 1], sizes = [2, 1], strides = [1, 1]} : vector<2x4xf32> to vector<2x1xf32>
    %1917 = arith.negf %1916 : vector<2x1xf32>
    %1918 = math.exp %1917 : vector<2x1xf32>
    %cst_299 = arith.constant 1.000000e+00 : f32
    %1919 = vector.broadcast %cst_299 : f32 to vector<2x1xf32>
    %1920 = arith.addf %1919, %1918 : vector<2x1xf32>
    %1921 = arith.divf %1919, %1920 : vector<2x1xf32>
    %1922 = vector.extract_strided_slice %1909 {offsets = [0, 2], sizes = [2, 1], strides = [1, 1]} : vector<2x4xf32> to vector<2x1xf32>
    %1923 = math.tanh %1922 : vector<2x1xf32>
    %1924 = vector.extract_strided_slice %1909 {offsets = [0, 3], sizes = [2, 1], strides = [1, 1]} : vector<2x4xf32> to vector<2x1xf32>
    %1925 = arith.negf %1924 : vector<2x1xf32>
    %1926 = math.exp %1925 : vector<2x1xf32>
    %cst_300 = arith.constant 1.000000e+00 : f32
    %1927 = vector.broadcast %cst_300 : f32 to vector<2x1xf32>
    %1928 = arith.addf %1927, %1926 : vector<2x1xf32>
    %1929 = arith.divf %1927, %1928 : vector<2x1xf32>
    %1930 = arith.mulf %1921, %1870 : vector<2x1xf32>
    %1931 = arith.mulf %1915, %1923 : vector<2x1xf32>
    %1932 = arith.addf %1930, %1931 : vector<2x1xf32>
    %1933 = math.tanh %1932 : vector<2x1xf32>
    %1934 = arith.mulf %1929, %1933 : vector<2x1xf32>
    %1935 = vector.broadcast %1901 : vector<2x1xf32> to vector<2x4xf32>
    %1936 = vector.broadcast %1525 : vector<1x4xf32> to vector<2x4xf32>
    %1937 = arith.mulf %1935, %1936 : vector<2x4xf32>
    %1938 = arith.addf %1905, %1937 : vector<2x4xf32>
    %1939 = vector.extract_strided_slice %1938 {offsets = [0, 0], sizes = [2, 1], strides = [1, 1]} : vector<2x4xf32> to vector<2x1xf32>
    %1940 = arith.negf %1939 : vector<2x1xf32>
    %1941 = math.exp %1940 : vector<2x1xf32>
    %cst_301 = arith.constant 1.000000e+00 : f32
    %1942 = vector.broadcast %cst_301 : f32 to vector<2x1xf32>
    %1943 = arith.addf %1942, %1941 : vector<2x1xf32>
    %1944 = arith.divf %1942, %1943 : vector<2x1xf32>
    %1945 = vector.extract_strided_slice %1938 {offsets = [0, 1], sizes = [2, 1], strides = [1, 1]} : vector<2x4xf32> to vector<2x1xf32>
    %1946 = arith.negf %1945 : vector<2x1xf32>
    %1947 = math.exp %1946 : vector<2x1xf32>
    %cst_302 = arith.constant 1.000000e+00 : f32
    %1948 = vector.broadcast %cst_302 : f32 to vector<2x1xf32>
    %1949 = arith.addf %1948, %1947 : vector<2x1xf32>
    %1950 = arith.divf %1948, %1949 : vector<2x1xf32>
    %1951 = vector.extract_strided_slice %1938 {offsets = [0, 2], sizes = [2, 1], strides = [1, 1]} : vector<2x4xf32> to vector<2x1xf32>
    %1952 = math.tanh %1951 : vector<2x1xf32>
    %1953 = vector.extract_strided_slice %1938 {offsets = [0, 3], sizes = [2, 1], strides = [1, 1]} : vector<2x4xf32> to vector<2x1xf32>
    %1954 = arith.negf %1953 : vector<2x1xf32>
    %1955 = math.exp %1954 : vector<2x1xf32>
    %cst_303 = arith.constant 1.000000e+00 : f32
    %1956 = vector.broadcast %cst_303 : f32 to vector<2x1xf32>
    %1957 = arith.addf %1956, %1955 : vector<2x1xf32>
    %1958 = arith.divf %1956, %1957 : vector<2x1xf32>
    %1959 = arith.mulf %1950, %1899 : vector<2x1xf32>
    %1960 = arith.mulf %1944, %1952 : vector<2x1xf32>
    %1961 = arith.addf %1959, %1960 : vector<2x1xf32>
    %1962 = math.tanh %1961 : vector<2x1xf32>
    %1963 = arith.mulf %1958, %1962 : vector<2x1xf32>
    %1964 = vector.extract_strided_slice %1513 {offsets = [7, 0, 0], sizes = [1, 2, 4], strides = [1, 1, 1]} : vector<8x2x4xf32> to vector<1x2x4xf32>
    %1965 = vector.shape_cast %1964 : vector<1x2x4xf32> to vector<2x4xf32>
    %1966 = vector.extract_strided_slice %1521 {offsets = [0, 0, 0], sizes = [1, 2, 4], strides = [1, 1, 1]} : vector<8x2x4xf32> to vector<1x2x4xf32>
    %1967 = vector.shape_cast %1966 : vector<1x2x4xf32> to vector<2x4xf32>
    %1968 = vector.broadcast %1934 : vector<2x1xf32> to vector<2x4xf32>
    %1969 = vector.broadcast %1523 : vector<1x4xf32> to vector<2x4xf32>
    %1970 = arith.mulf %1968, %1969 : vector<2x4xf32>
    %1971 = arith.addf %1965, %1970 : vector<2x4xf32>
    %1972 = vector.extract_strided_slice %1971 {offsets = [0, 0], sizes = [2, 1], strides = [1, 1]} : vector<2x4xf32> to vector<2x1xf32>
    %1973 = arith.negf %1972 : vector<2x1xf32>
    %1974 = math.exp %1973 : vector<2x1xf32>
    %cst_304 = arith.constant 1.000000e+00 : f32
    %1975 = vector.broadcast %cst_304 : f32 to vector<2x1xf32>
    %1976 = arith.addf %1975, %1974 : vector<2x1xf32>
    %1977 = arith.divf %1975, %1976 : vector<2x1xf32>
    %1978 = vector.extract_strided_slice %1971 {offsets = [0, 1], sizes = [2, 1], strides = [1, 1]} : vector<2x4xf32> to vector<2x1xf32>
    %1979 = arith.negf %1978 : vector<2x1xf32>
    %1980 = math.exp %1979 : vector<2x1xf32>
    %cst_305 = arith.constant 1.000000e+00 : f32
    %1981 = vector.broadcast %cst_305 : f32 to vector<2x1xf32>
    %1982 = arith.addf %1981, %1980 : vector<2x1xf32>
    %1983 = arith.divf %1981, %1982 : vector<2x1xf32>
    %1984 = vector.extract_strided_slice %1971 {offsets = [0, 2], sizes = [2, 1], strides = [1, 1]} : vector<2x4xf32> to vector<2x1xf32>
    %1985 = math.tanh %1984 : vector<2x1xf32>
    %1986 = vector.extract_strided_slice %1971 {offsets = [0, 3], sizes = [2, 1], strides = [1, 1]} : vector<2x4xf32> to vector<2x1xf32>
    %1987 = arith.negf %1986 : vector<2x1xf32>
    %1988 = math.exp %1987 : vector<2x1xf32>
    %cst_306 = arith.constant 1.000000e+00 : f32
    %1989 = vector.broadcast %cst_306 : f32 to vector<2x1xf32>
    %1990 = arith.addf %1989, %1988 : vector<2x1xf32>
    %1991 = arith.divf %1989, %1990 : vector<2x1xf32>
    %1992 = arith.mulf %1983, %1932 : vector<2x1xf32>
    %1993 = arith.mulf %1977, %1985 : vector<2x1xf32>
    %1994 = arith.addf %1992, %1993 : vector<2x1xf32>
    %1995 = math.tanh %1994 : vector<2x1xf32>
    %1996 = arith.mulf %1991, %1995 : vector<2x1xf32>
    %1997 = vector.broadcast %1963 : vector<2x1xf32> to vector<2x4xf32>
    %1998 = vector.broadcast %1525 : vector<1x4xf32> to vector<2x4xf32>
    %1999 = arith.mulf %1997, %1998 : vector<2x4xf32>
    %2000 = arith.addf %1967, %1999 : vector<2x4xf32>
    %2001 = vector.extract_strided_slice %2000 {offsets = [0, 0], sizes = [2, 1], strides = [1, 1]} : vector<2x4xf32> to vector<2x1xf32>
    %2002 = arith.negf %2001 : vector<2x1xf32>
    %2003 = math.exp %2002 : vector<2x1xf32>
    %cst_307 = arith.constant 1.000000e+00 : f32
    %2004 = vector.broadcast %cst_307 : f32 to vector<2x1xf32>
    %2005 = arith.addf %2004, %2003 : vector<2x1xf32>
    %2006 = arith.divf %2004, %2005 : vector<2x1xf32>
    %2007 = vector.extract_strided_slice %2000 {offsets = [0, 1], sizes = [2, 1], strides = [1, 1]} : vector<2x4xf32> to vector<2x1xf32>
    %2008 = arith.negf %2007 : vector<2x1xf32>
    %2009 = math.exp %2008 : vector<2x1xf32>
    %cst_308 = arith.constant 1.000000e+00 : f32
    %2010 = vector.broadcast %cst_308 : f32 to vector<2x1xf32>
    %2011 = arith.addf %2010, %2009 : vector<2x1xf32>
    %2012 = arith.divf %2010, %2011 : vector<2x1xf32>
    %2013 = vector.extract_strided_slice %2000 {offsets = [0, 2], sizes = [2, 1], strides = [1, 1]} : vector<2x4xf32> to vector<2x1xf32>
    %2014 = math.tanh %2013 : vector<2x1xf32>
    %2015 = vector.extract_strided_slice %2000 {offsets = [0, 3], sizes = [2, 1], strides = [1, 1]} : vector<2x4xf32> to vector<2x1xf32>
    %2016 = arith.negf %2015 : vector<2x1xf32>
    %2017 = math.exp %2016 : vector<2x1xf32>
    %cst_309 = arith.constant 1.000000e+00 : f32
    %2018 = vector.broadcast %cst_309 : f32 to vector<2x1xf32>
    %2019 = arith.addf %2018, %2017 : vector<2x1xf32>
    %2020 = arith.divf %2018, %2019 : vector<2x1xf32>
    %2021 = arith.mulf %2012, %1961 : vector<2x1xf32>
    %2022 = arith.mulf %2006, %2014 : vector<2x1xf32>
    %2023 = arith.addf %2021, %2022 : vector<2x1xf32>
    %2024 = math.tanh %2023 : vector<2x1xf32>
    %2025 = arith.mulf %2020, %2024 : vector<2x1xf32>
    %2026 = vector.shape_cast %1562 : vector<2x1xf32> to vector<1x2x1xf32>
    %2027 = vector.shape_cast %1624 : vector<2x1xf32> to vector<1x2x1xf32>
    %2028 = vector.shape_cast %1686 : vector<2x1xf32> to vector<1x2x1xf32>
    %2029 = vector.shape_cast %1748 : vector<2x1xf32> to vector<1x2x1xf32>
    %2030 = vector.shape_cast %1810 : vector<2x1xf32> to vector<1x2x1xf32>
    %2031 = vector.shape_cast %1872 : vector<2x1xf32> to vector<1x2x1xf32>
    %2032 = vector.shape_cast %1934 : vector<2x1xf32> to vector<1x2x1xf32>
    %2033 = vector.shape_cast %1996 : vector<2x1xf32> to vector<1x2x1xf32>
    %2034 = tpu.concatenate %2026, %2027, %2028, %2029, %2030, %2031, %2032, %2033 in 0 : vector<1x2x1xf32>, vector<1x2x1xf32>, vector<1x2x1xf32>, vector<1x2x1xf32>, vector<1x2x1xf32>, vector<1x2x1xf32>, vector<1x2x1xf32>, vector<1x2x1xf32> -> vector<8x2x1xf32>
    %2035 = vector.shape_cast %2025 : vector<2x1xf32> to vector<1x2x1xf32>
    %2036 = vector.shape_cast %1963 : vector<2x1xf32> to vector<1x2x1xf32>
    %2037 = vector.shape_cast %1901 : vector<2x1xf32> to vector<1x2x1xf32>
    %2038 = vector.shape_cast %1839 : vector<2x1xf32> to vector<1x2x1xf32>
    %2039 = vector.shape_cast %1777 : vector<2x1xf32> to vector<1x2x1xf32>
    %2040 = vector.shape_cast %1715 : vector<2x1xf32> to vector<1x2x1xf32>
    %2041 = vector.shape_cast %1653 : vector<2x1xf32> to vector<1x2x1xf32>
    %2042 = vector.shape_cast %1591 : vector<2x1xf32> to vector<1x2x1xf32>
    %2043 = tpu.concatenate %2035, %2036, %2037, %2038, %2039, %2040, %2041, %2042 in 0 : vector<1x2x1xf32>, vector<1x2x1xf32>, vector<1x2x1xf32>, vector<1x2x1xf32>, vector<1x2x1xf32>, vector<1x2x1xf32>, vector<1x2x1xf32>, vector<1x2x1xf32> -> vector<8x2x1xf32>
    %2044 = tpu.concatenate %2034, %2043 in 2 : vector<8x2x1xf32>, vector<8x2x1xf32> -> vector<8x2x2xf32>
    %cst_310 = arith.constant dense<0.000000e+00> : vector<8x2xf32>
    %2045 = vector.multi_reduction <add>, %2044, %cst_310 [2] : vector<8x2x2xf32> to vector<8x2xf32>
    %2046 = tpu.transpose %2045, [1, 0] : vector<8x2xf32> -> vector<2x8xf32>
    %c0_311 = arith.constant 0 : index
    %c0_312 = arith.constant 0 : index
    %2047 = vector.load %arg16[%c0_311, %c0_312] : memref<2x8xf32, #tpu.memory_space<vmem>>, vector<2x8xf32>
    tpu.vector_store %arg16[%c0_311, %c0_312], %2046 {strides = array<i32>} : memref<2x8xf32, #tpu.memory_space<vmem>>, vector<2x8xf32>,
    return
  }
}

</mosaic_0001>

<bundles_post_ra>
// kernel: bilstm_vae_forward.1
= control target key start
LH: loop header
LB: loop body
LE: loop exit
PB: predicated region body
PF: predicated region fallthrough
CT: control target
= control target key end

     0   :  { %s11617_s0 = inlined_call_operand.vmem [shape: f32[8,2], index: 0, kind: input, shape index: {}]   ;;  %s11618_s1 = inlined_call_operand.vmem [shape: f32[2,16], index: 1, kind: input, shape index: {}]   ;;  %s11619_s2 = inlined_call_operand.vmem [shape: f32[2,1,200], index: 2, kind: input, shape index: {}]   ;;  %s11620_s3 = inlined_call_operand.vmem [shape: f32[2,50,200], index: 3, kind: input, shape index: {}]   ;;  %s11621_s4 = inlined_call_operand.vmem [shape: f32[2,1,200], index: 4, kind: input, shape index: {}]   ;;  %s11622_s5 = inlined_call_operand.vmem [shape: f32[2,100,32], index: 5, kind: input, shape index: {}]   ;;  %s11623_s6 = inlined_call_operand.vmem [shape: f32[2,8,32], index: 6, kind: input, shape index: {}]   ;;  %s11624_s7 = inlined_call_operand.vmem [shape: f32[2,1,32], index: 7, kind: input, shape index: {}]   ;;  %s11625_s8 = inlined_call_operand.vmem [shape: f32[16,32], index: 8, kind: input, shape index: {}]   ;;  %s11626_s9 = inlined_call_operand.vmem [shape: f32[1,32], index: 9, kind: input, shape index: {}]   ;;  %s11627_s10 = inlined_call_operand.vmem [shape: f32[2,16,200], index: 10, kind: input, shape index: {}]   ;;  %s11628_s11 = inlined_call_operand.vmem [shape: f32[2,50,200], index: 11, kind: input, shape index: {}]   ;;  %s11629_s12 = inlined_call_operand.vmem [shape: f32[2,1,200], index: 12, kind: input, shape index: {}]   ;;  %s11630_s13 = inlined_call_operand.vmem [shape: f32[2,100,4], index: 13, kind: input, shape index: {}]   ;;  %s11631_s14 = inlined_call_operand.vmem [shape: f32[2,1,4], index: 14, kind: input, shape index: {}]   ;;  %s11632_s15 = inlined_call_operand.vmem [shape: f32[2,1,4], index: 15, kind: input, shape index: {}]   ;;  %s11633_s16 = inlined_call_operand.hbm [shape: f32[2,8], index: 16, kind: output, shape index: {0}]   ;;  %s11634_s17 = inlined_call_operand.hbm [shape: f32[2,16], index: 17, kind: output, shape index: {1}]   ;;  %s11635_s18 = inlined_call_operand.hbm [shape: f32[2,16], index: 18, kind: output, shape index: {2}]  }
   0x1   :  { %11652 = sst [smem:[#allocation18_spill]] %s11617_s0 }
   0x2   :  { %11653 = sst [smem:[#allocation19_spill]] %s11618_s1 }
   0x3   :  { %11654 = sst [smem:[#allocation20_spill]] %s11619_s2 }
   0x4   :  { %24 = vsyncpa [#allocation3], 0  ;;  %v9066_v0 = vld [vmem:[%s11620_s3 + $0xd8] sm:$0x3]  ;;  %vm259_vm0 = vcmask 1041408   ;;  %v9076_v2 = vld [vmem:[%s11620_s3 + $0xc8] sm:$0xff]  ;;  %v11637_v5 = vlaneseq }
   0x5   :  { %v9071_v1 = vld [vmem:[%s11620_s3 + $0xd0] sm:$0x3]  ;;  %7582 = vmatprep.subr.msk.mxu1 %vm259_vm0, %v9066_v0  ;;  %v9083_v3 = vld [vmem:[%s11620_s3 + $0xc0] sm:$0xff]  ;;  %v9088_v4 = vld [vmem:[%s11620_s3 + $0x68] sm:$0x3]  ;;  %s11656_s19 = sld [smem:[#allocation18_spill]] }
   0x6   :  { %7583 = vmatpush1.msk.msra.mxu1 %vm259_vm0, %v9071_v1  ;;  %7578 = vmatprep.subr.msk.mxu0 %vm259_vm0, %v9088_v4  ;;  %v9097_v6 = vld [vmem:[%s11620_s3 + $0xb8] sm:$0xff]  ;;  %v9102_v7 = vld [vmem:[%s11620_s3 + $0x60] sm:$0x3]  ;;  %v9115_v9 = vld [vmem:[%s11620_s3 + $0xb0] sm:$0xff]  ;;  %v9152_v16 = vshrl.u32 %v11637_v5, 7 }
   0x7   :  { %v9107_v8 = vld [vmem:[%s11620_s3 + $0x58] sm:$0xff]  ;;  %401 = vmatprep.subr.mxu1 %v9076_v2  ;;  %7579 = vmatpush1.msk.msra.mxu0 %vm259_vm0, %v9102_v7  ;;  %v9120_v10 = vld [vmem:[%s11620_s3 + $0x50] sm:$0xff]  ;;  %v9127_v11 = vld [vmem:[%s11620_s3 + $0xa8] sm:$0xff] }
   0x8   :  { %402 = vmatpush1.msra.mxu1 %v9083_v3  ;;  %286 = vmatprep.subr.mxu0 %v9107_v8  ;;  %v9132_v12 = vld [vmem:[%s11620_s3 + $0x48] sm:$0xff]  ;;  %v9137_v13 = vld [vmem:[%s11620_s3 + $0x40] sm:$0xff]  ;;  %v9149_v15 = vld [vmem:[%s11620_s3 + $0x38] sm:$0xff]  ;;  %11655 = vst [vmem:[#allocation9_spill] sm:$0xff] %v9152_v16  ;;  %v110_v25 = vsub.s32 7, %v9152_v16 }
   0x9   :  { %403 = vmatprep.subr.mxu1 %v9097_v6  ;;  %287 = vmatpush1.msra.mxu0 %v9120_v10  ;;  %v9144_v14 = vld [vmem:[%s11620_s3 + $0xa0] sm:$0xff]  ;;  %v9159_v17 = vld [vmem:[%s11620_s3 + $0x98] sm:$0xff]  ;;  %v9164_v18 = vld [vmem:[%s11620_s3 + $0x30] sm:$0xff] }
   0xa   :  { %404 = vmatpush1.msra.mxu1 %v9115_v9  ;;  %288 = vmatprep.subr.mxu0 %v9132_v12  ;;  %v9171_v19 = vld [vmem:[%s11620_s3 + $0x90] sm:$0xff]  ;;  %v9176_v20 = vld [vmem:[%s11620_s3 + $0x28] sm:$0xff]  ;;  %v9188_v22 = vld [vmem:[%s11620_s3 + $0x20] sm:$0xff] }
   0xb   :  { %405 = vmatprep.subr.mxu1 %v9127_v11  ;;  %289 = vmatpush1.msra.mxu0 %v9137_v13  ;;  %v9183_v21 = vld [vmem:[%s11620_s3 + $0x88] sm:$0xff]  ;;  %v9195_v23 = vld [vmem:[%s11620_s3 + $0x80] sm:$0xff]  ;;  %v9200_v24 = vld [vmem:[%s11620_s3 + $0x78] sm:$0xff] }
   0xc   :  { %406 = vmatpush1.msra.mxu1 %v9144_v14  ;;  %290 = vmatprep.subr.mxu0 %v9149_v15  ;;  %v9208_v26 = vld [vmem:[%s11620_s3 + $0x18] sm:$0xff]  ;;  %v9213_v27 = vld [vmem:[%s11656_s19] sm:$0xff] }
   0xd   :  { %407 = vmatprep.subr.mxu1 %v9159_v17  ;;  %291 = vmatpush1.msra.mxu0 %v9164_v18 }
   0xe   :  { %408 = vmatpush1.msra.mxu1 %v9171_v19  ;;  %292 = vmatprep.subr.mxu0 %v9176_v20 }
   0xf   :  { %25 = vsyncpa [#allocation5], 0  ;;  %409 = vmatprep.subr.mxu1 %v9183_v21  ;;  %293 = vmatpush1.msra.mxu0 %v9188_v22  ;;  %v9220_v28 = vld [vmem:[%s11620_s3 + $0x70] sm:$0xff]  ;;  %v11638_v30 = vmov 0.0   ;;  %v9232_v31 = vld [vmem:[%s11620_s3 + $0x8] sm:$0xff]  ;;  %v111_v33 = vrot.slane %v9213_v27, %v110_v25  ;;  %v9243_v34 = vsub.s32 0, %v9152_v16 }
  0x10   :  { %v9225_v29 = vld [vmem:[%s11620_s3 + $0x10] sm:$0xff]  ;;  %410 = vmatpush1.msra.mxu1 %v9195_v23  ;;  %445 = vmatprep.mubr.f32.mxu1 %v11638_v30  ;;  %v9239_v32 = vld [vmem:[%s11620_s3] sm:$0xff]  ;;  %s11658_s28 = sld [smem:[#allocation20_spill]]  ;;  %v9299_v38 = vsub.s32 1, %v9152_v16  ;;  %vm360_vm1 = vcmask 228352   ;;  %s8950_s21 = smov 50  }
  0x11   :  { %411 = vmatprep.subr.mxu1 %v9200_v24  ;;  %294 = vmatprep.subr.mxu0 %v9208_v26  ;;  %11657 = vst [vmem:[#allocation10_spill] sm:$0xff] %v9243_v34  ;;  %v62_v35 = vrot.slane %v9213_v27, %v9243_v34  ;;  %v146_v40 = vld [vmem:[%s11621_s4 + $0x2] sm:$0x3]  ;;  %v145_v47 = vld [vmem:[%s11621_s4] sm:$0x3]  ;;  %s8949_s4 = smov 28  }
  0x12   :  { %412 = vmatpush1.msra.mxu1 %v9220_v28  ;;  %295 = vmatpush1.msra.mxu0 %v9225_v29  ;;  %11659 = vst [vmem:[#allocation11_spill] sm:$0xff] %v9299_v38  ;;  %v9312_v43 = vrot.slane %v146_v40, %v9243_v34  ;;  %v9332_v51 = vrot.slane %v146_v40, %v9299_v38  ;;  %s8951_s22 = smov 100   ;;  %s8952_s2 = smov 106   ;;  %vm255_vm2 = vcmask 408576   ;;  %vm2198_vm3 = vcmask 1043456  }
  0x13   :  { %446 = vmatmul.mubr.f32.vlgmr.msra.gmra.mxu1 %v11638_v30  ;;  %296 = vmatprep.subr.mxu0 %v9232_v31  ;;  %v9337_v53 = vrot.slane %v145_v47, %v9243_v34  ;;  %v9344_v59 = vrot.slane %v145_v47, %v9299_v38  ;;  %vm2193_vm4 = vcmask 818176   ;;  %vm8954_vm5 = vmmov 0   ;;  %s8956_s24 = smov 8   ;;  %s8957_s25 = smov 16  }
  0x14   :  { %297 = vmatpush1.msra.mxu0 %v9239_v32  ;;  %330 = vmatprep.mubr.f32.mxu0 %v11638_v30  ;;  %s8958_s26 = smov 104   ;;  %vm2449_vm6 = vcmask 64512   ;;  %vm4172_vm7 = vcmask 130048   ;;  %vm4256_vm8 = vcmask 123904   ;;  %s11674_s1 = sld [smem:[#allocation19_spill]]  ;;  %vm7412_vm9 = vcmask 7168  }
  0x15   :  { %331 = vmatmul.mubr.f32.vlgmr.msra.gmra.mxu0 %v11638_v30  ;;  %113 = vbcast.lane.b32.xlu0 %v111_v33, 256  ;;  %vm7421_vm10 = vcmask 9216   ;;  %vm7488_vm11 = vcmask 1041409   ;;  %vm7490_vm12 = vcmask 1042434   ;;  %vm7492_vm13 = vcmask 1043459  }
  0x16   :  { %7591 = vmatprep.subr.msk.mxu1 %vm259_vm0, %v9066_v0  ;;  %7586 = vmatprep.subr.msk.mxu0 %vm259_vm0, %v9088_v4  ;;  %v116_v36 = vld [vmem:[%s11658_s28 + $0x2] sm:$0x3]  ;;  %v115_v41 = vld [vmem:[%s11658_s28] sm:$0x3]  ;;  %vm7494_vm14 = vcmask 1044484   ;;  %vm7496_vm15 = vcmask 1045509  }
  0x17   :  { %7592 = vmatpush1.msk.msra.mxu1 %vm259_vm0, %v9071_v1  ;;  %7587 = vmatpush1.msk.msra.mxu0 %vm259_vm0, %v9102_v7  ;;  %v9296_v37 = vrot.slane %v116_v36, %v9243_v34  ;;  %v9315_v44 = vrot.slane %v116_v36, %v9299_v38  ;;  %v9320_v46 = vrot.slane %v115_v41, %v9243_v34 }
  0x18   :  { %627 = vmatprep.subr.mxu1 %v9076_v2  ;;  %514 = vmatprep.subr.mxu0 %v9107_v8  ;;  %v9326_v48 = vrot.slane %v115_v41, %v9299_v38 }
  0x19   :  { %64 = vbcast.lane.b32.xlu0 %v62_v35, 256  ;;  %628 = vmatpush1.msra.mxu1 %v9083_v3 }
  0x1a   :  { %629 = vmatprep.subr.mxu1 %v9097_v6  ;;  %515 = vmatpush1.msra.mxu0 %v9120_v10 }
  0x1b   :  { %630 = vmatpush1.msra.mxu1 %v9115_v9  ;;  %516 = vmatprep.subr.mxu0 %v9132_v12 }
  0x1c   :  { %631 = vmatprep.subr.mxu1 %v9127_v11  ;;  %517 = vmatpush1.msra.mxu0 %v9137_v13 }
  0x1d   :  { %632 = vmatpush1.msra.mxu1 %v9144_v14  ;;  %518 = vmatprep.subr.mxu0 %v9149_v15 }
  0x1e   :  { %633 = vmatprep.subr.mxu1 %v9159_v17  ;;  %519 = vmatpush1.msra.mxu0 %v9164_v18 }
  0x1f   :  { %634 = vmatpush1.msra.mxu1 %v9171_v19  ;;  %520 = vmatprep.subr.mxu0 %v9176_v20 }
  0x20   :  { %635 = vmatprep.subr.mxu1 %v9183_v21  ;;  %521 = vmatpush1.msra.mxu0 %v9188_v22 }
  0x21   :  { %636 = vmatpush1.msra.mxu1 %v9195_v23  ;;  %671 = vmatprep.mubr.f32.mxu1 %v11638_v30 }
  0x22   :  { %637 = vmatprep.subr.mxu1 %v9200_v24  ;;  %522 = vmatprep.subr.mxu0 %v9208_v26 }
  0x23   :  { %638 = vmatpush1.msra.mxu1 %v9220_v28  ;;  %523 = vmatpush1.msra.mxu0 %v9225_v29 }
  0x24   :  { %524 = vmatprep.subr.mxu0 %v9232_v31  ;;  %558 = vmatprep.mubr.f32.mxu0 %v11638_v30 }
  0x25   :  { %525 = vmatpush1.msra.mxu0 %v9239_v32  ;;  %7601 = vmatprep.subr.msk.mxu1 %vm259_vm0, %v9066_v0 }
  0x26   :  { %7596 = vmatprep.subr.msk.mxu0 %vm259_vm0, %v9088_v4 }
  0x87   :  { %v9301_v39 = vpop.permute.xlu0 %113 }
  0x88   :  { %v226_v42 = vmul.f32 %v9296_v37, %v9301_v39  ;;  %v227_v50 = vmul.f32 %v9315_v44, %v9301_v39 }
  0x8a   :  { %v253_v49 = vadd.f32 %v9312_v43, %v226_v42  ;;  %v254_v57 = vadd.f32 %v9332_v51, %v227_v50 }
  0x8b   :  { %v9317_v45 = vpop.permute.xlu0 %64 }
  0x8c   :  { %v158_v52 = vmul.f32 %v9320_v46, %v9317_v45  ;;  %v159_v54 = vmul.f32 %v9326_v48, %v9317_v45 }
  0x8e   :  { %v185_v58 = vadd.f32 %v9337_v53, %v158_v52  ;;  %v186_v63 = vadd.f32 %v9344_v59, %v159_v54 }
  0xd3   :  { %v447_v55 = vpop.f32.mrf.mxu1 }
  0xd4   :  { %v452_v56 = vadd.f32 %v447_v55, %v253_v49 }
  0xd5   :  { %v449_v60 = vpop.f32.mrf.mxu1  ;;  %v332_v61 = vpop.f32.mrf.mxu0 }
  0xd6   :  { %8122 = vtanh.f32 %v452_v56  ;;  %v453_v62 = vadd.f32 %v449_v60, %v254_v57  ;;  %v337_v33 = vadd.f32 %v332_v61, %v185_v58  ;;  %v7584_v47 = vmul.f32 -1.442695, %v452_v56 }
  0xd7   :  { %v334_v25 = vpop.f32.mrf.mxu0 }
  0xd8   :  { %8124 = vtanh.f32 %v453_v62  ;;  %v338_v35 = vadd.f32 %v334_v25, %v186_v63  ;;  %v7580_v49 = vmul.f32 -1.442695, %v337_v33 }
  0xd9   :  { %8126 = vtanh.f32 %v337_v33 }
  0xda   :  { %8128 = vtanh.f32 %v338_v35 }
  0xdb   :  { %8130 = vpow2.f32 %v7584_v47 }
  0xdc   :  { %8132 = vpow2.f32 %v7580_v49 }
  0xe3   :  { %v8123_v36 = vpop.eup %8122 }
  0xe4   :  { %471 = vrot.lane.b32.xlu1 %v8123_v36, %s8949_s4 }
  0xe5   :  { %v8125_v40 = vpop.eup %8124 }
  0xe6   :  { %v8127_v41 = vpop.eup %8126 }
  0xe7   :  { %356 = vrot.lane.b32.xlu0 %v8127_v41, %s8949_s4  ;;  %v8129_v42 = vpop.eup %8128 }
  0xe8   :  { %473 = vrot.lane.b32.xlu1 %v8125_v40, %s8949_s4  ;;  %v8131_v50 = vpop.eup %8130 }
  0xe9   :  { %v457_v52 = vadd.f32 1.0, %v8131_v50  ;;  %v8133_v54 = vpop.eup %8132 }
  0xea   :  { %v342_v55 = vadd.f32 1.0, %v8133_v54 }
  0xeb   :  { %8134 = vrcp.f32 %v457_v52 }
  0xec   :  { %358 = vrot.lane.b32.xlu1 %v8129_v42, %s8949_s4  ;;  %8136 = vrcp.f32 %v342_v55 }
  0xf8   :  { %v8135_v60 = vpop.eup %8134 }
  0xf9   :  { %v8137_v56 = vpop.eup %8136  ;;  %v468_v41 = vmul.f32 0.0, %v8135_v60 }
  0xfa   :  { %v353_v49 = vmul.f32 0.0, %v8137_v56 }
 0x156   :  { %v472_v57 = vpop.permute.xlu1 %471 }
 0x159   :  { %v357_v25 = vpop.permute.xlu0 %356 }
 0x15a   :  { %v474_v58 = vpop.permute.xlu1 %473 }
 0x15b   :  { %v475_v61 = vsel %vm360_vm1, %v472_v57, %v474_v58  ;;  %v7585_v57 = vmul.f32 -1.442695, %v453_v62  ;;  %v7581_v58 = vmul.f32 -1.442695, %v338_v35 }
 0x15c   :  { %v477_v63 = vmul.f32 %v8135_v60, %v475_v61 }
 0x15e   :  { %v359_v36 = vpop.permute.xlu1 %358  ;;  %479 = vrot.lane.b32.xlu0 %v477_v63, %s8950_s21 }
 0x15f   :  { %v361_v33 = vsel %vm360_vm1, %v357_v25, %v359_v36  ;;  %v103_v36 = vsub.s32 6, %v9152_v16 }
 0x160   :  { %v363_v40 = vmul.f32 %v8137_v56, %v361_v33 }
 0x161   :  { %v104_v62 = vrot.slane %v9213_v27, %v103_v36 }
 0x162   :  { %365 = vrot.lane.b32.xlu1 %v363_v40, %s8950_s21 }
 0x1d0   :  { %v480_v42 = vpop.permute.xlu0 %479 }
 0x1d1   :  { %v9355_v47 = vadd.f32 %v480_v42, %v468_v41 }
 0x1d3   :  { %8138 = vtanh.f32 %v9355_v47 }
 0x1d4   :  { %v366_v50 = vpop.permute.xlu1 %365 }
 0x1d5   :  { %v9358_v52 = vadd.f32 %v366_v50, %v353_v49  ;;  %v69_v49 = vrot.slane %v9213_v27, %v9299_v38 }
 0x1d7   :  { %8140 = vtanh.f32 %v9358_v52 }
 0x1d8   :  { %8142 = vpow2.f32 %v7585_v57 }
 0x1d9   :  { %8144 = vpow2.f32 %v7581_v58 }
 0x1e0   :  { %v8139_v54 = vpop.eup %8138 }
 0x1e1   :  { %485 = vrot.lane.b32.xlu0 %v8139_v54, %s8951_s22 }
 0x1e4   :  { %v8141_v55 = vpop.eup %8140 }
 0x1e5   :  { %371 = vrot.lane.b32.xlu1 %v8141_v55, %s8951_s22  ;;  %v8143_v60 = vpop.eup %8142 }
 0x1e6   :  { %v465_v61 = vadd.f32 1.0, %v8143_v60  ;;  %v8145_v63 = vpop.eup %8144 }
 0x1e7   :  { %v350_v25 = vadd.f32 1.0, %v8145_v63 }
 0x1e8   :  { %8146 = vrcp.f32 %v465_v61 }
 0x1e9   :  { %8148 = vrcp.f32 %v350_v25 }
 0x1f5   :  { %v8147_v56 = vpop.eup %8146 }
 0x1f6   :  { %v8149_v35 = vpop.eup %8148 }
 0x253   :  { %v486_v33 = vpop.permute.xlu0 %485 }
 0x254   :  { %v9364_v40 = vmul.f32 %v8147_v56, %v486_v33 }
 0x256   :  { %11660 = vst [vmem:[#allocation12_spill] sm:$0xff] %v9364_v40  ;;  %603 = vrot.lane.b32.xlu0 %v9364_v40, %s8952_s2 }
 0x257   :  { %v372_v41 = vpop.permute.xlu1 %371 }
 0x258   :  { %v374_v42 = vmul.f32 %v8149_v35, %v372_v41 }
 0x25a   :  { %490 = vrot.lane.b32.xlu1 %v374_v42, %s8952_s2  ;;  %106 = vbcast.lane.b32.xlu0 %v104_v62, 256 }
 0x25e   :  { %71 = vbcast.lane.b32.xlu1 %v69_v49, 256 }
 0x2c8   :  { %v604_v50 = vpop.permute.xlu0 %603 }
 0x2c9   :  { %7593 = vmatmul.mubr.msk.f32.vlgmr.msra.gmra.mxu1 %vm255_vm2, %v604_v50 }
 0x2ca   :  { %7602 = vmatpush1.msk.msra.mxu1 %vm259_vm0, %v9071_v1  ;;  %897 = vmatprep.mubr.f32.mxu1 %v11638_v30 }
 0x2cb   :  { %853 = vmatprep.subr.mxu1 %v9076_v2 }
 0x2cc   :  { %v9377_v54 = vpop.permute.xlu1 %490  ;;  %854 = vmatpush1.msra.mxu1 %v9083_v3  ;;  %v9411_v55 = vpop.permute.xlu0 %106 }
 0x2cd   :  { %11661 = vst [vmem:[#allocation13_spill] sm:$0xff] %v9377_v54  ;;  %7588 = vmatmul.mubr.msk.f32.vlgmr.msra.gmra.mxu0 %vm255_vm2, %v9377_v54  ;;  %855 = vmatprep.subr.mxu1 %v9097_v6  ;;  %v224_v57 = vmul.f32 %v9296_v37, %v9411_v55  ;;  %v225_v60 = vmul.f32 %v9315_v44, %v9411_v55 }
 0x2ce   :  { %7597 = vmatpush1.msk.msra.mxu0 %vm259_vm0, %v9102_v7  ;;  %856 = vmatpush1.msra.mxu1 %v9115_v9 }
 0x2cf   :  { %740 = vmatprep.subr.mxu0 %v9107_v8  ;;  %857 = vmatprep.subr.mxu1 %v9127_v11  ;;  %v251_v61 = vadd.f32 %v9312_v43, %v224_v57  ;;  %v252_v25 = vadd.f32 %v9332_v51, %v225_v60 }
 0x2d0   :  { %741 = vmatpush1.msra.mxu0 %v9120_v10  ;;  %858 = vmatpush1.msra.mxu1 %v9144_v14  ;;  %v9415_v58 = vpop.permute.xlu1 %71 }
 0x2d1   :  { %742 = vmatprep.subr.mxu0 %v9132_v12  ;;  %859 = vmatprep.subr.mxu1 %v9159_v17  ;;  %v160_v63 = vmul.f32 %v9320_v46, %v9415_v58  ;;  %v161_v36 = vmul.f32 %v9326_v48, %v9415_v58 }
 0x2d2   :  { %743 = vmatpush1.msra.mxu0 %v9137_v13  ;;  %860 = vmatpush1.msra.mxu1 %v9171_v19 }
 0x2d3   :  { %744 = vmatprep.subr.mxu0 %v9149_v15  ;;  %861 = vmatprep.subr.mxu1 %v9183_v21  ;;  %v187_v62 = vadd.f32 %v9337_v53, %v160_v63  ;;  %v188_v42 = vadd.f32 %v9344_v59, %v161_v36 }
 0x2d4   :  { %745 = vmatpush1.msra.mxu0 %v9164_v18  ;;  %862 = vmatpush1.msra.mxu1 %v9195_v23 }
 0x2d5   :  { %746 = vmatprep.subr.mxu0 %v9176_v20  ;;  %863 = vmatprep.subr.mxu1 %v9200_v24 }
 0x2d6   :  { %747 = vmatpush1.msra.mxu0 %v9188_v22  ;;  %864 = vmatpush1.msra.mxu1 %v9220_v28 }
 0x2d7   :  { %748 = vmatprep.subr.mxu0 %v9208_v26  ;;  %784 = vmatprep.mubr.f32.mxu0 %v11638_v30 }
 0x2d8   :  { %749 = vmatpush1.msra.mxu0 %v9225_v29  ;;  %7611 = vmatprep.subr.msk.mxu1 %vm259_vm0, %v9066_v0 }
 0x2d9   :  { %750 = vmatprep.subr.mxu0 %v9232_v31 }
 0x2da   :  { %751 = vmatpush1.msra.mxu0 %v9239_v32 }
 0x2db   :  { %7606 = vmatprep.subr.msk.mxu0 %vm259_vm0, %v9088_v4 }
 0x389   :  { %v673_v56 = vpop.f32.mrf.mxu1 }
 0x38a   :  { %v678_v33 = vadd.f32 %v673_v56, %v251_v61 }
 0x38b   :  { %v675_v35 = vpop.f32.mrf.mxu1 }
 0x38c   :  { %8150 = vtanh.f32 %v678_v33  ;;  %v679_v41 = vadd.f32 %v675_v35, %v252_v25  ;;  %v7594_v25 = vmul.f32 -1.442695, %v678_v33 }
 0x38d   :  { %v560_v49 = vpop.f32.mrf.mxu0 }
 0x38e   :  { %v565_v50 = vadd.f32 %v560_v49, %v187_v62  ;;  %8152 = vtanh.f32 %v679_v41 }
 0x38f   :  { %v562_v57 = vpop.f32.mrf.mxu0 }
 0x390   :  { %v566_v5 = vadd.f32 %v562_v57, %v188_v42  ;;  %8154 = vtanh.f32 %v565_v50  ;;  %v7589_v36 = vmul.f32 -1.442695, %v565_v50 }
 0x392   :  { %8156 = vtanh.f32 %v566_v5 }
 0x393   :  { %8158 = vpow2.f32 %v7594_v25 }
 0x394   :  { %8160 = vpow2.f32 %v7589_v36 }
 0x399   :  { %v8151_v60 = vpop.eup %8150 }
 0x39a   :  { %697 = vrot.lane.b32.xlu0 %v8151_v60, %s8949_s4 }
 0x39b   :  { %v8153_v30 = vpop.eup %8152 }
 0x39c   :  { %699 = vrot.lane.b32.xlu1 %v8153_v30, %s8949_s4 }
 0x39d   :  { %v8155_v61 = vpop.eup %8154 }
 0x39e   :  { %584 = vrot.lane.b32.xlu0 %v8155_v61, %s8949_s4 }
 0x39f   :  { %v8157_v63 = vpop.eup %8156 }
 0x3a0   :  { %586 = vrot.lane.b32.xlu1 %v8157_v63, %s8949_s4  ;;  %v8159_v56 = vpop.eup %8158 }
 0x3a1   :  { %v683_v62 = vadd.f32 1.0, %v8159_v56  ;;  %v8161_v35 = vpop.eup %8160 }
 0x3a2   :  { %v570_v42 = vadd.f32 1.0, %v8161_v35 }
 0x3a3   :  { %8162 = vrcp.f32 %v683_v62 }
 0x3a4   :  { %8164 = vrcp.f32 %v570_v42 }
 0x3b0   :  { %v8163_v60 = vpop.eup %8162 }
 0x3b1   :  { %v8165_v33 = vpop.eup %8164  ;;  %v694_v36 = vmul.f32 %v8163_v60, %v9355_v47  ;;  %v7590_v47 = vmul.f32 -1.442695, %v566_v5  ;;  %v75_v5 = vsub.s32 2, %v9152_v16 }
 0x3b2   :  { %v581_v35 = vmul.f32 %v8165_v33, %v9358_v52 }
 0x40c   :  { %v698_v49 = vpop.permute.xlu0 %697 }
 0x40e   :  { %v700_v57 = vpop.permute.xlu1 %699 }
 0x40f   :  { %v701_v30 = vsel %vm360_vm1, %v698_v49, %v700_v57 }
 0x410   :  { %v703_v38 = vmul.f32 %v8163_v60, %v701_v30  ;;  %v585_v61 = vpop.permute.xlu0 %584  ;;  %v7595_v30 = vmul.f32 -1.442695, %v679_v41 }
 0x412   :  { %705 = vrot.lane.b32.xlu0 %v703_v38, %s8950_s21  ;;  %v587_v63 = vpop.permute.xlu1 %586 }
 0x413   :  { %v588_v50 = vsel %vm360_vm1, %v585_v61, %v587_v63 }
 0x414   :  { %v590_v25 = vmul.f32 %v8165_v33, %v588_v50  ;;  %v96_v33 = vsub.s32 5, %v9152_v16 }
 0x416   :  { %592 = vrot.lane.b32.xlu1 %v590_v25, %s8950_s21  ;;  %v97_v41 = vrot.slane %v9213_v27, %v96_v33 }
 0x484   :  { %v706_v56 = vpop.permute.xlu0 %705 }
 0x485   :  { %v9436_v62 = vadd.f32 %v706_v56, %v694_v36 }
 0x487   :  { %8166 = vtanh.f32 %v9436_v62 }
 0x488   :  { %v593_v42 = vpop.permute.xlu1 %592 }
 0x489   :  { %v9440_v49 = vadd.f32 %v593_v42, %v581_v35 }
 0x48b   :  { %8168 = vtanh.f32 %v9440_v49 }
 0x48c   :  { %8170 = vpow2.f32 %v7595_v30  ;;  %v11663_v30 = vmov 0.0  }
 0x48d   :  { %8172 = vpow2.f32 %v7590_v47 }
 0x494   :  { %v8167_v38 = vpop.eup %8166 }
 0x495   :  { %711 = vrot.lane.b32.xlu0 %v8167_v38, %s8951_s22  ;;  %v76_v38 = vrot.slane %v9213_v27, %v75_v5 }
 0x498   :  { %v8169_v57 = vpop.eup %8168 }
 0x499   :  { %598 = vrot.lane.b32.xlu1 %v8169_v57, %s8951_s22  ;;  %v8171_v60 = vpop.eup %8170 }
 0x49a   :  { %v691_v61 = vadd.f32 1.0, %v8171_v60  ;;  %v8173_v63 = vpop.eup %8172 }
 0x49b   :  { %v578_v52 = vadd.f32 1.0, %v8173_v63 }
 0x49c   :  { %8174 = vrcp.f32 %v691_v61 }
 0x49d   :  { %8176 = vrcp.f32 %v578_v52 }
 0x4a9   :  { %v8175_v50 = vpop.eup %8174 }
 0x4aa   :  { %v8177_v56 = vpop.eup %8176 }
 0x507   :  { %v712_v25 = vpop.permute.xlu0 %711 }
 0x508   :  { %v9446_v36 = vmul.f32 %v8175_v50, %v712_v25 }
 0x50a   :  { %11662 = vst [vmem:[#allocation14_spill] sm:$0xff] %v9446_v36  ;;  %829 = vrot.lane.b32.xlu0 %v9446_v36, %s8952_s2 }
 0x50b   :  { %v599_v35 = vpop.permute.xlu1 %598 }
 0x50c   :  { %v601_v42 = vmul.f32 %v8177_v56, %v599_v35 }
 0x50e   :  { %716 = vrot.lane.b32.xlu1 %v601_v42, %s8952_s2  ;;  %99 = vbcast.lane.b32.xlu0 %v97_v41, 256 }
 0x512   :  { %78 = vbcast.lane.b32.xlu1 %v76_v38, 256 }
 0x57c   :  { %v830_v57 = vpop.permute.xlu0 %829 }
 0x57d   :  { %7603 = vmatmul.mubr.msk.f32.vlgmr.msra.gmra.mxu1 %vm255_vm2, %v830_v57 }
 0x57e   :  { %7612 = vmatpush1.msk.msra.mxu1 %vm259_vm0, %v9071_v1  ;;  %1123 = vmatprep.mubr.f32.mxu1 %v11663_v30 }
 0x57f   :  { %1079 = vmatprep.subr.mxu1 %v9076_v2 }
 0x580   :  { %v9459_v47 = vpop.permute.xlu1 %716  ;;  %1080 = vmatpush1.msra.mxu1 %v9083_v3  ;;  %v9493_v60 = vpop.permute.xlu0 %99 }
 0x581   :  { %11664 = vst [vmem:[#allocation15_spill] sm:$0xff] %v9459_v47  ;;  %7598 = vmatmul.mubr.msk.f32.vlgmr.msra.gmra.mxu0 %vm255_vm2, %v9459_v47  ;;  %1081 = vmatprep.subr.mxu1 %v9097_v6  ;;  %v222_v61 = vmul.f32 %v9296_v37, %v9493_v60  ;;  %v223_v52 = vmul.f32 %v9315_v44, %v9493_v60 }
 0x582   :  { %7607 = vmatpush1.msk.msra.mxu0 %vm259_vm0, %v9102_v7  ;;  %1082 = vmatpush1.msra.mxu1 %v9115_v9 }
 0x583   :  { %966 = vmatprep.subr.mxu0 %v9107_v8  ;;  %1083 = vmatprep.subr.mxu1 %v9127_v11  ;;  %v249_v33 = vadd.f32 %v9312_v43, %v222_v61  ;;  %v250_v25 = vadd.f32 %v9332_v51, %v223_v52 }
 0x584   :  { %967 = vmatpush1.msra.mxu0 %v9120_v10  ;;  %1084 = vmatpush1.msra.mxu1 %v9144_v14  ;;  %v9497_v63 = vpop.permute.xlu1 %78 }
 0x585   :  { %968 = vmatprep.subr.mxu0 %v9132_v12  ;;  %1085 = vmatprep.subr.mxu1 %v9159_v17  ;;  %v162_v50 = vmul.f32 %v9320_v46, %v9497_v63  ;;  %v163_v41 = vmul.f32 %v9326_v48, %v9497_v63 }
 0x586   :  { %969 = vmatpush1.msra.mxu0 %v9137_v13  ;;  %1086 = vmatpush1.msra.mxu1 %v9171_v19 }
 0x587   :  { %970 = vmatprep.subr.mxu0 %v9149_v15  ;;  %1087 = vmatprep.subr.mxu1 %v9183_v21  ;;  %v189_v35 = vadd.f32 %v9337_v53, %v162_v50  ;;  %v190_v57 = vadd.f32 %v9344_v59, %v163_v41 }
 0x588   :  { %971 = vmatpush1.msra.mxu0 %v9164_v18  ;;  %1088 = vmatpush1.msra.mxu1 %v9195_v23 }
 0x589   :  { %972 = vmatprep.subr.mxu0 %v9176_v20  ;;  %1089 = vmatprep.subr.mxu1 %v9200_v24 }
 0x58a   :  { %973 = vmatpush1.msra.mxu0 %v9188_v22  ;;  %1090 = vmatpush1.msra.mxu1 %v9220_v28 }
 0x58b   :  { %974 = vmatprep.subr.mxu0 %v9208_v26  ;;  %1010 = vmatprep.mubr.f32.mxu0 %v11663_v30 }
 0x58c   :  { %975 = vmatpush1.msra.mxu0 %v9225_v29  ;;  %7621 = vmatprep.subr.msk.mxu1 %vm259_vm0, %v9066_v0 }
 0x58d   :  { %976 = vmatprep.subr.mxu0 %v9232_v31 }
 0x58e   :  { %977 = vmatpush1.msra.mxu0 %v9239_v32 }
 0x58f   :  { %7616 = vmatprep.subr.msk.mxu0 %vm259_vm0, %v9088_v4 }
 0x63d   :  { %v899_v5 = vpop.f32.mrf.mxu1 }
 0x63e   :  { %v904_v56 = vadd.f32 %v899_v5, %v249_v33 }
 0x63f   :  { %v901_v42 = vpop.f32.mrf.mxu1 }
 0x640   :  { %8178 = vtanh.f32 %v904_v56  ;;  %v905_v38 = vadd.f32 %v901_v42, %v250_v25  ;;  %v7604_v25 = vmul.f32 -1.442695, %v904_v56 }
 0x641   :  { %v786_v34 = vpop.f32.mrf.mxu0 }
 0x642   :  { %v791_v54 = vadd.f32 %v786_v34, %v189_v35  ;;  %8180 = vtanh.f32 %v905_v38 }
 0x643   :  { %v788_v61 = vpop.f32.mrf.mxu0 }
 0x644   :  { %v792_v47 = vadd.f32 %v788_v61, %v190_v57  ;;  %8182 = vtanh.f32 %v791_v54  ;;  %v7599_v34 = vmul.f32 -1.442695, %v791_v54 }
 0x646   :  { %8184 = vtanh.f32 %v792_v47 }
 0x647   :  { %8186 = vpow2.f32 %v7604_v25 }
 0x648   :  { %8188 = vpow2.f32 %v7599_v34 }
 0x64d   :  { %v8179_v52 = vpop.eup %8178 }
 0x64e   :  { %923 = vrot.lane.b32.xlu0 %v8179_v52, %s8949_s4 }
 0x64f   :  { %v8181_v40 = vpop.eup %8180 }
 0x650   :  { %925 = vrot.lane.b32.xlu1 %v8181_v40, %s8949_s4 }
 0x651   :  { %v8183_v33 = vpop.eup %8182 }
 0x652   :  { %810 = vrot.lane.b32.xlu0 %v8183_v33, %s8949_s4 }
 0x653   :  { %v8185_v50 = vpop.eup %8184 }
 0x654   :  { %812 = vrot.lane.b32.xlu1 %v8185_v50, %s8949_s4  ;;  %v8187_v41 = vpop.eup %8186 }
 0x655   :  { %v909_v5 = vadd.f32 1.0, %v8187_v41  ;;  %v8189_v35 = vpop.eup %8188 }
 0x656   :  { %v796_v42 = vadd.f32 1.0, %v8189_v35 }
 0x657   :  { %8190 = vrcp.f32 %v909_v5 }
 0x658   :  { %8192 = vrcp.f32 %v796_v42 }
 0x664   :  { %v8191_v52 = vpop.eup %8190 }
 0x665   :  { %v8193_v56 = vpop.eup %8192  ;;  %v920_v34 = vmul.f32 %v8191_v52, %v9436_v62  ;;  %v7600_v62 = vmul.f32 -1.442695, %v792_v47  ;;  %v82_v47 = vsub.s32 3, %v9152_v16 }
 0x666   :  { %v807_v35 = vmul.f32 %v8193_v56, %v9440_v49 }
 0x6c0   :  { %v924_v57 = vpop.permute.xlu0 %923 }
 0x6c2   :  { %v926_v61 = vpop.permute.xlu1 %925 }
 0x6c3   :  { %v927_v40 = vsel %vm360_vm1, %v924_v57, %v926_v61 }
 0x6c4   :  { %v929_v36 = vmul.f32 %v8191_v52, %v927_v40  ;;  %v811_v33 = vpop.permute.xlu0 %810  ;;  %v7605_v40 = vmul.f32 -1.442695, %v905_v38 }
 0x6c6   :  { %931 = vrot.lane.b32.xlu0 %v929_v36, %s8950_s21  ;;  %v813_v50 = vpop.permute.xlu1 %812 }
 0x6c7   :  { %v814_v54 = vsel %vm360_vm1, %v811_v33, %v813_v50 }
 0x6c8   :  { %v816_v25 = vmul.f32 %v8193_v56, %v814_v54  ;;  %v89_v56 = vsub.s32 4, %v9152_v16 }
 0x6ca   :  { %818 = vrot.lane.b32.xlu1 %v816_v25, %s8950_s21  ;;  %v90_v38 = vrot.slane %v9213_v27, %v89_v56 }
 0x738   :  { %v932_v41 = vpop.permute.xlu0 %931 }
 0x739   :  { %v9518_v5 = vadd.f32 %v932_v41, %v920_v34 }
 0x73b   :  { %8194 = vtanh.f32 %v9518_v5 }
 0x73c   :  { %v819_v42 = vpop.permute.xlu1 %818 }
 0x73d   :  { %v9522_v57 = vadd.f32 %v819_v42, %v807_v35 }
 0x73f   :  { %8196 = vtanh.f32 %v9522_v57 }
 0x740   :  { %8198 = vpow2.f32 %v7605_v40 }
 0x741   :  { %8200 = vpow2.f32 %v7600_v62 }
 0x748   :  { %v8195_v36 = vpop.eup %8194 }
 0x749   :  { %937 = vrot.lane.b32.xlu0 %v8195_v36, %s8951_s22  ;;  %v83_v36 = vrot.slane %v9213_v27, %v82_v47 }
 0x74c   :  { %v8197_v61 = vpop.eup %8196 }
 0x74d   :  { %824 = vrot.lane.b32.xlu1 %v8197_v61, %s8951_s22  ;;  %v8199_v52 = vpop.eup %8198 }
 0x74e   :  { %v917_v33 = vadd.f32 1.0, %v8199_v52  ;;  %v8201_v50 = vpop.eup %8200 }
 0x74f   :  { %v804_v49 = vadd.f32 1.0, %v8201_v50 }
 0x750   :  { %8202 = vrcp.f32 %v917_v33 }
 0x751   :  { %8204 = vrcp.f32 %v804_v49 }
 0x75d   :  { %v8203_v54 = vpop.eup %8202 }
 0x75e   :  { %v8205_v41 = vpop.eup %8204 }
 0x7bb   :  { %v938_v25 = vpop.permute.xlu0 %937 }
 0x7bc   :  { %v9528_v34 = vmul.f32 %v8203_v54, %v938_v25 }
 0x7be   :  { %1055 = vrot.lane.b32.xlu0 %v9528_v34, %s8952_s2 }
 0x7bf   :  { %v825_v35 = vpop.permute.xlu1 %824 }
 0x7c0   :  { %v827_v42 = vmul.f32 %v8205_v41, %v825_v35 }
 0x7c2   :  { %942 = vrot.lane.b32.xlu1 %v827_v42, %s8952_s2  ;;  %92 = vbcast.lane.b32.xlu0 %v90_v38, 256 }
 0x7c6   :  { %85 = vbcast.lane.b32.xlu1 %v83_v36, 256 }
 0x830   :  { %v1056_v61 = vpop.permute.xlu0 %1055 }
 0x831   :  { %7613 = vmatmul.mubr.msk.f32.vlgmr.msra.gmra.mxu1 %vm255_vm2, %v1056_v61 }
 0x832   :  { %7622 = vmatpush1.msk.msra.mxu1 %vm259_vm0, %v9071_v1  ;;  %1349 = vmatprep.mubr.f32.mxu1 %v11663_v30 }
 0x833   :  { %1305 = vmatprep.subr.mxu1 %v9076_v2 }
 0x834   :  { %v9541_v40 = vpop.permute.xlu1 %942  ;;  %1306 = vmatpush1.msra.mxu1 %v9083_v3  ;;  %v9575_v1 = vpop.permute.xlu0 %92 }
 0x835   :  { %11665 = vst [vmem:[#allocation16_spill] sm:$0xff] %v9541_v40  ;;  %7608 = vmatmul.mubr.msk.f32.vlgmr.msra.gmra.mxu0 %vm255_vm2, %v9541_v40  ;;  %1307 = vmatprep.subr.mxu1 %v9097_v6  ;;  %v220_v2 = vmul.f32 %v9296_v37, %v9575_v1  ;;  %v221_v6 = vmul.f32 %v9315_v44, %v9575_v1 }
 0x836   :  { %7617 = vmatpush1.msk.msra.mxu0 %vm259_vm0, %v9102_v7  ;;  %1308 = vmatpush1.msra.mxu1 %v9115_v9 }
 0x837   :  { %1192 = vmatprep.subr.mxu0 %v9107_v8  ;;  %1309 = vmatprep.subr.mxu1 %v9127_v11  ;;  %v247_v7 = vadd.f32 %v9312_v43, %v220_v2  ;;  %v248_v8 = vadd.f32 %v9332_v51, %v221_v6 }
 0x838   :  { %1193 = vmatpush1.msra.mxu0 %v9120_v10  ;;  %1310 = vmatpush1.msra.mxu1 %v9144_v14  ;;  %v9579_v3 = vpop.permute.xlu1 %85 }
 0x839   :  { %1194 = vmatprep.subr.mxu0 %v9132_v12  ;;  %1311 = vmatprep.subr.mxu1 %v9159_v17 }
 0x83a   :  { %1195 = vmatpush1.msra.mxu0 %v9137_v13  ;;  %1312 = vmatpush1.msra.mxu1 %v9171_v19 }
 0x83b   :  { %1196 = vmatprep.subr.mxu0 %v9149_v15  ;;  %1313 = vmatprep.subr.mxu1 %v9183_v21 }
 0x83c   :  { %1197 = vmatpush1.msra.mxu0 %v9164_v18  ;;  %1314 = vmatpush1.msra.mxu1 %v9195_v23 }
 0x83d   :  { %1198 = vmatprep.subr.mxu0 %v9176_v20  ;;  %1315 = vmatprep.subr.mxu1 %v9200_v24 }
 0x83e   :  { %1199 = vmatpush1.msra.mxu0 %v9188_v22  ;;  %1316 = vmatpush1.msra.mxu1 %v9220_v28 }
 0x83f   :  { %1200 = vmatprep.subr.mxu0 %v9208_v26  ;;  %1236 = vmatprep.mubr.f32.mxu0 %v11663_v30 }
 0x840   :  { %1201 = vmatpush1.msra.mxu0 %v9225_v29  ;;  %7631 = vmatprep.subr.msk.mxu1 %vm259_vm0, %v9066_v0  ;;  %v164_v0 = vmul.f32 %v9320_v46, %v9579_v3 }
 0x841   :  { %1202 = vmatprep.subr.mxu0 %v9232_v31 }
 0x842   :  { %1203 = vmatpush1.msra.mxu0 %v9239_v32  ;;  %v191_v11 = vadd.f32 %v9337_v53, %v164_v0 }
 0x843   :  { %7626 = vmatprep.subr.msk.mxu0 %vm259_vm0, %v9088_v4  ;;  %v165_v4 = vmul.f32 %v9326_v48, %v9579_v3 }
 0x845   :  { %v192_v14 = vadd.f32 %v9344_v59, %v165_v4 }
 0x8f1   :  { %v1125_v9 = vpop.f32.mrf.mxu1 }
 0x8f2   :  { %v1130_v10 = vadd.f32 %v1125_v9, %v247_v7 }
 0x8f3   :  { %v1127_v12 = vpop.f32.mrf.mxu1 }
 0x8f4   :  { %8206 = vtanh.f32 %v1130_v10  ;;  %v1131_v13 = vadd.f32 %v1127_v12, %v248_v8  ;;  %v7614_v24 = vmul.f32 -1.442695, %v1130_v10 }
 0x8f5   :  { %v1012_v15 = vpop.f32.mrf.mxu0 }
 0x8f6   :  { %v1017_v17 = vadd.f32 %v1012_v15, %v191_v11  ;;  %8208 = vtanh.f32 %v1131_v13  ;;  %v7615_v7 = vmul.f32 -1.442695, %v1131_v13 }
 0x8f7   :  { %v1014_v18 = vpop.f32.mrf.mxu0 }
 0x8f8   :  { %v1018_v19 = vadd.f32 %v1014_v18, %v192_v14  ;;  %8210 = vtanh.f32 %v1017_v17  ;;  %v7609_v26 = vmul.f32 -1.442695, %v1017_v17  ;;  %v9618_v17 = vld [vmem:[%s11620_s3 + $0xd0] sm:$0x3]  ;;  %v9626_v18 = vld [vmem:[%s11620_s3 + $0xc8] sm:$0xff] }
 0x8fa   :  { %8212 = vtanh.f32 %v1018_v19 }
 0x8fb   :  { %8214 = vpow2.f32 %v7614_v24  ;;  %v9661_v24 = vld [vmem:[%s11620_s3 + $0x58] sm:$0xff] }
 0x8fc   :  { %8216 = vpow2.f32 %v7609_v26  ;;  %v9667_v26 = vld [vmem:[%s11620_s3 + $0xa8] sm:$0xff] }
 0x901   :  { %v8207_v20 = vpop.eup %8206 }
 0x902   :  { %1149 = vrot.lane.b32.xlu0 %v8207_v20, %s8949_s4  ;;  %v9634_v20 = vld [vmem:[%s11620_s3 + $0xc0] sm:$0xff] }
 0x903   :  { %v8209_v21 = vpop.eup %8208 }
 0x904   :  { %1151 = vrot.lane.b32.xlu1 %v8209_v21, %s8949_s4  ;;  %v9642_v21 = vld [vmem:[%s11620_s3 + $0xb8] sm:$0xff] }
 0x905   :  { %v8211_v22 = vpop.eup %8210 }
 0x906   :  { %1036 = vrot.lane.b32.xlu0 %v8211_v22, %s8949_s4  ;;  %v9648_v22 = vld [vmem:[%s11620_s3 + $0x60] sm:$0x3] }
 0x907   :  { %v8213_v23 = vpop.eup %8212 }
 0x908   :  { %1038 = vrot.lane.b32.xlu1 %v8213_v23, %s8949_s4  ;;  %v8215_v27 = vpop.eup %8214  ;;  %v9655_v23 = vld [vmem:[%s11620_s3 + $0xb0] sm:$0xff] }
 0x909   :  { %v1135_v28 = vadd.f32 1.0, %v8215_v27  ;;  %v8217_v29 = vpop.eup %8216  ;;  %v9673_v27 = vld [vmem:[%s11620_s3 + $0x50] sm:$0xff] }
 0x90a   :  { %v1022_v31 = vadd.f32 1.0, %v8217_v29  ;;  %v9685_v29 = vld [vmem:[%s11620_s3 + $0x48] sm:$0xff] }
 0x90b   :  { %8218 = vrcp.f32 %v1135_v28  ;;  %v9679_v28 = vld [vmem:[%s11620_s3 + $0xa0] sm:$0xff] }
 0x90c   :  { %8220 = vrcp.f32 %v1022_v31  ;;  %v9691_v31 = vld [vmem:[%s11620_s3 + $0x98] sm:$0xff] }
 0x918   :  { %v8219_v52 = vpop.eup %8218 }
 0x919   :  { %v8221_v54 = vpop.eup %8220  ;;  %v1146_v47 = vmul.f32 %v8219_v52, %v9518_v5  ;;  %v7610_v5 = vmul.f32 -1.442695, %v1018_v19 }
 0x91a   :  { %v1033_v42 = vmul.f32 %v8221_v54, %v9522_v57 }
 0x974   :  { %v1150_v32 = vpop.permute.xlu0 %1149 }
 0x976   :  { %v1152_v62 = vpop.permute.xlu1 %1151 }
 0x977   :  { %v1153_v33 = vsel %vm360_vm1, %v1150_v32, %v1152_v62  ;;  %v9697_v32 = vld [vmem:[%s11620_s3 + $0x40] sm:$0xff]  ;;  %v9703_v62 = vld [vmem:[%s11620_s3 + $0x90] sm:$0xff] }
 0x978   :  { %v1155_v50 = vmul.f32 %v8219_v52, %v1153_v33  ;;  %v1037_v49 = vpop.permute.xlu0 %1036  ;;  %v9709_v52 = vld [vmem:[%s11620_s3 + $0x38] sm:$0xff]  ;;  %v9715_v33 = vld [vmem:[%s11620_s3 + $0x88] sm:$0xff] }
 0x97a   :  { %1157 = vrot.lane.b32.xlu0 %v1155_v50, %s8950_s21  ;;  %v1039_v56 = vpop.permute.xlu1 %1038  ;;  %v9721_v50 = vld [vmem:[%s11620_s3 + $0x30] sm:$0xff] }
 0x97b   :  { %v1040_v25 = vsel %vm360_vm1, %v1037_v49, %v1039_v56  ;;  %v9727_v49 = vld [vmem:[%s11620_s3 + $0x80] sm:$0xff]  ;;  %v9733_v56 = vld [vmem:[%s11620_s3 + $0x28] sm:$0xff] }
 0x97c   :  { %v1042_v38 = vmul.f32 %v8221_v54, %v1040_v25  ;;  %v9739_v54 = vld [vmem:[%s11620_s3 + $0x78] sm:$0xff]  ;;  %v9745_v25 = vld [vmem:[%s11620_s3 + $0x20] sm:$0xff] }
 0x97e   :  { %1044 = vrot.lane.b32.xlu1 %v1042_v38, %s8950_s21  ;;  %v9751_v38 = vld [vmem:[%s11620_s3 + $0x70] sm:$0xff] }
 0x9ec   :  { %v1158_v41 = vpop.permute.xlu0 %1157 }
 0x9ed   :  { %v9600_v35 = vadd.f32 %v1158_v41, %v1146_v47  ;;  %v9757_v47 = vld [vmem:[%s11620_s3 + $0x18] sm:$0xff]  ;;  %v9764_v41 = vld [vmem:[%s11620_s3 + $0x10] sm:$0xff] }
 0x9ef   :  { %8222 = vtanh.f32 %v9600_v35 }
 0x9f0   :  { %v1045_v36 = vpop.permute.xlu1 %1044 }
 0x9f1   :  { %v9604_v61 = vadd.f32 %v1045_v36, %v1033_v42  ;;  %v9770_v42 = vld [vmem:[%s11620_s3 + $0xd8] sm:$0x3]  ;;  %v9777_v36 = vld [vmem:[%s11620_s3 + $0x8] sm:$0xff] }
 0x9f3   :  { %8224 = vtanh.f32 %v9604_v61 }
 0x9f4   :  { %8226 = vpow2.f32 %v7615_v7  ;;  %v218_v7 = vmul.f32 %v9296_v37, %v9579_v3 }
 0x9f5   :  { %8228 = vpow2.f32 %v7610_v5  ;;  %v219_v5 = vmul.f32 %v9315_v44, %v9579_v3 }
 0x9fc   :  { %v8223_v2 = vpop.eup %8222 }
 0x9fd   :  { %1163 = vrot.lane.b32.xlu0 %v8223_v2, %s8951_s22  ;;  %v9783_v2 = vld [vmem:[%s11620_s3] sm:$0xff] }
 0xa00   :  { %v8225_v6 = vpop.eup %8224 }
 0xa01   :  { %1050 = vrot.lane.b32.xlu1 %v8225_v6, %s8951_s22  ;;  %v8227_v0 = vpop.eup %8226  ;;  %v9789_v6 = vld [vmem:[%s11620_s3 + $0x68] sm:$0x3] }
 0xa02   :  { %v1143_v8 = vadd.f32 1.0, %v8227_v0  ;;  %v8229_v4 = vpop.eup %8228  ;;  %v245_v0 = vadd.f32 %v9312_v43, %v218_v7 }
 0xa03   :  { %v1030_v57 = vadd.f32 1.0, %v8229_v4 }
 0xa04   :  { %8230 = vrcp.f32 %v1143_v8  ;;  %v166_v8 = vmul.f32 %v9320_v46, %v9575_v1 }
 0xa05   :  { %8232 = vrcp.f32 %v1030_v57 }
 0xa11   :  { %v8231_v9 = vpop.eup %8230 }
 0xa12   :  { %v8233_v12 = vpop.eup %8232 }
 0xa6f   :  { %v1164_v10 = vpop.permute.xlu0 %1163 }
 0xa70   :  { %v9609_v11 = vmul.f32 %v8231_v9, %v1164_v10  ;;  %v246_v9 = vadd.f32 %v9332_v51, %v219_v5  ;;  %v167_v10 = vmul.f32 %v9326_v48, %v9575_v1 }
 0xa72   :  { %1281 = vrot.lane.b32.xlu0 %v9609_v11, %s8952_s2  ;;  %v194_v3 = vadd.f32 %v9344_v59, %v167_v10 }
 0xa73   :  { %v1051_v14 = vpop.permute.xlu1 %1050 }
 0xa74   :  { %v1053_v15 = vmul.f32 %v8233_v12, %v1051_v14 }
 0xa76   :  { %1168 = vrot.lane.b32.xlu1 %v1053_v15, %s8952_s2  ;;  %v193_v15 = vadd.f32 %v9337_v53, %v166_v8 }
 0xae4   :  { %v1282_v13 = vpop.permute.xlu0 %1281 }
 0xae5   :  { %7623 = vmatmul.mubr.msk.f32.vlgmr.msra.gmra.mxu1 %vm255_vm2, %v1282_v13 }
 0xae6   :  { %7632 = vmatpush1.msk.msra.mxu1 %vm259_vm0, %v9618_v17  ;;  %1575 = vmatprep.mubr.f32.mxu1 %v11663_v30 }
 0xae7   :  { %1531 = vmatprep.subr.mxu1 %v9626_v18 }
 0xae8   :  { %v9629_v19 = vpop.permute.xlu1 %1168  ;;  %1532 = vmatpush1.msra.mxu1 %v9634_v20 }
 0xae9   :  { %11666 = vst [vmem:[#allocation17_spill] sm:$0xff] %v9629_v19  ;;  %7618 = vmatmul.mubr.msk.f32.vlgmr.msra.gmra.mxu0 %vm255_vm2, %v9629_v19  ;;  %1533 = vmatprep.subr.mxu1 %v9642_v21 }
 0xaea   :  { %7627 = vmatpush1.msk.msra.mxu0 %vm259_vm0, %v9648_v22  ;;  %1534 = vmatpush1.msra.mxu1 %v9655_v23 }
 0xaeb   :  { %1418 = vmatprep.subr.mxu0 %v9661_v24  ;;  %1535 = vmatprep.subr.mxu1 %v9667_v26 }
 0xaec   :  { %1419 = vmatpush1.msra.mxu0 %v9673_v27  ;;  %1536 = vmatpush1.msra.mxu1 %v9679_v28 }
 0xaed   :  { %1420 = vmatprep.subr.mxu0 %v9685_v29  ;;  %1537 = vmatprep.subr.mxu1 %v9691_v31 }
 0xaee   :  { %1421 = vmatpush1.msra.mxu0 %v9697_v32  ;;  %1538 = vmatpush1.msra.mxu1 %v9703_v62 }
 0xaef   :  { %1422 = vmatprep.subr.mxu0 %v9709_v52  ;;  %1539 = vmatprep.subr.mxu1 %v9715_v33 }
 0xaf0   :  { %1423 = vmatpush1.msra.mxu0 %v9721_v50  ;;  %1540 = vmatpush1.msra.mxu1 %v9727_v49 }
 0xaf1   :  { %1424 = vmatprep.subr.mxu0 %v9733_v56  ;;  %1541 = vmatprep.subr.mxu1 %v9739_v54 }
 0xaf2   :  { %1425 = vmatpush1.msra.mxu0 %v9745_v25  ;;  %1542 = vmatpush1.msra.mxu1 %v9751_v38 }
 0xaf3   :  { %1426 = vmatprep.subr.mxu0 %v9757_v47  ;;  %1462 = vmatprep.mubr.f32.mxu0 %v11663_v30 }
 0xaf4   :  { %1427 = vmatpush1.msra.mxu0 %v9764_v41  ;;  %7641 = vmatprep.subr.msk.mxu1 %vm259_vm0, %v9770_v42 }
 0xaf5   :  { %1428 = vmatprep.subr.mxu0 %v9777_v36 }
 0xaf6   :  { %1429 = vmatpush1.msra.mxu0 %v9783_v2 }
 0xaf7   :  { %7636 = vmatprep.subr.msk.mxu0 %vm259_vm0, %v9789_v6 }
 0xba5   :  { %v1351_v4 = vpop.f32.mrf.mxu1 }
 0xba6   :  { %v1356_v57 = vadd.f32 %v1351_v4, %v245_v0 }
 0xba7   :  { %v1353_v12 = vpop.f32.mrf.mxu1 }
 0xba8   :  { %8234 = vtanh.f32 %v1356_v57  ;;  %v1357_v14 = vadd.f32 %v1353_v12, %v246_v9  ;;  %v7624_v8 = vmul.f32 -1.442695, %v1356_v57 }
 0xba9   :  { %v1238_v13 = vpop.f32.mrf.mxu0 }
 0xbaa   :  { %v1243_v16 = vadd.f32 %v1238_v13, %v193_v15  ;;  %8236 = vtanh.f32 %v1357_v14 }
 0xbab   :  { %v1240_v7 = vpop.f32.mrf.mxu0 }
 0xbac   :  { %v1244_v40 = vadd.f32 %v1240_v7, %v194_v3  ;;  %8238 = vtanh.f32 %v1243_v16  ;;  %v7619_v9 = vmul.f32 -1.442695, %v1243_v16 }
 0xbae   :  { %8240 = vtanh.f32 %v1244_v40 }
 0xbaf   :  { %8242 = vpow2.f32 %v7624_v8 }
 0xbb0   :  { %8244 = vpow2.f32 %v7619_v9 }
 0xbb5   :  { %v8235_v0 = vpop.eup %8234 }
 0xbb6   :  { %1375 = vrot.lane.b32.xlu0 %v8235_v0, %s8949_s4 }
 0xbb7   :  { %v8237_v5 = vpop.eup %8236 }
 0xbb8   :  { %1377 = vrot.lane.b32.xlu1 %v8237_v5, %s8949_s4 }
 0xbb9   :  { %v8239_v1 = vpop.eup %8238 }
 0xbba   :  { %1262 = vrot.lane.b32.xlu0 %v8239_v1, %s8949_s4 }
 0xbbb   :  { %v8241_v4 = vpop.eup %8240 }
 0xbbc   :  { %1264 = vrot.lane.b32.xlu1 %v8241_v4, %s8949_s4  ;;  %v8243_v10 = vpop.eup %8242 }
 0xbbd   :  { %v1361_v12 = vadd.f32 1.0, %v8243_v10  ;;  %v8245_v15 = vpop.eup %8244 }
 0xbbe   :  { %v1248_v13 = vadd.f32 1.0, %v8245_v15 }
 0xbbf   :  { %8246 = vrcp.f32 %v1361_v12 }
 0xbc0   :  { %8248 = vrcp.f32 %v1248_v13 }
 0xbcc   :  { %v8247_v0 = vpop.eup %8246 }
 0xbcd   :  { %v8249_v57 = vpop.eup %8248  ;;  %v1372_v9 = vmul.f32 %v8247_v0, %v9600_v35  ;;  %v7620_v35 = vmul.f32 -1.442695, %v1244_v40 }
 0xbce   :  { %v1259_v15 = vmul.f32 %v8249_v57, %v9604_v61 }
 0xc28   :  { %v1376_v3 = vpop.permute.xlu0 %1375 }
 0xc2a   :  { %v1378_v7 = vpop.permute.xlu1 %1377 }
 0xc2b   :  { %v1379_v5 = vsel %vm360_vm1, %v1376_v3, %v1378_v7 }
 0xc2c   :  { %v1381_v19 = vmul.f32 %v8247_v0, %v1379_v5  ;;  %v1263_v1 = vpop.permute.xlu0 %1262  ;;  %v7625_v5 = vmul.f32 -1.442695, %v1357_v14 }
 0xc2e   :  { %1383 = vrot.lane.b32.xlu0 %v1381_v19, %s8950_s21  ;;  %v1265_v4 = vpop.permute.xlu1 %1264 }
 0xc2f   :  { %v1266_v16 = vsel %vm360_vm1, %v1263_v1, %v1265_v4 }
 0xc30   :  { %v1268_v8 = vmul.f32 %v8249_v57, %v1266_v16 }
 0xc32   :  { %1270 = vrot.lane.b32.xlu1 %v1268_v8, %s8950_s21 }
 0xca0   :  { %v1384_v10 = vpop.permute.xlu0 %1383 }
 0xca1   :  { %v9814_v12 = vadd.f32 %v1384_v10, %v1372_v9 }
 0xca3   :  { %8250 = vtanh.f32 %v9814_v12 }
 0xca4   :  { %v1271_v13 = vpop.permute.xlu1 %1270 }
 0xca5   :  { %v9818_v3 = vadd.f32 %v1271_v13, %v1259_v15  ;;  %v216_v13 = vmul.f32 %v9296_v37, %v9497_v63 }
 0xca7   :  { %8252 = vtanh.f32 %v9818_v3 }
 0xca8   :  { %8254 = vpow2.f32 %v7625_v5  ;;  %v168_v5 = vmul.f32 %v9320_v46, %v9493_v60 }
 0xca9   :  { %8256 = vpow2.f32 %v7620_v35 }
 0xcb0   :  { %v8251_v19 = vpop.eup %8250 }
 0xcb1   :  { %1389 = vrot.lane.b32.xlu0 %v8251_v19, %s8951_s22  ;;  %v217_v19 = vmul.f32 %v9315_v44, %v9497_v63 }
 0xcb4   :  { %v8253_v7 = vpop.eup %8252 }
 0xcb5   :  { %1276 = vrot.lane.b32.xlu1 %v8253_v7, %s8951_s22  ;;  %v8255_v0 = vpop.eup %8254  ;;  %v243_v7 = vadd.f32 %v9312_v43, %v216_v13 }
 0xcb6   :  { %v1369_v1 = vadd.f32 1.0, %v8255_v0  ;;  %v8257_v4 = vpop.eup %8256  ;;  %v244_v0 = vadd.f32 %v9332_v51, %v217_v19 }
 0xcb7   :  { %v1256_v61 = vadd.f32 1.0, %v8257_v4 }
 0xcb8   :  { %8258 = vrcp.f32 %v1369_v1  ;;  %v169_v1 = vmul.f32 %v9326_v48, %v9493_v60 }
 0xcb9   :  { %8260 = vrcp.f32 %v1256_v61  ;;  %v195_v61 = vadd.f32 %v9337_v53, %v168_v5 }
 0xcba   :  { %v196_v63 = vadd.f32 %v9344_v59, %v169_v1 }
 0xcc5   :  { %v8259_v57 = vpop.eup %8258 }
 0xcc6   :  { %v8261_v9 = vpop.eup %8260 }
 0xd23   :  { %v1390_v16 = vpop.permute.xlu0 %1389 }
 0xd24   :  { %v9823_v8 = vmul.f32 %v8259_v57, %v1390_v16 }
 0xd26   :  { %1507 = vrot.lane.b32.xlu0 %v9823_v8, %s8952_s2 }
 0xd27   :  { %v1277_v10 = vpop.permute.xlu1 %1276 }
 0xd28   :  { %v1279_v15 = vmul.f32 %v8261_v9, %v1277_v10 }
 0xd2a   :  { %1394 = vrot.lane.b32.xlu1 %v1279_v15, %s8952_s2 }
 0xd98   :  { %v1508_v40 = vpop.permute.xlu0 %1507 }
 0xd99   :  { %7633 = vmatmul.mubr.msk.f32.vlgmr.msra.gmra.mxu1 %vm255_vm2, %v1508_v40 }
 0xd9a   :  { %7642 = vmatpush1.msk.msra.mxu1 %vm259_vm0, %v9618_v17  ;;  %1801 = vmatprep.mubr.f32.mxu1 %v11663_v30 }
 0xd9b   :  { %1757 = vmatprep.subr.mxu1 %v9626_v18 }
 0xd9c   :  { %v9833_v14 = vpop.permute.xlu1 %1394  ;;  %1758 = vmatpush1.msra.mxu1 %v9634_v20 }
 0xd9d   :  { %7628 = vmatmul.mubr.msk.f32.vlgmr.msra.gmra.mxu0 %vm255_vm2, %v9833_v14  ;;  %1759 = vmatprep.subr.mxu1 %v9642_v21 }
 0xd9e   :  { %7637 = vmatpush1.msk.msra.mxu0 %vm259_vm0, %v9648_v22  ;;  %1760 = vmatpush1.msra.mxu1 %v9655_v23 }
 0xd9f   :  { %1644 = vmatprep.subr.mxu0 %v9661_v24  ;;  %1761 = vmatprep.subr.mxu1 %v9667_v26 }
 0xda0   :  { %1645 = vmatpush1.msra.mxu0 %v9673_v27  ;;  %1762 = vmatpush1.msra.mxu1 %v9679_v28 }
 0xda1   :  { %1646 = vmatprep.subr.mxu0 %v9685_v29  ;;  %1763 = vmatprep.subr.mxu1 %v9691_v31 }
 0xda2   :  { %1647 = vmatpush1.msra.mxu0 %v9697_v32  ;;  %1764 = vmatpush1.msra.mxu1 %v9703_v62 }
 0xda3   :  { %1648 = vmatprep.subr.mxu0 %v9709_v52  ;;  %1765 = vmatprep.subr.mxu1 %v9715_v33 }
 0xda4   :  { %1649 = vmatpush1.msra.mxu0 %v9721_v50  ;;  %1766 = vmatpush1.msra.mxu1 %v9727_v49 }
 0xda5   :  { %1650 = vmatprep.subr.mxu0 %v9733_v56  ;;  %1767 = vmatprep.subr.mxu1 %v9739_v54 }
 0xda6   :  { %1651 = vmatpush1.msra.mxu0 %v9745_v25  ;;  %1768 = vmatpush1.msra.mxu1 %v9751_v38 }
 0xda7   :  { %1652 = vmatprep.subr.mxu0 %v9757_v47  ;;  %1688 = vmatprep.mubr.f32.mxu0 %v11663_v30 }
 0xda8   :  { %1653 = vmatpush1.msra.mxu0 %v9764_v41  ;;  %7651 = vmatprep.subr.msk.mxu1 %vm259_vm0, %v9770_v42 }
 0xda9   :  { %1654 = vmatprep.subr.mxu0 %v9777_v36 }
 0xdaa   :  { %1655 = vmatpush1.msra.mxu0 %v9783_v2 }
 0xdab   :  { %7646 = vmatprep.subr.msk.mxu0 %vm259_vm0, %v9789_v6 }
 0xe59   :  { %v1577_v35 = vpop.f32.mrf.mxu1 }
 0xe5a   :  { %v1582_v42 = vadd.f32 %v1577_v35, %v243_v7 }
 0xe5b   :  { %v1579_v4 = vpop.f32.mrf.mxu1 }
 0xe5c   :  { %8262 = vtanh.f32 %v1582_v42  ;;  %v1583_v6 = vadd.f32 %v1579_v4, %v244_v0  ;;  %v7634_v19 = vmul.f32 -1.442695, %v1582_v42 }
 0xe5d   :  { %v1464_v57 = vpop.f32.mrf.mxu0 }
 0xe5e   :  { %v1469_v16 = vadd.f32 %v1464_v57, %v195_v61  ;;  %8264 = vtanh.f32 %v1583_v6 }
 0xe5f   :  { %v1466_v9 = vpop.f32.mrf.mxu0 }
 0xe60   :  { %v1470_v10 = vadd.f32 %v1466_v9, %v196_v63  ;;  %8266 = vtanh.f32 %v1469_v16  ;;  %v7629_v7 = vmul.f32 -1.442695, %v1469_v16 }
 0xe62   :  { %8268 = vtanh.f32 %v1470_v10 }
 0xe63   :  { %8270 = vpow2.f32 %v7634_v19 }
 0xe64   :  { %8272 = vpow2.f32 %v7629_v7 }
 0xe69   :  { %v8263_v15 = vpop.eup %8262 }
 0xe6a   :  { %1601 = vrot.lane.b32.xlu0 %v8263_v15, %s8949_s4 }
 0xe6b   :  { %v8265_v40 = vpop.eup %8264 }
 0xe6c   :  { %1603 = vrot.lane.b32.xlu1 %v8265_v40, %s8949_s4 }
 0xe6d   :  { %v8267_v60 = vpop.eup %8266 }
 0xe6e   :  { %1488 = vrot.lane.b32.xlu0 %v8267_v60, %s8949_s4 }
 0xe6f   :  { %v8269_v13 = vpop.eup %8268 }
 0xe70   :  { %1490 = vrot.lane.b32.xlu1 %v8269_v13, %s8949_s4  ;;  %v8271_v5 = vpop.eup %8270 }
 0xe71   :  { %v1587_v35 = vadd.f32 1.0, %v8271_v5  ;;  %v8273_v0 = vpop.eup %8272 }
 0xe72   :  { %v1474_v1 = vadd.f32 1.0, %v8273_v0 }
 0xe73   :  { %8274 = vrcp.f32 %v1587_v35 }
 0xe74   :  { %8276 = vrcp.f32 %v1474_v1 }
 0xe80   :  { %v8275_v57 = vpop.eup %8274 }
 0xe81   :  { %v8277_v42 = vpop.eup %8276  ;;  %v1598_v13 = vmul.f32 %v8275_v57, %v9814_v12  ;;  %v7630_v12 = vmul.f32 -1.442695, %v1470_v10 }
 0xe82   :  { %v1485_v5 = vmul.f32 %v8277_v42, %v9818_v3 }
 0xedc   :  { %v1602_v4 = vpop.permute.xlu0 %1601 }
 0xede   :  { %v1604_v61 = vpop.permute.xlu1 %1603 }
 0xedf   :  { %v1605_v63 = vsel %vm360_vm1, %v1602_v4, %v1604_v61  ;;  %v7635_v61 = vmul.f32 -1.442695, %v1583_v6 }
 0xee0   :  { %v1607_v9 = vmul.f32 %v8275_v57, %v1605_v63  ;;  %v1489_v15 = vpop.permute.xlu0 %1488 }
 0xee2   :  { %1609 = vrot.lane.b32.xlu0 %v1607_v9, %s8950_s21  ;;  %v1491_v40 = vpop.permute.xlu1 %1490 }
 0xee3   :  { %v1492_v16 = vsel %vm360_vm1, %v1489_v15, %v1491_v40 }
 0xee4   :  { %v1494_v60 = vmul.f32 %v8277_v42, %v1492_v16 }
 0xee6   :  { %1496 = vrot.lane.b32.xlu1 %v1494_v60, %s8950_s21 }
 0xf54   :  { %v1610_v19 = vpop.permute.xlu0 %1609 }
 0xf55   :  { %v9888_v7 = vadd.f32 %v1610_v19, %v1598_v13 }
 0xf57   :  { %8278 = vtanh.f32 %v9888_v7 }
 0xf58   :  { %v1497_v35 = vpop.permute.xlu1 %1496 }
 0xf59   :  { %v9892_v0 = vadd.f32 %v1497_v35, %v1485_v5 }
 0xf5b   :  { %8280 = vtanh.f32 %v9892_v0 }
 0xf5c   :  { %8282 = vpow2.f32 %v7635_v61 }
 0xf5d   :  { %8284 = vpow2.f32 %v7630_v12 }
 0xf64   :  { %v8279_v1 = vpop.eup %8278 }
 0xf65   :  { %1615 = vrot.lane.b32.xlu0 %v8279_v1, %s8951_s22 }
 0xf68   :  { %v8281_v4 = vpop.eup %8280 }
 0xf69   :  { %1502 = vrot.lane.b32.xlu1 %v8281_v4, %s8951_s22  ;;  %v8283_v57 = vpop.eup %8282 }
 0xf6a   :  { %v1595_v63 = vadd.f32 1.0, %v8283_v57  ;;  %v8285_v9 = vpop.eup %8284 }
 0xf6b   :  { %v1482_v3 = vadd.f32 1.0, %v8285_v9 }
 0xf6c   :  { %8286 = vrcp.f32 %v1595_v63 }
 0xf6d   :  { %8288 = vrcp.f32 %v1482_v3 }
 0xf79   :  { %v8287_v15 = vpop.eup %8286 }
 0xf7a   :  { %v8289_v16 = vpop.eup %8288 }
 0xfd7   :  { %v1616_v40 = vpop.permute.xlu0 %1615 }
 0xfd8   :  { %v9897_v42 = vmul.f32 %v8287_v15, %v1616_v40 }
 0xfda   :  { %1733 = vrot.lane.b32.xlu0 %v9897_v42, %s8952_s2 }
 0xfdb   :  { %v1503_v60 = vpop.permute.xlu1 %1502 }
 0xfdc   :  { %v1505_v13 = vmul.f32 %v8289_v16, %v1503_v60 }
 0xfde   :  { %1620 = vrot.lane.b32.xlu1 %v1505_v13, %s8952_s2 }
0x104c   :  { %v1734_v6 = vpop.permute.xlu0 %1733 }
0x104d   :  { %7643 = vmatmul.mubr.msk.f32.vlgmr.msra.gmra.mxu1 %vm255_vm2, %v1734_v6 }
0x104e   :  { %7652 = vmatpush1.msk.msra.mxu1 %vm259_vm0, %v9618_v17  ;;  %2027 = vmatprep.mubr.f32.mxu1 %v11663_v30  ;;  %v214_v17 = vmul.f32 %v9296_v37, %v9415_v58 }
0x104f   :  { %1983 = vmatprep.subr.mxu1 %v9626_v18  ;;  %v215_v18 = vmul.f32 %v9315_v44, %v9415_v58 }
0x1050   :  { %v9907_v10 = vpop.permute.xlu1 %1620  ;;  %1984 = vmatpush1.msra.mxu1 %v9634_v20  ;;  %v241_v20 = vadd.f32 %v9312_v43, %v214_v17 }
0x1051   :  { %7638 = vmatmul.mubr.msk.f32.vlgmr.msra.gmra.mxu0 %vm255_vm2, %v9907_v10  ;;  %1985 = vmatprep.subr.mxu1 %v9642_v21  ;;  %v170_v21 = vmul.f32 %v9320_v46, %v9411_v55 }
0x1052   :  { %7647 = vmatpush1.msk.msra.mxu0 %vm259_vm0, %v9648_v22  ;;  %1986 = vmatpush1.msra.mxu1 %v9655_v23 }
0x1053   :  { %1870 = vmatprep.subr.mxu0 %v9661_v24  ;;  %1987 = vmatprep.subr.mxu1 %v9667_v26  ;;  %v242_v24 = vadd.f32 %v9332_v51, %v215_v18  ;;  %v171_v26 = vmul.f32 %v9326_v48, %v9411_v55 }
0x1054   :  { %1871 = vmatpush1.msra.mxu0 %v9673_v27  ;;  %1988 = vmatpush1.msra.mxu1 %v9679_v28 }
0x1055   :  { %1872 = vmatprep.subr.mxu0 %v9685_v29  ;;  %1989 = vmatprep.subr.mxu1 %v9691_v31  ;;  %v197_v29 = vadd.f32 %v9337_v53, %v170_v21  ;;  %v198_v58 = vadd.f32 %v9344_v59, %v171_v26 }
0x1056   :  { %1873 = vmatpush1.msra.mxu0 %v9697_v32  ;;  %1990 = vmatpush1.msra.mxu1 %v9703_v62 }
0x1057   :  { %1874 = vmatprep.subr.mxu0 %v9709_v52  ;;  %1991 = vmatprep.subr.mxu1 %v9715_v33 }
0x1058   :  { %1875 = vmatpush1.msra.mxu0 %v9721_v50  ;;  %1992 = vmatpush1.msra.mxu1 %v9727_v49 }
0x1059   :  { %1876 = vmatprep.subr.mxu0 %v9733_v56  ;;  %1993 = vmatprep.subr.mxu1 %v9739_v54 }
0x105a   :  { %1877 = vmatpush1.msra.mxu0 %v9745_v25  ;;  %1994 = vmatpush1.msra.mxu1 %v9751_v38 }
0x105b   :  { %1878 = vmatprep.subr.mxu0 %v9757_v47  ;;  %1914 = vmatprep.mubr.f32.mxu0 %v11663_v30 }
0x105c   :  { %1879 = vmatpush1.msra.mxu0 %v9764_v41 }
0x105d   :  { %1880 = vmatprep.subr.mxu0 %v9777_v36 }
0x105e   :  { %1881 = vmatpush1.msra.mxu0 %v9783_v2 }
0x110d   :  { %v1803_v22 = vpop.f32.mrf.mxu1 }
0x110e   :  { %v1808_v23 = vadd.f32 %v1803_v22, %v241_v20 }
0x110f   :  { %v1805_v27 = vpop.f32.mrf.mxu1 }
0x1110   :  { %8290 = vtanh.f32 %v1808_v23  ;;  %v1809_v28 = vadd.f32 %v1805_v27, %v242_v24  ;;  %v7644_v56 = vmul.f32 -1.442695, %v1808_v23 }
0x1111   :  { %v1690_v31 = vpop.f32.mrf.mxu0 }
0x1112   :  { %v1695_v32 = vadd.f32 %v1690_v31, %v197_v29  ;;  %8292 = vtanh.f32 %v1809_v28  ;;  %v7645_v6 = vmul.f32 -1.442695, %v1809_v28  ;;  %v212_v31 = vmul.f32 %v9296_v37, %v9317_v45 }
0x1113   :  { %v1692_v62 = vpop.f32.mrf.mxu0 }
0x1114   :  { %v1696_v52 = vadd.f32 %v1692_v62, %v198_v58  ;;  %8294 = vtanh.f32 %v1695_v32  ;;  %v7639_v54 = vmul.f32 -1.442695, %v1695_v32  ;;  %v213_v32 = vmul.f32 %v9315_v44, %v9317_v45 }
0x1115   :  { %v239_v58 = vadd.f32 %v9312_v43, %v212_v31  ;;  %v172_v62 = vmul.f32 %v9320_v46, %v9301_v39 }
0x1116   :  { %8296 = vtanh.f32 %v1696_v52 }
0x1117   :  { %8298 = vpow2.f32 %v7644_v56  ;;  %v199_v37 = vadd.f32 %v9337_v53, %v172_v62  ;;  %v2121_v62 = vld [vmem:[%s11622_s5 + $0x30] sm:$0xff] }
0x1118   :  { %8300 = vpow2.f32 %v7639_v54 }
0x111d   :  { %v8291_v33 = vpop.eup %8290 }
0x111e   :  { %1827 = vrot.lane.b32.xlu0 %v8291_v33, %s8949_s4 }
0x111f   :  { %v8293_v50 = vpop.eup %8292 }
0x1120   :  { %1829 = vrot.lane.b32.xlu1 %v8293_v50, %s8949_s4  ;;  %v240_v50 = vadd.f32 %v9332_v51, %v213_v32 }
0x1121   :  { %v8295_v55 = vpop.eup %8294 }
0x1122   :  { %1714 = vrot.lane.b32.xlu0 %v8295_v55, %s8949_s4  ;;  %v173_v55 = vmul.f32 %v9326_v48, %v9301_v39 }
0x1123   :  { %v8297_v49 = vpop.eup %8296 }
0x1124   :  { %1716 = vrot.lane.b32.xlu1 %v8297_v49, %s8949_s4  ;;  %v8299_v25 = vpop.eup %8298  ;;  %v200_v43 = vadd.f32 %v9344_v59, %v173_v55  ;;  %v2119_v55 = vld [vmem:[%s11622_s5 + $0x20] sm:$0xff] }
0x1125   :  { %v1813_v38 = vadd.f32 1.0, %v8299_v25  ;;  %v8301_v47 = vpop.eup %8300 }
0x1126   :  { %v1700_v41 = vadd.f32 1.0, %v8301_v47 }
0x1127   :  { %8302 = vrcp.f32 %v1813_v38 }
0x1128   :  { %8304 = vrcp.f32 %v1700_v41 }
0x1134   :  { %v8303_v19 = vpop.eup %8302 }
0x1135   :  { %v8305_v61 = vpop.eup %8304  ;;  %v1824_v63 = vmul.f32 %v8303_v19, %v9888_v7  ;;  %v7640_v7 = vmul.f32 -1.442695, %v1696_v52 }
0x1136   :  { %v1711_v15 = vmul.f32 %v8305_v61, %v9892_v0 }
0x1190   :  { %v1828_v36 = vpop.permute.xlu0 %1827 }
0x1192   :  { %v1830_v2 = vpop.permute.xlu1 %1829 }
0x1193   :  { %v1831_v5 = vsel %vm360_vm1, %v1828_v36, %v1830_v2 }
0x1194   :  { %v1833_v35 = vmul.f32 %v8303_v19, %v1831_v5  ;;  %v1715_v1 = vpop.permute.xlu0 %1714 }
0x1196   :  { %1835 = vrot.lane.b32.xlu0 %v1833_v35, %s8950_s21  ;;  %v1717_v4 = vpop.permute.xlu1 %1716 }
0x1197   :  { %v1718_v12 = vsel %vm360_vm1, %v1715_v1, %v1717_v4 }
0x1198   :  { %v1720_v57 = vmul.f32 %v8305_v61, %v1718_v12 }
0x119a   :  { %1722 = vrot.lane.b32.xlu1 %v1720_v57, %s8950_s21 }
0x1208   :  { %v1836_v9 = vpop.permute.xlu0 %1835 }
0x1209   :  { %v9958_v3 = vadd.f32 %v1836_v9, %v1824_v63 }
0x120b   :  { %8306 = vtanh.f32 %v9958_v3 }
0x120c   :  { %v1723_v40 = vpop.permute.xlu1 %1722 }
0x120d   :  { %v9962_v16 = vadd.f32 %v1723_v40, %v1711_v15 }
0x120f   :  { %8308 = vtanh.f32 %v9962_v16 }
0x1210   :  { %8310 = vpow2.f32 %v7645_v6 }
0x1211   :  { %8312 = vpow2.f32 %v7640_v7 }
0x1218   :  { %v8307_v60 = vpop.eup %8306 }
0x1219   :  { %1841 = vrot.lane.b32.xlu0 %v8307_v60, %s8951_s22 }
0x121c   :  { %v8309_v13 = vpop.eup %8308 }
0x121d   :  { %1728 = vrot.lane.b32.xlu1 %v8309_v13, %s8951_s22  ;;  %v8311_v17 = vpop.eup %8310 }
0x121e   :  { %v1821_v18 = vadd.f32 1.0, %v8311_v17  ;;  %v8313_v20 = vpop.eup %8312 }
0x121f   :  { %v1708_v0 = vadd.f32 1.0, %v8313_v20  ;;  %v2138_v20 = vld [vmem:[%s11622_s5 + $0xb8] sm:$0xff] }
0x1220   :  { %8314 = vrcp.f32 %v1821_v18  ;;  %v2139_v18 = vld [vmem:[%s11622_s5 + $0xc0] sm:$0xff] }
0x1221   :  { %8316 = vrcp.f32 %v1708_v0  ;;  %v2124_v0 = vld [vmem:[%s11622_s5 + $0x48] sm:$0xff] }
0x122d   :  { %v8315_v21 = vpop.eup %8314 }
0x122e   :  { %v8317_v24 = vpop.eup %8316 }
0x128b   :  { %v1842_v22 = vpop.permute.xlu0 %1841 }
0x128c   :  { %v9967_v23 = vmul.f32 %v8315_v21, %v1842_v22  ;;  %v2137_v21 = vld [vmem:[%s11622_s5 + $0xb0] sm:$0xff]  ;;  %v2123_v22 = vld [vmem:[%s11622_s5 + $0x40] sm:$0xff] }
0x128e   :  { %1959 = vrot.lane.b32.xlu0 %v9967_v23, %s8952_s2 }
0x128f   :  { %v1729_v26 = vpop.permute.xlu1 %1728 }
0x1290   :  { %v1731_v27 = vmul.f32 %v8317_v24, %v1729_v26  ;;  %v2135_v24 = vld [vmem:[%s11622_s5 + $0xa0] sm:$0xff]  ;;  %v11667_v26 = vld [vmem:[#allocation14_spill] sm:$0xff] }
0x1292   :  { %1846 = vrot.lane.b32.xlu1 %v1731_v27, %s8952_s2 }
0x1300   :  { %v1960_v28 = vpop.permute.xlu0 %1959 }
0x1301   :  { %7653 = vmatmul.mubr.msk.f32.vlgmr.msra.gmra.mxu1 %vm255_vm2, %v1960_v28 }
0x1304   :  { %v9973_v29 = vpop.permute.xlu1 %1846 }
0x1305   :  { %7648 = vmatmul.mubr.msk.f32.vlgmr.msra.gmra.mxu0 %vm255_vm2, %v9973_v29 }
0x13c1   :  { %v2029_v52 = vpop.f32.mrf.mxu1 }
0x13c2   :  { %v2034_v33 = vadd.f32 %v2029_v52, %v239_v58  ;;  %v2134_v52 = vld [vmem:[%s11622_s5 + $0x98] sm:$0xff] }
0x13c3   :  { %v2031_v49 = vpop.f32.mrf.mxu1 }
0x13c4   :  { %8318 = vtanh.f32 %v2034_v33  ;;  %v9987_v56 = vadd.f32 %v2031_v49, %v240_v50  ;;  %v7654_v59 = vmul.f32 -1.442695, %v2034_v33  ;;  %v2120_v33 = vld [vmem:[%s11622_s5 + $0x28] sm:$0xff]  ;;  %v2133_v50 = vld [vmem:[%s11622_s5 + $0x90] sm:$0xff] }
0x13c5   :  { %v1916_v54 = vpop.f32.mrf.mxu0  ;;  %v2132_v49 = vld [vmem:[%s11622_s5 + $0x88] sm:$0xff] }
0x13c6   :  { %v1921_v44 = vadd.f32 %v1916_v54, %v199_v37  ;;  %8320 = vtanh.f32 %v9987_v56  ;;  %v2131_v37 = vld [vmem:[%s11622_s5 + $0x80] sm:$0xff]  ;;  %v2117_v54 = vld [vmem:[%s11622_s5 + $0x10] sm:$0xff] }
0x13c7   :  { %v1918_v45 = vpop.f32.mrf.mxu0 }
0x13c8   :  { %v9992_v46 = vadd.f32 %v1918_v45, %v200_v43  ;;  %8322 = vtanh.f32 %v1921_v44  ;;  %v7649_v25 = vmul.f32 -1.442695, %v1921_v44  ;;  %v2130_v44 = vld [vmem:[%s11622_s5 + $0x78] sm:$0xff] }
0x13ca   :  { %8324 = vtanh.f32 %v9992_v46  ;;  %v7650_v27 = vmul.f32 -1.442695, %v9992_v46  ;;  %v2116_v46 = vld [vmem:[%s11622_s5 + $0x8] sm:$0xff] }
0x13cb   :  { %8326 = vpow2.f32 %v7654_v59 }
0x13cc   :  { %8328 = vpow2.f32 %v7649_v25 }
0x13d1   :  { %v8319_v51 = vpop.eup %8318 }
0x13d2   :  { %2053 = vrot.lane.b32.xlu0 %v8319_v51, %s8949_s4  ;;  %v2129_v51 = vld [vmem:[%s11622_s5 + $0x70] sm:$0xff] }
0x13d3   :  { %v8321_v39 = vpop.eup %8320 }
0x13d4   :  { %2055 = vrot.lane.b32.xlu1 %v8321_v39, %s8949_s4 }
0x13d5   :  { %v8323_v48 = vpop.eup %8322 }
0x13d6   :  { %1940 = vrot.lane.b32.xlu0 %v8323_v48, %s8949_s4  ;;  %v2115_v48 = vld [vmem:[%s11622_s5] sm:$0xff] }
0x13d7   :  { %v8325_v53 = vpop.eup %8324 }
0x13d8   :  { %1942 = vrot.lane.b32.xlu1 %v8325_v53, %s8949_s4  ;;  %v8327_v38 = vpop.eup %8326  ;;  %v2128_v53 = vld [vmem:[%s11622_s5 + $0x68] sm:$0xff] }
0x13d9   :  { %v2039_v47 = vadd.f32 1.0, %v8327_v38  ;;  %v8329_v41 = vpop.eup %8328 }
0x13da   :  { %v1926_v36 = vadd.f32 1.0, %v8329_v41 }
0x13db   :  { %8330 = vrcp.f32 %v2039_v47  ;;  %v11668_v47 = vld [vmem:[#allocation12_spill] sm:$0xff] }
0x13dc   :  { %8332 = vrcp.f32 %v1926_v36 }
0x13e8   :  { %v8331_v5 = vpop.eup %8330 }
0x13e9   :  { %v8333_v12 = vpop.eup %8332  ;;  %v2050_v9 = vmul.f32 %v8331_v5, %v9958_v3  ;;  %v2127_v3 = vld [vmem:[%s11622_s5 + $0x60] sm:$0xf] }
0x13ea   :  { %v1937_v60 = vmul.f32 %v8333_v12, %v9962_v16  ;;  %v2140_v16 = vld [vmem:[%s11622_s5 + $0xc8] sm:$0xf]  ;;  %7897 = vmatprep.subr.msk.mxu0 %vm2198_vm3, %v2127_v3 }
0x13eb   :  { %7926 = vmatprep.subr.msk.mxu1 %vm2198_vm3, %v2140_v16  ;;  %7898 = vmatpush3.msk.msra.mxu0 %vm2198_vm3, %v2127_v3 }
0x13ec   :  { %7927 = vmatpush3.msk.msra.mxu1 %vm2198_vm3, %v2140_v16 }
0x13ed   :  { %7928 = vmatprep.subr.mxu1 %v2139_v18 }
0x13ee   :  { %7929 = vmatpush3.msra.mxu1 %v2139_v18 }
0x13ef   :  { %7930 = vmatprep.subr.mxu1 %v2138_v20 }
0x13f0   :  { %7931 = vmatpush3.msra.mxu1 %v2138_v20 }
0x13f1   :  { %7932 = vmatprep.subr.mxu1 %v2137_v21 }
0x13f2   :  { %7933 = vmatpush3.msra.mxu1 %v2137_v21 }
0x1444   :  { %v2054_v2 = vpop.permute.xlu0 %2053 }
0x1446   :  { %v2056_v19 = vpop.permute.xlu1 %2055 }
0x1447   :  { %v2057_v35 = vsel %vm360_vm1, %v2054_v2, %v2056_v19  ;;  %v8953_v2 = vmov 1983009808  }
0x1448   :  { %v2059_v1 = vmul.f32 %v8331_v5, %v2057_v35  ;;  %v1941_v4 = vpop.permute.xlu0 %1940  ;;  %v2162_v19 = vunpack.c.l.s4 %v8953_v2 }
0x144a   :  { %2061 = vrot.lane.b32.xlu0 %v2059_v1, %s8950_s21  ;;  %v1943_v61 = vpop.permute.xlu1 %1942  ;;  %v2163_v35 = vunpack.c.0.s8 %v2162_v19 }
0x144b   :  { %v1944_v57 = vsel %vm360_vm1, %v1941_v4, %v1943_v61  ;;  %v11669_v4 = vld [vmem:[#allocation17_spill] sm:$0xff] }
0x144c   :  { %v1946_v63 = vmul.f32 %v8333_v12, %v1944_v57  ;;  %v11670_v12 = vld [vmem:[#allocation16_spill] sm:$0xff] }
0x144e   :  { %1948 = vrot.lane.b32.xlu1 %v1946_v63, %s8950_s21  ;;  %v11671_v63 = vld [vmem:[#allocation9_spill] sm:$0xff] }
0x14bc   :  { %v2062_v15 = vpop.permute.xlu0 %2061 }
0x14bd   :  { %v2064_v40 = vadd.f32 %v2062_v15, %v2050_v9  ;;  %v10114_v9 = vsub.s32 %v2163_v35, %v11671_v63 }
0x14bf   :  { %8334 = vtanh.f32 %v2064_v40 }
0x14c0   :  { %v1949_v13 = vpop.permute.xlu1 %1948 }
0x14c1   :  { %v1951_v6 = vadd.f32 %v1949_v13, %v1937_v60  ;;  %v11672_v13 = vld [vmem:[#allocation15_spill] sm:$0xff] }
0x14c3   :  { %8336 = vtanh.f32 %v1951_v6 }
0x14cc   :  { %v8335_v7 = vpop.eup %8334 }
0x14cd   :  { %2067 = vrot.lane.b32.xlu0 %v8335_v7, %s8951_s22  ;;  %v11673_v7 = vld [vmem:[#allocation13_spill] sm:$0xff] }
0x14d0   :  { %v8337_v17 = vpop.eup %8336 }
0x14d1   :  { %2087 = vrot.lane.b32.xlu0 %v9897_v42, %s8949_s4  ;;  %1954 = vrot.lane.b32.xlu1 %v8337_v17, %s8951_s22  ;;  %v2126_v42 = vld [vmem:[%s11622_s5 + $0x58] sm:$0xff] }
0x14d2   :  { %7899 = vmatprep.subr.mxu0 %v2126_v42 }
0x14d3   :  { %7900 = vmatpush3.msra.mxu0 %v2126_v42 }
0x14d5   :  { %2093 = vrot.lane.b32.xlu0 %v9528_v34, %s8949_s4  ;;  %2085 = vrot.lane.b32.xlu1 %v9967_v23, %s8949_s4  ;;  %v2125_v34 = vld [vmem:[%s11622_s5 + $0x50] sm:$0xff]  ;;  %v2122_v23 = vld [vmem:[%s11622_s5 + $0x38] sm:$0xff] }
0x14d6   :  { %7901 = vmatprep.subr.mxu0 %v2125_v34 }
0x14d7   :  { %7902 = vmatpush3.msra.mxu0 %v2125_v34 }
0x14d8   :  { %7903 = vmatprep.subr.mxu0 %v2124_v0 }
0x14d9   :  { %2089 = vrot.lane.b32.xlu1 %v9823_v8, %s8949_s4  ;;  %v2136_v8 = vld [vmem:[%s11622_s5 + $0xa8] sm:$0xff]  ;;  %7904 = vmatpush3.msra.mxu0 %v2124_v0 }
0x14da   :  { %7905 = vmatprep.subr.mxu0 %v2123_v22  ;;  %7934 = vmatprep.subr.mxu1 %v2136_v8 }
0x14db   :  { %7906 = vmatpush3.msra.mxu0 %v2123_v22  ;;  %7935 = vmatpush3.msra.mxu1 %v2136_v8 }
0x14dc   :  { %7907 = vmatprep.subr.mxu0 %v2122_v23  ;;  %7936 = vmatprep.subr.mxu1 %v2135_v24 }
0x14dd   :  { %2091 = vrot.lane.b32.xlu1 %v9609_v11, %s8949_s4  ;;  %7908 = vmatpush3.msra.mxu0 %v2122_v23  ;;  %v7655_v11 = vmul.f32 -1.442695, %v9987_v56  ;;  %v2118_v56 = vld [vmem:[%s11622_s5 + $0x18] sm:$0xff]  ;;  %s8964_s5 = smov 125  }
0x14de   :  { %7937 = vmatpush3.msra.mxu1 %v2135_v24  ;;  %7909 = vmatprep.subr.mxu0 %v2121_v62 }
0x14df   :  { %8338 = vpow2.f32 %v7655_v11  ;;  %7938 = vmatprep.subr.mxu1 %v2134_v52  ;;  %7910 = vmatpush3.msra.mxu0 %v2121_v62 }
0x14e0   :  { %8340 = vpow2.f32 %v7650_v27  ;;  %7939 = vmatpush3.msra.mxu1 %v2134_v52  ;;  %7911 = vmatprep.subr.mxu0 %v2120_v33 }
0x14e1   :  { %2095 = vrot.lane.b32.xlu1 %v11667_v26, %s8949_s4  ;;  %7940 = vmatprep.subr.mxu1 %v2133_v50 }
0x14e2   :  { %7912 = vmatpush3.msra.mxu0 %v2120_v33  ;;  %7941 = vmatpush3.msra.mxu1 %v2133_v50 }
0x14e3   :  { %7913 = vmatprep.subr.mxu0 %v2119_v55  ;;  %7942 = vmatprep.subr.mxu1 %v2132_v49 }
0x14e4   :  { %7914 = vmatpush3.msra.mxu0 %v2119_v55  ;;  %7943 = vmatpush3.msra.mxu1 %v2132_v49 }
0x14e5   :  { %7915 = vmatprep.subr.mxu0 %v2118_v56  ;;  %7944 = vmatprep.subr.mxu1 %v2131_v37 }
0x14e6   :  { %7916 = vmatpush3.msra.mxu0 %v2118_v56  ;;  %7945 = vmatpush3.msra.mxu1 %v2131_v37 }
0x14e7   :  { %7917 = vmatprep.subr.mxu0 %v2117_v54  ;;  %7946 = vmatprep.subr.mxu1 %v2130_v44 }
0x14e8   :  { %7918 = vmatpush3.msra.mxu0 %v2117_v54  ;;  %7947 = vmatpush3.msra.mxu1 %v2130_v44 }
0x14e9   :  { %7919 = vmatprep.subr.mxu0 %v2116_v46  ;;  %7948 = vmatprep.subr.mxu1 %v2129_v51 }
0x14ea   :  { %7920 = vmatpush3.msra.mxu0 %v2116_v46  ;;  %7949 = vmatpush3.msra.mxu1 %v2129_v51 }
0x14eb   :  { %7921 = vmatprep.subr.mxu0 %v2115_v48  ;;  %7950 = vmatprep.subr.mxu1 %v2128_v53 }
0x14ec   :  { %v8339_v28 = vpop.eup %8338  ;;  %7922 = vmatpush3.msra.mxu0 %v2115_v48  ;;  %7951 = vmatpush3.msra.mxu1 %v2128_v53 }
0x14ed   :  { %v2047_v31 = vadd.f32 1.0, %v8339_v28  ;;  %v8341_v32 = vpop.eup %8340  ;;  %7955 = vmatprep.subr.mxu0 %v11663_v30  ;;  %7960 = vmatprep.subr.mxu1 %v11663_v30  ;;  %v10141_v28 = vld [vmem:[%s11623_s6 + $0x8] sm:$0xff] }
0x14ee   :  { %v1934_v58 = vadd.f32 1.0, %v8341_v32 }
0x14ef   :  { %8342 = vrcp.f32 %v2047_v31  ;;  %v7660_v31 = vld [vmem:[%s11624_s7 + $0x1] ss:$0 sm:$0xff] }
0x14f0   :  { %8344 = vrcp.f32 %v1934_v58 }
0x14fc   :  { %v8343_v43 = vpop.eup %8342 }
0x14fd   :  { %v8345_v59 = vpop.eup %8344 }
0x153f   :  { %v2068_v45 = vpop.permute.xlu0 %2067 }
0x1540   :  { %v2070_v39 = vmul.f32 %v8343_v43, %v2068_v45 }
0x1542   :  { %2083 = vrot.lane.b32.xlu0 %v2070_v39, %s8949_s4 }
0x1543   :  { %v1955_v25 = vpop.permute.xlu1 %1954  ;;  %v2088_v36 = vpop.permute.xlu0 %2087 }
0x1544   :  { %v1957_v38 = vmul.f32 %v8345_v59, %v1955_v25  ;;  %v2109_v57 = vsel %vm255_vm2, %v11670_v12, %v2088_v36 }
0x1546   :  { %2072 = vrot.lane.b32.xlu0 %v1957_v38, %s8952_s2 }
0x1547   :  { %v2086_v41 = vpop.permute.xlu1 %2085  ;;  %v2094_v1 = vpop.permute.xlu0 %2093 }
0x1548   :  { %v2108_v6 = vsel %vm255_vm2, %v11672_v13, %v2086_v41  ;;  %v2112_v21 = vsel %vm255_vm2, %v9907_v10, %v2094_v1  ;;  %v10136_v10 = vld [vmem:[%s11623_s6] sm:$0xff] }
0x154a   :  { %2097 = vrot.lane.b32.xlu0 %v11668_v47, %s8949_s4 }
0x154b   :  { %v2090_v5 = vpop.permute.xlu1 %2089 }
0x154c   :  { %v2110_v61 = vsel %vm255_vm2, %v11669_v4, %v2090_v5 }
0x154d   :  { %v2160_v15 = vcombine.low %v2109_v57, %v2110_v61 }
0x154f   :  { %v2092_v40 = vpop.permute.xlu1 %2091  ;;  %v2174_v16 = vrot.slane %v2160_v15, %v10114_v9 }
0x1550   :  { %v2111_v34 = vsel %vm255_vm2, %v9833_v14, %v2092_v40 }
0x1551   :  { %v2176_v22 = vcombine.low %v2111_v34, %v2112_v21 }
0x1553   :  { %v2096_v20 = vpop.permute.xlu1 %2095  ;;  %v2184_v14 = vrot.slane %v2176_v22, %v10114_v9 }
0x1554   :  { %v2113_v23 = vsel %vm255_vm2, %v9973_v29, %v2096_v20  ;;  %v7656_v29 = vld [vmem:[%s11624_s7] ss:$0 sm:$0xff]  ;;  %s8955_s7 = smov 112  }
0x15b4   :  { %v2084_v60 = vpop.permute.xlu0 %2083 }
0x15b5   :  { %v2107_v17 = vsel %vm255_vm2, %v11673_v7, %v2084_v60 }
0x15b6   :  { %v2159_v3 = vcombine.low %v2107_v17, %v2108_v6 }
0x15b8   :  { %v2167_v42 = vrot.slane %v2159_v3, %v10114_v9  ;;  %v2073_v18 = vpop.permute.xlu0 %2072 }
0x15ba   :  { %v2175_v0 = vcombine.low %v2167_v42, %v2174_v16 }
0x15bc   :  { %v2098_v8 = vpop.permute.xlu0 %2097  ;;  %7923 = vmatprep.mubr.msk.f32.mxu0 %vm2193_vm4, %v2175_v0  ;;  %7952 = vmatprep.mubr.msk.f32.mxu1 %vm2193_vm4, %v2175_v0 }
0x15bd   :  { %v2114_v24 = vsel %vm255_vm2, %v2073_v18, %v2098_v8 }
0x15be   :  { %v2177_v26 = vcombine.low %v2113_v23, %v2114_v24 }
0x15c0   :  { %v2191_v11 = vrot.slane %v2177_v26, %v10114_v9 }
0x15c2   :  { %v2192_v27 = vcombine.low %v2184_v14, %v2191_v11 }
0x15c4   :  { %7924 = vmatmul.mubr.msk.f32.vlgmr.msra.gmra.mxu0 %vm2193_vm4, %v2192_v27  ;;  %7953 = vmatmul.mubr.msk.f32.vlgmr.msra.gmra.mxu1 %vm2193_vm4, %v2192_v27 }
0x15c5   :  { %7956 = vmatpush3.msra.mxu0 %v10136_v10  ;;  %7961 = vmatpush3.msra.mxu1 %v10141_v28 }
0x15c6   :  { %7957 = vmatprep.mubr.msk.f32.mxu0 %vm8954_vm5, %v11663_v30  ;;  %7962 = vmatprep.mubr.msk.f32.mxu1 %vm8954_vm5, %v11663_v30 }
0x15c7   :  { %7965 = vmatprep.subr.mxu0 %v11663_v30  ;;  %7970 = vmatprep.subr.mxu1 %v11663_v30 }
0x15c8   :  { %7958 = vmatmul.mubr.f32.vlgmr.msra.gmra.mxu0 %v11663_v30  ;;  %7963 = vmatmul.mubr.f32.vlgmr.msra.gmra.mxu1 %v11663_v30 }
0x15c9   :  { %7966 = vmatpush3.msra.mxu0 %v10136_v10  ;;  %7971 = vmatpush3.msra.mxu1 %v10141_v28 }
0x15ca   :  { %7967 = vmatprep.mubr.msk.f32.mxu0 %vm8954_vm5, %v11663_v30  ;;  %7972 = vmatprep.mubr.msk.f32.mxu1 %vm8954_vm5, %v11663_v30 }
0x15cb   :  { %7975 = vmatprep.subr.mxu0 %v11663_v30  ;;  %7980 = vmatprep.subr.mxu1 %v11663_v30 }
0x1684   :  { %v7925_v32 = vpop.f32.mrf.mxu0  ;;  %v7954_v58 = vpop.f32.mrf.mxu1 }
0x1685   :  { %v10169_v62 = vadd.f32 %v7925_v32, %v7656_v29  ;;  %v10171_v52 = vadd.f32 %v7954_v58, %v7660_v31 }
0x1686   :  { %v2268_v33 = vpop.f32.mrf.mxu0  ;;  %v2396_v50 = vpop.f32.mrf.mxu1 }
0x1687   :  { %v2424_v55 = vcombine.high %v10171_v52, %v10171_v52  ;;  %v10175_v49 = vadd.f32 %v7656_v29, %v2268_v33  ;;  %v10177_v56 = vadd.f32 %v7660_v31, %v2396_v50 }
0x1688   :  { %v2518_v37 = vpop.f32.mrf.mxu0  ;;  %v2613_v54 = vpop.f32.mrf.mxu1 }
0x1689   :  { %v10181_v44 = vrot.slane %v10175_v49, %v10114_v9  ;;  %v10184_v43 = vrot.slane %v2424_v55, %v10114_v9 }
0x168a   :  { %v7959_v45 = vpop.f32.mrf.mxu0  ;;  %v7964_v46 = vpop.f32.mrf.mxu1 }
0x168b   :  { %v2522_v51 = vadd.f32 %v2518_v37, %v10181_v44  ;;  %v2440_v39 = vcombine.high %v10184_v43, %v10184_v43  ;;  %v2294_v21 = vcombine.high %v10181_v44, %v10181_v44 }
0x168d   :  { %8346 = vtanh.f32 %v2522_v51  ;;  %v2617_v48 = vadd.f32 %v2613_v54, %v2440_v39  ;;  %v7664_v25 = vmul.f32 -1.442695, %v2522_v51 }
0x168f   :  { %8348 = vtanh.f32 %v2617_v48  ;;  %v7665_v38 = vmul.f32 -1.442695, %v2617_v48 }
0x1690   :  { %8350 = vpow2.f32 %v7664_v25 }
0x1691   :  { %8352 = vpow2.f32 %v7665_v38 }
0x169a   :  { %v8347_v53 = vpop.eup %8346 }
0x169b   :  { %2532 = vrot.lane.b32.xlu1 %v8347_v53, %s8955_s7 }
0x169c   :  { %v8349_v59 = vpop.eup %8348 }
0x169d   :  { %2627 = vrot.lane.b32.xlu0 %v8349_v59, %s8955_s7  ;;  %v8351_v47 = vpop.eup %8350 }
0x169e   :  { %v8353_v41 = vpop.eup %8352  ;;  %v2526_v36 = vadd.f32 1.0, %v8351_v47 }
0x169f   :  { %v2621_v2 = vadd.f32 1.0, %v8353_v41 }
0x16a0   :  { %8354 = vrcp.f32 %v2526_v36 }
0x16a1   :  { %8356 = vrcp.f32 %v2621_v2 }
0x16ad   :  { %v8355_v19 = vpop.eup %8354 }
0x16ae   :  { %v8357_v1 = vpop.eup %8356  ;;  %v2530_v12 = vmul.f32 0.0, %v8355_v19 }
0x16af   :  { %v2625_v40 = vmul.f32 0.0, %v8357_v1 }
0x170d   :  { %v2533_v5 = vpop.permute.xlu1 %2532 }
0x170e   :  { %v2535_v35 = vmul.f32 %v8355_v19, %v2533_v5 }
0x170f   :  { %v2628_v4 = vpop.permute.xlu0 %2627 }
0x1710   :  { %2537 = vrot.lane.b32.xlu1 %v2535_v35, %s8956_s24  ;;  %v2630_v61 = vmul.f32 %v8357_v1, %v2628_v4  ;;  %v2279_v4 = vcombine.high %v10175_v49, %v10175_v49 }
0x1712   :  { %2632 = vrot.lane.b32.xlu0 %v2630_v61, %s8956_s24  ;;  %v10236_v61 = vrot.slane %v10171_v52, %v10114_v9 }
0x1782   :  { %v2538_v57 = vpop.permute.xlu1 %2537 }
0x1783   :  { %v2540_v15 = vadd.f32 %v2538_v57, %v2530_v12  ;;  %v10239_v12 = vrot.slane %v2279_v4, %v10114_v9 }
0x1784   :  { %v2633_v60 = vpop.permute.xlu0 %2632 }
0x1785   :  { %8358 = vtanh.f32 %v2540_v15  ;;  %v2635_v13 = vadd.f32 %v2633_v60, %v2625_v40  ;;  %v2439_v60 = vcombine.high %v10236_v61, %v10236_v61 }
0x1787   :  { %8360 = vtanh.f32 %v2635_v13 }
0x1792   :  { %v8359_v6 = vpop.eup %8358 }
0x1793   :  { %2543 = vrot.lane.b32.xlu1 %v8359_v6, %s8957_s25 }
0x1794   :  { %v8361_v7 = vpop.eup %8360 }
0x1795   :  { %2638 = vrot.lane.b32.xlu0 %v8361_v7, %s8957_s25 }
0x1805   :  { %v2544_v17 = vpop.permute.xlu1 %2543 }
0x1806   :  { %v2546_v3 = vmul.f32 %v8355_v19, %v2544_v17 }
0x1807   :  { %v2639_v42 = vpop.permute.xlu0 %2638 }
0x1808   :  { %v2649_v16 = vrot.slane %v2546_v3, %v10114_v9  ;;  %v2641_v18 = vmul.f32 %v8357_v1, %v2639_v42 }
0x180a   :  { %2650 = vrot.lane.b32.xlu1 %v2649_v16, %s8958_s26  ;;  %v2756_v34 = vrot.slane %v2641_v18, %v10114_v9 }
0x180c   :  { %2757 = vrot.lane.b32.xlu0 %v2756_v34, %s8958_s26 }
0x187c   :  { %v2651_v20 = vpop.permute.xlu1 %2650 }
0x187d   :  { %7968 = vmatmul.mubr.msk.f32.vlgmr.msra.gmra.mxu0 %vm2449_vm6, %v2651_v20 }
0x187e   :  { %7976 = vmatpush3.msra.mxu0 %v10136_v10  ;;  %7977 = vmatprep.mubr.msk.f32.mxu0 %vm8954_vm5, %v11663_v30  ;;  %v2758_v0 = vpop.permute.xlu0 %2757 }
0x187f   :  { %7985 = vmatprep.subr.mxu0 %v11663_v30  ;;  %7973 = vmatmul.mubr.msk.f32.vlgmr.msra.gmra.mxu1 %vm2449_vm6, %v2758_v0 }
0x1880   :  { %7981 = vmatpush3.msra.mxu1 %v10141_v28  ;;  %7982 = vmatprep.mubr.msk.f32.mxu1 %vm8954_vm5, %v11663_v30 }
0x1881   :  { %7990 = vmatprep.subr.mxu1 %v11663_v30 }
0x193d   :  { %v2720_v22 = vpop.f32.mrf.mxu0 }
0x193e   :  { %v2724_v8 = vadd.f32 %v2720_v22, %v2294_v21 }
0x193f   :  { %v7969_v23 = vpop.f32.mrf.mxu0  ;;  %v2827_v24 = vpop.f32.mrf.mxu1 }
0x1940   :  { %8362 = vtanh.f32 %v2724_v8  ;;  %v2831_v26 = vadd.f32 %v2827_v24, %v10184_v43  ;;  %v7667_v29 = vmul.f32 -1.442695, %v2724_v8 }
0x1941   :  { %v7974_v14 = vpop.f32.mrf.mxu1 }
0x1942   :  { %8364 = vtanh.f32 %v2831_v26  ;;  %v7669_v31 = vmul.f32 -1.442695, %v2831_v26 }
0x1943   :  { %8366 = vpow2.f32 %v7667_v29 }
0x1944   :  { %8368 = vpow2.f32 %v7669_v31 }
0x194d   :  { %v8363_v11 = vpop.eup %8362 }
0x194e   :  { %2734 = vrot.lane.b32.xlu1 %v8363_v11, %s8955_s7 }
0x194f   :  { %v8365_v27 = vpop.eup %8364 }
0x1950   :  { %2841 = vrot.lane.b32.xlu0 %v8365_v27, %s8955_s7  ;;  %v8367_v32 = vpop.eup %8366 }
0x1951   :  { %v8369_v58 = vpop.eup %8368  ;;  %v2728_v33 = vadd.f32 1.0, %v8367_v32 }
0x1952   :  { %v2835_v50 = vadd.f32 1.0, %v8369_v58 }
0x1953   :  { %8370 = vrcp.f32 %v2728_v33 }
0x1954   :  { %8372 = vrcp.f32 %v2835_v50 }
0x1960   :  { %v8371_v55 = vpop.eup %8370 }
0x1961   :  { %v8373_v44 = vpop.eup %8372  ;;  %v2732_v46 = vmul.f32 %v8371_v55, %v2540_v15 }
0x1962   :  { %v2839_v48 = vmul.f32 %v8373_v44, %v2635_v13 }
0x19c0   :  { %v2735_v37 = vpop.permute.xlu1 %2734 }
0x19c1   :  { %v2737_v54 = vmul.f32 %v8371_v55, %v2735_v37 }
0x19c2   :  { %v2842_v43 = vpop.permute.xlu0 %2841 }
0x19c3   :  { %2739 = vrot.lane.b32.xlu1 %v2737_v54, %s8956_s24  ;;  %v2844_v45 = vmul.f32 %v8373_v44, %v2842_v43 }
0x19c5   :  { %2846 = vrot.lane.b32.xlu0 %v2844_v45, %s8956_s24  ;;  %v2295_v45 = vcombine.high %v10239_v12, %v10239_v12 }
0x1a35   :  { %v2740_v51 = vpop.permute.xlu1 %2739 }
0x1a36   :  { %v2742_v39 = vadd.f32 %v2740_v51, %v2732_v46 }
0x1a37   :  { %v2847_v53 = vpop.permute.xlu0 %2846 }
0x1a38   :  { %8374 = vtanh.f32 %v2742_v39  ;;  %v2849_v59 = vadd.f32 %v2847_v53, %v2839_v48 }
0x1a3a   :  { %8376 = vtanh.f32 %v2849_v59 }
0x1a45   :  { %v8375_v25 = vpop.eup %8374 }
0x1a46   :  { %2745 = vrot.lane.b32.xlu1 %v8375_v25, %s8957_s25 }
0x1a47   :  { %v8377_v38 = vpop.eup %8376 }
0x1a48   :  { %2852 = vrot.lane.b32.xlu0 %v8377_v38, %s8957_s25 }
0x1ab8   :  { %v2746_v47 = vpop.permute.xlu1 %2745 }
0x1ab9   :  { %v2748_v41 = vmul.f32 %v8371_v55, %v2746_v47 }
0x1aba   :  { %v2853_v2 = vpop.permute.xlu0 %2852 }
0x1abb   :  { %v2863_v36 = vrot.slane %v2748_v41, %v10114_v9  ;;  %v2855_v19 = vmul.f32 %v8373_v44, %v2853_v2 }
0x1abd   :  { %2864 = vrot.lane.b32.xlu1 %v2863_v36, %s8958_s26  ;;  %v2970_v5 = vrot.slane %v2855_v19, %v10114_v9 }
0x1abf   :  { %2971 = vrot.lane.b32.xlu0 %v2970_v5, %s8958_s26 }
0x1b2f   :  { %v2865_v35 = vpop.permute.xlu1 %2864 }
0x1b30   :  { %7978 = vmatmul.mubr.msk.f32.vlgmr.msra.gmra.mxu0 %vm2449_vm6, %v2865_v35 }
0x1b31   :  { %7986 = vmatpush3.msra.mxu0 %v10136_v10  ;;  %7987 = vmatprep.mubr.msk.f32.mxu0 %vm8954_vm5, %v11663_v30  ;;  %v2972_v1 = vpop.permute.xlu0 %2971 }
0x1b32   :  { %7995 = vmatprep.subr.mxu0 %v11663_v30  ;;  %7983 = vmatmul.mubr.msk.f32.vlgmr.msra.gmra.mxu1 %vm2449_vm6, %v2972_v1 }
0x1b33   :  { %7991 = vmatpush3.msra.mxu1 %v10141_v28  ;;  %7992 = vmatprep.mubr.msk.f32.mxu1 %vm8954_vm5, %v11663_v30 }
0x1b34   :  { %8000 = vmatprep.subr.mxu1 %v11663_v30 }
0x1bf0   :  { %v2934_v57 = vpop.f32.mrf.mxu0 }
0x1bf1   :  { %v2938_v15 = vadd.f32 %v2934_v57, %v10239_v12 }
0x1bf2   :  { %v7979_v40 = vpop.f32.mrf.mxu0  ;;  %v3041_v13 = vpop.f32.mrf.mxu1 }
0x1bf3   :  { %8378 = vtanh.f32 %v2938_v15  ;;  %v3045_v6 = vadd.f32 %v3041_v13, %v2439_v60  ;;  %v7671_v17 = vmul.f32 -1.442695, %v2938_v15 }
0x1bf4   :  { %v7984_v7 = vpop.f32.mrf.mxu1 }
0x1bf5   :  { %8380 = vtanh.f32 %v3045_v6  ;;  %v7673_v3 = vmul.f32 -1.442695, %v3045_v6 }
0x1bf6   :  { %8382 = vpow2.f32 %v7671_v17 }
0x1bf7   :  { %8384 = vpow2.f32 %v7673_v3 }
0x1c00   :  { %v8379_v49 = vpop.eup %8378 }
0x1c01   :  { %2948 = vrot.lane.b32.xlu1 %v8379_v49, %s8955_s7 }
0x1c02   :  { %v8381_v52 = vpop.eup %8380 }
0x1c03   :  { %3055 = vrot.lane.b32.xlu0 %v8381_v52, %s8955_s7  ;;  %v8383_v16 = vpop.eup %8382 }
0x1c04   :  { %v8385_v42 = vpop.eup %8384  ;;  %v2942_v18 = vadd.f32 1.0, %v8383_v16 }
0x1c05   :  { %v3049_v34 = vadd.f32 1.0, %v8385_v42 }
0x1c06   :  { %8386 = vrcp.f32 %v2942_v18 }
0x1c07   :  { %8388 = vrcp.f32 %v3049_v34 }
0x1c13   :  { %v8387_v20 = vpop.eup %8386 }
0x1c14   :  { %v8389_v22 = vpop.eup %8388  ;;  %v2946_v24 = vmul.f32 %v8387_v20, %v2742_v39 }
0x1c15   :  { %v3053_v11 = vmul.f32 %v8389_v22, %v2849_v59 }
0x1c73   :  { %v2949_v0 = vpop.permute.xlu1 %2948 }
0x1c74   :  { %v2951_v21 = vmul.f32 %v8387_v20, %v2949_v0 }
0x1c75   :  { %v3056_v8 = vpop.permute.xlu0 %3055 }
0x1c76   :  { %2953 = vrot.lane.b32.xlu1 %v2951_v21, %s8956_s24  ;;  %v3058_v23 = vmul.f32 %v8389_v22, %v3056_v8  ;;  %v2407_v21 = vcombine.high %v10177_v56, %v10177_v56  ;;  %v10294_v8 = vrot.slane %v10169_v62, %v10114_v9 }
0x1c78   :  { %3060 = vrot.lane.b32.xlu0 %v3058_v23, %s8956_s24 }
0x1ce8   :  { %v2954_v26 = vpop.permute.xlu1 %2953 }
0x1ce9   :  { %v2956_v14 = vadd.f32 %v2954_v26, %v2946_v24 }
0x1cea   :  { %v3061_v27 = vpop.permute.xlu0 %3060 }
0x1ceb   :  { %8390 = vtanh.f32 %v2956_v14  ;;  %v3063_v29 = vadd.f32 %v3061_v27, %v3053_v11 }
0x1ced   :  { %8392 = vtanh.f32 %v3063_v29 }
0x1cf8   :  { %v8391_v31 = vpop.eup %8390 }
0x1cf9   :  { %2959 = vrot.lane.b32.xlu1 %v8391_v31, %s8957_s25 }
0x1cfa   :  { %v8393_v32 = vpop.eup %8392 }
0x1cfb   :  { %3066 = vrot.lane.b32.xlu0 %v8393_v32, %s8957_s25 }
0x1d6b   :  { %v2960_v58 = vpop.permute.xlu1 %2959 }
0x1d6c   :  { %v2962_v33 = vmul.f32 %v8387_v20, %v2960_v58 }
0x1d6d   :  { %v3067_v55 = vpop.permute.xlu0 %3066 }
0x1d6e   :  { %v3077_v50 = vrot.slane %v2962_v33, %v10114_v9  ;;  %v3069_v37 = vmul.f32 %v8389_v22, %v3067_v55  ;;  %v10290_v22 = vrot.slane %v2407_v21, %v10114_v9 }
0x1d70   :  { %3078 = vrot.lane.b32.xlu1 %v3077_v50, %s8958_s26  ;;  %v3184_v54 = vrot.slane %v3069_v37, %v10114_v9 }
0x1d72   :  { %3185 = vrot.lane.b32.xlu0 %v3184_v54, %s8958_s26 }
0x1de2   :  { %v3079_v44 = vpop.permute.xlu1 %3078 }
0x1de3   :  { %7988 = vmatmul.mubr.msk.f32.vlgmr.msra.gmra.mxu0 %vm2449_vm6, %v3079_v44 }
0x1de4   :  { %7996 = vmatpush3.msra.mxu0 %v10136_v10  ;;  %7997 = vmatprep.mubr.msk.f32.mxu0 %vm8954_vm5, %v11663_v30  ;;  %v3186_v43 = vpop.permute.xlu0 %3185 }
0x1de5   :  { %8005 = vmatprep.subr.mxu0 %v11663_v30  ;;  %7993 = vmatmul.mubr.msk.f32.vlgmr.msra.gmra.mxu1 %vm2449_vm6, %v3186_v43 }
0x1de6   :  { %8001 = vmatpush3.msra.mxu1 %v10141_v28  ;;  %8002 = vmatprep.mubr.msk.f32.mxu1 %vm8954_vm5, %v11663_v30 }
0x1de7   :  { %8010 = vmatprep.subr.mxu1 %v11663_v30 }
0x1ea3   :  { %v3148_v46 = vpop.f32.mrf.mxu0 }
0x1ea4   :  { %v3152_v51 = vadd.f32 %v3148_v46, %v2295_v45 }
0x1ea5   :  { %v7989_v39 = vpop.f32.mrf.mxu0  ;;  %v3255_v48 = vpop.f32.mrf.mxu1 }
0x1ea6   :  { %8394 = vtanh.f32 %v3152_v51  ;;  %v3259_v53 = vadd.f32 %v3255_v48, %v10236_v61  ;;  %v7675_v47 = vmul.f32 -1.442695, %v3152_v51 }
0x1ea7   :  { %v7994_v59 = vpop.f32.mrf.mxu1 }
0x1ea8   :  { %8396 = vtanh.f32 %v3259_v53  ;;  %v7677_v41 = vmul.f32 -1.442695, %v3259_v53 }
0x1ea9   :  { %8398 = vpow2.f32 %v7675_v47 }
0x1eaa   :  { %8400 = vpow2.f32 %v7677_v41 }
0x1eb3   :  { %v8395_v25 = vpop.eup %8394 }
0x1eb4   :  { %3162 = vrot.lane.b32.xlu1 %v8395_v25, %s8955_s7 }
0x1eb5   :  { %v8397_v38 = vpop.eup %8396 }
0x1eb6   :  { %3269 = vrot.lane.b32.xlu0 %v8397_v38, %s8955_s7  ;;  %v8399_v36 = vpop.eup %8398 }
0x1eb7   :  { %v8401_v2 = vpop.eup %8400  ;;  %v3156_v19 = vadd.f32 1.0, %v8399_v36 }
0x1eb8   :  { %v3263_v5 = vadd.f32 1.0, %v8401_v2 }
0x1eb9   :  { %8402 = vrcp.f32 %v3156_v19 }
0x1eba   :  { %8404 = vrcp.f32 %v3263_v5 }
0x1ec6   :  { %v8403_v35 = vpop.eup %8402 }
0x1ec7   :  { %v8405_v61 = vpop.eup %8404  ;;  %v3160_v15 = vmul.f32 %v8403_v35, %v2956_v14  ;;  %v2423_v14 = vcombine.high %v10290_v22, %v10290_v22 }
0x1ec8   :  { %v3267_v13 = vmul.f32 %v8405_v61, %v3063_v29 }
0x1f26   :  { %v3163_v1 = vpop.permute.xlu1 %3162 }
0x1f27   :  { %v3165_v4 = vmul.f32 %v8403_v35, %v3163_v1 }
0x1f28   :  { %v3270_v12 = vpop.permute.xlu0 %3269 }
0x1f29   :  { %3167 = vrot.lane.b32.xlu1 %v3165_v4, %s8956_s24  ;;  %v3272_v57 = vmul.f32 %v8405_v61, %v3270_v12 }
0x1f2b   :  { %3274 = vrot.lane.b32.xlu0 %v3272_v57, %s8956_s24  ;;  %v2311_v57 = vcombine.high %v10294_v8, %v10294_v8 }
0x1f9b   :  { %v3168_v40 = vpop.permute.xlu1 %3167 }
0x1f9c   :  { %v3170_v60 = vadd.f32 %v3168_v40, %v3160_v15 }
0x1f9d   :  { %v3275_v6 = vpop.permute.xlu0 %3274 }
0x1f9e   :  { %8406 = vtanh.f32 %v3170_v60  ;;  %v3277_v7 = vadd.f32 %v3275_v6, %v3267_v13 }
0x1fa0   :  { %8408 = vtanh.f32 %v3277_v7 }
0x1fab   :  { %v8407_v49 = vpop.eup %8406 }
0x1fac   :  { %3173 = vrot.lane.b32.xlu1 %v8407_v49, %s8957_s25 }
0x1fad   :  { %v8409_v52 = vpop.eup %8408 }
0x1fae   :  { %3280 = vrot.lane.b32.xlu0 %v8409_v52, %s8957_s25 }
0x201e   :  { %v3174_v17 = vpop.permute.xlu1 %3173 }
0x201f   :  { %v3176_v3 = vmul.f32 %v8403_v35, %v3174_v17 }
0x2020   :  { %v3281_v42 = vpop.permute.xlu0 %3280 }
0x2021   :  { %v3291_v16 = vrot.slane %v3176_v3, %v10114_v9  ;;  %v3283_v18 = vmul.f32 %v8405_v61, %v3281_v42 }
0x2023   :  { %3292 = vrot.lane.b32.xlu1 %v3291_v16, %s8958_s26  ;;  %v3398_v34 = vrot.slane %v3283_v18, %v10114_v9 }
0x2025   :  { %3399 = vrot.lane.b32.xlu0 %v3398_v34, %s8958_s26 }
0x2095   :  { %v3293_v20 = vpop.permute.xlu1 %3292 }
0x2096   :  { %7998 = vmatmul.mubr.msk.f32.vlgmr.msra.gmra.mxu0 %vm2449_vm6, %v3293_v20 }
0x2097   :  { %8006 = vmatpush3.msra.mxu0 %v10136_v10  ;;  %8007 = vmatprep.mubr.msk.f32.mxu0 %vm8954_vm5, %v11663_v30  ;;  %v3400_v0 = vpop.permute.xlu0 %3399 }
0x2098   :  { %8015 = vmatprep.subr.mxu0 %v11663_v30  ;;  %8003 = vmatmul.mubr.msk.f32.vlgmr.msra.gmra.mxu1 %vm2449_vm6, %v3400_v0 }
0x2099   :  { %8011 = vmatpush3.msra.mxu1 %v10141_v28  ;;  %8012 = vmatprep.mubr.msk.f32.mxu1 %vm8954_vm5, %v11663_v30 }
0x209a   :  { %8020 = vmatprep.subr.mxu1 %v11663_v30 }
0x2156   :  { %v3362_v23 = vpop.f32.mrf.mxu0 }
0x2157   :  { %v3366_v24 = vadd.f32 %v3362_v23, %v10294_v8 }
0x2158   :  { %v7999_v26 = vpop.f32.mrf.mxu0  ;;  %v3469_v11 = vpop.f32.mrf.mxu1 }
0x2159   :  { %8410 = vtanh.f32 %v3366_v24  ;;  %v3473_v27 = vadd.f32 %v3469_v11, %v2423_v14  ;;  %v7679_v58 = vmul.f32 -1.442695, %v3366_v24 }
0x215a   :  { %v8004_v29 = vpop.f32.mrf.mxu1 }
0x215b   :  { %8412 = vtanh.f32 %v3473_v27  ;;  %v7681_v33 = vmul.f32 -1.442695, %v3473_v27 }
0x215c   :  { %8414 = vpow2.f32 %v7679_v58 }
0x215d   :  { %8416 = vpow2.f32 %v7681_v33 }
0x2166   :  { %v8411_v31 = vpop.eup %8410 }
0x2167   :  { %3376 = vrot.lane.b32.xlu1 %v8411_v31, %s8955_s7 }
0x2168   :  { %v8413_v32 = vpop.eup %8412 }
0x2169   :  { %3483 = vrot.lane.b32.xlu0 %v8413_v32, %s8955_s7  ;;  %v8415_v50 = vpop.eup %8414 }
0x216a   :  { %v8417_v55 = vpop.eup %8416  ;;  %v3370_v37 = vadd.f32 1.0, %v8415_v50 }
0x216b   :  { %v3477_v54 = vadd.f32 1.0, %v8417_v55 }
0x216c   :  { %8418 = vrcp.f32 %v3370_v37 }
0x216d   :  { %8420 = vrcp.f32 %v3477_v54 }
0x2179   :  { %v8419_v44 = vpop.eup %8418 }
0x217a   :  { %v8421_v46 = vpop.eup %8420  ;;  %v3374_v48 = vmul.f32 %v8419_v44, %v3170_v60 }
0x217b   :  { %v3481_v25 = vmul.f32 %v8421_v46, %v3277_v7 }
0x21d9   :  { %v3377_v43 = vpop.permute.xlu1 %3376 }
0x21da   :  { %v3379_v45 = vmul.f32 %v8419_v44, %v3377_v43 }
0x21db   :  { %v3484_v51 = vpop.permute.xlu0 %3483 }
0x21dc   :  { %3381 = vrot.lane.b32.xlu1 %v3379_v45, %s8956_s24  ;;  %v3486_v39 = vmul.f32 %v8421_v46, %v3484_v51  ;;  %v2296_v45 = vcombine.high %v10169_v62, %v10169_v62 }
0x21de   :  { %3488 = vrot.lane.b32.xlu0 %v3486_v39, %s8956_s24 }
0x224e   :  { %v3382_v53 = vpop.permute.xlu1 %3381 }
0x224f   :  { %v3384_v59 = vadd.f32 %v3382_v53, %v3374_v48 }
0x2250   :  { %v3489_v38 = vpop.permute.xlu0 %3488 }
0x2251   :  { %8422 = vtanh.f32 %v3384_v59  ;;  %v3491_v47 = vadd.f32 %v3489_v38, %v3481_v25 }
0x2253   :  { %8424 = vtanh.f32 %v3491_v47 }
0x225e   :  { %v8423_v41 = vpop.eup %8422 }
0x225f   :  { %3387 = vrot.lane.b32.xlu1 %v8423_v41, %s8957_s25 }
0x2260   :  { %v8425_v36 = vpop.eup %8424 }
0x2261   :  { %3494 = vrot.lane.b32.xlu0 %v8425_v36, %s8957_s25 }
0x22d1   :  { %v3388_v2 = vpop.permute.xlu1 %3387 }
0x22d2   :  { %v3390_v19 = vmul.f32 %v8419_v44, %v3388_v2 }
0x22d3   :  { %v3495_v35 = vpop.permute.xlu0 %3494 }
0x22d4   :  { %v3505_v5 = vrot.slane %v3390_v19, %v10114_v9  ;;  %v3497_v1 = vmul.f32 %v8421_v46, %v3495_v35  ;;  %v10345_v46 = vrot.slane %v10177_v56, %v10114_v9 }
0x22d6   :  { %3506 = vrot.lane.b32.xlu1 %v3505_v5, %s8958_s26  ;;  %v3612_v4 = vrot.slane %v3497_v1, %v10114_v9  ;;  %v2422_v53 = vcombine.high %v10345_v46, %v10345_v46 }
0x22d8   :  { %3613 = vrot.lane.b32.xlu0 %v3612_v4, %s8958_s26 }
0x2348   :  { %v3507_v61 = vpop.permute.xlu1 %3506 }
0x2349   :  { %8008 = vmatmul.mubr.msk.f32.vlgmr.msra.gmra.mxu0 %vm2449_vm6, %v3507_v61 }
0x234a   :  { %8016 = vmatpush3.msra.mxu0 %v10136_v10  ;;  %8017 = vmatprep.mubr.msk.f32.mxu0 %vm8954_vm5, %v11663_v30  ;;  %v3614_v12 = vpop.permute.xlu0 %3613 }
0x234b   :  { %8025 = vmatprep.subr.mxu0 %v11663_v30  ;;  %8013 = vmatmul.mubr.msk.f32.vlgmr.msra.gmra.mxu1 %vm2449_vm6, %v3614_v12 }
0x234c   :  { %8021 = vmatpush3.msra.mxu1 %v10141_v28  ;;  %8022 = vmatprep.mubr.msk.f32.mxu1 %vm8954_vm5, %v11663_v30 }
0x234d   :  { %8030 = vmatprep.subr.mxu1 %v11663_v30 }
0x2409   :  { %v3576_v15 = vpop.f32.mrf.mxu0 }
0x240a   :  { %v3580_v40 = vadd.f32 %v3576_v15, %v2311_v57 }
0x240b   :  { %v8009_v60 = vpop.f32.mrf.mxu0  ;;  %v3683_v13 = vpop.f32.mrf.mxu1 }
0x240c   :  { %8426 = vtanh.f32 %v3580_v40  ;;  %v3687_v6 = vadd.f32 %v3683_v13, %v10290_v22  ;;  %v7683_v17 = vmul.f32 -1.442695, %v3580_v40 }
0x240d   :  { %v8014_v7 = vpop.f32.mrf.mxu1 }
0x240e   :  { %8428 = vtanh.f32 %v3687_v6  ;;  %v7685_v3 = vmul.f32 -1.442695, %v3687_v6 }
0x240f   :  { %8430 = vpow2.f32 %v7683_v17 }
0x2410   :  { %8432 = vpow2.f32 %v7685_v3 }
0x2419   :  { %v8427_v49 = vpop.eup %8426 }
0x241a   :  { %3590 = vrot.lane.b32.xlu1 %v8427_v49, %s8955_s7 }
0x241b   :  { %v8429_v52 = vpop.eup %8428 }
0x241c   :  { %3697 = vrot.lane.b32.xlu0 %v8429_v52, %s8955_s7  ;;  %v8431_v16 = vpop.eup %8430 }
0x241d   :  { %v8433_v42 = vpop.eup %8432  ;;  %v3584_v18 = vadd.f32 1.0, %v8431_v16 }
0x241e   :  { %v3691_v34 = vadd.f32 1.0, %v8433_v42 }
0x241f   :  { %8434 = vrcp.f32 %v3584_v18 }
0x2420   :  { %8436 = vrcp.f32 %v3691_v34 }
0x242c   :  { %v8435_v20 = vpop.eup %8434 }
0x242d   :  { %v8437_v22 = vpop.eup %8436  ;;  %v3588_v24 = vmul.f32 %v8435_v20, %v3384_v59 }
0x242e   :  { %v3695_v11 = vmul.f32 %v8437_v22, %v3491_v47 }
0x248c   :  { %v3591_v0 = vpop.permute.xlu1 %3590 }
0x248d   :  { %v3593_v21 = vmul.f32 %v8435_v20, %v3591_v0 }
0x248e   :  { %v3698_v8 = vpop.permute.xlu0 %3697 }
0x248f   :  { %3595 = vrot.lane.b32.xlu1 %v3593_v21, %s8956_s24  ;;  %v3700_v23 = vmul.f32 %v8437_v22, %v3698_v8 }
0x2491   :  { %3702 = vrot.lane.b32.xlu0 %v3700_v23, %s8956_s24 }
0x2501   :  { %v3596_v26 = vpop.permute.xlu1 %3595 }
0x2502   :  { %v3598_v14 = vadd.f32 %v3596_v26, %v3588_v24 }
0x2503   :  { %v3703_v27 = vpop.permute.xlu0 %3702 }
0x2504   :  { %8438 = vtanh.f32 %v3598_v14  ;;  %v3705_v29 = vadd.f32 %v3703_v27, %v3695_v11 }
0x2506   :  { %8440 = vtanh.f32 %v3705_v29 }
0x2511   :  { %v8439_v31 = vpop.eup %8438 }
0x2512   :  { %3601 = vrot.lane.b32.xlu1 %v8439_v31, %s8957_s25 }
0x2513   :  { %v8441_v32 = vpop.eup %8440 }
0x2514   :  { %3708 = vrot.lane.b32.xlu0 %v8441_v32, %s8957_s25 }
0x2584   :  { %v3602_v58 = vpop.permute.xlu1 %3601 }
0x2585   :  { %v3604_v33 = vmul.f32 %v8435_v20, %v3602_v58 }
0x2586   :  { %v3709_v55 = vpop.permute.xlu0 %3708 }
0x2587   :  { %v3719_v50 = vrot.slane %v3604_v33, %v10114_v9  ;;  %v3711_v37 = vmul.f32 %v8437_v22, %v3709_v55 }
0x2589   :  { %3720 = vrot.lane.b32.xlu1 %v3719_v50, %s8958_s26  ;;  %v3826_v54 = vrot.slane %v3711_v37, %v10114_v9 }
0x258b   :  { %3827 = vrot.lane.b32.xlu0 %v3826_v54, %s8958_s26 }
0x25fb   :  { %v3721_v44 = vpop.permute.xlu1 %3720 }
0x25fc   :  { %8018 = vmatmul.mubr.msk.f32.vlgmr.msra.gmra.mxu0 %vm2449_vm6, %v3721_v44 }
0x25fd   :  { %8026 = vmatpush3.msra.mxu0 %v10136_v10  ;;  %8027 = vmatprep.mubr.msk.f32.mxu0 %vm8954_vm5, %v11663_v30  ;;  %v3828_v43 = vpop.permute.xlu0 %3827  ;;  %v2310_v10 = vrot.slane %v2296_v45, %v10114_v9 }
0x25fe   :  { %8035 = vmatprep.subr.mxu0 %v11663_v30  ;;  %8023 = vmatmul.mubr.msk.f32.vlgmr.msra.gmra.mxu1 %vm2449_vm6, %v3828_v43 }
0x25ff   :  { %8031 = vmatpush3.msra.mxu1 %v10141_v28  ;;  %8032 = vmatprep.mubr.msk.f32.mxu1 %vm8954_vm5, %v11663_v30  ;;  %v2312_v0 = vcombine.high %v2310_v10, %v2310_v10 }
0x26bc   :  { %v3790_v51 = vpop.f32.mrf.mxu0 }
0x26bd   :  { %v3794_v39 = vadd.f32 %v3790_v51, %v2310_v10 }
0x26be   :  { %v8019_v48 = vpop.f32.mrf.mxu0  ;;  %v3897_v28 = vpop.f32.mrf.mxu1 }
0x26bf   :  { %8442 = vtanh.f32 %v3794_v39  ;;  %v3901_v59 = vadd.f32 %v3897_v28, %v2422_v53  ;;  %v7687_v56 = vmul.f32 -1.442695, %v3794_v39  ;;  %v4164_v53 = vld [vmem:[%s11625_s8 + $0x8] sm:$0xff] }
0x26c0   :  { %v8024_v25 = vpop.f32.mrf.mxu1 }
0x26c1   :  { %8444 = vtanh.f32 %v3901_v59  ;;  %v7689_v47 = vmul.f32 -1.442695, %v3901_v59  ;;  %v4163_v25 = vld [vmem:[%s11625_s8] sm:$0xff]  ;;  %s8962_s8 = smov 2  }
0x26c2   :  { %8446 = vpow2.f32 %v7687_v56 }
0x26c3   :  { %8448 = vpow2.f32 %v7689_v47 }
0x26cc   :  { %v8443_v38 = vpop.eup %8442 }
0x26cd   :  { %3804 = vrot.lane.b32.xlu1 %v8443_v38, %s8955_s7 }
0x26ce   :  { %v8445_v62 = vpop.eup %8444 }
0x26cf   :  { %3911 = vrot.lane.b32.xlu0 %v8445_v62, %s8955_s7  ;;  %v8447_v41 = vpop.eup %8446 }
0x26d0   :  { %v8449_v36 = vpop.eup %8448  ;;  %v3798_v2 = vadd.f32 1.0, %v8447_v41 }
0x26d1   :  { %v3905_v19 = vadd.f32 1.0, %v8449_v36 }
0x26d2   :  { %8450 = vrcp.f32 %v3798_v2 }
0x26d3   :  { %8452 = vrcp.f32 %v3905_v19 }
0x26df   :  { %v8451_v5 = vpop.eup %8450 }
0x26e0   :  { %v8453_v4 = vpop.eup %8452  ;;  %v3802_v57 = vmul.f32 %v8451_v5, %v3598_v14 }
0x26e1   :  { %v3909_v60 = vmul.f32 %v8453_v4, %v3705_v29 }
0x273f   :  { %v3805_v35 = vpop.permute.xlu1 %3804 }
0x2740   :  { %v3807_v1 = vmul.f32 %v8451_v5, %v3805_v35  ;;  %v4266_v35 = vld [vmem:[%s11627_s10 + $0x18] sm:$0xff] }
0x2741   :  { %v3912_v61 = vpop.permute.xlu0 %3911  ;;  %4343 = vmatprep.subr.mxu1 %v4266_v35 }
0x2742   :  { %3809 = vrot.lane.b32.xlu1 %v3807_v1, %s8956_s24  ;;  %v3914_v12 = vmul.f32 %v8453_v4, %v3912_v61  ;;  %v4270_v1 = vld [vmem:[%s11627_s10 + $0x38] sm:$0xff] }
0x2744   :  { %3916 = vrot.lane.b32.xlu0 %v3914_v12, %s8956_s24 }
0x27b4   :  { %v3810_v15 = vpop.permute.xlu1 %3809 }
0x27b5   :  { %v3812_v40 = vadd.f32 %v3810_v15, %v3802_v57 }
0x27b6   :  { %v3917_v13 = vpop.permute.xlu0 %3916 }
0x27b7   :  { %8454 = vtanh.f32 %v3812_v40  ;;  %v3919_v6 = vadd.f32 %v3917_v13, %v3909_v60  ;;  %v4265_v60 = vld [vmem:[%s11627_s10 + $0x10] sm:$0xff] }
0x27b8   :  { %v4269_v13 = vld [vmem:[%s11627_s10 + $0x30] sm:$0xff] }
0x27b9   :  { %8456 = vtanh.f32 %v3919_v6 }
0x27c4   :  { %v8455_v7 = vpop.eup %8454 }
0x27c5   :  { %3815 = vrot.lane.b32.xlu1 %v8455_v7, %s8957_s25  ;;  %v4268_v7 = vld [vmem:[%s11627_s10 + $0x28] sm:$0xff] }
0x27c6   :  { %v8457_v49 = vpop.eup %8456 }
0x27c7   :  { %3922 = vrot.lane.b32.xlu0 %v8457_v49, %s8957_s25  ;;  %v4263_v49 = vld [vmem:[%s11627_s10] sm:$0xff] }
0x2837   :  { %v3816_v52 = vpop.permute.xlu1 %3815 }
0x2838   :  { %v3818_v17 = vmul.f32 %v8451_v5, %v3816_v52  ;;  %v4267_v52 = vld [vmem:[%s11627_s10 + $0x20] sm:$0xff] }
0x2839   :  { %v3923_v16 = vpop.permute.xlu0 %3922 }
0x283a   :  { %v3933_v3 = vrot.slane %v3818_v17, %v10114_v9  ;;  %v3925_v42 = vmul.f32 %v8453_v4, %v3923_v16  ;;  %v7694_v4 = vld [vmem:[%s11626_s9] ss:$0 sm:$0xff]  ;;  %v10421_v17 = vld [vmem:[%s11628_s11 + $0x68] sm:$0x3] }
0x283c   :  { %3934 = vrot.lane.b32.xlu1 %v3933_v3, %s8958_s26  ;;  %v4040_v18 = vrot.slane %v3925_v42, %v10114_v9  ;;  %v10426_v3 = vld [vmem:[%s11628_s11 + $0xd8] sm:$0x3]  ;;  %v4246_v42 = vld [vmem:[%s11674_s1] sm:$0x3] }
0x283e   :  { %4041 = vrot.lane.b32.xlu0 %v4040_v18, %s8958_s26 }
0x28ae   :  { %v3935_v34 = vpop.permute.xlu1 %3934 }
0x28af   :  { %8028 = vmatmul.mubr.msk.f32.vlgmr.msra.gmra.mxu0 %vm2449_vm6, %v3935_v34 }
0x28b0   :  { %8039 = vmatprep.mubr.msk.f32.mxu0 %vm8954_vm5, %v11663_v30  ;;  %v4042_v20 = vpop.permute.xlu0 %4041  ;;  %8036 = vmatpush3.msra.mxu0 %v4164_v53 }
0x28b1   :  { %8033 = vmatmul.mubr.msk.f32.vlgmr.msra.gmra.mxu1 %vm2449_vm6, %v4042_v20  ;;  %8037 = vmatprep.subr.mxu0 %v11663_v30 }
0x28b2   :  { %4379 = vmatprep.mubr.f32.mxu1 %v11663_v30  ;;  %8038 = vmatpush3.msra.mxu0 %v4163_v25  ;;  %v11675_v25 = vld [vmem:[#allocation10_spill] sm:$0xff] }
0x28b3   :  { %4425 = vmatprep.subr.mxu0 %v4270_v1  ;;  %4344 = vmatpush1.msra.mxu1 %v4265_v60 }
0x296f   :  { %v4004_v21 = vpop.f32.mrf.mxu0 }
0x2970   :  { %v4008_v22 = vadd.f32 %v4004_v21, %v2312_v0  ;;  %v10440_v0 = vld [vmem:[%s11628_s11 + $0x60] sm:$0x3]  ;;  %v10445_v21 = vld [vmem:[%s11628_s11 + $0xd0] sm:$0x3] }
0x2971   :  { %v8029_v8 = vpop.f32.mrf.mxu0  ;;  %v4111_v23 = vpop.f32.mrf.mxu1 }
0x2972   :  { %8458 = vtanh.f32 %v4008_v22  ;;  %v4115_v24 = vadd.f32 %v4111_v23, %v10345_v46  ;;  %v7691_v27 = vmul.f32 -1.442695, %v4008_v22  ;;  %v10450_v22 = vld [vmem:[%s11628_s11 + $0x58] sm:$0xff]  ;;  %v10455_v8 = vld [vmem:[%s11628_s11 + $0xc8] sm:$0xff]  ;;  %v10462_v23 = vld [vmem:[%s11628_s11 + $0x50] sm:$0xff] }
0x2973   :  { %v8034_v26 = vpop.f32.mrf.mxu1 }
0x2974   :  { %8460 = vtanh.f32 %v4115_v24  ;;  %v7693_v29 = vmul.f32 -1.442695, %v4115_v24  ;;  %v10467_v24 = vld [vmem:[%s11628_s11 + $0xc0] sm:$0xff]  ;;  %v10476_v26 = vld [vmem:[%s11628_s11 + $0x48] sm:$0xff] }
0x2975   :  { %8462 = vpow2.f32 %v7691_v27  ;;  %v10493_v27 = vld [vmem:[%s11628_s11 + $0xb0] sm:$0xff] }
0x2976   :  { %8464 = vpow2.f32 %v7693_v29  ;;  %v10500_v29 = vld [vmem:[%s11628_s11 + $0x38] sm:$0xff] }
0x297f   :  { %v8459_v14 = vpop.eup %8458 }
0x2980   :  { %4018 = vrot.lane.b32.xlu1 %v8459_v14, %s8955_s7  ;;  %v10481_v14 = vld [vmem:[%s11628_s11 + $0xb8] sm:$0xff] }
0x2981   :  { %v8461_v11 = vpop.eup %8460 }
0x2982   :  { %4125 = vrot.lane.b32.xlu0 %v8461_v11, %s8955_s7  ;;  %v8463_v31 = vpop.eup %8462  ;;  %v10488_v11 = vld [vmem:[%s11628_s11 + $0x40] sm:$0xff] }
0x2983   :  { %v8465_v32 = vpop.eup %8464  ;;  %v4012_v58 = vadd.f32 1.0, %v8463_v31  ;;  %v10505_v31 = vld [vmem:[%s11628_s11 + $0xa8] sm:$0xff] }
0x2984   :  { %v4119_v33 = vadd.f32 1.0, %v8465_v32  ;;  %v10512_v32 = vld [vmem:[%s11628_s11 + $0x30] sm:$0xff] }
0x2985   :  { %8466 = vrcp.f32 %v4012_v58  ;;  %v10517_v58 = vld [vmem:[%s11628_s11 + $0xa0] sm:$0xff] }
0x2986   :  { %8468 = vrcp.f32 %v4119_v33  ;;  %v10524_v33 = vld [vmem:[%s11628_s11 + $0x28] sm:$0xff] }
0x2992   :  { %v8467_v50 = vpop.eup %8466 }
0x2993   :  { %v8469_v54 = vpop.eup %8468  ;;  %v4016_v45 = vmul.f32 %v8467_v50, %v3812_v40 }
0x2994   :  { %v4123_v51 = vmul.f32 %v8469_v54, %v3919_v6  ;;  %v4264_v6 = vld [vmem:[%s11627_s10 + $0x8] sm:$0xff] }
0x2995   :  { %4345 = vmatprep.subr.mxu1 %v4264_v6 }
0x2996   :  { %4346 = vmatpush1.msra.mxu1 %v4263_v49 }
0x2997   :  { %7698 = vmatprep.subr.msk.mxu1 %vm259_vm0, %v10421_v17 }
0x29f2   :  { %v4019_v55 = vpop.permute.xlu1 %4018 }
0x29f3   :  { %v4021_v37 = vmul.f32 %v8467_v50, %v4019_v55  ;;  %v10536_v55 = vld [vmem:[%s11628_s11 + $0x20] sm:$0xff] }
0x29f4   :  { %v4126_v44 = vpop.permute.xlu0 %4125 }
0x29f5   :  { %4023 = vrot.lane.b32.xlu1 %v4021_v37, %s8956_s24  ;;  %v4128_v43 = vmul.f32 %v8469_v54, %v4126_v44  ;;  %v10541_v37 = vld [vmem:[%s11628_s11 + $0x90] sm:$0xff]  ;;  %v10553_v44 = vld [vmem:[%s11628_s11 + $0x88] sm:$0xff] }
0x29f7   :  { %4130 = vrot.lane.b32.xlu0 %v4128_v43, %s8956_s24  ;;  %v10560_v43 = vld [vmem:[%s11628_s11 + $0x10] sm:$0xff] }
0x2a67   :  { %v4024_v46 = vpop.permute.xlu1 %4023 }
0x2a68   :  { %v4026_v10 = vadd.f32 %v4024_v46, %v4016_v45  ;;  %v10565_v45 = vld [vmem:[%s11628_s11 + $0x80] sm:$0xff]  ;;  %v10572_v46 = vld [vmem:[%s11628_s11 + $0x8] sm:$0xff] }
0x2a69   :  { %v4131_v39 = vpop.permute.xlu0 %4130 }
0x2a6a   :  { %8470 = vtanh.f32 %v4026_v10  ;;  %v4133_v48 = vadd.f32 %v4131_v39, %v4123_v51  ;;  %v10577_v10 = vld [vmem:[%s11628_s11 + $0x78] sm:$0xff]  ;;  %v10584_v51 = vld [vmem:[%s11628_s11] sm:$0xff]  ;;  %v10591_v39 = vld [vmem:[%s11628_s11 + $0x70] sm:$0xff] }
0x2a6c   :  { %8472 = vtanh.f32 %v4133_v48  ;;  %v4300_v48 = vld [vmem:[%s11629_s12 + $0x2] sm:$0x3] }
0x2a77   :  { %v8471_v28 = vpop.eup %8470 }
0x2a78   :  { %4029 = vrot.lane.b32.xlu1 %v8471_v28, %s8957_s25  ;;  %v4299_v28 = vld [vmem:[%s11629_s12] sm:$0x3] }
0x2a79   :  { %v8473_v59 = vpop.eup %8472 }
0x2a7a   :  { %4136 = vrot.lane.b32.xlu0 %v8473_v59, %s8957_s25 }
0x2aea   :  { %v4030_v38 = vpop.permute.xlu1 %4029 }
0x2aeb   :  { %v4032_v62 = vmul.f32 %v8467_v50, %v4030_v38  ;;  %v10529_v50 = vld [vmem:[%s11628_s11 + $0x98] sm:$0xff]  ;;  %v4390_v38 = vrot.slane %v4300_v48, %v11675_v25 }
0x2aec   :  { %v4137_v47 = vpop.permute.xlu0 %4136 }
0x2aed   :  { %v4147_v56 = vrot.slane %v4032_v62, %v10114_v9  ;;  %v4139_v41 = vmul.f32 %v8469_v54, %v4137_v47  ;;  %v10548_v54 = vld [vmem:[%s11628_s11 + $0x18] sm:$0xff]  ;;  %v4305_v62 = vrot.slane %v4299_v28, %v11675_v25 }
0x2aef   :  { %4148 = vrot.lane.b32.xlu1 %v4147_v56, %s8958_s26  ;;  %v4158_v36 = vrot.slane %v4139_v41, %v10114_v9 }
0x2af1   :  { %4159 = vrot.lane.b32.xlu0 %v4158_v36, %s8955_s7  ;;  %v11676_v36 = vld [vmem:[#allocation11_spill] sm:$0xff] }
0x2b61   :  { %v4149_v2 = vpop.permute.xlu1 %4148 }
0x2b63   :  { %v4160_v19 = vpop.permute.xlu0 %4159 }
0x2b64   :  { %v4162_v5 = vsel %vm2449_vm6, %v4149_v2, %v4160_v19  ;;  %v4394_v2 = vrot.slane %v4300_v48, %v11676_v36 }
0x2b65   :  { %8040 = vmatmul.mubr.msk.f32.vlgmr.msra.gmra.mxu0 %vm4172_vm7, %v4162_v5 }
0x2b66   :  { %4461 = vmatprep.mubr.f32.mxu0 %v11663_v30  ;;  %4426 = vmatpush1.msra.mxu0 %v4269_v13 }
0x2b67   :  { %4427 = vmatprep.subr.mxu0 %v4268_v7 }
0x2b68   :  { %4428 = vmatpush1.msra.mxu0 %v4267_v52 }
0x2b69   :  { %7702 = vmatprep.subr.msk.mxu0 %vm259_vm0, %v10426_v3 }
0x2c25   :  { %v4242_v61 = vpop.f32.mrf.mxu0 }
0x2c26   :  { %v10395_v12 = vadd.f32 %v7694_v4, %v4242_v61  ;;  %v4309_v61 = vrot.slane %v4299_v28, %v11676_v36 }
0x2c27   :  { %v8041_v57 = vpop.f32.mrf.mxu0 }
0x2c28   :  { %v4247_v15 = vmul.f32 0.5, %v10395_v12  ;;  %4257 = vst.msk [vmem:[#allocation4] sm:$0x3] %vm4256_vm8, %v10395_v12 }
0x2c2a   :  { %v4248_v40 = vmul.f32 1.442695, %v4247_v15 }
0x2c2c   :  { %8474 = vpow2.f32 %v4248_v40 }
0x2c39   :  { %v8475_v16 = vpop.eup %8474 }
0x2c3a   :  { %4251 = vrot.lane.b32.xlu1 %v8475_v16, %s8955_s7 }
0x2cac   :  { %v4252_v18 = vpop.permute.xlu1 %4251 }
0x2cad   :  { %v4254_v34 = vmul.f32 %v4252_v18, %v4246_v42 }
0x2caf   :  { %v4255_v20 = vadd.f32 %v4254_v34, %v10395_v12 }
0x2cb1   :  { %7696 = vmatmul.mubr.msk.f32.vlgmr.msra.gmra.mxu1 %vm4172_vm7, %v4255_v20  ;;  %7697 = vmatmul.mubr.msk.f32.vlgmr.msra.gmra.mxu0 %vm4172_vm7, %v4255_v20 }
0x2cb2   :  { %7699 = vmatpush1.msk.msra.mxu1 %vm259_vm0, %v10440_v0  ;;  %7703 = vmatpush1.msk.msra.mxu0 %vm259_vm0, %v10445_v21 }
0x2cb3   :  { %4494 = vmatprep.subr.mxu1 %v10450_v22  ;;  %4608 = vmatprep.subr.mxu0 %v10455_v8 }
0x2cb4   :  { %4495 = vmatpush1.msra.mxu1 %v10462_v23  ;;  %4609 = vmatpush1.msra.mxu0 %v10467_v24 }
0x2cb5   :  { %4496 = vmatprep.subr.mxu1 %v10476_v26  ;;  %4610 = vmatprep.subr.mxu0 %v10481_v14 }
0x2cb6   :  { %4497 = vmatpush1.msra.mxu1 %v10488_v11  ;;  %4611 = vmatpush1.msra.mxu0 %v10493_v27 }
0x2cb7   :  { %4498 = vmatprep.subr.mxu1 %v10500_v29  ;;  %4612 = vmatprep.subr.mxu0 %v10505_v31 }
0x2cb8   :  { %4499 = vmatpush1.msra.mxu1 %v10512_v32  ;;  %4613 = vmatpush1.msra.mxu0 %v10517_v58 }
0x2cb9   :  { %4500 = vmatprep.subr.mxu1 %v10524_v33  ;;  %4614 = vmatprep.subr.mxu0 %v10529_v50 }
0x2cba   :  { %4501 = vmatpush1.msra.mxu1 %v10536_v55  ;;  %4615 = vmatpush1.msra.mxu0 %v10541_v37 }
0x2cbb   :  { %4502 = vmatprep.subr.mxu1 %v10548_v54  ;;  %4616 = vmatprep.subr.mxu0 %v10553_v44 }
0x2cbc   :  { %4503 = vmatpush1.msra.mxu1 %v10560_v43  ;;  %4617 = vmatpush1.msra.mxu0 %v10565_v45 }
0x2cbd   :  { %4504 = vmatprep.subr.mxu1 %v10572_v46  ;;  %4618 = vmatprep.subr.mxu0 %v10577_v10 }
0x2cbe   :  { %4505 = vmatpush1.msra.mxu1 %v10584_v51  ;;  %4538 = vmatprep.mubr.f32.mxu1 %v11663_v30 }
0x2cbf   :  { %4619 = vmatpush1.msra.mxu0 %v10591_v39  ;;  %4652 = vmatprep.mubr.f32.mxu0 %v11663_v30 }
0x2cc0   :  { %4539 = vmatmul.mubr.f32.vlgmr.msra.gmra.mxu1 %v11663_v30  ;;  %4653 = vmatmul.mubr.f32.vlgmr.msra.gmra.mxu0 %v11663_v30 }
0x2cc1   :  { %7711 = vmatprep.subr.msk.mxu0 %vm259_vm0, %v10426_v3  ;;  %7706 = vmatprep.subr.msk.mxu1 %vm259_vm0, %v10421_v17 }
0x2cc2   :  { %7712 = vmatpush1.msk.msra.mxu0 %vm259_vm0, %v10445_v21  ;;  %7707 = vmatpush1.msk.msra.mxu1 %vm259_vm0, %v10440_v0 }
0x2cc3   :  { %4834 = vmatprep.subr.mxu0 %v10455_v8  ;;  %4721 = vmatprep.subr.mxu1 %v10450_v22 }
0x2cc4   :  { %4835 = vmatpush1.msra.mxu0 %v10467_v24  ;;  %4722 = vmatpush1.msra.mxu1 %v10462_v23 }
0x2cc5   :  { %4836 = vmatprep.subr.mxu0 %v10481_v14  ;;  %4723 = vmatprep.subr.mxu1 %v10476_v26 }
0x2cc6   :  { %4837 = vmatpush1.msra.mxu0 %v10493_v27  ;;  %4724 = vmatpush1.msra.mxu1 %v10488_v11 }
0x2cc7   :  { %4838 = vmatprep.subr.mxu0 %v10505_v31  ;;  %4725 = vmatprep.subr.mxu1 %v10500_v29 }
0x2cc8   :  { %4839 = vmatpush1.msra.mxu0 %v10517_v58  ;;  %4726 = vmatpush1.msra.mxu1 %v10512_v32 }
0x2cc9   :  { %4840 = vmatprep.subr.mxu0 %v10529_v50  ;;  %4727 = vmatprep.subr.mxu1 %v10524_v33 }
0x2cca   :  { %4841 = vmatpush1.msra.mxu0 %v10541_v37  ;;  %4728 = vmatpush1.msra.mxu1 %v10536_v55 }
0x2ccb   :  { %4842 = vmatprep.subr.mxu0 %v10553_v44  ;;  %4878 = vmatprep.mubr.f32.mxu0 %v11663_v30 }
0x2ccc   :  { %4843 = vmatpush1.msra.mxu0 %v10565_v45  ;;  %4729 = vmatprep.subr.mxu1 %v10548_v54 }
0x2ccd   :  { %4844 = vmatprep.subr.mxu0 %v10577_v10  ;;  %4730 = vmatpush1.msra.mxu1 %v10560_v43 }
0x2cce   :  { %4845 = vmatpush1.msra.mxu0 %v10591_v39  ;;  %4731 = vmatprep.subr.mxu1 %v10572_v46 }
0x2ccf   :  { %4732 = vmatpush1.msra.mxu1 %v10584_v51  ;;  %4765 = vmatprep.mubr.f32.mxu1 %v11663_v30 }
0x2cd0   :  { %7721 = vmatprep.subr.msk.mxu0 %vm259_vm0, %v10426_v3  ;;  %7716 = vmatprep.subr.msk.mxu1 %vm259_vm0, %v10421_v17 }
0x2d71   :  { %v4463_v53 = vpop.f32.mrf.mxu0  ;;  %v4381_v59 = vpop.f32.mrf.mxu1 }
0x2d72   :  { %v10647_v47 = vadd.f32 %v4463_v53, %v4390_v38  ;;  %v10651_v1 = vadd.f32 %v4381_v59, %v4305_v62 }
0x2d73   :  { %v4465_v56 = vpop.f32.mrf.mxu0  ;;  %v4383_v41 = vpop.f32.mrf.mxu1 }
0x2d74   :  { %v10654_v57 = vadd.f32 %v4465_v56, %v4394_v2  ;;  %v10658_v13 = vadd.f32 %v4383_v41, %v4309_v61 }
0x2d80   :  { %v4654_v19 = vpop.f32.mrf.mxu0  ;;  %v4540_v5 = vpop.f32.mrf.mxu1 }
0x2d81   :  { %v4659_v35 = vadd.f32 %v4654_v19, %v10647_v47  ;;  %v4545_v15 = vadd.f32 %v4540_v5, %v10651_v1 }
0x2d82   :  { %v4656_v4 = vpop.f32.mrf.mxu0  ;;  %v4542_v60 = vpop.f32.mrf.mxu1 }
0x2d83   :  { %8476 = vtanh.f32 %v4659_v35  ;;  %v4660_v40 = vadd.f32 %v4656_v4, %v10654_v57  ;;  %v4546_v6 = vadd.f32 %v4542_v60, %v10658_v13  ;;  %v7704_v42 = vmul.f32 -1.442695, %v4659_v35 }
0x2d84   :  { %8478 = vtanh.f32 %v4545_v15  ;;  %v7700_v18 = vmul.f32 -1.442695, %v4545_v15 }
0x2d85   :  { %8480 = vtanh.f32 %v4660_v40 }
0x2d86   :  { %8482 = vtanh.f32 %v4546_v6 }
0x2d87   :  { %8484 = vpow2.f32 %v7704_v42 }
0x2d88   :  { %8486 = vpow2.f32 %v7700_v18 }
0x2d90   :  { %v8477_v7 = vpop.eup %8476 }
0x2d91   :  { %4678 = vrot.lane.b32.xlu0 %v8477_v7, %s8949_s4  ;;  %v8479_v49 = vpop.eup %8478 }
0x2d92   :  { %v8481_v52 = vpop.eup %8480 }
0x2d93   :  { %4680 = vrot.lane.b32.xlu1 %v8481_v52, %s8949_s4  ;;  %v8483_v16 = vpop.eup %8482  ;;  %v7705_v52 = vmul.f32 -1.442695, %v4660_v40 }
0x2d94   :  { %v8485_v34 = vpop.eup %8484 }
0x2d95   :  { %4564 = vrot.lane.b32.xlu0 %v8479_v49, %s8949_s4  ;;  %v4664_v20 = vadd.f32 1.0, %v8485_v34  ;;  %v8487_v48 = vpop.eup %8486 }
0x2d96   :  { %v4550_v53 = vadd.f32 1.0, %v8487_v48 }
0x2d97   :  { %4566 = vrot.lane.b32.xlu1 %v8483_v16, %s8949_s4  ;;  %8488 = vrcp.f32 %v4664_v20  ;;  %v7701_v16 = vmul.f32 -1.442695, %v4546_v6 }
0x2d98   :  { %8490 = vrcp.f32 %v4550_v53 }
0x2da4   :  { %v8489_v25 = vpop.eup %8488 }
0x2da5   :  { %v8491_v36 = vpop.eup %8490  ;;  %v4675_v5 = vmul.f32 0.0, %v8489_v25 }
0x2da6   :  { %v4561_v61 = vmul.f32 0.0, %v8491_v36 }
0x2e03   :  { %v4679_v28 = vpop.permute.xlu0 %4678 }
0x2e05   :  { %v4681_v59 = vpop.permute.xlu1 %4680 }
0x2e06   :  { %v4682_v38 = vsel %vm360_vm1, %v4679_v28, %v4681_v59 }
0x2e07   :  { %v4684_v62 = vmul.f32 %v8489_v25, %v4682_v38  ;;  %v4565_v56 = vpop.permute.xlu0 %4564 }
0x2e09   :  { %v4567_v41 = vpop.permute.xlu1 %4566  ;;  %4686 = vrot.lane.b32.xlu0 %v4684_v62, %s8950_s21 }
0x2e0a   :  { %v4568_v2 = vsel %vm360_vm1, %v4565_v56, %v4567_v41 }
0x2e0b   :  { %v4570_v19 = vmul.f32 %v8491_v36, %v4568_v2 }
0x2e0d   :  { %4572 = vrot.lane.b32.xlu1 %v4570_v19, %s8950_s21 }
0x2e7b   :  { %v4687_v35 = vpop.permute.xlu0 %4686 }
0x2e7c   :  { %v10669_v4 = vadd.f32 %v4687_v35, %v4675_v5 }
0x2e7e   :  { %8492 = vtanh.f32 %v10669_v4 }
0x2e7f   :  { %v4573_v15 = vpop.permute.xlu1 %4572 }
0x2e80   :  { %v10672_v60 = vadd.f32 %v4573_v15, %v4561_v61 }
0x2e82   :  { %8494 = vtanh.f32 %v10672_v60 }
0x2e83   :  { %8496 = vpow2.f32 %v7705_v52 }
0x2e84   :  { %8498 = vpow2.f32 %v7701_v16 }
0x2e8b   :  { %v8493_v7 = vpop.eup %8492 }
0x2e8c   :  { %4692 = vrot.lane.b32.xlu0 %v8493_v7, %s8951_s22 }
0x2e8f   :  { %v8495_v49 = vpop.eup %8494 }
0x2e90   :  { %4578 = vrot.lane.b32.xlu1 %v8495_v49, %s8951_s22  ;;  %v8497_v42 = vpop.eup %8496 }
0x2e91   :  { %v4672_v18 = vadd.f32 1.0, %v8497_v42  ;;  %v8499_v34 = vpop.eup %8498 }
0x2e92   :  { %v4558_v20 = vadd.f32 1.0, %v8499_v34 }
0x2e93   :  { %8500 = vrcp.f32 %v4672_v18 }
0x2e94   :  { %8502 = vrcp.f32 %v4558_v20 }
0x2ea0   :  { %v8501_v48 = vpop.eup %8500 }
0x2ea1   :  { %v8503_v59 = vpop.eup %8502 }
0x2efe   :  { %v4693_v53 = vpop.permute.xlu0 %4692 }
0x2eff   :  { %v10677_v28 = vmul.f32 %v8501_v48, %v4693_v53 }
0x2f01   :  { %4810 = vrot.lane.b32.xlu0 %v10677_v28, %s8952_s2 }
0x2f02   :  { %v4579_v25 = vpop.permute.xlu1 %4578 }
0x2f03   :  { %v4581_v38 = vmul.f32 %v8503_v59, %v4579_v25 }
0x2f05   :  { %4697 = vrot.lane.b32.xlu1 %v4581_v38, %s8952_s2 }
0x2f73   :  { %v4811_v40 = vpop.permute.xlu0 %4810 }
0x2f74   :  { %7713 = vmatmul.mubr.msk.f32.vlgmr.msra.gmra.mxu0 %vm255_vm2, %v4811_v40 }
0x2f75   :  { %7722 = vmatpush1.msk.msra.mxu0 %vm259_vm0, %v10445_v21  ;;  %5104 = vmatprep.mubr.f32.mxu0 %v11663_v30 }
0x2f76   :  { %5060 = vmatprep.subr.mxu0 %v10455_v8 }
0x2f77   :  { %v10687_v6 = vpop.permute.xlu1 %4697  ;;  %5061 = vmatpush1.msra.mxu0 %v10467_v24 }
0x2f78   :  { %7708 = vmatmul.mubr.msk.f32.vlgmr.msra.gmra.mxu1 %vm255_vm2, %v10687_v6  ;;  %5062 = vmatprep.subr.mxu0 %v10481_v14 }
0x2f79   :  { %7717 = vmatpush1.msk.msra.mxu1 %vm259_vm0, %v10440_v0  ;;  %5063 = vmatpush1.msra.mxu0 %v10493_v27 }
0x2f7a   :  { %4947 = vmatprep.subr.mxu1 %v10450_v22  ;;  %5064 = vmatprep.subr.mxu0 %v10505_v31 }
0x2f7b   :  { %4948 = vmatpush1.msra.mxu1 %v10462_v23  ;;  %5065 = vmatpush1.msra.mxu0 %v10517_v58 }
0x2f7c   :  { %4949 = vmatprep.subr.mxu1 %v10476_v26  ;;  %5066 = vmatprep.subr.mxu0 %v10529_v50 }
0x2f7d   :  { %4950 = vmatpush1.msra.mxu1 %v10488_v11  ;;  %5067 = vmatpush1.msra.mxu0 %v10541_v37 }
0x2f7e   :  { %4951 = vmatprep.subr.mxu1 %v10500_v29  ;;  %5068 = vmatprep.subr.mxu0 %v10553_v44 }
0x2f7f   :  { %4952 = vmatpush1.msra.mxu1 %v10512_v32  ;;  %5069 = vmatpush1.msra.mxu0 %v10565_v45 }
0x2f80   :  { %4953 = vmatprep.subr.mxu1 %v10524_v33  ;;  %5070 = vmatprep.subr.mxu0 %v10577_v10 }
0x2f81   :  { %4954 = vmatpush1.msra.mxu1 %v10536_v55  ;;  %5071 = vmatpush1.msra.mxu0 %v10591_v39 }
0x2f82   :  { %4955 = vmatprep.subr.mxu1 %v10548_v54  ;;  %4991 = vmatprep.mubr.f32.mxu1 %v11663_v30 }
0x2f83   :  { %4956 = vmatpush1.msra.mxu1 %v10560_v43  ;;  %7731 = vmatprep.subr.msk.mxu0 %vm259_vm0, %v10426_v3 }
0x2f84   :  { %4957 = vmatprep.subr.mxu1 %v10572_v46 }
0x2f85   :  { %4958 = vmatpush1.msra.mxu1 %v10584_v51 }
0x2f86   :  { %7726 = vmatprep.subr.msk.mxu1 %vm259_vm0, %v10421_v17 }
0x3034   :  { %v4880_v62 = vpop.f32.mrf.mxu0 }
0x3035   :  { %v4885_v56 = vadd.f32 %v4880_v62, %v10647_v47 }
0x3036   :  { %v4882_v41 = vpop.f32.mrf.mxu0 }
0x3037   :  { %8504 = vtanh.f32 %v4885_v56  ;;  %v4886_v36 = vadd.f32 %v4882_v41, %v10654_v57  ;;  %v7714_v52 = vmul.f32 -1.442695, %v4885_v56 }
0x3038   :  { %v4767_v2 = vpop.f32.mrf.mxu1 }
0x3039   :  { %v4772_v19 = vadd.f32 %v4767_v2, %v10651_v1  ;;  %8506 = vtanh.f32 %v4886_v36 }
0x303a   :  { %v4769_v5 = vpop.f32.mrf.mxu1 }
0x303b   :  { %v4773_v35 = vadd.f32 %v4769_v5, %v10658_v13  ;;  %8508 = vtanh.f32 %v4772_v19  ;;  %v7709_v16 = vmul.f32 -1.442695, %v4772_v19 }
0x303d   :  { %8510 = vtanh.f32 %v4773_v35 }
0x303e   :  { %8512 = vpow2.f32 %v7714_v52 }
0x303f   :  { %8514 = vpow2.f32 %v7709_v16 }
0x3044   :  { %v8505_v61 = vpop.eup %8504 }
0x3045   :  { %4904 = vrot.lane.b32.xlu0 %v8505_v61, %s8949_s4 }
0x3046   :  { %v8507_v15 = vpop.eup %8506 }
0x3047   :  { %4906 = vrot.lane.b32.xlu1 %v8507_v15, %s8949_s4 }
0x3048   :  { %v8509_v7 = vpop.eup %8508 }
0x3049   :  { %4791 = vrot.lane.b32.xlu0 %v8509_v7, %s8949_s4 }
0x304a   :  { %v8511_v49 = vpop.eup %8510 }
0x304b   :  { %4793 = vrot.lane.b32.xlu1 %v8511_v49, %s8949_s4  ;;  %v8513_v42 = vpop.eup %8512 }
0x304c   :  { %v4890_v18 = vadd.f32 1.0, %v8513_v42  ;;  %v8515_v34 = vpop.eup %8514  ;;  %v7715_v42 = vmul.f32 -1.442695, %v4886_v36 }
0x304d   :  { %v4777_v20 = vadd.f32 1.0, %v8515_v34 }
0x304e   :  { %8516 = vrcp.f32 %v4890_v18 }
0x304f   :  { %8518 = vrcp.f32 %v4777_v20 }
0x305b   :  { %v8517_v59 = vpop.eup %8516 }
0x305c   :  { %v8519_v56 = vpop.eup %8518  ;;  %v4901_v19 = vmul.f32 %v8517_v59, %v10669_v4  ;;  %v7710_v4 = vmul.f32 -1.442695, %v4773_v35 }
0x305d   :  { %v4788_v15 = vmul.f32 %v8519_v56, %v10672_v60 }
0x30b7   :  { %v4905_v48 = vpop.permute.xlu0 %4904 }
0x30b9   :  { %v4907_v53 = vpop.permute.xlu1 %4906 }
0x30ba   :  { %v4908_v25 = vsel %vm360_vm1, %v4905_v48, %v4907_v53 }
0x30bb   :  { %v4910_v38 = vmul.f32 %v8517_v59, %v4908_v25  ;;  %v4792_v40 = vpop.permute.xlu0 %4791 }
0x30bd   :  { %4912 = vrot.lane.b32.xlu0 %v4910_v38, %s8950_s21  ;;  %v4794_v62 = vpop.permute.xlu1 %4793 }
0x30be   :  { %v4795_v41 = vsel %vm360_vm1, %v4792_v40, %v4794_v62 }
0x30bf   :  { %v4797_v2 = vmul.f32 %v8519_v56, %v4795_v41 }
0x30c1   :  { %4799 = vrot.lane.b32.xlu1 %v4797_v2, %s8950_s21 }
0x312f   :  { %v4913_v5 = vpop.permute.xlu0 %4912 }
0x3130   :  { %v10734_v61 = vadd.f32 %v4913_v5, %v4901_v19 }
0x3132   :  { %8520 = vtanh.f32 %v10734_v61 }
0x3133   :  { %v4800_v7 = vpop.permute.xlu1 %4799 }
0x3134   :  { %v10738_v49 = vadd.f32 %v4800_v7, %v4788_v15 }
0x3136   :  { %8522 = vtanh.f32 %v10738_v49 }
0x3137   :  { %8524 = vpow2.f32 %v7715_v42 }
0x3138   :  { %8526 = vpow2.f32 %v7710_v4 }
0x313f   :  { %v8521_v52 = vpop.eup %8520 }
0x3140   :  { %4918 = vrot.lane.b32.xlu0 %v8521_v52, %s8951_s22 }
0x3143   :  { %v8523_v16 = vpop.eup %8522 }
0x3144   :  { %4805 = vrot.lane.b32.xlu1 %v8523_v16, %s8951_s22  ;;  %v8525_v18 = vpop.eup %8524 }
0x3145   :  { %v4898_v34 = vadd.f32 1.0, %v8525_v18  ;;  %v8527_v20 = vpop.eup %8526 }
0x3146   :  { %v4785_v60 = vadd.f32 1.0, %v8527_v20 }
0x3147   :  { %8528 = vrcp.f32 %v4898_v34 }
0x3148   :  { %8530 = vrcp.f32 %v4785_v60 }
0x3154   :  { %v8529_v48 = vpop.eup %8528 }
0x3155   :  { %v8531_v25 = vpop.eup %8530 }
0x31b2   :  { %v4919_v53 = vpop.permute.xlu0 %4918 }
0x31b3   :  { %v10743_v59 = vmul.f32 %v8529_v48, %v4919_v53 }
0x31b5   :  { %5036 = vrot.lane.b32.xlu0 %v10743_v59, %s8952_s2 }
0x31b6   :  { %v4806_v38 = vpop.permute.xlu1 %4805 }
0x31b7   :  { %v4808_v40 = vmul.f32 %v8531_v25, %v4806_v38 }
0x31b9   :  { %4923 = vrot.lane.b32.xlu1 %v4808_v40, %s8952_s2 }
0x3227   :  { %v5037_v36 = vpop.permute.xlu0 %5036 }
0x3228   :  { %7723 = vmatmul.mubr.msk.f32.vlgmr.msra.gmra.mxu0 %vm255_vm2, %v5037_v36 }
0x3229   :  { %7732 = vmatpush1.msk.msra.mxu0 %vm259_vm0, %v10445_v21  ;;  %5330 = vmatprep.mubr.f32.mxu0 %v11663_v30 }
0x322a   :  { %5286 = vmatprep.subr.mxu0 %v10455_v8 }
0x322b   :  { %v10753_v35 = vpop.permute.xlu1 %4923  ;;  %5287 = vmatpush1.msra.mxu0 %v10467_v24 }
0x322c   :  { %7718 = vmatmul.mubr.msk.f32.vlgmr.msra.gmra.mxu1 %vm255_vm2, %v10753_v35  ;;  %5288 = vmatprep.subr.mxu0 %v10481_v14 }
0x322d   :  { %7727 = vmatpush1.msk.msra.mxu1 %vm259_vm0, %v10440_v0  ;;  %5289 = vmatpush1.msra.mxu0 %v10493_v27 }
0x322e   :  { %5173 = vmatprep.subr.mxu1 %v10450_v22  ;;  %5290 = vmatprep.subr.mxu0 %v10505_v31 }
0x322f   :  { %5174 = vmatpush1.msra.mxu1 %v10462_v23  ;;  %5291 = vmatpush1.msra.mxu0 %v10517_v58 }
0x3230   :  { %5175 = vmatprep.subr.mxu1 %v10476_v26  ;;  %5292 = vmatprep.subr.mxu0 %v10529_v50 }
0x3231   :  { %5176 = vmatpush1.msra.mxu1 %v10488_v11  ;;  %5293 = vmatpush1.msra.mxu0 %v10541_v37 }
0x3232   :  { %5177 = vmatprep.subr.mxu1 %v10500_v29  ;;  %5294 = vmatprep.subr.mxu0 %v10553_v44 }
0x3233   :  { %5178 = vmatpush1.msra.mxu1 %v10512_v32  ;;  %5295 = vmatpush1.msra.mxu0 %v10565_v45 }
0x3234   :  { %5179 = vmatprep.subr.mxu1 %v10524_v33  ;;  %5296 = vmatprep.subr.mxu0 %v10577_v10 }
0x3235   :  { %5180 = vmatpush1.msra.mxu1 %v10536_v55  ;;  %5297 = vmatpush1.msra.mxu0 %v10591_v39 }
0x3236   :  { %5181 = vmatprep.subr.mxu1 %v10548_v54  ;;  %5217 = vmatprep.mubr.f32.mxu1 %v11663_v30 }
0x3237   :  { %5182 = vmatpush1.msra.mxu1 %v10560_v43  ;;  %7741 = vmatprep.subr.msk.mxu0 %vm259_vm0, %v10426_v3 }
0x3238   :  { %5183 = vmatprep.subr.mxu1 %v10572_v46 }
0x3239   :  { %5184 = vmatpush1.msra.mxu1 %v10584_v51 }
0x323a   :  { %7736 = vmatprep.subr.msk.mxu1 %vm259_vm0, %v10421_v17 }
0x32e8   :  { %v5106_v62 = vpop.f32.mrf.mxu0 }
0x32e9   :  { %v5111_v56 = vadd.f32 %v5106_v62, %v10647_v47 }
0x32ea   :  { %v5108_v41 = vpop.f32.mrf.mxu0 }
0x32eb   :  { %8532 = vtanh.f32 %v5111_v56  ;;  %v5112_v2 = vadd.f32 %v5108_v41, %v10654_v57  ;;  %v7724_v18 = vmul.f32 -1.442695, %v5111_v56 }
0x32ec   :  { %v4993_v19 = vpop.f32.mrf.mxu1 }
0x32ed   :  { %v4998_v5 = vadd.f32 %v4993_v19, %v10651_v1  ;;  %8534 = vtanh.f32 %v5112_v2 }
0x32ee   :  { %v4995_v15 = vpop.f32.mrf.mxu1 }
0x32ef   :  { %v4999_v7 = vadd.f32 %v4995_v15, %v10658_v13  ;;  %8536 = vtanh.f32 %v4998_v5  ;;  %v7719_v34 = vmul.f32 -1.442695, %v4998_v5 }
0x32f1   :  { %8538 = vtanh.f32 %v4999_v7 }
0x32f2   :  { %8540 = vpow2.f32 %v7724_v18 }
0x32f3   :  { %8542 = vpow2.f32 %v7719_v34 }
0x32f8   :  { %v8533_v52 = vpop.eup %8532 }
0x32f9   :  { %5130 = vrot.lane.b32.xlu0 %v8533_v52, %s8949_s4 }
0x32fa   :  { %v8535_v16 = vpop.eup %8534 }
0x32fb   :  { %5132 = vrot.lane.b32.xlu1 %v8535_v16, %s8949_s4 }
0x32fc   :  { %v8537_v42 = vpop.eup %8536 }
0x32fd   :  { %5017 = vrot.lane.b32.xlu0 %v8537_v42, %s8949_s4 }
0x32fe   :  { %v8539_v4 = vpop.eup %8538 }
0x32ff   :  { %5019 = vrot.lane.b32.xlu1 %v8539_v4, %s8949_s4  ;;  %v8541_v20 = vpop.eup %8540 }
0x3300   :  { %v5116_v60 = vadd.f32 1.0, %v8541_v20  ;;  %v8543_v48 = vpop.eup %8542 }
0x3301   :  { %v5003_v53 = vadd.f32 1.0, %v8543_v48  ;;  %v7725_v48 = vmul.f32 -1.442695, %v5112_v2 }
0x3302   :  { %8544 = vrcp.f32 %v5116_v60 }
0x3303   :  { %8546 = vrcp.f32 %v5003_v53 }
0x330f   :  { %v8545_v40 = vpop.eup %8544 }
0x3310   :  { %v8547_v56 = vpop.eup %8546  ;;  %v5127_v52 = vmul.f32 %v8545_v40, %v10734_v61  ;;  %v7720_v61 = vmul.f32 -1.442695, %v4999_v7 }
0x3311   :  { %v5014_v4 = vmul.f32 %v8547_v56, %v10738_v49 }
0x336b   :  { %v5131_v25 = vpop.permute.xlu0 %5130 }
0x336d   :  { %v5133_v38 = vpop.permute.xlu1 %5132 }
0x336e   :  { %v5134_v36 = vsel %vm360_vm1, %v5131_v25, %v5133_v38 }
0x336f   :  { %v5136_v62 = vmul.f32 %v8545_v40, %v5134_v36  ;;  %v5018_v41 = vpop.permute.xlu0 %5017 }
0x3371   :  { %5138 = vrot.lane.b32.xlu0 %v5136_v62, %s8950_s21  ;;  %v5020_v19 = vpop.permute.xlu1 %5019 }
0x3372   :  { %v5021_v5 = vsel %vm360_vm1, %v5018_v41, %v5020_v19 }
0x3373   :  { %v5023_v15 = vmul.f32 %v8547_v56, %v5021_v5 }
0x3375   :  { %5025 = vrot.lane.b32.xlu1 %v5023_v15, %s8950_s21 }
0x33e3   :  { %v5139_v16 = vpop.permute.xlu0 %5138 }
0x33e4   :  { %v10800_v42 = vadd.f32 %v5139_v16, %v5127_v52 }
0x33e6   :  { %8548 = vtanh.f32 %v10800_v42 }
0x33e7   :  { %v5026_v18 = vpop.permute.xlu1 %5025 }
0x33e8   :  { %v10804_v34 = vadd.f32 %v5026_v18, %v5014_v4 }
0x33ea   :  { %8550 = vtanh.f32 %v10804_v34 }
0x33eb   :  { %8552 = vpow2.f32 %v7725_v48 }
0x33ec   :  { %8554 = vpow2.f32 %v7720_v61 }
0x33f3   :  { %v8549_v20 = vpop.eup %8548 }
0x33f4   :  { %5144 = vrot.lane.b32.xlu0 %v8549_v20, %s8951_s22 }
0x33f7   :  { %v8551_v60 = vpop.eup %8550 }
0x33f8   :  { %5031 = vrot.lane.b32.xlu1 %v8551_v60, %s8951_s22  ;;  %v8553_v53 = vpop.eup %8552 }
0x33f9   :  { %v5124_v25 = vadd.f32 1.0, %v8553_v53  ;;  %v8555_v38 = vpop.eup %8554 }
0x33fa   :  { %v5011_v49 = vadd.f32 1.0, %v8555_v38 }
0x33fb   :  { %8556 = vrcp.f32 %v5124_v25 }
0x33fc   :  { %8558 = vrcp.f32 %v5011_v49 }
0x3408   :  { %v8557_v40 = vpop.eup %8556 }
0x3409   :  { %v8559_v41 = vpop.eup %8558 }
0x3466   :  { %v5145_v36 = vpop.permute.xlu0 %5144 }
0x3467   :  { %v10809_v62 = vmul.f32 %v8557_v40, %v5145_v36 }
0x3469   :  { %5262 = vrot.lane.b32.xlu0 %v10809_v62, %s8952_s2 }
0x346a   :  { %v5032_v19 = vpop.permute.xlu1 %5031 }
0x346b   :  { %v5034_v56 = vmul.f32 %v8559_v41, %v5032_v19 }
0x346d   :  { %5149 = vrot.lane.b32.xlu1 %v5034_v56, %s8952_s2 }
0x34db   :  { %v5263_v2 = vpop.permute.xlu0 %5262 }
0x34dc   :  { %7733 = vmatmul.mubr.msk.f32.vlgmr.msra.gmra.mxu0 %vm255_vm2, %v5263_v2 }
0x34dd   :  { %7742 = vmatpush1.msk.msra.mxu0 %vm259_vm0, %v10445_v21  ;;  %5556 = vmatprep.mubr.f32.mxu0 %v11663_v30 }
0x34de   :  { %5512 = vmatprep.subr.mxu0 %v10455_v8 }
0x34df   :  { %v10819_v7 = vpop.permute.xlu1 %5149  ;;  %5513 = vmatpush1.msra.mxu0 %v10467_v24 }
0x34e0   :  { %7728 = vmatmul.mubr.msk.f32.vlgmr.msra.gmra.mxu1 %vm255_vm2, %v10819_v7  ;;  %5514 = vmatprep.subr.mxu0 %v10481_v14 }
0x34e1   :  { %7737 = vmatpush1.msk.msra.mxu1 %vm259_vm0, %v10440_v0  ;;  %5515 = vmatpush1.msra.mxu0 %v10493_v27 }
0x34e2   :  { %5399 = vmatprep.subr.mxu1 %v10450_v22  ;;  %5516 = vmatprep.subr.mxu0 %v10505_v31 }
0x34e3   :  { %5400 = vmatpush1.msra.mxu1 %v10462_v23  ;;  %5517 = vmatpush1.msra.mxu0 %v10517_v58 }
0x34e4   :  { %5401 = vmatprep.subr.mxu1 %v10476_v26  ;;  %5518 = vmatprep.subr.mxu0 %v10529_v50 }
0x34e5   :  { %5402 = vmatpush1.msra.mxu1 %v10488_v11  ;;  %5519 = vmatpush1.msra.mxu0 %v10541_v37 }
0x34e6   :  { %5403 = vmatprep.subr.mxu1 %v10500_v29  ;;  %5520 = vmatprep.subr.mxu0 %v10553_v44 }
0x34e7   :  { %5404 = vmatpush1.msra.mxu1 %v10512_v32  ;;  %5521 = vmatpush1.msra.mxu0 %v10565_v45 }
0x34e8   :  { %5405 = vmatprep.subr.mxu1 %v10524_v33  ;;  %5522 = vmatprep.subr.mxu0 %v10577_v10 }
0x34e9   :  { %5406 = vmatpush1.msra.mxu1 %v10536_v55  ;;  %5523 = vmatpush1.msra.mxu0 %v10591_v39 }
0x34ea   :  { %5407 = vmatprep.subr.mxu1 %v10548_v54  ;;  %5443 = vmatprep.mubr.f32.mxu1 %v11663_v30 }
0x34eb   :  { %5408 = vmatpush1.msra.mxu1 %v10560_v43  ;;  %7751 = vmatprep.subr.msk.mxu0 %vm259_vm0, %v10426_v3 }
0x34ec   :  { %5409 = vmatprep.subr.mxu1 %v10572_v46 }
0x34ed   :  { %5410 = vmatpush1.msra.mxu1 %v10584_v51 }
0x34ee   :  { %7746 = vmatprep.subr.msk.mxu1 %vm259_vm0, %v10421_v17 }
0x359c   :  { %v5332_v5 = vpop.f32.mrf.mxu0 }
0x359d   :  { %v5337_v15 = vadd.f32 %v5332_v5, %v10647_v47 }
0x359e   :  { %v5334_v52 = vpop.f32.mrf.mxu0 }
0x359f   :  { %8560 = vtanh.f32 %v5337_v15  ;;  %v5338_v16 = vadd.f32 %v5334_v52, %v10654_v57  ;;  %v7734_v53 = vmul.f32 -1.442695, %v5337_v15 }
0x35a0   :  { %v5219_v4 = vpop.f32.mrf.mxu1 }
0x35a1   :  { %v5224_v18 = vadd.f32 %v5219_v4, %v10651_v1  ;;  %8562 = vtanh.f32 %v5338_v16 }
0x35a2   :  { %v5221_v20 = vpop.f32.mrf.mxu1 }
0x35a3   :  { %v5225_v3 = vadd.f32 %v5221_v20, %v10658_v13  ;;  %8564 = vtanh.f32 %v5224_v18  ;;  %v7729_v25 = vmul.f32 -1.442695, %v5224_v18 }
0x35a5   :  { %8566 = vtanh.f32 %v5225_v3 }
0x35a6   :  { %8568 = vpow2.f32 %v7734_v53 }
0x35a7   :  { %8570 = vpow2.f32 %v7729_v25 }
0x35ac   :  { %v8561_v60 = vpop.eup %8560 }
0x35ad   :  { %5356 = vrot.lane.b32.xlu0 %v8561_v60, %s8949_s4 }
0x35ae   :  { %v8563_v17 = vpop.eup %8562 }
0x35af   :  { %5358 = vrot.lane.b32.xlu1 %v8563_v17, %s8949_s4 }
0x35b0   :  { %v8565_v48 = vpop.eup %8564 }
0x35b1   :  { %5243 = vrot.lane.b32.xlu0 %v8565_v48, %s8949_s4 }
0x35b2   :  { %v8567_v61 = vpop.eup %8566 }
0x35b3   :  { %5245 = vrot.lane.b32.xlu1 %v8567_v61, %s8949_s4  ;;  %v8569_v38 = vpop.eup %8568 }
0x35b4   :  { %v5342_v49 = vadd.f32 1.0, %v8569_v38  ;;  %v8571_v40 = vpop.eup %8570 }
0x35b5   :  { %v5229_v36 = vadd.f32 1.0, %v8571_v40  ;;  %v7735_v40 = vmul.f32 -1.442695, %v5338_v16 }
0x35b6   :  { %8572 = vrcp.f32 %v5342_v49 }
0x35b7   :  { %8574 = vrcp.f32 %v5229_v36 }
0x35c3   :  { %v8573_v56 = vpop.eup %8572 }
0x35c4   :  { %v8575_v15 = vpop.eup %8574  ;;  %v5353_v60 = vmul.f32 %v8573_v56, %v10800_v42  ;;  %v7730_v42 = vmul.f32 -1.442695, %v5225_v3 }
0x35c5   :  { %v5240_v61 = vmul.f32 %v8575_v15, %v10804_v34 }
0x361f   :  { %v5357_v41 = vpop.permute.xlu0 %5356 }
0x3621   :  { %v5359_v19 = vpop.permute.xlu1 %5358 }
0x3622   :  { %v5360_v2 = vsel %vm360_vm1, %v5357_v41, %v5359_v19 }
0x3623   :  { %v5362_v5 = vmul.f32 %v8573_v56, %v5360_v2  ;;  %v5244_v52 = vpop.permute.xlu0 %5243 }
0x3625   :  { %5364 = vrot.lane.b32.xlu0 %v5362_v5, %s8950_s21  ;;  %v5246_v4 = vpop.permute.xlu1 %5245 }
0x3626   :  { %v5247_v18 = vsel %vm360_vm1, %v5244_v52, %v5246_v4 }
0x3627   :  { %v5249_v20 = vmul.f32 %v8575_v15, %v5247_v18 }
0x3629   :  { %5251 = vrot.lane.b32.xlu1 %v5249_v20, %s8950_s21 }
0x3697   :  { %v5365_v17 = vpop.permute.xlu0 %5364 }
0x3698   :  { %v10866_v48 = vadd.f32 %v5365_v17, %v5353_v60 }
0x369a   :  { %8576 = vtanh.f32 %v10866_v48 }
0x369b   :  { %v5252_v53 = vpop.permute.xlu1 %5251 }
0x369c   :  { %v10870_v25 = vadd.f32 %v5252_v53, %v5240_v61 }
0x369e   :  { %8578 = vtanh.f32 %v10870_v25 }
0x369f   :  { %8580 = vpow2.f32 %v7735_v40 }
0x36a0   :  { %8582 = vpow2.f32 %v7730_v42 }
0x36a7   :  { %v8577_v38 = vpop.eup %8576 }
0x36a8   :  { %5370 = vrot.lane.b32.xlu0 %v8577_v38, %s8951_s22 }
0x36ab   :  { %v8579_v49 = vpop.eup %8578 }
0x36ac   :  { %5257 = vrot.lane.b32.xlu1 %v8579_v49, %s8951_s22  ;;  %v8581_v36 = vpop.eup %8580 }
0x36ad   :  { %v5350_v41 = vadd.f32 1.0, %v8581_v36  ;;  %v8583_v19 = vpop.eup %8582 }
0x36ae   :  { %v5237_v34 = vadd.f32 1.0, %v8583_v19 }
0x36af   :  { %8584 = vrcp.f32 %v5350_v41 }
0x36b0   :  { %8586 = vrcp.f32 %v5237_v34 }
0x36bc   :  { %v8585_v56 = vpop.eup %8584 }
0x36bd   :  { %v8587_v52 = vpop.eup %8586 }
0x371a   :  { %v5371_v2 = vpop.permute.xlu0 %5370 }
0x371b   :  { %v10875_v5 = vmul.f32 %v8585_v56, %v5371_v2 }
0x371d   :  { %5488 = vrot.lane.b32.xlu0 %v10875_v5, %s8952_s2 }
0x371e   :  { %v5258_v4 = vpop.permute.xlu1 %5257 }
0x371f   :  { %v5260_v15 = vmul.f32 %v8587_v52, %v5258_v4 }
0x3721   :  { %5375 = vrot.lane.b32.xlu1 %v5260_v15, %s8952_s2 }
0x378f   :  { %v5489_v16 = vpop.permute.xlu0 %5488 }
0x3790   :  { %7743 = vmatmul.mubr.msk.f32.vlgmr.msra.gmra.mxu0 %vm255_vm2, %v5489_v16 }
0x3791   :  { %7752 = vmatpush1.msk.msra.mxu0 %vm259_vm0, %v10445_v21  ;;  %5782 = vmatprep.mubr.f32.mxu0 %v11663_v30  ;;  %v10925_v21 = vld [vmem:[%s11628_s11 + $0x68] sm:$0x3] }
0x3792   :  { %5738 = vmatprep.subr.mxu0 %v10455_v8 }
0x3793   :  { %v10885_v3 = vpop.permute.xlu1 %5375  ;;  %5739 = vmatpush1.msra.mxu0 %v10467_v24 }
0x3794   :  { %7738 = vmatmul.mubr.msk.f32.vlgmr.msra.gmra.mxu1 %vm255_vm2, %v10885_v3  ;;  %5740 = vmatprep.subr.mxu0 %v10481_v14 }
0x3795   :  { %7747 = vmatpush1.msk.msra.mxu1 %vm259_vm0, %v10440_v0  ;;  %5741 = vmatpush1.msra.mxu0 %v10493_v27  ;;  %v10916_v0 = vld [vmem:[%s11628_s11 + $0xd8] sm:$0x3] }
0x3796   :  { %5625 = vmatprep.subr.mxu1 %v10450_v22  ;;  %5742 = vmatprep.subr.mxu0 %v10505_v31 }
0x3797   :  { %5626 = vmatpush1.msra.mxu1 %v10462_v23  ;;  %5743 = vmatpush1.msra.mxu0 %v10517_v58 }
0x3798   :  { %5627 = vmatprep.subr.mxu1 %v10476_v26  ;;  %5744 = vmatprep.subr.mxu0 %v10529_v50 }
0x3799   :  { %5628 = vmatpush1.msra.mxu1 %v10488_v11  ;;  %5745 = vmatpush1.msra.mxu0 %v10541_v37 }
0x379a   :  { %5629 = vmatprep.subr.mxu1 %v10500_v29  ;;  %5746 = vmatprep.subr.mxu0 %v10553_v44 }
0x379b   :  { %5630 = vmatpush1.msra.mxu1 %v10512_v32  ;;  %5747 = vmatpush1.msra.mxu0 %v10565_v45 }
0x379c   :  { %5631 = vmatprep.subr.mxu1 %v10524_v33  ;;  %5748 = vmatprep.subr.mxu0 %v10577_v10 }
0x379d   :  { %5632 = vmatpush1.msra.mxu1 %v10536_v55  ;;  %5749 = vmatpush1.msra.mxu0 %v10591_v39 }
0x379e   :  { %5633 = vmatprep.subr.mxu1 %v10548_v54  ;;  %5669 = vmatprep.mubr.f32.mxu1 %v11663_v30 }
0x379f   :  { %5634 = vmatpush1.msra.mxu1 %v10560_v43  ;;  %7761 = vmatprep.subr.msk.mxu0 %vm259_vm0, %v10916_v0 }
0x37a0   :  { %5635 = vmatprep.subr.mxu1 %v10572_v46 }
0x37a1   :  { %5636 = vmatpush1.msra.mxu1 %v10584_v51 }
0x37a2   :  { %7756 = vmatprep.subr.msk.mxu1 %vm259_vm0, %v10925_v21 }
0x3850   :  { %v5558_v22 = vpop.f32.mrf.mxu0 }
0x3851   :  { %v5563_v8 = vadd.f32 %v5558_v22, %v10647_v47 }
0x3852   :  { %v5560_v23 = vpop.f32.mrf.mxu0 }
0x3853   :  { %8588 = vtanh.f32 %v5563_v8  ;;  %v5564_v24 = vadd.f32 %v5560_v23, %v10654_v57  ;;  %v7744_v33 = vmul.f32 -1.442695, %v5563_v8 }
0x3854   :  { %v5445_v26 = vpop.f32.mrf.mxu1 }
0x3855   :  { %v5450_v14 = vadd.f32 %v5445_v26, %v10651_v1  ;;  %8590 = vtanh.f32 %v5564_v24  ;;  %v7745_v19 = vmul.f32 -1.442695, %v5564_v24  ;;  %v10960_v24 = vld [vmem:[%s11628_s11 + $0xd0] sm:$0x3]  ;;  %v10968_v26 = vld [vmem:[%s11628_s11 + $0xc8] sm:$0xff] }
0x3856   :  { %v5447_v11 = vpop.f32.mrf.mxu1 }
0x3857   :  { %v5451_v27 = vadd.f32 %v5447_v11, %v10658_v13  ;;  %8592 = vtanh.f32 %v5450_v14  ;;  %v7739_v50 = vmul.f32 -1.442695, %v5450_v14  ;;  %v10976_v11 = vld [vmem:[%s11628_s11 + $0xc0] sm:$0xff] }
0x3859   :  { %8594 = vtanh.f32 %v5451_v27 }
0x385a   :  { %8596 = vpow2.f32 %v7744_v33  ;;  %v11015_v33 = vld [vmem:[%s11628_s11 + $0x50] sm:$0xff] }
0x385b   :  { %8598 = vpow2.f32 %v7739_v50  ;;  %v11021_v50 = vld [vmem:[%s11628_s11 + $0xa0] sm:$0xff] }
0x3860   :  { %v8589_v29 = vpop.eup %8588 }
0x3861   :  { %5582 = vrot.lane.b32.xlu0 %v8589_v29, %s8949_s4  ;;  %v10990_v29 = vld [vmem:[%s11628_s11 + $0x60] sm:$0x3] }
0x3862   :  { %v8591_v31 = vpop.eup %8590 }
0x3863   :  { %5584 = vrot.lane.b32.xlu1 %v8591_v31, %s8949_s4  ;;  %v10997_v31 = vld [vmem:[%s11628_s11 + $0xb0] sm:$0xff] }
0x3864   :  { %v8593_v32 = vpop.eup %8592 }
0x3865   :  { %5469 = vrot.lane.b32.xlu0 %v8593_v32, %s8949_s4  ;;  %v11003_v32 = vld [vmem:[%s11628_s11 + $0x58] sm:$0xff] }
0x3866   :  { %v8595_v58 = vpop.eup %8594 }
0x3867   :  { %5471 = vrot.lane.b32.xlu1 %v8595_v58, %s8949_s4  ;;  %v8597_v55 = vpop.eup %8596  ;;  %v11009_v58 = vld [vmem:[%s11628_s11 + $0xa8] sm:$0xff] }
0x3868   :  { %v5568_v37 = vadd.f32 1.0, %v8597_v55  ;;  %v8599_v54 = vpop.eup %8598  ;;  %v11027_v55 = vld [vmem:[%s11628_s11 + $0x48] sm:$0xff] }
0x3869   :  { %v5455_v44 = vadd.f32 1.0, %v8599_v54  ;;  %v11039_v54 = vld [vmem:[%s11628_s11 + $0x40] sm:$0xff] }
0x386a   :  { %8600 = vrcp.f32 %v5568_v37  ;;  %v11033_v37 = vld [vmem:[%s11628_s11 + $0x98] sm:$0xff] }
0x386b   :  { %8602 = vrcp.f32 %v5455_v44  ;;  %v11045_v44 = vld [vmem:[%s11628_s11 + $0x90] sm:$0xff] }
0x3877   :  { %v8601_v46 = vpop.eup %8600 }
0x3878   :  { %v8603_v20 = vpop.eup %8602  ;;  %v5579_v61 = vmul.f32 %v8601_v46, %v10866_v48  ;;  %v7740_v48 = vmul.f32 -1.442695, %v5451_v27  ;;  %v10984_v27 = vld [vmem:[%s11628_s11 + $0xb8] sm:$0xff] }
0x3879   :  { %v5466_v49 = vmul.f32 %v8603_v20, %v10870_v25 }
0x38d3   :  { %v5583_v43 = vpop.permute.xlu0 %5582 }
0x38d5   :  { %v5585_v45 = vpop.permute.xlu1 %5584 }
0x38d6   :  { %v5586_v10 = vsel %vm360_vm1, %v5583_v43, %v5585_v45  ;;  %v11051_v43 = vld [vmem:[%s11628_s11 + $0x38] sm:$0xff]  ;;  %v11057_v45 = vld [vmem:[%s11628_s11 + $0x88] sm:$0xff] }
0x38d7   :  { %v5588_v51 = vmul.f32 %v8601_v46, %v5586_v10  ;;  %v5470_v39 = vpop.permute.xlu0 %5469  ;;  %v11063_v46 = vld [vmem:[%s11628_s11 + $0x30] sm:$0xff]  ;;  %v11069_v10 = vld [vmem:[%s11628_s11 + $0x80] sm:$0xff] }
0x38d9   :  { %5590 = vrot.lane.b32.xlu0 %v5588_v51, %s8950_s21  ;;  %v5472_v18 = vpop.permute.xlu1 %5471  ;;  %v11075_v51 = vld [vmem:[%s11628_s11 + $0x28] sm:$0xff] }
0x38da   :  { %v5473_v60 = vsel %vm360_vm1, %v5470_v39, %v5472_v18  ;;  %v11081_v39 = vld [vmem:[%s11628_s11 + $0x78] sm:$0xff]  ;;  %v11087_v18 = vld [vmem:[%s11628_s11 + $0x20] sm:$0xff] }
0x38db   :  { %v5475_v17 = vmul.f32 %v8603_v20, %v5473_v60  ;;  %v11093_v20 = vld [vmem:[%s11628_s11 + $0x70] sm:$0xff]  ;;  %v11099_v60 = vld [vmem:[%s11628_s11 + $0x18] sm:$0xff] }
0x38dd   :  { %5477 = vrot.lane.b32.xlu1 %v5475_v17, %s8950_s21  ;;  %v11106_v17 = vld [vmem:[%s11628_s11 + $0x10] sm:$0xff] }
0x394b   :  { %v5591_v53 = vpop.permute.xlu0 %5590 }
0x394c   :  { %v10942_v38 = vadd.f32 %v5591_v53, %v5579_v61  ;;  %v11114_v61 = vld [vmem:[%s11628_s11 + $0x8] sm:$0xff]  ;;  %v11120_v53 = vld [vmem:[%s11628_s11] sm:$0xff] }
0x394e   :  { %8604 = vtanh.f32 %v10942_v38 }
0x394f   :  { %v5478_v40 = vpop.permute.xlu1 %5477 }
0x3950   :  { %v10946_v42 = vadd.f32 %v5478_v40, %v5466_v49 }
0x3952   :  { %8606 = vtanh.f32 %v10946_v42 }
0x3953   :  { %8608 = vpow2.f32 %v7745_v19 }
0x3954   :  { %8610 = vpow2.f32 %v7740_v48 }
0x395b   :  { %v8605_v36 = vpop.eup %8604 }
0x395c   :  { %5596 = vrot.lane.b32.xlu0 %v8605_v36, %s8951_s22 }
0x395f   :  { %v8607_v41 = vpop.eup %8606 }
0x3960   :  { %5483 = vrot.lane.b32.xlu1 %v8607_v41, %s8951_s22  ;;  %v8609_v34 = vpop.eup %8608 }
0x3961   :  { %v5576_v56 = vadd.f32 1.0, %v8609_v34  ;;  %v8611_v2 = vpop.eup %8610 }
0x3962   :  { %v5463_v25 = vadd.f32 1.0, %v8611_v2 }
0x3963   :  { %8612 = vrcp.f32 %v5576_v56 }
0x3964   :  { %8614 = vrcp.f32 %v5463_v25 }
0x3970   :  { %v8613_v52 = vpop.eup %8612 }
0x3971   :  { %v8615_v16 = vpop.eup %8614 }
0x39ce   :  { %v5597_v4 = vpop.permute.xlu0 %5596 }
0x39cf   :  { %v10951_v15 = vmul.f32 %v8613_v52, %v5597_v4 }
0x39d1   :  { %5714 = vrot.lane.b32.xlu0 %v10951_v15, %s8952_s2 }
0x39d2   :  { %v5484_v22 = vpop.permute.xlu1 %5483 }
0x39d3   :  { %v5486_v8 = vmul.f32 %v8615_v16, %v5484_v22 }
0x39d5   :  { %5601 = vrot.lane.b32.xlu1 %v5486_v8, %s8952_s2 }
0x3a43   :  { %v5715_v23 = vpop.permute.xlu0 %5714 }
0x3a44   :  { %7753 = vmatmul.mubr.msk.f32.vlgmr.msra.gmra.mxu0 %vm255_vm2, %v5715_v23 }
0x3a45   :  { %7762 = vmatpush1.msk.msra.mxu0 %vm259_vm0, %v10960_v24  ;;  %6008 = vmatprep.mubr.f32.mxu0 %v11663_v30 }
0x3a46   :  { %5964 = vmatprep.subr.mxu0 %v10968_v26 }
0x3a47   :  { %v10971_v14 = vpop.permute.xlu1 %5601  ;;  %5965 = vmatpush1.msra.mxu0 %v10976_v11 }
0x3a48   :  { %7748 = vmatmul.mubr.msk.f32.vlgmr.msra.gmra.mxu1 %vm255_vm2, %v10971_v14  ;;  %5966 = vmatprep.subr.mxu0 %v10984_v27 }
0x3a49   :  { %7757 = vmatpush1.msk.msra.mxu1 %vm259_vm0, %v10990_v29  ;;  %5967 = vmatpush1.msra.mxu0 %v10997_v31 }
0x3a4a   :  { %5851 = vmatprep.subr.mxu1 %v11003_v32  ;;  %5968 = vmatprep.subr.mxu0 %v11009_v58 }
0x3a4b   :  { %5852 = vmatpush1.msra.mxu1 %v11015_v33  ;;  %5969 = vmatpush1.msra.mxu0 %v11021_v50 }
0x3a4c   :  { %5853 = vmatprep.subr.mxu1 %v11027_v55  ;;  %5970 = vmatprep.subr.mxu0 %v11033_v37 }
0x3a4d   :  { %5854 = vmatpush1.msra.mxu1 %v11039_v54  ;;  %5971 = vmatpush1.msra.mxu0 %v11045_v44 }
0x3a4e   :  { %5855 = vmatprep.subr.mxu1 %v11051_v43  ;;  %5972 = vmatprep.subr.mxu0 %v11057_v45 }
0x3a4f   :  { %5856 = vmatpush1.msra.mxu1 %v11063_v46  ;;  %5973 = vmatpush1.msra.mxu0 %v11069_v10 }
0x3a50   :  { %5857 = vmatprep.subr.mxu1 %v11075_v51  ;;  %5974 = vmatprep.subr.mxu0 %v11081_v39 }
0x3a51   :  { %5858 = vmatpush1.msra.mxu1 %v11087_v18  ;;  %5975 = vmatpush1.msra.mxu0 %v11093_v20 }
0x3a52   :  { %5859 = vmatprep.subr.mxu1 %v11099_v60  ;;  %5895 = vmatprep.mubr.f32.mxu1 %v11663_v30 }
0x3a53   :  { %5860 = vmatpush1.msra.mxu1 %v11106_v17  ;;  %7771 = vmatprep.subr.msk.mxu0 %vm259_vm0, %v10916_v0 }
0x3a54   :  { %5861 = vmatprep.subr.mxu1 %v11114_v61 }
0x3a55   :  { %5862 = vmatpush1.msra.mxu1 %v11120_v53 }
0x3a56   :  { %7766 = vmatprep.subr.msk.mxu1 %vm259_vm0, %v10925_v21 }
0x3b04   :  { %v5784_v49 = vpop.f32.mrf.mxu0 }
0x3b05   :  { %v5789_v0 = vadd.f32 %v5784_v49, %v10647_v47 }
0x3b06   :  { %v5786_v40 = vpop.f32.mrf.mxu0 }
0x3b07   :  { %8616 = vtanh.f32 %v5789_v0  ;;  %v5790_v36 = vadd.f32 %v5786_v40, %v10654_v57  ;;  %v7754_v52 = vmul.f32 -1.442695, %v5789_v0 }
0x3b08   :  { %v5671_v41 = vpop.f32.mrf.mxu1 }
0x3b09   :  { %v5676_v19 = vadd.f32 %v5671_v41, %v10651_v1  ;;  %8618 = vtanh.f32 %v5790_v36 }
0x3b0a   :  { %v5673_v48 = vpop.f32.mrf.mxu1 }
0x3b0b   :  { %v5677_v34 = vadd.f32 %v5673_v48, %v10658_v13  ;;  %8620 = vtanh.f32 %v5676_v19  ;;  %v7749_v4 = vmul.f32 -1.442695, %v5676_v19 }
0x3b0d   :  { %8622 = vtanh.f32 %v5677_v34 }
0x3b0e   :  { %8624 = vpow2.f32 %v7754_v52 }
0x3b0f   :  { %8626 = vpow2.f32 %v7749_v4 }
0x3b14   :  { %v8617_v56 = vpop.eup %8616 }
0x3b15   :  { %5808 = vrot.lane.b32.xlu0 %v8617_v56, %s8949_s4 }
0x3b16   :  { %v8619_v21 = vpop.eup %8618 }
0x3b17   :  { %5810 = vrot.lane.b32.xlu1 %v8619_v21, %s8949_s4 }
0x3b18   :  { %v8621_v2 = vpop.eup %8620 }
0x3b19   :  { %5695 = vrot.lane.b32.xlu0 %v8621_v2, %s8949_s4 }
0x3b1a   :  { %v8623_v25 = vpop.eup %8622 }
0x3b1b   :  { %5697 = vrot.lane.b32.xlu1 %v8623_v25, %s8949_s4  ;;  %v8625_v16 = vpop.eup %8624 }
0x3b1c   :  { %v5794_v22 = vadd.f32 1.0, %v8625_v16  ;;  %v8627_v8 = vpop.eup %8626 }
0x3b1d   :  { %v5681_v23 = vadd.f32 1.0, %v8627_v8 }
0x3b1e   :  { %8628 = vrcp.f32 %v5794_v22 }
0x3b1f   :  { %8630 = vrcp.f32 %v5681_v23 }
0x3b2b   :  { %v8629_v41 = vpop.eup %8628 }
0x3b2c   :  { %v8631_v0 = vpop.eup %8630  ;;  %v5805_v52 = vmul.f32 %v8629_v41, %v10942_v38  ;;  %v7750_v38 = vmul.f32 -1.442695, %v5677_v34 }
0x3b2d   :  { %v5692_v22 = vmul.f32 %v8631_v0, %v10946_v42 }
0x3b87   :  { %v5809_v49 = vpop.permute.xlu0 %5808 }
0x3b89   :  { %v5811_v40 = vpop.permute.xlu1 %5810 }
0x3b8a   :  { %v5812_v48 = vsel %vm360_vm1, %v5809_v49, %v5811_v40 }
0x3b8b   :  { %v5814_v56 = vmul.f32 %v8629_v41, %v5812_v48  ;;  %v5696_v21 = vpop.permute.xlu0 %5695  ;;  %v7755_v48 = vmul.f32 -1.442695, %v5790_v36 }
0x3b8d   :  { %5816 = vrot.lane.b32.xlu0 %v5814_v56, %s8950_s21  ;;  %v5698_v2 = vpop.permute.xlu1 %5697 }
0x3b8e   :  { %v5699_v19 = vsel %vm360_vm1, %v5696_v21, %v5698_v2 }
0x3b8f   :  { %v5701_v25 = vmul.f32 %v8631_v0, %v5699_v19 }
0x3b91   :  { %5703 = vrot.lane.b32.xlu1 %v5701_v25, %s8950_s21 }
0x3bff   :  { %v5817_v4 = vpop.permute.xlu0 %5816 }
0x3c00   :  { %v11138_v16 = vadd.f32 %v5817_v4, %v5805_v52 }
0x3c02   :  { %8632 = vtanh.f32 %v11138_v16 }
0x3c03   :  { %v5704_v8 = vpop.permute.xlu1 %5703 }
0x3c04   :  { %v11142_v23 = vadd.f32 %v5704_v8, %v5692_v22 }
0x3c06   :  { %8634 = vtanh.f32 %v11142_v23 }
0x3c07   :  { %8636 = vpow2.f32 %v7755_v48 }
0x3c08   :  { %8638 = vpow2.f32 %v7750_v38 }
0x3c0f   :  { %v8633_v49 = vpop.eup %8632 }
0x3c10   :  { %5822 = vrot.lane.b32.xlu0 %v8633_v49, %s8951_s22 }
0x3c13   :  { %v8635_v40 = vpop.eup %8634 }
0x3c14   :  { %5709 = vrot.lane.b32.xlu1 %v8635_v40, %s8951_s22  ;;  %v8637_v41 = vpop.eup %8636 }
0x3c15   :  { %v5802_v56 = vadd.f32 1.0, %v8637_v41  ;;  %v8639_v21 = vpop.eup %8638 }
0x3c16   :  { %v5689_v42 = vadd.f32 1.0, %v8639_v21 }
0x3c17   :  { %8640 = vrcp.f32 %v5802_v56 }
0x3c18   :  { %8642 = vrcp.f32 %v5689_v42 }
0x3c24   :  { %v8641_v2 = vpop.eup %8640 }
0x3c25   :  { %v8643_v25 = vpop.eup %8642 }
0x3c82   :  { %v5823_v0 = vpop.permute.xlu0 %5822 }
0x3c83   :  { %v11147_v19 = vmul.f32 %v8641_v2, %v5823_v0 }
0x3c85   :  { %5940 = vrot.lane.b32.xlu0 %v11147_v19, %s8952_s2 }
0x3c86   :  { %v5710_v52 = vpop.permute.xlu1 %5709 }
0x3c87   :  { %v5712_v4 = vmul.f32 %v8643_v25, %v5710_v52 }
0x3c89   :  { %5827 = vrot.lane.b32.xlu1 %v5712_v4, %s8952_s2 }
0x3cf7   :  { %v5941_v36 = vpop.permute.xlu0 %5940 }
0x3cf8   :  { %7763 = vmatmul.mubr.msk.f32.vlgmr.msra.gmra.mxu0 %vm255_vm2, %v5941_v36 }
0x3cf9   :  { %7772 = vmatpush1.msk.msra.mxu0 %vm259_vm0, %v10960_v24  ;;  %6234 = vmatprep.mubr.f32.mxu0 %v11663_v30 }
0x3cfa   :  { %6190 = vmatprep.subr.mxu0 %v10968_v26 }
0x3cfb   :  { %v11157_v34 = vpop.permute.xlu1 %5827  ;;  %6191 = vmatpush1.msra.mxu0 %v10976_v11 }
0x3cfc   :  { %7758 = vmatmul.mubr.msk.f32.vlgmr.msra.gmra.mxu1 %vm255_vm2, %v11157_v34  ;;  %6192 = vmatprep.subr.mxu0 %v10984_v27 }
0x3cfd   :  { %7767 = vmatpush1.msk.msra.mxu1 %vm259_vm0, %v10990_v29  ;;  %6193 = vmatpush1.msra.mxu0 %v10997_v31  ;;  %vm7498_vm0 = vcmask 1046534  }
0x3cfe   :  { %6077 = vmatprep.subr.mxu1 %v11003_v32  ;;  %6194 = vmatprep.subr.mxu0 %v11009_v58 }
0x3cff   :  { %6078 = vmatpush1.msra.mxu1 %v11015_v33  ;;  %6195 = vmatpush1.msra.mxu0 %v11021_v50 }
0x3d00   :  { %6079 = vmatprep.subr.mxu1 %v11027_v55  ;;  %6196 = vmatprep.subr.mxu0 %v11033_v37 }
0x3d01   :  { %6080 = vmatpush1.msra.mxu1 %v11039_v54  ;;  %6197 = vmatpush1.msra.mxu0 %v11045_v44 }
0x3d02   :  { %6081 = vmatprep.subr.mxu1 %v11051_v43  ;;  %6198 = vmatprep.subr.mxu0 %v11057_v45 }
0x3d03   :  { %6082 = vmatpush1.msra.mxu1 %v11063_v46  ;;  %6199 = vmatpush1.msra.mxu0 %v11069_v10 }
0x3d04   :  { %6083 = vmatprep.subr.mxu1 %v11075_v51  ;;  %6200 = vmatprep.subr.mxu0 %v11081_v39 }
0x3d05   :  { %6084 = vmatpush1.msra.mxu1 %v11087_v18  ;;  %6201 = vmatpush1.msra.mxu0 %v11093_v20 }
0x3d06   :  { %6085 = vmatprep.subr.mxu1 %v11099_v60  ;;  %6121 = vmatprep.mubr.f32.mxu1 %v11663_v30 }
0x3d07   :  { %6086 = vmatpush1.msra.mxu1 %v11106_v17 }
0x3d08   :  { %6087 = vmatprep.subr.mxu1 %v11114_v61 }
0x3d09   :  { %6088 = vmatpush1.msra.mxu1 %v11120_v53 }
0x3db8   :  { %v6010_v24 = vpop.f32.mrf.mxu0 }
0x3db9   :  { %v6015_v26 = vadd.f32 %v6010_v24, %v10647_v47 }
0x3dba   :  { %v6012_v11 = vpop.f32.mrf.mxu0 }
0x3dbb   :  { %8644 = vtanh.f32 %v6015_v26  ;;  %v6016_v27 = vadd.f32 %v6012_v11, %v10654_v57  ;;  %v7764_v37 = vmul.f32 -1.442695, %v6015_v26 }
0x3dbc   :  { %v5897_v29 = vpop.f32.mrf.mxu1 }
0x3dbd   :  { %v5902_v31 = vadd.f32 %v5897_v29, %v10651_v1  ;;  %8646 = vtanh.f32 %v6016_v27  ;;  %v7765_v42 = vmul.f32 -1.442695, %v6016_v27 }
0x3dbe   :  { %v5899_v32 = vpop.f32.mrf.mxu1 }
0x3dbf   :  { %v5903_v30 = vadd.f32 %v5899_v32, %v10658_v13  ;;  %8648 = vtanh.f32 %v5902_v31  ;;  %v7759_v54 = vmul.f32 -1.442695, %v5902_v31 }
0x3dc1   :  { %8650 = vtanh.f32 %v5903_v30 }
0x3dc2   :  { %8652 = vpow2.f32 %v7764_v37 }
0x3dc3   :  { %8654 = vpow2.f32 %v7759_v54 }
0x3dc8   :  { %v8645_v58 = vpop.eup %8644 }
0x3dc9   :  { %6034 = vrot.lane.b32.xlu0 %v8645_v58, %s8949_s4 }
0x3dca   :  { %v8647_v33 = vpop.eup %8646 }
0x3dcb   :  { %6036 = vrot.lane.b32.xlu1 %v8647_v33, %s8949_s4 }
0x3dcc   :  { %v8649_v50 = vpop.eup %8648 }
0x3dcd   :  { %5921 = vrot.lane.b32.xlu0 %v8649_v50, %s8949_s4 }
0x3dce   :  { %v8651_v55 = vpop.eup %8650 }
0x3dcf   :  { %5923 = vrot.lane.b32.xlu1 %v8651_v55, %s8949_s4  ;;  %v8653_v44 = vpop.eup %8652 }
0x3dd0   :  { %v6020_v43 = vadd.f32 1.0, %v8653_v44  ;;  %v8655_v45 = vpop.eup %8654 }
0x3dd1   :  { %v5907_v46 = vadd.f32 1.0, %v8655_v45 }
0x3dd2   :  { %8656 = vrcp.f32 %v6020_v43 }
0x3dd3   :  { %8658 = vrcp.f32 %v5907_v46 }
0x3ddf   :  { %v8657_v39 = vpop.eup %8656 }
0x3de0   :  { %v8659_v61 = vpop.eup %8658  ;;  %v6031_v8 = vmul.f32 %v8657_v39, %v11138_v16  ;;  %v7760_v16 = vmul.f32 -1.442695, %v5903_v30 }
0x3de1   :  { %v5918_v48 = vmul.f32 %v8659_v61, %v11142_v23 }
0x3e3b   :  { %v6035_v10 = vpop.permute.xlu0 %6034 }
0x3e3d   :  { %v6037_v51 = vpop.permute.xlu1 %6036 }
0x3e3e   :  { %v6038_v18 = vsel %vm360_vm1, %v6035_v10, %v6037_v51 }
0x3e3f   :  { %v6040_v20 = vmul.f32 %v8657_v39, %v6038_v18  ;;  %v5922_v60 = vpop.permute.xlu0 %5921 }
0x3e41   :  { %6042 = vrot.lane.b32.xlu0 %v6040_v20, %s8950_s21  ;;  %v5924_v17 = vpop.permute.xlu1 %5923 }
0x3e42   :  { %v5925_v53 = vsel %vm360_vm1, %v5922_v60, %v5924_v17 }
0x3e43   :  { %v5927_v22 = vmul.f32 %v8659_v61, %v5925_v53 }
0x3e45   :  { %5929 = vrot.lane.b32.xlu1 %v5927_v22, %s8950_s21 }
0x3eb3   :  { %v6043_v49 = vpop.permute.xlu0 %6042 }
0x3eb4   :  { %v11200_v40 = vadd.f32 %v6043_v49, %v6031_v8 }
0x3eb6   :  { %8660 = vtanh.f32 %v11200_v40 }
0x3eb7   :  { %v5930_v38 = vpop.permute.xlu1 %5929 }
0x3eb8   :  { %v11204_v41 = vadd.f32 %v5930_v38, %v5918_v48 }
0x3eba   :  { %8662 = vtanh.f32 %v11204_v41 }
0x3ebb   :  { %8664 = vpow2.f32 %v7765_v42 }
0x3ebc   :  { %8666 = vpow2.f32 %v7760_v16 }
0x3ec3   :  { %v8661_v56 = vpop.eup %8660 }
0x3ec4   :  { %6048 = vrot.lane.b32.xlu0 %v8661_v56, %s8951_s22 }
0x3ec7   :  { %v8663_v21 = vpop.eup %8662 }
0x3ec8   :  { %5935 = vrot.lane.b32.xlu1 %v8663_v21, %s8951_s22  ;;  %v8665_v2 = vpop.eup %8664 }
0x3ec9   :  { %v6028_v0 = vadd.f32 1.0, %v8665_v2  ;;  %v8667_v25 = vpop.eup %8666 }
0x3eca   :  { %v5915_v23 = vadd.f32 1.0, %v8667_v25  ;;  %v6345_v25 = vld [vmem:[%s11630_s13 + $0xb8] sm:$0xff] }
0x3ecb   :  { %8668 = vrcp.f32 %v6028_v0  ;;  %v6346_v0 = vld [vmem:[%s11630_s13 + $0xc0] sm:$0xff] }
0x3ecc   :  { %8670 = vrcp.f32 %v5915_v23  ;;  %v6331_v23 = vld [vmem:[%s11630_s13 + $0x48] sm:$0xff] }
0x3ed8   :  { %v8669_v52 = vpop.eup %8668 }
0x3ed9   :  { %v8671_v24 = vpop.eup %8670 }
0x3f36   :  { %v6049_v4 = vpop.permute.xlu0 %6048 }
0x3f37   :  { %v11209_v36 = vmul.f32 %v8669_v52, %v6049_v4  ;;  %v6344_v52 = vld [vmem:[%s11630_s13 + $0xb0] sm:$0xff]  ;;  %v6330_v4 = vld [vmem:[%s11630_s13 + $0x40] sm:$0xff] }
0x3f39   :  { %6166 = vrot.lane.b32.xlu0 %v11209_v36, %s8952_s2 }
0x3f3a   :  { %v5936_v26 = vpop.permute.xlu1 %5935 }
0x3f3b   :  { %v5938_v11 = vmul.f32 %v8671_v24, %v5936_v26  ;;  %v6342_v24 = vld [vmem:[%s11630_s13 + $0xa0] sm:$0xff] }
0x3f3d   :  { %6053 = vrot.lane.b32.xlu1 %v5938_v11, %s8952_s2 }
0x3fab   :  { %v6167_v27 = vpop.permute.xlu0 %6166 }
0x3fac   :  { %7773 = vmatmul.mubr.msk.f32.vlgmr.msra.gmra.mxu0 %vm255_vm2, %v6167_v27 }
0x3faf   :  { %v11215_v29 = vpop.permute.xlu1 %6053 }
0x3fb0   :  { %7768 = vmatmul.mubr.msk.f32.vlgmr.msra.gmra.mxu1 %vm255_vm2, %v11215_v29 }
0x406c   :  { %v6236_v31 = vpop.f32.mrf.mxu0 }
0x406d   :  { %v6241_v32 = vadd.f32 %v6236_v31, %v10647_v47 }
0x406e   :  { %v6238_v30 = vpop.f32.mrf.mxu0 }
0x406f   :  { %8672 = vtanh.f32 %v6241_v32  ;;  %v11221_v58 = vadd.f32 %v6238_v30, %v10654_v57  ;;  %v6328_v30 = vld [vmem:[%s11630_s13 + $0x30] sm:$0xff] }
0x4070   :  { %v6123_v33 = vpop.f32.mrf.mxu1 }
0x4071   :  { %v6128_v50 = vadd.f32 %v6123_v33, %v10651_v1  ;;  %8674 = vtanh.f32 %v11221_v58  ;;  %v7774_v1 = vmul.f32 -1.442695, %v6241_v32  ;;  %v6340_v33 = vld [vmem:[%s11630_s13 + $0x90] sm:$0xff] }
0x4072   :  { %v6125_v55 = vpop.f32.mrf.mxu1 }
0x4073   :  { %v11226_v37 = vadd.f32 %v6125_v55, %v10658_v13  ;;  %8676 = vtanh.f32 %v6128_v50  ;;  %v7769_v43 = vmul.f32 -1.442695, %v6128_v50  ;;  %v6326_v50 = vld [vmem:[%s11630_s13 + $0x20] sm:$0xff]  ;;  %v6339_v55 = vld [vmem:[%s11630_s13 + $0x88] sm:$0xff] }
0x4075   :  { %8678 = vtanh.f32 %v11226_v37  ;;  %v7770_v26 = vmul.f32 -1.442695, %v11226_v37  ;;  %v6325_v37 = vld [vmem:[%s11630_s13 + $0x18] sm:$0xff] }
0x4076   :  { %8680 = vpow2.f32 %v7774_v1 }
0x4077   :  { %8682 = vpow2.f32 %v7769_v43  ;;  %v6323_v43 = vld [vmem:[%s11630_s13 + $0x8] sm:$0xff] }
0x407c   :  { %v8673_v54 = vpop.eup %8672 }
0x407d   :  { %6260 = vrot.lane.b32.xlu0 %v8673_v54, %s8949_s4  ;;  %v6338_v54 = vld [vmem:[%s11630_s13 + $0x80] sm:$0xff] }
0x407e   :  { %v8675_v47 = vpop.eup %8674 }
0x407f   :  { %6262 = vrot.lane.b32.xlu1 %v8675_v47, %s8949_s4  ;;  %v6324_v47 = vld [vmem:[%s11630_s13 + $0x10] sm:$0xff] }
0x4080   :  { %v8677_v57 = vpop.eup %8676 }
0x4081   :  { %6147 = vrot.lane.b32.xlu0 %v8677_v57, %s8949_s4  ;;  %v6337_v57 = vld [vmem:[%s11630_s13 + $0x78] sm:$0xff] }
0x4082   :  { %v8679_v44 = vpop.eup %8678 }
0x4083   :  { %6149 = vrot.lane.b32.xlu1 %v8679_v44, %s8949_s4  ;;  %v8681_v13 = vpop.eup %8680 }
0x4084   :  { %v6246_v45 = vadd.f32 1.0, %v8681_v13  ;;  %v8683_v46 = vpop.eup %8682  ;;  %v6336_v13 = vld [vmem:[%s11630_s13 + $0x70] sm:$0xff] }
0x4085   :  { %v6133_v10 = vadd.f32 1.0, %v8683_v46  ;;  %v6322_v46 = vld [vmem:[%s11630_s13] sm:$0xff] }
0x4086   :  { %8684 = vrcp.f32 %v6246_v45 }
0x4087   :  { %8686 = vrcp.f32 %v6133_v10  ;;  %v6335_v10 = vld [vmem:[%s11630_s13 + $0x68] sm:$0xff] }
0x4093   :  { %v8685_v18 = vpop.eup %8684 }
0x4094   :  { %v8687_v53 = vpop.eup %8686  ;;  %v6257_v49 = vmul.f32 %v8685_v18, %v11200_v40  ;;  %v6334_v40 = vld [vmem:[%s11630_s13 + $0x60] sm:$0xf] }
0x4095   :  { %v6144_v56 = vmul.f32 %v8687_v53, %v11204_v41  ;;  %v6347_v41 = vld [vmem:[%s11630_s13 + $0xc8] sm:$0xf]  ;;  %8042 = vmatprep.subr.msk.mxu1 %vm2198_vm3, %v6334_v40 }
0x4096   :  { %8071 = vmatprep.subr.msk.mxu0 %vm2198_vm3, %v6347_v41  ;;  %8043 = vmatpush3.msk.msra.mxu1 %vm2198_vm3, %v6334_v40 }
0x4097   :  { %8072 = vmatpush3.msk.msra.mxu0 %vm2198_vm3, %v6347_v41 }
0x4098   :  { %8073 = vmatprep.subr.mxu0 %v6346_v0 }
0x4099   :  { %8074 = vmatpush3.msra.mxu0 %v6346_v0 }
0x409a   :  { %8075 = vmatprep.subr.mxu0 %v6345_v25 }
0x409b   :  { %8076 = vmatpush3.msra.mxu0 %v6345_v25 }
0x409c   :  { %8077 = vmatprep.subr.mxu0 %v6344_v52 }
0x409d   :  { %8078 = vmatpush3.msra.mxu0 %v6344_v52 }
0x40ef   :  { %v6261_v51 = vpop.permute.xlu0 %6260 }
0x40f1   :  { %v6263_v39 = vpop.permute.xlu1 %6262 }
0x40f2   :  { %v6264_v20 = vsel %vm360_vm1, %v6261_v51, %v6263_v39 }
0x40f3   :  { %v6266_v60 = vmul.f32 %v8685_v18, %v6264_v20  ;;  %v6148_v17 = vpop.permute.xlu0 %6147 }
0x40f5   :  { %6268 = vrot.lane.b32.xlu0 %v6266_v60, %s8950_s21  ;;  %v6150_v61 = vpop.permute.xlu1 %6149 }
0x40f6   :  { %v6151_v22 = vsel %vm360_vm1, %v6148_v17, %v6150_v61  ;;  %vm7500_vm1 = vcmask 1047559  }
0x40f7   :  { %v6153_v8 = vmul.f32 %v8687_v53, %v6151_v22 }
0x40f9   :  { %6155 = vrot.lane.b32.xlu1 %v6153_v8, %s8950_s21 }
0x4167   :  { %v6269_v48 = vpop.permute.xlu0 %6268 }
0x4168   :  { %v6271_v38 = vadd.f32 %v6269_v48, %v6257_v49 }
0x416a   :  { %8688 = vtanh.f32 %v6271_v38 }
0x416b   :  { %v6156_v21 = vpop.permute.xlu1 %6155 }
0x416c   :  { %v6158_v42 = vadd.f32 %v6156_v21, %v6144_v56 }
0x416e   :  { %8690 = vtanh.f32 %v6158_v42 }
0x4177   :  { %v8689_v16 = vpop.eup %8688 }
0x4178   :  { %6274 = vrot.lane.b32.xlu0 %v8689_v16, %s8951_s22 }
0x417b   :  { %v8691_v2 = vpop.eup %8690 }
0x417c   :  { %6294 = vrot.lane.b32.xlu0 %v11147_v19, %s8949_s4  ;;  %6161 = vrot.lane.b32.xlu1 %v8691_v2, %s8951_s22  ;;  %v6333_v19 = vld [vmem:[%s11630_s13 + $0x58] sm:$0xff] }
0x417d   :  { %8044 = vmatprep.subr.mxu1 %v6333_v19 }
0x417e   :  { %8045 = vmatpush3.msra.mxu1 %v6333_v19 }
0x4180   :  { %6300 = vrot.lane.b32.xlu0 %v10809_v62, %s8949_s4  ;;  %6292 = vrot.lane.b32.xlu1 %v11209_v36, %s8949_s4  ;;  %v6332_v62 = vld [vmem:[%s11630_s13 + $0x50] sm:$0xff]  ;;  %v6329_v36 = vld [vmem:[%s11630_s13 + $0x38] sm:$0xff] }
0x4181   :  { %8046 = vmatprep.subr.mxu1 %v6332_v62 }
0x4182   :  { %8047 = vmatpush3.msra.mxu1 %v6332_v62 }
0x4183   :  { %8048 = vmatprep.subr.mxu1 %v6331_v23 }
0x4184   :  { %6296 = vrot.lane.b32.xlu1 %v10951_v15, %s8949_s4  ;;  %v6343_v15 = vld [vmem:[%s11630_s13 + $0xa8] sm:$0xff]  ;;  %8049 = vmatpush3.msra.mxu1 %v6331_v23 }
0x4185   :  { %8050 = vmatprep.subr.mxu1 %v6330_v4  ;;  %8079 = vmatprep.subr.mxu0 %v6343_v15 }
0x4186   :  { %8051 = vmatpush3.msra.mxu1 %v6330_v4  ;;  %8080 = vmatpush3.msra.mxu0 %v6343_v15 }
0x4187   :  { %8052 = vmatprep.subr.mxu1 %v6329_v36  ;;  %8081 = vmatprep.subr.mxu0 %v6342_v24 }
0x4188   :  { %6298 = vrot.lane.b32.xlu1 %v10875_v5, %s8949_s4  ;;  %8053 = vmatpush3.msra.mxu1 %v6329_v36  ;;  %v7775_v5 = vmul.f32 -1.442695, %v11221_v58  ;;  %v6327_v58 = vld [vmem:[%s11630_s13 + $0x28] sm:$0xff]  ;;  %v11380_v36 = vld [vmem:[%s11631_s14] ss:$0 sm:$0xff] }
0x4189   :  { %8082 = vmatpush3.msra.mxu0 %v6342_v24  ;;  %8054 = vmatprep.subr.mxu1 %v6328_v30  ;;  %v11385_v24 = vld [vmem:[%s11631_s14 + $0x1] ss:$0 sm:$0xff]  ;;  %s8959_s14 = smov 126  }
0x418a   :  { %8692 = vpow2.f32 %v7775_v5  ;;  %8055 = vmatpush3.msra.mxu1 %v6328_v30 }
0x418b   :  { %8694 = vpow2.f32 %v7770_v26  ;;  %8056 = vmatprep.subr.mxu1 %v6327_v58 }
0x418c   :  { %6302 = vrot.lane.b32.xlu1 %v10743_v59, %s8949_s4  ;;  %v6341_v59 = vld [vmem:[%s11630_s13 + $0x98] sm:$0xff]  ;;  %8057 = vmatpush3.msra.mxu1 %v6327_v58 }
0x418d   :  { %8083 = vmatprep.subr.mxu0 %v6341_v59  ;;  %8058 = vmatprep.subr.mxu1 %v6326_v50 }
0x418e   :  { %8084 = vmatpush3.msra.mxu0 %v6341_v59  ;;  %8059 = vmatpush3.msra.mxu1 %v6326_v50 }
0x418f   :  { %8085 = vmatprep.subr.mxu0 %v6340_v33  ;;  %8060 = vmatprep.subr.mxu1 %v6325_v37 }
0x4190   :  { %8086 = vmatpush3.msra.mxu0 %v6340_v33  ;;  %8061 = vmatpush3.msra.mxu1 %v6325_v37 }
0x4191   :  { %8087 = vmatprep.subr.mxu0 %v6339_v55  ;;  %8062 = vmatprep.subr.mxu1 %v6324_v47 }
0x4192   :  { %8088 = vmatpush3.msra.mxu0 %v6339_v55  ;;  %8063 = vmatpush3.msra.mxu1 %v6324_v47 }
0x4193   :  { %8089 = vmatprep.subr.mxu0 %v6338_v54  ;;  %8064 = vmatprep.subr.mxu1 %v6323_v43 }
0x4194   :  { %8090 = vmatpush3.msra.mxu0 %v6338_v54  ;;  %8065 = vmatpush3.msra.mxu1 %v6323_v43 }
0x4195   :  { %8091 = vmatprep.subr.mxu0 %v6337_v57  ;;  %8066 = vmatprep.subr.mxu1 %v6322_v46 }
0x4196   :  { %8092 = vmatpush3.msra.mxu0 %v6337_v57  ;;  %8067 = vmatpush3.msra.mxu1 %v6322_v46 }
0x4197   :  { %v8693_v11 = vpop.eup %8692  ;;  %8093 = vmatprep.subr.mxu0 %v6336_v13 }
0x4198   :  { %v6254_v27 = vadd.f32 1.0, %v8693_v11  ;;  %v8695_v31 = vpop.eup %8694  ;;  %8094 = vmatpush3.msra.mxu0 %v6336_v13 }
0x4199   :  { %v6141_v32 = vadd.f32 1.0, %v8695_v31  ;;  %8095 = vmatprep.subr.mxu0 %v6335_v10 }
0x419a   :  { %8696 = vrcp.f32 %v6254_v27  ;;  %8096 = vmatpush3.msra.mxu0 %v6335_v10  ;;  %v6660_v27 = vmul.f32 0.0, %v11380_v36 }
0x419b   :  { %8698 = vrcp.f32 %v6141_v32  ;;  %v6692_v32 = vmul.f32 0.0, %v11385_v24 }
0x41a7   :  { %v8697_v44 = vpop.eup %8696 }
0x41a8   :  { %v8699_v51 = vpop.eup %8698 }
0x41ea   :  { %v6275_v1 = vpop.permute.xlu0 %6274 }
0x41eb   :  { %v6277_v45 = vmul.f32 %v8697_v44, %v6275_v1 }
0x41ed   :  { %6290 = vrot.lane.b32.xlu0 %v6277_v45, %s8949_s4 }
0x41ee   :  { %v6162_v39 = vpop.permute.xlu1 %6161  ;;  %v6295_v60 = vpop.permute.xlu0 %6294 }
0x41ef   :  { %v6164_v18 = vmul.f32 %v8699_v51, %v6162_v39  ;;  %v6316_v22 = vsel %vm255_vm2, %v10819_v7, %v6295_v60 }
0x41f1   :  { %6279 = vrot.lane.b32.xlu0 %v6164_v18, %s8952_s2 }
0x41f2   :  { %v6293_v20 = vpop.permute.xlu1 %6292  ;;  %v6301_v61 = vpop.permute.xlu0 %6300 }
0x41f3   :  { %v6315_v38 = vsel %vm255_vm2, %v10753_v35, %v6293_v20  ;;  %v6319_v40 = vsel %vm255_vm2, %v11157_v34, %v6301_v61  ;;  %v7776_v34 = vld [vmem:[%s11632_s15] ss:$0 sm:$0xff] }
0x41f5   :  { %6304 = vrot.lane.b32.xlu0 %v10677_v28, %s8949_s4 }
0x41f6   :  { %v6297_v17 = vpop.permute.xlu1 %6296 }
0x41f7   :  { %v6317_v53 = vsel %vm255_vm2, %v10885_v3, %v6297_v17 }
0x41f8   :  { %v6367_v8 = vcombine.low %v6316_v22, %v6317_v53  ;;  %v8961_v53 = vmov 3  }
0x41f9   :  { %8121 = vset.pattern.permute.xlu0 %v8961_v53  ;;  %8120 = vset.pattern.permute.xlu1 %v8961_v53 }
0x41fa   :  { %v6299_v49 = vpop.permute.xlu1 %6298  ;;  %v6381_v21 = vrot.slane %v6367_v8, %v10114_v9 }
0x41fb   :  { %v6318_v3 = vsel %vm255_vm2, %v10971_v14, %v6299_v49 }
0x41fc   :  { %v6383_v41 = vcombine.low %v6318_v3, %v6319_v40 }
0x41fe   :  { %v6303_v2 = vpop.permute.xlu1 %6302  ;;  %v6391_v62 = vrot.slane %v6383_v41, %v10114_v9 }
0x425f   :  { %v6291_v48 = vpop.permute.xlu0 %6290 }
0x4260   :  { %v6314_v56 = vsel %vm255_vm2, %v10687_v6, %v6291_v48  ;;  %v6320_v6 = vsel %vm255_vm2, %v11215_v29, %v6303_v2  ;;  %v11370_v29 = vld [vmem:[%s11632_s15 + $0x1] ss:$0 sm:$0xff]  ;;  %s8960_s15 = smov 1  }
0x4261   :  { %v6366_v28 = vcombine.low %v6314_v56, %v6315_v38 }
0x4263   :  { %v6374_v42 = vrot.slane %v6366_v28, %v10114_v9  ;;  %v6280_v16 = vpop.permute.xlu0 %6279  ;;  %v8963_v28 = vmov 269488144  }
0x4265   :  { %v6382_v7 = vcombine.low %v6374_v42, %v6381_v21  ;;  %v6724_v21 = vunpack.c.l.s4 %v8963_v28 }
0x4267   :  { %v6305_v19 = vpop.permute.xlu0 %6304  ;;  %8068 = vmatprep.mubr.msk.f32.mxu1 %vm2193_vm4, %v6382_v7  ;;  %8097 = vmatprep.mubr.msk.f32.mxu0 %vm2193_vm4, %v6382_v7  ;;  %v6725_v42 = vunpack.c.0.s8 %v6724_v21 }
0x4268   :  { %v6321_v35 = vsel %vm255_vm2, %v6280_v16, %v6305_v19 }
0x4269   :  { %v6384_v0 = vcombine.low %v6320_v6, %v6321_v35  ;;  %v11416_v16 = vsub.s32 %v6725_v42, %v11671_v63 }
0x426b   :  { %v6398_v14 = vrot.slane %v6384_v0, %v10114_v9 }
0x426d   :  { %v6399_v25 = vcombine.low %v6391_v62, %v6398_v14 }
0x426f   :  { %8069 = vmatmul.mubr.msk.f32.vlgmr.msra.gmra.mxu1 %vm2193_vm4, %v6399_v25  ;;  %8098 = vmatmul.mubr.msk.f32.vlgmr.msra.gmra.mxu0 %vm2193_vm4, %v6399_v25 }
0x432f   :  { %v8070_v23 = vpop.f32.mrf.mxu1  ;;  %v8099_v52 = vpop.f32.mrf.mxu0 }
0x4330   :  { %v11372_v4 = vadd.f32 %v8070_v23, %v7776_v34  ;;  %v11375_v15 = vadd.f32 %v8099_v52, %v11370_v29 }
0x4331   :  { %v6473_v5 = vpop.f32.mrf.mxu1 }
0x4332   :  { %v6629_v26 = vcombine.high %v11375_v15, %v11375_v15  ;;  %v11389_v11 = vadd.f32 %v7776_v34, %v6473_v5 }
0x4334   :  { %v11393_v31 = vrot.slane %v6629_v26, %v10114_v9  ;;  %v11398_v30 = vrot.slane %v11389_v11, %v10114_v9 }
0x4336   :  { %v6645_v59 = vcombine.high %v11393_v31, %v11393_v31  ;;  %v6661_v58 = vadd.f32 %v6660_v27, %v11398_v30  ;;  %v6499_v6 = vcombine.high %v11398_v30, %v11398_v30 }
0x4338   :  { %v6693_v33 = vadd.f32 %v6692_v32, %v6645_v59  ;;  %8700 = vtanh.f32 %v6661_v58  ;;  %v7785_v37 = vmul.f32 -1.442695, %v6661_v58 }
0x433a   :  { %8702 = vtanh.f32 %v6693_v33  ;;  %v7787_v54 = vmul.f32 -1.442695, %v6693_v33 }
0x433b   :  { %8704 = vpow2.f32 %v7785_v37 }
0x433c   :  { %8706 = vpow2.f32 %v7787_v54 }
0x4345   :  { %v8701_v50 = vpop.eup %8700 }
0x4346   :  { %6671 = vrot.lane.b32.xlu0 %v8701_v50, %s8959_s14 }
0x4347   :  { %v8703_v55 = vpop.eup %8702 }
0x4348   :  { %6703 = vrot.lane.b32.xlu1 %v8703_v55, %s8959_s14  ;;  %v8705_v47 = vpop.eup %8704 }
0x4349   :  { %v8707_v57 = vpop.eup %8706  ;;  %v6665_v44 = vadd.f32 1.0, %v8705_v47 }
0x434a   :  { %v6697_v1 = vadd.f32 1.0, %v8707_v57 }
0x434b   :  { %8708 = vrcp.f32 %v6665_v44 }
0x434c   :  { %8710 = vrcp.f32 %v6697_v1 }
0x4358   :  { %v8709_v43 = vpop.eup %8708 }
0x4359   :  { %v8711_v45 = vpop.eup %8710  ;;  %v6669_v39 = vmul.f32 0.0, %v8709_v43 }
0x435a   :  { %v6701_v20 = vmul.f32 0.0, %v8711_v45 }
0x43b8   :  { %v6672_v13 = vpop.permute.xlu0 %6671 }
0x43b9   :  { %v6674_v46 = vmul.f32 %v8709_v43, %v6672_v13 }
0x43ba   :  { %v6704_v10 = vpop.permute.xlu1 %6703 }
0x43bb   :  { %v6706_v51 = vmul.f32 %v8711_v45, %v6704_v10  ;;  %6676 = vrot.lane.b32.xlu0 %v6674_v46, %s8960_s15  ;;  %v6636_v46 = vrot.slane %v11375_v15, %v10114_v9 }
0x43bd   :  { %6708 = vrot.lane.b32.xlu1 %v6706_v51, %s8960_s15 }
0x442d   :  { %v6677_v18 = vpop.permute.xlu0 %6676 }
0x442e   :  { %v6679_v60 = vadd.f32 %v6677_v18, %v6669_v39  ;;  %v6644_v39 = vcombine.high %v6636_v46, %v6636_v46  ;;  %v6484_v18 = vcombine.high %v11389_v11, %v11389_v11 }
0x442f   :  { %v6709_v17 = vpop.permute.xlu1 %6708 }
0x4430   :  { %v6711_v61 = vadd.f32 %v6709_v17, %v6701_v20  ;;  %8712 = vtanh.f32 %v6679_v60  ;;  %v6498_v53 = vrot.slane %v6484_v18, %v10114_v9 }
0x4432   :  { %8714 = vtanh.f32 %v6711_v61 }
0x443d   :  { %v8713_v22 = vpop.eup %8712 }
0x443e   :  { %6682 = vrot.lane.b32.xlu0 %v8713_v22, %s8962_s8 }
0x443f   :  { %v8715_v8 = vpop.eup %8714 }
0x4440   :  { %6714 = vrot.lane.b32.xlu1 %v8715_v8, %s8962_s8 }
0x44b0   :  { %v6683_v49 = vpop.permute.xlu0 %6682 }
0x44b1   :  { %v11409_v48 = vmul.f32 %v8709_v43, %v6683_v49 }
0x44b2   :  { %v6715_v38 = vpop.permute.xlu1 %6714 }
0x44b3   :  { %v11411_v56 = vmul.f32 %v8711_v45, %v6715_v38  ;;  %6720 = vperm.xlu0 %8121, %v11409_v48  }
0x44b5   :  { %6758 = vperm.xlu1 %8120, %v11411_v56  }
0x452e   :  { %v6721_v3 = vpop.permute.xlu0 %6720 }
0x452f   :  { %v6729_v2 = vrot.slane %v6721_v3, %v11416_v16 }
0x4530   :  { %v6759_v7 = vpop.permute.xlu1 %6758 }
0x4531   :  { %v6767_v40 = vrot.slane %v6759_v7, %v11416_v16  ;;  %v6730_v41 = vmul.f32 %v11380_v36, %v6729_v2 }
0x4533   :  { %v6768_v19 = vmul.f32 %v11385_v24, %v6767_v40  ;;  %v6731_v0 = vadd.f32 %v6730_v41, %v6499_v6 }
0x4535   :  { %v6769_v35 = vadd.f32 %v6768_v19, %v11393_v31  ;;  %v7788_v34 = vmul.f32 -1.442695, %v6731_v0 }
0x4537   :  { %8716 = vtanh.f32 %v6769_v35  ;;  %v7789_v25 = vmul.f32 -1.442695, %v6769_v35 }
0x4538   :  { %8718 = vtanh.f32 %v6731_v0 }
0x4539   :  { %8720 = vpow2.f32 %v7789_v25 }
0x453a   :  { %8722 = vpow2.f32 %v7788_v34 }
0x4544   :  { %v8717_v62 = vpop.eup %8716 }
0x4545   :  { %6779 = vrot.lane.b32.xlu1 %v8717_v62, %s8959_s14  ;;  %v8719_v14 = vpop.eup %8718 }
0x4546   :  { %v8721_v23 = vpop.eup %8720 }
0x4547   :  { %v6773_v52 = vadd.f32 1.0, %v8721_v23  ;;  %v8723_v5 = vpop.eup %8722 }
0x4548   :  { %v6735_v26 = vadd.f32 1.0, %v8723_v5 }
0x4549   :  { %6741 = vrot.lane.b32.xlu1 %v8719_v14, %s8959_s14  ;;  %8724 = vrcp.f32 %v6773_v52 }
0x454a   :  { %8726 = vrcp.f32 %v6735_v26 }
0x4556   :  { %v8725_v27 = vpop.eup %8724 }
0x4557   :  { %v8727_v30 = vpop.eup %8726  ;;  %v6777_v33 = vmul.f32 %v8725_v27, %v6711_v61 }
0x4558   :  { %v6739_v37 = vmul.f32 %v8727_v30, %v6679_v60 }
0x45b7   :  { %v6780_v31 = vpop.permute.xlu1 %6779 }
0x45b8   :  { %v6782_v32 = vmul.f32 %v8725_v27, %v6780_v31 }
0x45ba   :  { %6784 = vrot.lane.b32.xlu0 %v6782_v32, %s8960_s15 }
0x45bb   :  { %v6742_v59 = vpop.permute.xlu1 %6741 }
0x45bc   :  { %v6744_v58 = vmul.f32 %v8727_v30, %v6742_v59 }
0x45be   :  { %6746 = vrot.lane.b32.xlu1 %v6744_v58, %s8960_s15 }
0x462c   :  { %v6785_v50 = vpop.permute.xlu0 %6784 }
0x462d   :  { %v6787_v55 = vadd.f32 %v6785_v50, %v6777_v33 }
0x462f   :  { %8728 = vtanh.f32 %v6787_v55 }
0x4630   :  { %v6747_v54 = vpop.permute.xlu1 %6746 }
0x4631   :  { %v6749_v47 = vadd.f32 %v6747_v54, %v6739_v37 }
0x4633   :  { %8730 = vtanh.f32 %v6749_v47 }
0x463c   :  { %v8729_v57 = vpop.eup %8728 }
0x463d   :  { %6790 = vrot.lane.b32.xlu0 %v8729_v57, %s8962_s8 }
0x4640   :  { %v8731_v44 = vpop.eup %8730 }
0x4641   :  { %6752 = vrot.lane.b32.xlu1 %v8731_v44, %s8962_s8 }
0x46af   :  { %v6791_v1 = vpop.permute.xlu0 %6790 }
0x46b0   :  { %v11431_v43 = vmul.f32 %v8725_v27, %v6791_v1 }
0x46b2   :  { %6834 = vperm.xlu0 %8121, %v11431_v43  }
0x46b3   :  { %v6753_v13 = vpop.permute.xlu1 %6752 }
0x46b4   :  { %v11434_v45 = vmul.f32 %v8727_v30, %v6753_v13 }
0x46b6   :  { %6796 = vperm.xlu1 %8120, %v11434_v45  }
0x472d   :  { %v6835_v10 = vpop.permute.xlu0 %6834 }
0x472e   :  { %v6843_v51 = vrot.slane %v6835_v10, %v11416_v16 }
0x4730   :  { %v6844_v20 = vmul.f32 %v11385_v24, %v6843_v51 }
0x4731   :  { %v6797_v60 = vpop.permute.xlu1 %6796 }
0x4732   :  { %v6845_v17 = vadd.f32 %v6844_v20, %v6644_v39  ;;  %v6805_v61 = vrot.slane %v6797_v60, %v11416_v16 }
0x4734   :  { %8732 = vtanh.f32 %v6845_v17  ;;  %v6806_v22 = vmul.f32 %v11380_v36, %v6805_v61  ;;  %v7791_v11 = vmul.f32 -1.442695, %v6845_v17 }
0x4736   :  { %v6807_v8 = vadd.f32 %v6806_v22, %v6498_v53 }
0x4738   :  { %8734 = vtanh.f32 %v6807_v8  ;;  %v7790_v38 = vmul.f32 -1.442695, %v6807_v8 }
0x4739   :  { %8736 = vpow2.f32 %v7791_v11 }
0x473a   :  { %8738 = vpow2.f32 %v7790_v38 }
0x4741   :  { %v8733_v15 = vpop.eup %8732 }
0x4742   :  { %6855 = vrot.lane.b32.xlu0 %v8733_v15, %s8959_s14 }
0x4745   :  { %v8735_v49 = vpop.eup %8734 }
0x4746   :  { %6817 = vrot.lane.b32.xlu1 %v8735_v49, %s8959_s14  ;;  %v8737_v28 = vpop.eup %8736 }
0x4747   :  { %v6849_v21 = vadd.f32 1.0, %v8737_v28  ;;  %v8739_v42 = vpop.eup %8738 }
0x4748   :  { %v6811_v3 = vadd.f32 1.0, %v8739_v42 }
0x4749   :  { %8740 = vrcp.f32 %v6849_v21 }
0x474a   :  { %8742 = vrcp.f32 %v6811_v3 }
0x4756   :  { %v8741_v2 = vpop.eup %8740 }
0x4757   :  { %v8743_v41 = vpop.eup %8742  ;;  %v6853_v35 = vmul.f32 %v8741_v2, %v6787_v55  ;;  %v6500_v55 = vcombine.high %v6498_v53, %v6498_v53 }
0x4758   :  { %v6815_v14 = vmul.f32 %v8743_v41, %v6749_v47 }
0x47b4   :  { %v6856_v7 = vpop.permute.xlu0 %6855 }
0x47b5   :  { %v6858_v40 = vmul.f32 %v8741_v2, %v6856_v7  ;;  %v6601_v7 = vpop.f32.mrf.mxu0 }
0x47b7   :  { %6860 = vrot.lane.b32.xlu0 %v6858_v40, %s8960_s15  ;;  %v11475_v40 = vadd.f32 %v11370_v29, %v6601_v7 }
0x47b8   :  { %v6818_v19 = vpop.permute.xlu1 %6817 }
0x47b9   :  { %v6820_v6 = vmul.f32 %v8743_v41, %v6818_v19 }
0x47bb   :  { %6822 = vrot.lane.b32.xlu1 %v6820_v6, %s8960_s15 }
0x4829   :  { %v6861_v0 = vpop.permute.xlu0 %6860 }
0x482a   :  { %v6863_v62 = vadd.f32 %v6861_v0, %v6853_v35 }
0x482c   :  { %8744 = vtanh.f32 %v6863_v62 }
0x482d   :  { %v6823_v25 = vpop.permute.xlu1 %6822 }
0x482e   :  { %v6825_v34 = vadd.f32 %v6823_v25, %v6815_v14 }
0x4830   :  { %8746 = vtanh.f32 %v6825_v34 }
0x4839   :  { %v8745_v23 = vpop.eup %8744 }
0x483a   :  { %6866 = vrot.lane.b32.xlu0 %v8745_v23, %s8962_s8  ;;  %v6508_v23 = vrot.slane %v11372_v4, %v10114_v9 }
0x483d   :  { %v8747_v52 = vpop.eup %8746 }
0x483e   :  { %6828 = vrot.lane.b32.xlu1 %v8747_v52, %s8962_s8 }
0x48ac   :  { %v6867_v5 = vpop.permute.xlu0 %6866 }
0x48ad   :  { %v11452_v26 = vmul.f32 %v8741_v2, %v6867_v5 }
0x48af   :  { %6910 = vperm.xlu0 %8121, %v11452_v26  }
0x48b0   :  { %v6829_v27 = vpop.permute.xlu1 %6828 }
0x48b1   :  { %v11455_v31 = vmul.f32 %v8743_v41, %v6829_v27  ;;  %v6612_v41 = vcombine.high %v11475_v40, %v11475_v40 }
0x48b3   :  { %6872 = vperm.xlu1 %8120, %v11455_v31   ;;  %v6626_v19 = vrot.slane %v6612_v41, %v10114_v9 }
0x48b5   :  { %v6628_v0 = vcombine.high %v6626_v19, %v6626_v19 }
0x492a   :  { %v6911_v32 = vpop.permute.xlu0 %6910 }
0x492b   :  { %v6919_v30 = vrot.slane %v6911_v32, %v11416_v16 }
0x492d   :  { %v6920_v59 = vmul.f32 %v11385_v24, %v6919_v30 }
0x492e   :  { %v6873_v58 = vpop.permute.xlu1 %6872 }
0x492f   :  { %v6921_v33 = vadd.f32 %v6920_v59, %v6636_v46  ;;  %v6881_v50 = vrot.slane %v6873_v58, %v11416_v16 }
0x4931   :  { %8748 = vtanh.f32 %v6921_v33  ;;  %v6882_v37 = vmul.f32 %v11380_v36, %v6881_v50  ;;  %v7793_v44 = vmul.f32 -1.442695, %v6921_v33 }
0x4933   :  { %v6883_v54 = vadd.f32 %v6882_v37, %v6500_v55 }
0x4935   :  { %8750 = vtanh.f32 %v6883_v54  ;;  %v7792_v1 = vmul.f32 -1.442695, %v6883_v54 }
0x4936   :  { %8752 = vpow2.f32 %v7793_v44 }
0x4937   :  { %8754 = vpow2.f32 %v7792_v1 }
0x493e   :  { %v8749_v47 = vpop.eup %8748 }
0x493f   :  { %6931 = vrot.lane.b32.xlu0 %v8749_v47, %s8959_s14 }
0x4942   :  { %v8751_v57 = vpop.eup %8750 }
0x4943   :  { %6893 = vrot.lane.b32.xlu1 %v8751_v57, %s8959_s14  ;;  %v8753_v13 = vpop.eup %8752 }
0x4944   :  { %v6925_v46 = vadd.f32 1.0, %v8753_v13  ;;  %v8755_v10 = vpop.eup %8754 }
0x4945   :  { %v6887_v51 = vadd.f32 1.0, %v8755_v10 }
0x4946   :  { %8756 = vrcp.f32 %v6925_v46 }
0x4947   :  { %8758 = vrcp.f32 %v6887_v51 }
0x4953   :  { %v8757_v39 = vpop.eup %8756 }
0x4954   :  { %v8759_v60 = vpop.eup %8758  ;;  %v6929_v53 = vmul.f32 %v8757_v39, %v6863_v62 }
0x4955   :  { %v6891_v15 = vmul.f32 %v8759_v60, %v6825_v34 }
0x49b1   :  { %v6932_v18 = vpop.permute.xlu0 %6931 }
0x49b2   :  { %v6934_v20 = vmul.f32 %v8757_v39, %v6932_v18 }
0x49b4   :  { %6936 = vrot.lane.b32.xlu0 %v6934_v20, %s8960_s15 }
0x49b5   :  { %v6894_v17 = vpop.permute.xlu1 %6893 }
0x49b6   :  { %v6896_v61 = vmul.f32 %v8759_v60, %v6894_v17 }
0x49b8   :  { %6898 = vrot.lane.b32.xlu1 %v6896_v61, %s8960_s15 }
0x4a26   :  { %v6937_v22 = vpop.permute.xlu0 %6936 }
0x4a27   :  { %v6939_v8 = vadd.f32 %v6937_v22, %v6929_v53 }
0x4a29   :  { %8760 = vtanh.f32 %v6939_v8 }
0x4a2a   :  { %v6899_v49 = vpop.permute.xlu1 %6898 }
0x4a2b   :  { %v6901_v11 = vadd.f32 %v6899_v49, %v6891_v15 }
0x4a2d   :  { %8762 = vtanh.f32 %v6901_v11 }
0x4a36   :  { %v8761_v38 = vpop.eup %8760 }
0x4a37   :  { %6942 = vrot.lane.b32.xlu0 %v8761_v38, %s8962_s8 }
0x4a3a   :  { %v8763_v28 = vpop.eup %8762 }
0x4a3b   :  { %6904 = vrot.lane.b32.xlu1 %v8763_v28, %s8962_s8  ;;  %v6516_v28 = vcombine.high %v6508_v23, %v6508_v23 }
0x4aa9   :  { %v6943_v21 = vpop.permute.xlu0 %6942 }
0x4aaa   :  { %v11468_v42 = vmul.f32 %v8757_v39, %v6943_v21 }
0x4aac   :  { %6986 = vperm.xlu0 %8121, %v11468_v42  }
0x4aad   :  { %v6905_v3 = vpop.permute.xlu1 %6904 }
0x4aae   :  { %v11471_v2 = vmul.f32 %v8759_v60, %v6905_v3 }
0x4ab0   :  { %6948 = vperm.xlu1 %8120, %v11471_v2  }
0x4b27   :  { %v6987_v6 = vpop.permute.xlu0 %6986 }
0x4b28   :  { %v6995_v35 = vrot.slane %v6987_v6, %v11416_v16 }
0x4b2a   :  { %v6996_v62 = vmul.f32 %v11385_v24, %v6995_v35 }
0x4b2b   :  { %v6949_v14 = vpop.permute.xlu1 %6948 }
0x4b2c   :  { %v6997_v25 = vadd.f32 %v6996_v62, %v6628_v0  ;;  %v6957_v34 = vrot.slane %v6949_v14, %v11416_v16 }
0x4b2e   :  { %8764 = vtanh.f32 %v6997_v25  ;;  %v6958_v29 = vmul.f32 %v11380_v36, %v6957_v34  ;;  %v7795_v32 = vmul.f32 -1.442695, %v6997_v25 }
0x4b30   :  { %v6959_v52 = vadd.f32 %v6958_v29, %v6508_v23 }
0x4b32   :  { %8766 = vtanh.f32 %v6959_v52  ;;  %v7794_v30 = vmul.f32 -1.442695, %v6959_v52 }
0x4b33   :  { %8768 = vpow2.f32 %v7795_v32 }
0x4b34   :  { %8770 = vpow2.f32 %v7794_v30 }
0x4b3b   :  { %v8765_v5 = vpop.eup %8764 }
0x4b3c   :  { %7007 = vrot.lane.b32.xlu0 %v8765_v5, %s8959_s14 }
0x4b3f   :  { %v8767_v27 = vpop.eup %8766 }
0x4b40   :  { %6969 = vrot.lane.b32.xlu1 %v8767_v27, %s8959_s14  ;;  %v8769_v59 = vpop.eup %8768 }
0x4b41   :  { %v7001_v58 = vadd.f32 1.0, %v8769_v59  ;;  %v8771_v33 = vpop.eup %8770 }
0x4b42   :  { %v6963_v50 = vadd.f32 1.0, %v8771_v33 }
0x4b43   :  { %8772 = vrcp.f32 %v7001_v58 }
0x4b44   :  { %8774 = vrcp.f32 %v6963_v50 }
0x4b50   :  { %v8773_v55 = vpop.eup %8772 }
0x4b51   :  { %v8775_v47 = vpop.eup %8774  ;;  %v7005_v1 = vmul.f32 %v8773_v55, %v6939_v8 }
0x4b52   :  { %v6967_v10 = vmul.f32 %v8775_v47, %v6901_v11 }
0x4bae   :  { %v7008_v37 = vpop.permute.xlu0 %7007 }
0x4baf   :  { %v7010_v54 = vmul.f32 %v8773_v55, %v7008_v37 }
0x4bb1   :  { %7012 = vrot.lane.b32.xlu0 %v7010_v54, %s8960_s15 }
0x4bb2   :  { %v6970_v57 = vpop.permute.xlu1 %6969 }
0x4bb3   :  { %v6972_v44 = vmul.f32 %v8775_v47, %v6970_v57 }
0x4bb5   :  { %6974 = vrot.lane.b32.xlu1 %v6972_v44, %s8960_s15  ;;  %v6619_v44 = vrot.slane %v11475_v40, %v10114_v9 }
0x4c23   :  { %v7013_v13 = vpop.permute.xlu0 %7012 }
0x4c24   :  { %v7015_v46 = vadd.f32 %v7013_v13, %v7005_v1 }
0x4c26   :  { %8776 = vtanh.f32 %v7015_v46 }
0x4c27   :  { %v6975_v51 = vpop.permute.xlu1 %6974 }
0x4c28   :  { %v6977_v39 = vadd.f32 %v6975_v51, %v6967_v10  ;;  %v6627_v10 = vcombine.high %v6619_v44, %v6619_v44 }
0x4c2a   :  { %8778 = vtanh.f32 %v6977_v39 }
0x4c33   :  { %v8777_v18 = vpop.eup %8776 }
0x4c34   :  { %7018 = vrot.lane.b32.xlu0 %v8777_v18, %s8962_s8 }
0x4c37   :  { %v8779_v20 = vpop.eup %8778 }
0x4c38   :  { %6980 = vrot.lane.b32.xlu1 %v8779_v20, %s8962_s8 }
0x4ca6   :  { %v7019_v60 = vpop.permute.xlu0 %7018 }
0x4ca7   :  { %v11492_v17 = vmul.f32 %v8773_v55, %v7019_v60 }
0x4ca9   :  { %7062 = vperm.xlu0 %8121, %v11492_v17  }
0x4caa   :  { %v6981_v61 = vpop.permute.xlu1 %6980 }
0x4cab   :  { %v11495_v53 = vmul.f32 %v8775_v47, %v6981_v61 }
0x4cad   :  { %7024 = vperm.xlu1 %8120, %v11495_v53  }
0x4d24   :  { %v7063_v22 = vpop.permute.xlu0 %7062 }
0x4d25   :  { %v7071_v8 = vrot.slane %v7063_v22, %v11416_v16 }
0x4d27   :  { %v7072_v15 = vmul.f32 %v11385_v24, %v7071_v8 }
0x4d28   :  { %v7025_v49 = vpop.permute.xlu1 %7024 }
0x4d29   :  { %v7073_v11 = vadd.f32 %v7072_v15, %v6626_v19  ;;  %v7033_v38 = vrot.slane %v7025_v49, %v11416_v16 }
0x4d2b   :  { %8780 = vtanh.f32 %v7073_v11  ;;  %v7034_v21 = vmul.f32 %v11380_v36, %v7033_v38  ;;  %v7797_v6 = vmul.f32 -1.442695, %v7073_v11 }
0x4d2d   :  { %v7035_v3 = vadd.f32 %v7034_v21, %v6516_v28 }
0x4d2f   :  { %8782 = vtanh.f32 %v7035_v3  ;;  %v7796_v35 = vmul.f32 -1.442695, %v7035_v3 }
0x4d30   :  { %8784 = vpow2.f32 %v7797_v6 }
0x4d31   :  { %8786 = vpow2.f32 %v7796_v35 }
0x4d38   :  { %v8781_v7 = vpop.eup %8780 }
0x4d39   :  { %7083 = vrot.lane.b32.xlu0 %v8781_v7, %s8959_s14 }
0x4d3c   :  { %v8783_v41 = vpop.eup %8782 }
0x4d3d   :  { %7045 = vrot.lane.b32.xlu1 %v8783_v41, %s8959_s14  ;;  %v8785_v0 = vpop.eup %8784 }
0x4d3e   :  { %v7077_v19 = vadd.f32 1.0, %v8785_v0  ;;  %v8787_v62 = vpop.eup %8786 }
0x4d3f   :  { %v7039_v14 = vadd.f32 1.0, %v8787_v62 }
0x4d40   :  { %8788 = vrcp.f32 %v7077_v19 }
0x4d41   :  { %8790 = vrcp.f32 %v7039_v14 }
0x4d4d   :  { %v8789_v25 = vpop.eup %8788 }
0x4d4e   :  { %v8791_v29 = vpop.eup %8790  ;;  %v7081_v27 = vmul.f32 %v8789_v25, %v7015_v46  ;;  %v6501_v46 = vcombine.high %v11372_v4, %v11372_v4 }
0x4d4f   :  { %v7043_v59 = vmul.f32 %v8791_v29, %v6977_v39 }
0x4d50   :  { %v6515_v60 = vrot.slane %v6501_v46, %v10114_v9 }
0x4dab   :  { %v7084_v34 = vpop.permute.xlu0 %7083 }
0x4dac   :  { %v7086_v23 = vmul.f32 %v8789_v25, %v7084_v34 }
0x4dae   :  { %7088 = vrot.lane.b32.xlu0 %v7086_v23, %s8960_s15 }
0x4daf   :  { %v7046_v52 = vpop.permute.xlu1 %7045 }
0x4db0   :  { %v7048_v5 = vmul.f32 %v8791_v29, %v7046_v52 }
0x4db2   :  { %7050 = vrot.lane.b32.xlu1 %v7048_v5, %s8960_s15 }
0x4e20   :  { %v7089_v32 = vpop.permute.xlu0 %7088 }
0x4e21   :  { %v7091_v30 = vadd.f32 %v7089_v32, %v7081_v27 }
0x4e23   :  { %8792 = vtanh.f32 %v7091_v30 }
0x4e24   :  { %v7051_v58 = vpop.permute.xlu1 %7050 }
0x4e25   :  { %v7053_v33 = vadd.f32 %v7051_v58, %v7043_v59 }
0x4e27   :  { %8794 = vtanh.f32 %v7053_v33 }
0x4e30   :  { %v8793_v50 = vpop.eup %8792 }
0x4e31   :  { %7094 = vrot.lane.b32.xlu0 %v8793_v50, %s8962_s8 }
0x4e34   :  { %v8795_v55 = vpop.eup %8794 }
0x4e35   :  { %7056 = vrot.lane.b32.xlu1 %v8795_v55, %s8962_s8 }
0x4ea3   :  { %v7095_v37 = vpop.permute.xlu0 %7094 }
0x4ea4   :  { %v11508_v54 = vmul.f32 %v8789_v25, %v7095_v37  ;;  %v6517_v37 = vcombine.high %v6515_v60, %v6515_v60 }
0x4ea6   :  { %7138 = vperm.xlu0 %8121, %v11508_v54  }
0x4ea7   :  { %v7057_v47 = vpop.permute.xlu1 %7056 }
0x4ea8   :  { %v11511_v57 = vmul.f32 %v8791_v29, %v7057_v47 }
0x4eaa   :  { %7100 = vperm.xlu1 %8120, %v11511_v57  }
0x4f21   :  { %v7139_v1 = vpop.permute.xlu0 %7138 }
0x4f22   :  { %v7147_v13 = vrot.slane %v7139_v1, %v11416_v16 }
0x4f24   :  { %v7148_v51 = vmul.f32 %v11385_v24, %v7147_v13 }
0x4f25   :  { %v7101_v39 = vpop.permute.xlu1 %7100 }
0x4f26   :  { %v7149_v18 = vadd.f32 %v7148_v51, %v6627_v10  ;;  %v7109_v20 = vrot.slane %v7101_v39, %v11416_v16 }
0x4f28   :  { %8796 = vtanh.f32 %v7149_v18  ;;  %v7110_v61 = vmul.f32 %v11380_v36, %v7109_v20  ;;  %v7799_v4 = vmul.f32 -1.442695, %v7149_v18 }
0x4f2a   :  { %v7111_v22 = vadd.f32 %v7110_v61, %v6515_v60 }
0x4f2c   :  { %8798 = vtanh.f32 %v7111_v22  ;;  %v7798_v15 = vmul.f32 -1.442695, %v7111_v22 }
0x4f2d   :  { %8800 = vpow2.f32 %v7799_v4 }
0x4f2e   :  { %8802 = vpow2.f32 %v7798_v15 }
0x4f35   :  { %v8797_v40 = vpop.eup %8796 }
0x4f36   :  { %7159 = vrot.lane.b32.xlu0 %v8797_v40, %s8959_s14 }
0x4f39   :  { %v8799_v8 = vpop.eup %8798 }
0x4f3a   :  { %7121 = vrot.lane.b32.xlu1 %v8799_v8, %s8959_s14  ;;  %v8801_v49 = vpop.eup %8800 }
0x4f3b   :  { %v7153_v11 = vadd.f32 1.0, %v8801_v49  ;;  %v8803_v38 = vpop.eup %8802 }
0x4f3c   :  { %v7115_v28 = vadd.f32 1.0, %v8803_v38 }
0x4f3d   :  { %8804 = vrcp.f32 %v7153_v11 }
0x4f3e   :  { %8806 = vrcp.f32 %v7115_v28  ;;  %v7257_v28 = vrot.slane %v11409_v48, %v10114_v9 }
0x4f4a   :  { %v8805_v21 = vpop.eup %8804 }
0x4f4b   :  { %v8807_v41 = vpop.eup %8806  ;;  %v7157_v0 = vmul.f32 %v8805_v21, %v7091_v30 }
0x4f4c   :  { %v7119_v14 = vmul.f32 %v8807_v41, %v7053_v33 }
0x4fa8   :  { %v7160_v3 = vpop.permute.xlu0 %7159 }
0x4fa9   :  { %v7162_v7 = vmul.f32 %v8805_v21, %v7160_v3  ;;  %v7264_v3 = vrot.slane %v11434_v45, %v10114_v9  ;;  %v7352_v45 = vrot.slane %v11508_v54, %v10114_v9  ;;  %v7373_v54 = vrot.slane %v11452_v26, %v10114_v9 }
0x4fab   :  { %7164 = vrot.lane.b32.xlu0 %v7162_v7, %s8960_s15  ;;  %v7271_v7 = vrot.slane %v11455_v31, %v10114_v9  ;;  %v7359_v31 = vrot.slane %v11492_v17, %v10114_v9  ;;  %v7380_v17 = vrot.slane %v11431_v43, %v10114_v9 }
0x4fac   :  { %v7122_v6 = vpop.permute.xlu1 %7121 }
0x4fad   :  { %v7124_v35 = vmul.f32 %v8807_v41, %v7122_v6  ;;  %v7285_v6 = vrot.slane %v11495_v53, %v10114_v9  ;;  %v7366_v53 = vrot.slane %v11468_v42, %v10114_v9 }
0x4faf   :  { %7126 = vrot.lane.b32.xlu1 %v7124_v35, %s8960_s15 }
0x501d   :  { %v7165_v19 = vpop.permute.xlu0 %7164 }
0x501e   :  { %v7167_v62 = vadd.f32 %v7165_v19, %v7157_v0 }
0x5020   :  { %8808 = vtanh.f32 %v7167_v62 }
0x5021   :  { %v7127_v25 = vpop.permute.xlu1 %7126 }
0x5022   :  { %v7129_v34 = vadd.f32 %v7127_v25, %v7119_v14 }
0x5024   :  { %8810 = vtanh.f32 %v7129_v34 }
0x502d   :  { %v8809_v23 = vpop.eup %8808 }
0x502e   :  { %7170 = vrot.lane.b32.xlu0 %v8809_v23, %s8962_s8 }
0x5031   :  { %v8811_v29 = vpop.eup %8810 }
0x5032   :  { %7132 = vrot.lane.b32.xlu1 %v8811_v29, %s8962_s8 }
0x50a0   :  { %v7171_v52 = vpop.permute.xlu0 %7170 }
0x50a1   :  { %v7173_v5 = vmul.f32 %v8805_v21, %v7171_v52 }
0x50a3   :  { %7214 = vperm.xlu0 %8121, %v7173_v5   ;;  %v7345_v48 = vrot.slane %v7173_v5, %v10114_v9 }
0x50a4   :  { %v7133_v27 = vpop.permute.xlu1 %7132 }
0x50a5   :  { %v11529_v32 = vmul.f32 %v8807_v41, %v7133_v27  ;;  %v7278_v41 = vrot.slane %v11471_v2, %v10114_v9  ;;  %v7292_v2 = vrot.slane %v11511_v57, %v10114_v9  ;;  %v7387_v57 = vrot.slane %v11411_v56, %v10114_v9 }
0x50a7   :  { %7176 = vperm.xlu1 %8120, %v11529_v32  }
0x511e   :  { %v7215_v30 = vpop.permute.xlu0 %7214 }
0x511f   :  { %v7223_v59 = vrot.slane %v7215_v30, %v11416_v16 }
0x5121   :  { %v7224_v58 = vmul.f32 %v11385_v24, %v7223_v59 }
0x5122   :  { %v7177_v33 = vpop.permute.xlu1 %7176 }
0x5123   :  { %v7225_v50 = vadd.f32 %v7224_v58, %v6619_v44  ;;  %v7185_v55 = vrot.slane %v7177_v33, %v11416_v16 }
0x5125   :  { %8812 = vtanh.f32 %v7225_v50  ;;  %v7186_v47 = vmul.f32 %v11380_v36, %v7185_v55  ;;  %v7801_v10 = vmul.f32 -1.442695, %v7225_v50 }
0x5127   :  { %v7187_v1 = vadd.f32 %v7186_v47, %v6517_v37 }
0x5129   :  { %8814 = vtanh.f32 %v7187_v1  ;;  %v7800_v51 = vmul.f32 -1.442695, %v7187_v1 }
0x512a   :  { %8816 = vpow2.f32 %v7801_v10 }
0x512b   :  { %8818 = vpow2.f32 %v7800_v51 }
0x5132   :  { %v8813_v13 = vpop.eup %8812 }
0x5133   :  { %7235 = vrot.lane.b32.xlu0 %v8813_v13, %s8959_s14 }
0x5136   :  { %v8815_v46 = vpop.eup %8814 }
0x5137   :  { %7197 = vrot.lane.b32.xlu1 %v8815_v46, %s8959_s14  ;;  %v8817_v24 = vpop.eup %8816 }
0x5138   :  { %v7229_v44 = vadd.f32 1.0, %v8817_v24  ;;  %v8819_v39 = vpop.eup %8818 }
0x5139   :  { %v7191_v16 = vadd.f32 1.0, %v8819_v39 }
0x513a   :  { %8820 = vrcp.f32 %v7229_v44 }
0x513b   :  { %8822 = vrcp.f32 %v7191_v16 }
0x5147   :  { %v8821_v18 = vpop.eup %8820 }
0x5148   :  { %v8823_v60 = vpop.eup %8822  ;;  %v7233_v40 = vmul.f32 %v8821_v18, %v7167_v62  ;;  %v7299_v62 = vrot.slane %v11529_v32, %v10114_v9 }
0x5149   :  { %v7195_v15 = vmul.f32 %v8823_v60, %v7129_v34 }
0x51a5   :  { %v7236_v36 = vpop.permute.xlu0 %7235 }
0x51a6   :  { %v7238_v20 = vmul.f32 %v8821_v18, %v7236_v36 }
0x51a8   :  { %7240 = vrot.lane.b32.xlu0 %v7238_v20, %s8960_s15 }
0x51a9   :  { %v7198_v61 = vpop.permute.xlu1 %7197 }
0x51aa   :  { %v7200_v22 = vmul.f32 %v8823_v60, %v7198_v61 }
0x51ac   :  { %7202 = vrot.lane.b32.xlu1 %v7200_v22, %s8960_s15  ;;  %v11677_v22 = vlaneseq }
0x521a   :  { %v7241_v8 = vpop.permute.xlu0 %7240 }
0x521b   :  { %v7243_v4 = vadd.f32 %v7241_v8, %v7233_v40  ;;  %v7455_v40 = vand.u32 127, %v11677_v22 }
0x521d   :  { %8824 = vtanh.f32 %v7243_v4 }
0x521e   :  { %v7203_v49 = vpop.permute.xlu1 %7202 }
0x521f   :  { %v7205_v11 = vadd.f32 %v7203_v49, %v7195_v15  ;;  %v7458_v15 = vsub.s32 %v7455_v40, %v11671_v63 }
0x5221   :  { %8826 = vtanh.f32 %v7205_v11 }
0x522a   :  { %v8825_v38 = vpop.eup %8824 }
0x522b   :  { %7246 = vrot.lane.b32.xlu0 %v8825_v38, %s8962_s8 }
0x522e   :  { %v8827_v21 = vpop.eup %8826 }
0x522f   :  { %7307 = vrot.lane.b32.xlu0 %v7257_v28, %s8964_s5  ;;  %7208 = vrot.lane.b32.xlu1 %v8827_v21, %s8962_s8 }
0x5233   :  { %7311 = vrot.lane.b32.xlu0 %v7271_v7, %s8964_s5  ;;  %7309 = vrot.lane.b32.xlu1 %v7264_v3, %s8964_s5 }
0x5237   :  { %7390 = vrot.lane.b32.xlu1 %v7345_v48, %s8959_s14  ;;  %7313 = vrot.lane.b32.xlu0 %v7278_v41, %s8964_s5 }
0x523b   :  { %7392 = vrot.lane.b32.xlu1 %v7352_v45, %s8959_s14  ;;  %7315 = vrot.lane.b32.xlu0 %v7285_v6, %s8964_s5 }
0x523f   :  { %7394 = vrot.lane.b32.xlu1 %v7359_v31, %s8959_s14  ;;  %7317 = vrot.lane.b32.xlu0 %v7292_v2, %s8964_s5 }
0x5243   :  { %7396 = vrot.lane.b32.xlu1 %v7366_v53, %s8959_s14 }
0x5247   :  { %7398 = vrot.lane.b32.xlu1 %v7373_v54, %s8959_s14 }
0x524b   :  { %7400 = vrot.lane.b32.xlu1 %v7380_v17, %s8959_s14 }
0x524f   :  { %7402 = vrot.lane.b32.xlu1 %v7387_v57, %s8959_s14 }
0x529d   :  { %v7247_v35 = vpop.permute.xlu0 %7246 }
0x529e   :  { %v7249_v0 = vmul.f32 %v8821_v18, %v7247_v35 }
0x52a0   :  { %v7338_v42 = vrot.slane %v7249_v0, %v10114_v9 }
0x52a1   :  { %v7209_v19 = vpop.permute.xlu1 %7208  ;;  %v7308_v26 = vpop.permute.xlu0 %7307 }
0x52a2   :  { %7388 = vrot.lane.b32.xlu0 %v7338_v42, %s8959_s14  ;;  %v7211_v14 = vmul.f32 %v8823_v60, %v7209_v19 }
0x52a4   :  { %v7306_v56 = vrot.slane %v7211_v14, %v10114_v9 }
0x52a5   :  { %v7310_v43 = vpop.permute.xlu1 %7309  ;;  %v7312_v25 = vpop.permute.xlu0 %7311 }
0x52a6   :  { %7319 = vrot.lane.b32.xlu0 %v7299_v62, %s8964_s5 }
0x52a9   :  { %v7391_v34 = vpop.permute.xlu1 %7390  ;;  %v7314_v5 = vpop.permute.xlu0 %7313 }
0x52aa   :  { %v7414_v23 = vsel %vm7412_vm9, %v7310_v43, %v7391_v34  ;;  %7321 = vrot.lane.b32.xlu0 %v7306_v56, %s8964_s5 }
0x52ab   :  { %v7425_v29 = vsel %vm7421_vm10, %v7414_v23, 0.0 }
0x52ac   :  { %7426 = vadd.xlane.f32.xlu1 %v7425_v29 }
0x52ad   :  { %v7393_v52 = vpop.permute.xlu1 %7392  ;;  %v7316_v32 = vpop.permute.xlu0 %7315 }
0x52ae   :  { %v7415_v9 = vsel %vm7412_vm9, %v7312_v25, %v7393_v52 }
0x52af   :  { %v7428_v33 = vsel %vm7421_vm10, %v7415_v9, 0.0 }
0x52b1   :  { %v7395_v27 = vpop.permute.xlu1 %7394  ;;  %v7318_v37 = vpop.permute.xlu0 %7317 }
0x52b2   :  { %v7416_v50 = vsel %vm7412_vm9, %v7314_v5, %v7395_v27 }
0x52b3   :  { %v7431_v55 = vsel %vm7421_vm10, %v7416_v50, 0.0 }
0x52b5   :  { %v7397_v30 = vpop.permute.xlu1 %7396 }
0x52b6   :  { %v7417_v59 = vsel %vm7412_vm9, %v7316_v32, %v7397_v30 }
0x52b7   :  { %v7434_v58 = vsel %vm7421_vm10, %v7417_v59, 0.0 }
0x52b8   :  { %7435 = vadd.xlane.f32.xlu1 %v7434_v58 }
0x52b9   :  { %v7399_v47 = vpop.permute.xlu1 %7398 }
0x52ba   :  { %v7418_v51 = vsel %vm7412_vm9, %v7318_v37, %v7399_v47 }
0x52bb   :  { %v7437_v39 = vsel %vm7421_vm10, %v7418_v51, 0.0 }
0x52bd   :  { %v7401_v46 = vpop.permute.xlu1 %7400 }
0x52c1   :  { %v7403_v18 = vpop.permute.xlu1 %7402 }
0x52c9   :  { %7429 = vadd.xlane.f32.xlu0 %v7428_v33 }
0x52cd   :  { %7432 = vadd.xlane.f32.xlu0 %v7431_v55 }
0x5314   :  { %v7389_v1 = vpop.permute.xlu0 %7388 }
0x5315   :  { %v7413_v13 = vsel %vm7412_vm9, %v7308_v26, %v7389_v1 }
0x5316   :  { %v7422_v10 = vsel %vm7421_vm10, %v7413_v13, 0.0 }
0x5317   :  { %7423 = vadd.xlane.f32.xlu0 %v7422_v10 }
0x5318   :  { %v7320_v24 = vpop.permute.xlu0 %7319 }
0x5319   :  { %v7419_v44 = vsel %vm7412_vm9, %v7320_v24, %v7401_v46 }
0x531a   :  { %v7440_v16 = vsel %vm7421_vm10, %v7419_v44, 0.0 }
0x531b   :  { %7438 = vadd.xlane.f32.xlu0 %v7437_v39  ;;  %7441 = vadd.xlane.f32.xlu1 %v7440_v16 }
0x531c   :  { %v7322_v36 = vpop.permute.xlu0 %7321 }
0x531d   :  { %v7420_v20 = vsel %vm7412_vm9, %v7322_v36, %v7403_v18 }
0x531e   :  { %v7443_v60 = vsel %vm7421_vm10, %v7420_v20, 0.0 }
0x531f   :  { %7444 = vadd.xlane.f32.xlu0 %v7443_v60 }
0x532c   :  { %4259 = vrot.lane.b32.xlu1 %v10395_v12, %s8955_s7  ;;  %s8965_s7 = smov [#allocation4]  }
0x532d   :  { %s7553_s3 = sshll.u32 %s8965_s7, 4  ;;  %s7554_s3 = int_to_ptr.vmem [resolvable:$true] %s7553_s3 }
0x532e   :  { %s8884_s0 = scalar_lea.vmem %s7554_s3, 32  ;;  %p8889_p1 = scmp.lt.s32.totalorder %s7554_s3, %s7554_s3 }
0x532f   :  { %p8885_p0 = scmp.ne.s32.totalorder %s7554_s3, %s8884_s0  ;;  %p8890_p2 = scmp.lt.s32.totalorder %s8884_s0, %s8884_s0 }
0x5331   :  { %p8891_p3 = por %p8890_p2, %p8889_p1 }
0x5333   :  { %p8892_p4 = pnand %p8891_p3, %p8885_p0 }
0x5335   :  { %v7427_v8 = vpop.xlane.xlu1 %7426 }
0x5336   :  { %v7463_v38 = vrot.slane %v7427_v8, %v7458_v15 }
0x5341   :  { %v7436_v49 = vpop.xlane.xlu1 %7435 }
0x5342   :  { %v7475_v41 = vrot.slane %v7436_v49, %v7458_v15 }
0x5352   :  { %v7430_v61 = vpop.xlane.xlu0 %7429 }
0x5353   :  { %v7467_v21 = vrot.slane %v7430_v61, %v7458_v15 }
0x5356   :  { %v7433_v4 = vpop.xlane.xlu0 %7432 }
0x5357   :  { %v7471_v3 = vrot.slane %v7433_v4, %v7458_v15 }
0x53a0   :  { %v7424_v11 = vpop.xlane.xlu0 %7423 }
0x53a1   :  { %v7459_v28 = vrot.slane %v7424_v11, %v7458_v15 }
0x53a3   :  { %v7489_v7 = vsel %vm7488_vm11, %v7463_v38, %v7459_v28 }
0x53a4   :  { %v7491_v12 = vsel %vm7490_vm12, %v7467_v21, %v7489_v7  ;;  %v7442_v48 = vpop.xlane.xlu1 %7441  ;;  %v7439_v6 = vpop.xlane.xlu0 %7438 }
0x53a5   :  { %v7493_v45 = vsel %vm7492_vm13, %v7471_v3, %v7491_v12  ;;  %v7479_v31 = vrot.slane %v7439_v6, %v7458_v15  ;;  %v7483_v2 = vrot.slane %v7442_v48, %v7458_v15 }
0x53a6   :  { %v7495_v63 = vsel %vm7494_vm14, %v7475_v41, %v7493_v45 }
0x53a7   :  { %v7497_v53 = vsel %vm7496_vm15, %v7479_v31, %v7495_v63 }
0x53a8   :  { %v4260_v54 = vpop.permute.xlu1 %4259  ;;  %v7445_v17 = vpop.xlane.xlu0 %7444  ;;  %v7499_v35 = vsel %vm7498_vm0, %v7483_v2, %v7497_v53 }
0x53a9   :  { %4262 = vst.msk [vmem:[#allocation6] sm:$0x3] %vm4256_vm8, %v4260_v54  ;;  %v7487_v57 = vrot.slane %v7445_v17, %v7458_v15 }
0x53ab   :  { %v7501_v0 = vsel %vm7500_vm1, %v7487_v57, %v7499_v35 }
0x53ac   :  { %8895 = shalt.err (!%p8892_p4)
}
0x53ad   :  { %7556 = dma.vmem_to_hbm [thread:$0]  %s7554_s3, 32, %s11634_s17, [#allocation5]   ;;  %7503 = vxpose.xlu0.b32.start.end [1/1] (short) (narrow) %v7501_v0, 8 }
0x53ae   :  { %s8966_s6 = smov [#allocation6]  }
0x53af   :  { %s7563_s1 = sshll.u32 %s8966_s6, 4  ;;  %s7564_s1 = int_to_ptr.vmem [resolvable:$true] %s7563_s1 }
0x53b0   :  { %s8904_s20 = scalar_lea.vmem %s7564_s1, 32  ;;  %p8909_p6 = scmp.lt.s32.totalorder %s7564_s1, %s7564_s1 }
0x53b1   :  { %p8905_p5 = scmp.ne.s32.totalorder %s7564_s1, %s8904_s20  ;;  %p8910_p7 = scmp.lt.s32.totalorder %s8904_s20, %s8904_s20 }
0x53b3   :  { %p8911_p8 = por %p8910_p7, %p8909_p6 }
0x53b5   :  { %p8912_p9 = pnand %p8911_p8, %p8905_p5 }
0x53b7   :  { %8915 = shalt.err (!%p8912_p9)
}
0x53b8   :  { %7566 = dma.vmem_to_hbm [thread:$0]  %s7564_s1, 32, %s11635_s18, [#allocation5]   ;;  %vm7535_vm2 = vcmask 58368  }
0x53b9   :  { %s8967_s23 = smov [#allocation2]  }
0x53ba   :  { %s7543_s12 = sshll.u32 %s8967_s23, 4  ;;  %s7544_s12 = int_to_ptr.vmem [resolvable:$true] %s7543_s12 }
0x53bb   :  { %s8924_s17 = scalar_lea.vmem %s7544_s12, 32  ;;  %p8929_p11 = scmp.lt.s32.totalorder %s7544_s12, %s7544_s12 }
0x53bc   :  { %p8925_p10 = scmp.ne.s32.totalorder %s7544_s12, %s8924_s17  ;;  %p8930_p12 = scmp.lt.s32.totalorder %s8924_s17, %s8924_s17 }
0x53be   :  { %p8931_p13 = por %p8930_p12, %p8929_p11 }
0x53c0   :  { %p8932_p0 = pnand %p8931_p13, %p8925_p10 }
0x5429   :  { %v7519_v42 = vpop.trf.xlu0 }
0x542a   :  { %7536 = vst.msk [vmem:[#allocation2] sm:$0x3] %vm7535_vm2, %v7519_v42 }
0x542b   :  { %8935 = shalt.err (!%p8932_p0)
}
0x542c   :  { %7546 = dma.vmem_to_hbm [thread:$0]  %s7544_s12, 32, %s11633_s16, [#allocation3]  }
0x542d   :  { %8944 = dma.done.wait [#allocation3], 32  }
0x542e   :  { %8945 = vsyncadd [#allocation3], 4294967264 }
0x542f   :  { %8946 = dma.done.wait [#allocation5], 64  }
0x5430   :  { %8947 = vsyncadd [#allocation5], 4294967232 }
0x5431   :  { %7576 = vsyncpa [#allocation3], 1 }
0x5432   :  { %7577 = vsyncpa [#allocation5], 1 }

</bundles_post_ra>
